<compile_context>
chip_gen: v6e
topology: v6e:2x2x1
jax: 0.10.0
libtpu: 0.0.40
codegen_flags: <defaults>
</compile_context>

<pallas_src>
import functools

import jax
import jax.numpy as jnp
from jax.experimental import pallas as pl
from jax.experimental.pallas import tpu as pltpu

K = 5                 # conv kernel size
BN_EPS = 1e-5
LEAKY_SLOPE = 0.2
LANES = 128


def _round_up(v, m):
    return ((v + m - 1) // m) * m


# ------------------------------ Pallas kernel ------------------------------ #

def _conv_kernel(p_ref, w_ref, sc_ref, sh_ref, y_ref, s_ref, *, in_act, out_act):
    """One grid step = one packed-contraction matmul covering a whole group.

    p_ref : (1, M, Kp)    bf16  im2col patches, columns ordered (tap, cin)
    w_ref : (Kp, Coutp)   bf16  packed weights (constant index -> VMEM resident)
    sc_ref: (1, Kp)       f32   previous-layer BN scale, tiled over the 25 taps
    sh_ref: (1, Kp)       f32   previous-layer BN shift, tiled over the 25 taps
    y_ref : (1, M, Coutp)       conv output (bf16 intermediate / f32 final)
    s_ref : (1, 2, Coutp) f32   [sum, sum_of_squares] for the fused BN stats

    If `in_act`, the previous layer's BatchNorm affine + LeakyReLU(0.2) is
    applied to the patch tile just before the MXU dot (f32 VPU math riding
    otherwise-idle VALU slots).  If `out_act == "sigmoid"`, the final layer's
    sigmoid is applied to the f32 accumulator before the store.
    """
    lhs = p_ref[0]                                            # (M, Kp) bf16
    if in_act:
        z = lhs.astype(jnp.float32) * sc_ref[...] + sh_ref[...]
        z = jnp.where(z >= 0, z, LEAKY_SLOPE * z)
        lhs = z.astype(jnp.bfloat16)

    acc = jnp.dot(lhs, w_ref[...], preferred_element_type=jnp.float32)

    s_ref[0] = jnp.concatenate(
        [jnp.sum(acc, axis=0, keepdims=True),
         jnp.sum(acc * acc, axis=0, keepdims=True)], axis=0)

    if out_act == "sigmoid":
        acc = jax.nn.sigmoid(acc)
    y_ref[0] = acc.astype(y_ref.dtype)


def conv_bn_packed(patches, wts, sc_cols, sh_cols, *, in_act, out_act, out_dtype):
    """patches (G, M, Kp) bf16 @ wts (Kp, Coutp) bf16 -> y (G, M, Coutp), stats."""
    g, m, kp = patches.shape
    coutp = wts.shape[1]
    kernel = functools.partial(_conv_kernel, in_act=in_act, out_act=out_act)
    y, s = pl.pallas_call(
        kernel,
        out_shape=(
            jax.ShapeDtypeStruct((g, m, coutp), out_dtype),
            jax.ShapeDtypeStruct((g, 2, coutp), jnp.float32),
        ),
        grid=(g,),
        in_specs=[
            pl.BlockSpec((1, m, kp), lambda b: (b, 0, 0)),
            pl.BlockSpec((kp, coutp), lambda b: (0, 0)),     # resident weights
            pl.BlockSpec((1, kp), lambda b: (0, 0)),          # resident scale
            pl.BlockSpec((1, kp), lambda b: (0, 0)),          # resident shift
        ],
        out_specs=(
            pl.BlockSpec((1, m, coutp), lambda b: (b, 0, 0)),
            pl.BlockSpec((1, 2, coutp), lambda b: (b, 0, 0)),
        ),
        compiler_params=pltpu.CompilerParams(
            dimension_semantics=("parallel",)),
    )(patches, wts, sc_cols, sh_cols)
    return y, s


# -------------------------------- JAX glue ---------------------------------- #

def _build_patches(act, stride, pad, pad_value):
    """act (N, H, W, C) bf16 -> packed patches (N, Ho*Wo, 25*C) bf16.

    `pad_value` (per-channel, may be None for plain zero padding) is used so
    that when the consumer kernel applies leaky(scale*x + shift) the padded
    border positions map back to exactly zero activation.
    """
    n, h, w, c = act.shape
    hp, wp = h + 2 * pad, w + 2 * pad
    if pad:
        if pad_value is None:
            xp = jnp.pad(act, ((0, 0), (pad, pad), (pad, pad), (0, 0)))
        else:
            xp = jnp.broadcast_to(
                pad_value.astype(act.dtype)[None, None, None, :], (n, hp, wp, c))
            xp = jax.lax.dynamic_update_slice(xp, act, (0, pad, pad, 0))
    else:
        xp = act
    ho = (hp - K) // stride + 1
    wo = (wp - K) // stride + 1
    taps = []
    for di in range(K):
        for dj in range(K):
            taps.append(xp[:, di:di + stride * (ho - 1) + 1:stride,
                            dj:dj + stride * (wo - 1) + 1:stride, :])
    p = jnp.stack(taps, axis=3).reshape(n, ho * wo, K * K * c)
    return p, ho, wo


def _pack_weights(w, kp, coutp):
    """Torch (Cout, Cin, 5, 5) -> (Kp, Coutp) bf16 with rows ordered (di, dj, cin)."""
    cout, cin = w.shape[0], w.shape[1]
    wm = jnp.transpose(w, (2, 3, 1, 0)).reshape(K * K * cin, cout)
    wm = jnp.pad(wm, ((0, kp - K * K * cin), (0, coutp - cout)))
    return wm.astype(jnp.bfloat16)


# -------------------------------- model ------------------------------------- #

LAYER_CFG = (
    dict(stride=2, pad=1, norm=True),
    dict(stride=2, pad=1, norm=True),
    dict(stride=2, pad=1, norm=True),
    dict(stride=2, pad=1, norm=True),
    dict(stride=1, pad=0, norm=False),
)


def init_params(key, in_channels, out_channels, nker):
    chans = [in_channels, nker, 2 * nker, 4 * nker, 8 * nker, out_channels]
    params = []
    for li in range(5):
        key, kw, kg, kb = jax.random.split(key, 4)
        cin, cout = chans[li], chans[li + 1]
        w = 0.02 * jax.random.normal(kw, (cout, cin, K, K), jnp.float32)
        gamma = 1.0 + 0.01 * jax.random.normal(kg, (cout,), jnp.float32)
        beta = 0.01 * jax.random.normal(kb, (cout,), jnp.float32)
        params.append((w, gamma, beta))
    return params


def discriminator_forward(x, params, out_channels):
    n = x.shape[0]
    # One-time layout change: NCHW -> NHWC; bf16 activations, f32 accumulation.
    act = jnp.transpose(x, (0, 2, 3, 1)).astype(jnp.bfloat16)
    scale = shift = None          # BN affine of the previous layer (fused downstream)

    for cfg, (w, gamma, beta) in zip(LAYER_CFG, params):
        cin, cout = w.shape[1], w.shape[0]
        coutp = _round_up(cout, LANES)
        kp = _round_up(K * K * cin, LANES)       # packed contraction depth
        in_act = scale is not None

        # Spatial pad value so the fused in-kernel affine+leaky maps the padded
        # border back to exactly zero: leaky(scale * (-shift/scale) + shift) == 0.
        if in_act and cfg["pad"]:
            safe = jnp.where(jnp.abs(scale) > 1e-20, scale, 1e-20)
            pad_value = -shift / safe
        else:
            pad_value = None

        patches, ho, wo = _build_patches(act, cfg["stride"], cfg["pad"], pad_value)
        mo = ho * wo
        patches = jnp.pad(patches, ((0, 0), (0, 0), (0, kp - K * K * cin)))

        # Collapse tiny late layers: fold batch into the matmul M when the
        # per-sample output has fewer than 128 rows (layers 3-5 here); keep
        # batch as the "parallel" grid axis for the big layers (v7x megacore).
        fold = mo < 128
        g = 1 if fold else n
        patches = patches.reshape(g, (n * mo) // g, kp)

        wts = _pack_weights(w, kp, coutp)
        if in_act:
            sc_cols = jnp.pad(jnp.tile(scale, K * K), (0, kp - K * K * cin))
            sh_cols = jnp.pad(jnp.tile(shift, K * K), (0, kp - K * K * cin))
        else:
            sc_cols = jnp.zeros((kp,), jnp.float32)
            sh_cols = jnp.zeros((kp,), jnp.float32)
        sc_cols = sc_cols.reshape(1, kp).astype(jnp.float32)
        sh_cols = sh_cols.reshape(1, kp).astype(jnp.float32)

        out_act = None if cfg["norm"] else "sigmoid"
        out_dtype = jnp.bfloat16 if cfg["norm"] else jnp.float32
        y, s = conv_bn_packed(patches, wts, sc_cols, sh_cols,
                              in_act=in_act, out_act=out_act, out_dtype=out_dtype)

        if cfg["norm"]:
            # BatchNorm2d training-mode (biased) batch statistics from the
            # in-kernel f32 partial sums.  (E[x^2]-E[x]^2 in f32 is adequate at
            # these magnitudes.)  The affine + LeakyReLU are applied inside the
            # NEXT layer's conv kernel.
            tot = jnp.sum(s, axis=0)                         # (2, Coutp)
            m_total = n * ho * wo
            mean = tot[0, :cout] / m_total
            var = jnp.maximum(tot[1, :cout] / m_total - mean * mean, 0.0)
            scale = gamma * jax.lax.rsqrt(var + BN_EPS)
            shift = beta - mean * scale
        else:
            scale = shift = None

        # Next layer consumes only the real output channels, keeping the packed
        # contraction dense (no 128-lane channel padding carried forward).
        act = y.reshape(n, ho, wo, coutp)[..., :cout]

    # act: (N, 1, 1, out_channels) f32, sigmoid already applied in-kernel.
    out = act[..., :out_channels]
    return jnp.transpose(out, (0, 3, 1, 2)).astype(jnp.float32)


# --------------------------------- main -------------------------------------- #

if __name__ == "__main__":
    # Smallest valid spatial size: 96 -> 47 -> 23 -> 11 -> 5 -> 1 with k=5.
    batch, in_channels, out_channels, nker, spatial = 2, 3, 1, 8, 96

    key = jax.random.PRNGKey(0)
    key, kx = jax.random.split(key)
    x = jax.random.normal(kx, (batch, in_channels, spatial, spatial), jnp.float32)
    params = init_params(key, in_channels, out_channels, nker)

    fwd = jax.jit(functools.partial(discriminator_forward, params=params,
                                    out_channels=out_channels))
    out = jax.block_until_ready(fwd(x))

    assert out.shape == (batch, out_channels, 1, 1), out.shape
    assert bool(jnp.all(jnp.isfinite(out)))
    assert bool(jnp.all((out >= 0.0) & (out <= 1.0)))   # sigmoid range
    print("KERNEL_OK")
</pallas_src>

<mosaic_0001>
module attributes {stable_mosaic.version = 11 : i64} {
  func.func @_conv_kernel(%arg0: i32, %arg1: memref<1x2209x128xbf16, #tpu.memory_space<vmem>>, %arg2: memref<128x128xbf16, #tpu.memory_space<vmem>>, %arg3: memref<1x128xf32, #tpu.memory_space<vmem>>, %arg4: memref<1x128xf32, #tpu.memory_space<vmem>>, %arg5: memref<1x2209x128xbf16, #tpu.memory_space<vmem>>, %arg6: memref<1x2x128xf32, #tpu.memory_space<vmem>>) attributes {dimension_semantics = [#tpu.dimension_semantics<parallel>], iteration_bounds = array<i64: 2>, scalar_prefetch = 0 : i64, scratch_operands = 0 : i64, tpu.core_type = #tpu.core_type<tc>, window_params = [{transform_indices = @transform_0, window_bounds = array<i64: 1, 2209, 128>}, {pipeline_mode = #tpu.pipeline_mode<synchronous>, transform_indices = @transform_1, window_bounds = array<i64: 128, 128>}, {pipeline_mode = #tpu.pipeline_mode<synchronous>, transform_indices = @transform_2, window_bounds = array<i64: 1, 128>}, {pipeline_mode = #tpu.pipeline_mode<synchronous>, transform_indices = @transform_3, window_bounds = array<i64: 1, 128>}, {transform_indices = @transform_4, window_bounds = array<i64: 1, 2209, 128>}, {transform_indices = @transform_5, window_bounds = array<i64: 1, 2, 128>}]} {
    %c0 = arith.constant 0 : index
    %c0_0 = arith.constant 0 : index
    %c0_1 = arith.constant 0 : index
    %0 = vector.load %arg1[%c0, %c0_0, %c0_1] : memref<1x2209x128xbf16, #tpu.memory_space<vmem>>, vector<1x2209x128xbf16>
    %1 = vector.shape_cast %0 : vector<1x2209x128xbf16> to vector<2209x128xbf16>
    %c0_2 = arith.constant 0 : index
    %c0_3 = arith.constant 0 : index
    %2 = vector.load %arg2[%c0_2, %c0_3] : memref<128x128xbf16, #tpu.memory_space<vmem>>, vector<128x128xbf16>
    %cst = arith.constant dense<0.000000e+00> : vector<2209x128xf32>
    %3 = tpu.matmul %1, %2, %cst {dimension_numbers = #tpu.dot_dimension_numbers<[1], [0], [0], [1], [0, 0, 1, 1], [], []>} : vector<2209x128xbf16>, vector<128x128xbf16>, vector<2209x128xf32> -> vector<2209x128xf32>
    %cst_4 = arith.constant dense<0.000000e+00> : vector<128xf32>
    %4 = vector.multi_reduction <add>, %3, %cst_4 [0] : vector<2209x128xf32> to vector<128xf32>
    %5 = vector.shape_cast %4 : vector<128xf32> to vector<1x128xf32>
    %6 = arith.mulf %3, %3 : vector<2209x128xf32>
    %cst_5 = arith.constant dense<0.000000e+00> : vector<128xf32>
    %7 = vector.multi_reduction <add>, %6, %cst_5 [0] : vector<2209x128xf32> to vector<128xf32>
    %8 = vector.shape_cast %7 : vector<128xf32> to vector<1x128xf32>
    %9 = tpu.concatenate %5, %8 in 0 : vector<1x128xf32>, vector<1x128xf32> -> vector<2x128xf32>
    %c0_6 = arith.constant 0 : index
    %c0_7 = arith.constant 0 : index
    %c0_8 = arith.constant 0 : index
    %10 = vector.load %arg6[%c0_6, %c0_7, %c0_8] : memref<1x2x128xf32, #tpu.memory_space<vmem>>, vector<1x2x128xf32>
    %11 = vector.shape_cast %10 : vector<1x2x128xf32> to vector<2x128xf32>
    %12 = vector.shape_cast %9 : vector<2x128xf32> to vector<1x2x128xf32>
    tpu.vector_store %arg6[%c0_6, %c0_7, %c0_8], %12 {strides = array<i32>} : memref<1x2x128xf32, #tpu.memory_space<vmem>>, vector<1x2x128xf32>,
    %13 = arith.truncf %3 : vector<2209x128xf32> to vector<2209x128xbf16>
    %c0_9 = arith.constant 0 : index
    %c0_10 = arith.constant 0 : index
    %c0_11 = arith.constant 0 : index
    %14 = vector.load %arg5[%c0_9, %c0_10, %c0_11] : memref<1x2209x128xbf16, #tpu.memory_space<vmem>>, vector<1x2209x128xbf16>
    %15 = vector.shape_cast %14 : vector<1x2209x128xbf16> to vector<2209x128xbf16>
    %16 = vector.shape_cast %13 : vector<2209x128xbf16> to vector<1x2209x128xbf16>
    tpu.vector_store %arg5[%c0_9, %c0_10, %c0_11], %16 {strides = array<i32>} : memref<1x2209x128xbf16, #tpu.memory_space<vmem>>, vector<1x2209x128xbf16>,
    return
  }
  func.func @transform_0(%arg0: i32) -> (i32, i32, i32) {
    %c0_i32 = arith.constant 0 : i32
    %c0_i32_0 = arith.constant 0 : i32
    %c0_i32_1 = arith.constant 0 : i32
    return %arg0, %c0_i32, %c0_i32_0 : i32, i32, i32
  }
  func.func @transform_1(%arg0: i32) -> (i32, i32) {
    %c0_i32 = arith.constant 0 : i32
    %c0_i32_0 = arith.constant 0 : i32
    %c0_i32_1 = arith.constant 0 : i32
    return %c0_i32, %c0_i32_0 : i32, i32
  }
  func.func @transform_2(%arg0: i32) -> (i32, i32) {
    %c0_i32 = arith.constant 0 : i32
    %c0_i32_0 = arith.constant 0 : i32
    %c0_i32_1 = arith.constant 0 : i32
    return %c0_i32, %c0_i32_0 : i32, i32
  }
  func.func @transform_3(%arg0: i32) -> (i32, i32) {
    %c0_i32 = arith.constant 0 : i32
    %c0_i32_0 = arith.constant 0 : i32
    %c0_i32_1 = arith.constant 0 : i32
    return %c0_i32, %c0_i32_0 : i32, i32
  }
  func.func @transform_4(%arg0: i32) -> (i32, i32, i32) {
    %c0_i32 = arith.constant 0 : i32
    %c0_i32_0 = arith.constant 0 : i32
    %c0_i32_1 = arith.constant 0 : i32
    return %arg0, %c0_i32, %c0_i32_0 : i32, i32, i32
  }
  func.func @transform_5(%arg0: i32) -> (i32, i32, i32) {
    %c0_i32 = arith.constant 0 : i32
    %c0_i32_0 = arith.constant 0 : i32
    %c0_i32_1 = arith.constant 0 : i32
    return %arg0, %c0_i32, %c0_i32_0 : i32, i32, i32
  }
}

module attributes {stable_mosaic.version = 11 : i64} {
  func.func @_conv_kernel(%arg0: i32, %arg1: memref<1x529x256xbf16, #tpu.memory_space<vmem>>, %arg2: memref<256x128xbf16, #tpu.memory_space<vmem>>, %arg3: memref<1x256xf32, #tpu.memory_space<vmem>>, %arg4: memref<1x256xf32, #tpu.memory_space<vmem>>, %arg5: memref<1x529x128xbf16, #tpu.memory_space<vmem>>, %arg6: memref<1x2x128xf32, #tpu.memory_space<vmem>>) attributes {dimension_semantics = [#tpu.dimension_semantics<parallel>], iteration_bounds = array<i64: 2>, scalar_prefetch = 0 : i64, scratch_operands = 0 : i64, tpu.core_type = #tpu.core_type<tc>, window_params = [{transform_indices = @transform_0, window_bounds = array<i64: 1, 529, 256>}, {pipeline_mode = #tpu.pipeline_mode<synchronous>, transform_indices = @transform_1, window_bounds = array<i64: 256, 128>}, {pipeline_mode = #tpu.pipeline_mode<synchronous>, transform_indices = @transform_2, window_bounds = array<i64: 1, 256>}, {pipeline_mode = #tpu.pipeline_mode<synchronous>, transform_indices = @transform_3, window_bounds = array<i64: 1, 256>}, {transform_indices = @transform_4, window_bounds = array<i64: 1, 529, 128>}, {transform_indices = @transform_5, window_bounds = array<i64: 1, 2, 128>}]} {
    %c0 = arith.constant 0 : index
    %c0_0 = arith.constant 0 : index
    %c0_1 = arith.constant 0 : index
    %0 = vector.load %arg1[%c0, %c0_0, %c0_1] : memref<1x529x256xbf16, #tpu.memory_space<vmem>>, vector<1x529x256xbf16>
    %1 = vector.shape_cast %0 : vector<1x529x256xbf16> to vector<529x256xbf16>
    %2 = arith.extf %1 : vector<529x256xbf16> to vector<529x256xf32>
    %c0_2 = arith.constant 0 : index
    %c0_3 = arith.constant 0 : index
    %3 = vector.load %arg3[%c0_2, %c0_3] : memref<1x256xf32, #tpu.memory_space<vmem>>, vector<1x256xf32>
    %4 = vector.broadcast %3 : vector<1x256xf32> to vector<529x256xf32>
    %5 = arith.mulf %2, %4 : vector<529x256xf32>
    %c0_4 = arith.constant 0 : index
    %c0_5 = arith.constant 0 : index
    %6 = vector.load %arg4[%c0_4, %c0_5] : memref<1x256xf32, #tpu.memory_space<vmem>>, vector<1x256xf32>
    %7 = vector.broadcast %6 : vector<1x256xf32> to vector<529x256xf32>
    %8 = arith.addf %5, %7 : vector<529x256xf32>
    %cst = arith.constant 0.000000e+00 : f32
    %9 = vector.broadcast %cst : f32 to vector<529x256xf32>
    %10 = arith.cmpf oge, %8, %9 : vector<529x256xf32>
    %cst_6 = arith.constant 2.000000e-01 : f32
    %11 = vector.broadcast %cst_6 : f32 to vector<529x256xf32>
    %12 = arith.mulf %11, %8 : vector<529x256xf32>
    %13 = arith.select %10, %8, %12 : vector<529x256xi1>, vector<529x256xf32>
    %14 = arith.truncf %13 : vector<529x256xf32> to vector<529x256xbf16>
    %c0_7 = arith.constant 0 : index
    %c0_8 = arith.constant 0 : index
    %15 = vector.load %arg2[%c0_7, %c0_8] : memref<256x128xbf16, #tpu.memory_space<vmem>>, vector<256x128xbf16>
    %cst_9 = arith.constant dense<0.000000e+00> : vector<529x128xf32>
    %16 = tpu.matmul %14, %15, %cst_9 {dimension_numbers = #tpu.dot_dimension_numbers<[1], [0], [0], [1], [0, 0, 1, 1], [], []>} : vector<529x256xbf16>, vector<256x128xbf16>, vector<529x128xf32> -> vector<529x128xf32>
    %cst_10 = arith.constant dense<0.000000e+00> : vector<128xf32>
    %17 = vector.multi_reduction <add>, %16, %cst_10 [0] : vector<529x128xf32> to vector<128xf32>
    %18 = vector.shape_cast %17 : vector<128xf32> to vector<1x128xf32>
    %19 = arith.mulf %16, %16 : vector<529x128xf32>
    %cst_11 = arith.constant dense<0.000000e+00> : vector<128xf32>
    %20 = vector.multi_reduction <add>, %19, %cst_11 [0] : vector<529x128xf32> to vector<128xf32>
    %21 = vector.shape_cast %20 : vector<128xf32> to vector<1x128xf32>
    %22 = tpu.concatenate %18, %21 in 0 : vector<1x128xf32>, vector<1x128xf32> -> vector<2x128xf32>
    %c0_12 = arith.constant 0 : index
    %c0_13 = arith.constant 0 : index
    %c0_14 = arith.constant 0 : index
    %23 = vector.load %arg6[%c0_12, %c0_13, %c0_14] : memref<1x2x128xf32, #tpu.memory_space<vmem>>, vector<1x2x128xf32>
    %24 = vector.shape_cast %23 : vector<1x2x128xf32> to vector<2x128xf32>
    %25 = vector.shape_cast %22 : vector<2x128xf32> to vector<1x2x128xf32>
    tpu.vector_store %arg6[%c0_12, %c0_13, %c0_14], %25 {strides = array<i32>} : memref<1x2x128xf32, #tpu.memory_space<vmem>>, vector<1x2x128xf32>,
    %26 = arith.truncf %16 : vector<529x128xf32> to vector<529x128xbf16>
    %c0_15 = arith.constant 0 : index
    %c0_16 = arith.constant 0 : index
    %c0_17 = arith.constant 0 : index
    %27 = vector.load %arg5[%c0_15, %c0_16, %c0_17] : memref<1x529x128xbf16, #tpu.memory_space<vmem>>, vector<1x529x128xbf16>
    %28 = vector.shape_cast %27 : vector<1x529x128xbf16> to vector<529x128xbf16>
    %29 = vector.shape_cast %26 : vector<529x128xbf16> to vector<1x529x128xbf16>
    tpu.vector_store %arg5[%c0_15, %c0_16, %c0_17], %29 {strides = array<i32>} : memref<1x529x128xbf16, #tpu.memory_space<vmem>>, vector<1x529x128xbf16>,
    return
  }
  func.func @transform_0(%arg0: i32) -> (i32, i32, i32) {
    %c0_i32 = arith.constant 0 : i32
    %c0_i32_0 = arith.constant 0 : i32
    %c0_i32_1 = arith.constant 0 : i32
    return %arg0, %c0_i32, %c0_i32_0 : i32, i32, i32
  }
  func.func @transform_1(%arg0: i32) -> (i32, i32) {
    %c0_i32 = arith.constant 0 : i32
    %c0_i32_0 = arith.constant 0 : i32
    %c0_i32_1 = arith.constant 0 : i32
    return %c0_i32, %c0_i32_0 : i32, i32
  }
  func.func @transform_2(%arg0: i32) -> (i32, i32) {
    %c0_i32 = arith.constant 0 : i32
    %c0_i32_0 = arith.constant 0 : i32
    %c0_i32_1 = arith.constant 0 : i32
    return %c0_i32, %c0_i32_0 : i32, i32
  }
  func.func @transform_3(%arg0: i32) -> (i32, i32) {
    %c0_i32 = arith.constant 0 : i32
    %c0_i32_0 = arith.constant 0 : i32
    %c0_i32_1 = arith.constant 0 : i32
    return %c0_i32, %c0_i32_0 : i32, i32
  }
  func.func @transform_4(%arg0: i32) -> (i32, i32, i32) {
    %c0_i32 = arith.constant 0 : i32
    %c0_i32_0 = arith.constant 0 : i32
    %c0_i32_1 = arith.constant 0 : i32
    return %arg0, %c0_i32, %c0_i32_0 : i32, i32, i32
  }
  func.func @transform_5(%arg0: i32) -> (i32, i32, i32) {
    %c0_i32 = arith.constant 0 : i32
    %c0_i32_0 = arith.constant 0 : i32
    %c0_i32_1 = arith.constant 0 : i32
    return %arg0, %c0_i32, %c0_i32_0 : i32, i32, i32
  }
}

module attributes {stable_mosaic.version = 11 : i64} {
  func.func @_conv_kernel(%arg0: i32, %arg1: memref<1x242x512xbf16, #tpu.memory_space<vmem>>, %arg2: memref<512x128xbf16, #tpu.memory_space<vmem>>, %arg3: memref<1x512xf32, #tpu.memory_space<vmem>>, %arg4: memref<1x512xf32, #tpu.memory_space<vmem>>, %arg5: memref<1x242x128xbf16, #tpu.memory_space<vmem>>, %arg6: memref<1x2x128xf32, #tpu.memory_space<vmem>>) attributes {dimension_semantics = [#tpu.dimension_semantics<parallel>], iteration_bounds = array<i64: 1>, scalar_prefetch = 0 : i64, scratch_operands = 0 : i64, tpu.core_type = #tpu.core_type<tc>, window_params = [{transform_indices = @transform_0, window_bounds = array<i64: 1, 242, 512>}, {pipeline_mode = #tpu.pipeline_mode<synchronous>, transform_indices = @transform_1, window_bounds = array<i64: 512, 128>}, {pipeline_mode = #tpu.pipeline_mode<synchronous>, transform_indices = @transform_2, window_bounds = array<i64: 1, 512>}, {pipeline_mode = #tpu.pipeline_mode<synchronous>, transform_indices = @transform_3, window_bounds = array<i64: 1, 512>}, {transform_indices = @transform_4, window_bounds = array<i64: 1, 242, 128>}, {transform_indices = @transform_5, window_bounds = array<i64: 1, 2, 128>}]} {
    %c0 = arith.constant 0 : index
    %c0_0 = arith.constant 0 : index
    %c0_1 = arith.constant 0 : index
    %0 = vector.load %arg1[%c0, %c0_0, %c0_1] : memref<1x242x512xbf16, #tpu.memory_space<vmem>>, vector<1x242x512xbf16>
    %1 = vector.shape_cast %0 : vector<1x242x512xbf16> to vector<242x512xbf16>
    %2 = arith.extf %1 : vector<242x512xbf16> to vector<242x512xf32>
    %c0_2 = arith.constant 0 : index
    %c0_3 = arith.constant 0 : index
    %3 = vector.load %arg3[%c0_2, %c0_3] : memref<1x512xf32, #tpu.memory_space<vmem>>, vector<1x512xf32>
    %4 = vector.broadcast %3 : vector<1x512xf32> to vector<242x512xf32>
    %5 = arith.mulf %2, %4 : vector<242x512xf32>
    %c0_4 = arith.constant 0 : index
    %c0_5 = arith.constant 0 : index
    %6 = vector.load %arg4[%c0_4, %c0_5] : memref<1x512xf32, #tpu.memory_space<vmem>>, vector<1x512xf32>
    %7 = vector.broadcast %6 : vector<1x512xf32> to vector<242x512xf32>
    %8 = arith.addf %5, %7 : vector<242x512xf32>
    %cst = arith.constant 0.000000e+00 : f32
    %9 = vector.broadcast %cst : f32 to vector<242x512xf32>
    %10 = arith.cmpf oge, %8, %9 : vector<242x512xf32>
    %cst_6 = arith.constant 2.000000e-01 : f32
    %11 = vector.broadcast %cst_6 : f32 to vector<242x512xf32>
    %12 = arith.mulf %11, %8 : vector<242x512xf32>
    %13 = arith.select %10, %8, %12 : vector<242x512xi1>, vector<242x512xf32>
    %14 = arith.truncf %13 : vector<242x512xf32> to vector<242x512xbf16>
    %c0_7 = arith.constant 0 : index
    %c0_8 = arith.constant 0 : index
    %15 = vector.load %arg2[%c0_7, %c0_8] : memref<512x128xbf16, #tpu.memory_space<vmem>>, vector<512x128xbf16>
    %cst_9 = arith.constant dense<0.000000e+00> : vector<242x128xf32>
    %16 = tpu.matmul %14, %15, %cst_9 {dimension_numbers = #tpu.dot_dimension_numbers<[1], [0], [0], [1], [0, 0, 1, 1], [], []>} : vector<242x512xbf16>, vector<512x128xbf16>, vector<242x128xf32> -> vector<242x128xf32>
    %cst_10 = arith.constant dense<0.000000e+00> : vector<128xf32>
    %17 = vector.multi_reduction <add>, %16, %cst_10 [0] : vector<242x128xf32> to vector<128xf32>
    %18 = vector.shape_cast %17 : vector<128xf32> to vector<1x128xf32>
    %19 = arith.mulf %16, %16 : vector<242x128xf32>
    %cst_11 = arith.constant dense<0.000000e+00> : vector<128xf32>
    %20 = vector.multi_reduction <add>, %19, %cst_11 [0] : vector<242x128xf32> to vector<128xf32>
    %21 = vector.shape_cast %20 : vector<128xf32> to vector<1x128xf32>
    %22 = tpu.concatenate %18, %21 in 0 : vector<1x128xf32>, vector<1x128xf32> -> vector<2x128xf32>
    %c0_12 = arith.constant 0 : index
    %c0_13 = arith.constant 0 : index
    %c0_14 = arith.constant 0 : index
    %23 = vector.load %arg6[%c0_12, %c0_13, %c0_14] : memref<1x2x128xf32, #tpu.memory_space<vmem>>, vector<1x2x128xf32>
    %24 = vector.shape_cast %23 : vector<1x2x128xf32> to vector<2x128xf32>
    %25 = vector.shape_cast %22 : vector<2x128xf32> to vector<1x2x128xf32>
    tpu.vector_store %arg6[%c0_12, %c0_13, %c0_14], %25 {strides = array<i32>} : memref<1x2x128xf32, #tpu.memory_space<vmem>>, vector<1x2x128xf32>,
    %26 = arith.truncf %16 : vector<242x128xf32> to vector<242x128xbf16>
    %c0_15 = arith.constant 0 : index
    %c0_16 = arith.constant 0 : index
    %c0_17 = arith.constant 0 : index
    %27 = vector.load %arg5[%c0_15, %c0_16, %c0_17] : memref<1x242x128xbf16, #tpu.memory_space<vmem>>, vector<1x242x128xbf16>
    %28 = vector.shape_cast %27 : vector<1x242x128xbf16> to vector<242x128xbf16>
    %29 = vector.shape_cast %26 : vector<242x128xbf16> to vector<1x242x128xbf16>
    tpu.vector_store %arg5[%c0_15, %c0_16, %c0_17], %29 {strides = array<i32>} : memref<1x242x128xbf16, #tpu.memory_space<vmem>>, vector<1x242x128xbf16>,
    return
  }
  func.func @transform_0(%arg0: i32) -> (i32, i32, i32) {
    %c0_i32 = arith.constant 0 : i32
    %c0_i32_0 = arith.constant 0 : i32
    %c0_i32_1 = arith.constant 0 : i32
    return %arg0, %c0_i32, %c0_i32_0 : i32, i32, i32
  }
  func.func @transform_1(%arg0: i32) -> (i32, i32) {
    %c0_i32 = arith.constant 0 : i32
    %c0_i32_0 = arith.constant 0 : i32
    %c0_i32_1 = arith.constant 0 : i32
    return %c0_i32, %c0_i32_0 : i32, i32
  }
  func.func @transform_2(%arg0: i32) -> (i32, i32) {
    %c0_i32 = arith.constant 0 : i32
    %c0_i32_0 = arith.constant 0 : i32
    %c0_i32_1 = arith.constant 0 : i32
    return %c0_i32, %c0_i32_0 : i32, i32
  }
  func.func @transform_3(%arg0: i32) -> (i32, i32) {
    %c0_i32 = arith.constant 0 : i32
    %c0_i32_0 = arith.constant 0 : i32
    %c0_i32_1 = arith.constant 0 : i32
    return %c0_i32, %c0_i32_0 : i32, i32
  }
  func.func @transform_4(%arg0: i32) -> (i32, i32, i32) {
    %c0_i32 = arith.constant 0 : i32
    %c0_i32_0 = arith.constant 0 : i32
    %c0_i32_1 = arith.constant 0 : i32
    return %arg0, %c0_i32, %c0_i32_0 : i32, i32, i32
  }
  func.func @transform_5(%arg0: i32) -> (i32, i32, i32) {
    %c0_i32 = arith.constant 0 : i32
    %c0_i32_0 = arith.constant 0 : i32
    %c0_i32_1 = arith.constant 0 : i32
    return %arg0, %c0_i32, %c0_i32_0 : i32, i32, i32
  }
}

module attributes {stable_mosaic.version = 11 : i64} {
  func.func @_conv_kernel(%arg0: i32, %arg1: memref<1x50x896xbf16, #tpu.memory_space<vmem>>, %arg2: memref<896x128xbf16, #tpu.memory_space<vmem>>, %arg3: memref<1x896xf32, #tpu.memory_space<vmem>>, %arg4: memref<1x896xf32, #tpu.memory_space<vmem>>, %arg5: memref<1x50x128xbf16, #tpu.memory_space<vmem>>, %arg6: memref<1x2x128xf32, #tpu.memory_space<vmem>>) attributes {dimension_semantics = [#tpu.dimension_semantics<parallel>], iteration_bounds = array<i64: 1>, scalar_prefetch = 0 : i64, scratch_operands = 0 : i64, tpu.core_type = #tpu.core_type<tc>, window_params = [{transform_indices = @transform_0, window_bounds = array<i64: 1, 50, 896>}, {pipeline_mode = #tpu.pipeline_mode<synchronous>, transform_indices = @transform_1, window_bounds = array<i64: 896, 128>}, {pipeline_mode = #tpu.pipeline_mode<synchronous>, transform_indices = @transform_2, window_bounds = array<i64: 1, 896>}, {pipeline_mode = #tpu.pipeline_mode<synchronous>, transform_indices = @transform_3, window_bounds = array<i64: 1, 896>}, {transform_indices = @transform_4, window_bounds = array<i64: 1, 50, 128>}, {transform_indices = @transform_5, window_bounds = array<i64: 1, 2, 128>}]} {
    %c0 = arith.constant 0 : index
    %c0_0 = arith.constant 0 : index
    %c0_1 = arith.constant 0 : index
    %0 = vector.load %arg1[%c0, %c0_0, %c0_1] : memref<1x50x896xbf16, #tpu.memory_space<vmem>>, vector<1x50x896xbf16>
    %1 = vector.shape_cast %0 : vector<1x50x896xbf16> to vector<50x896xbf16>
    %2 = arith.extf %1 : vector<50x896xbf16> to vector<50x896xf32>
    %c0_2 = arith.constant 0 : index
    %c0_3 = arith.constant 0 : index
    %3 = vector.load %arg3[%c0_2, %c0_3] : memref<1x896xf32, #tpu.memory_space<vmem>>, vector<1x896xf32>
    %4 = vector.broadcast %3 : vector<1x896xf32> to vector<50x896xf32>
    %5 = arith.mulf %2, %4 : vector<50x896xf32>
    %c0_4 = arith.constant 0 : index
    %c0_5 = arith.constant 0 : index
    %6 = vector.load %arg4[%c0_4, %c0_5] : memref<1x896xf32, #tpu.memory_space<vmem>>, vector<1x896xf32>
    %7 = vector.broadcast %6 : vector<1x896xf32> to vector<50x896xf32>
    %8 = arith.addf %5, %7 : vector<50x896xf32>
    %cst = arith.constant 0.000000e+00 : f32
    %9 = vector.broadcast %cst : f32 to vector<50x896xf32>
    %10 = arith.cmpf oge, %8, %9 : vector<50x896xf32>
    %cst_6 = arith.constant 2.000000e-01 : f32
    %11 = vector.broadcast %cst_6 : f32 to vector<50x896xf32>
    %12 = arith.mulf %11, %8 : vector<50x896xf32>
    %13 = arith.select %10, %8, %12 : vector<50x896xi1>, vector<50x896xf32>
    %14 = arith.truncf %13 : vector<50x896xf32> to vector<50x896xbf16>
    %c0_7 = arith.constant 0 : index
    %c0_8 = arith.constant 0 : index
    %15 = vector.load %arg2[%c0_7, %c0_8] : memref<896x128xbf16, #tpu.memory_space<vmem>>, vector<896x128xbf16>
    %cst_9 = arith.constant dense<0.000000e+00> : vector<50x128xf32>
    %16 = tpu.matmul %14, %15, %cst_9 {dimension_numbers = #tpu.dot_dimension_numbers<[1], [0], [0], [1], [0, 0, 1, 1], [], []>} : vector<50x896xbf16>, vector<896x128xbf16>, vector<50x128xf32> -> vector<50x128xf32>
    %cst_10 = arith.constant dense<0.000000e+00> : vector<128xf32>
    %17 = vector.multi_reduction <add>, %16, %cst_10 [0] : vector<50x128xf32> to vector<128xf32>
    %18 = vector.shape_cast %17 : vector<128xf32> to vector<1x128xf32>
    %19 = arith.mulf %16, %16 : vector<50x128xf32>
    %cst_11 = arith.constant dense<0.000000e+00> : vector<128xf32>
    %20 = vector.multi_reduction <add>, %19, %cst_11 [0] : vector<50x128xf32> to vector<128xf32>
    %21 = vector.shape_cast %20 : vector<128xf32> to vector<1x128xf32>
    %22 = tpu.concatenate %18, %21 in 0 : vector<1x128xf32>, vector<1x128xf32> -> vector<2x128xf32>
    %c0_12 = arith.constant 0 : index
    %c0_13 = arith.constant 0 : index
    %c0_14 = arith.constant 0 : index
    %23 = vector.load %arg6[%c0_12, %c0_13, %c0_14] : memref<1x2x128xf32, #tpu.memory_space<vmem>>, vector<1x2x128xf32>
    %24 = vector.shape_cast %23 : vector<1x2x128xf32> to vector<2x128xf32>
    %25 = vector.shape_cast %22 : vector<2x128xf32> to vector<1x2x128xf32>
    tpu.vector_store %arg6[%c0_12, %c0_13, %c0_14], %25 {strides = array<i32>} : memref<1x2x128xf32, #tpu.memory_space<vmem>>, vector<1x2x128xf32>,
    %26 = arith.truncf %16 : vector<50x128xf32> to vector<50x128xbf16>
    %c0_15 = arith.constant 0 : index
    %c0_16 = arith.constant 0 : index
    %c0_17 = arith.constant 0 : index
    %27 = vector.load %arg5[%c0_15, %c0_16, %c0_17] : memref<1x50x128xbf16, #tpu.memory_space<vmem>>, vector<1x50x128xbf16>
    %28 = vector.shape_cast %27 : vector<1x50x128xbf16> to vector<50x128xbf16>
    %29 = vector.shape_cast %26 : vector<50x128xbf16> to vector<1x50x128xbf16>
    tpu.vector_store %arg5[%c0_15, %c0_16, %c0_17], %29 {strides = array<i32>} : memref<1x50x128xbf16, #tpu.memory_space<vmem>>, vector<1x50x128xbf16>,
    return
  }
  func.func @transform_0(%arg0: i32) -> (i32, i32, i32) {
    %c0_i32 = arith.constant 0 : i32
    %c0_i32_0 = arith.constant 0 : i32
    %c0_i32_1 = arith.constant 0 : i32
    return %arg0, %c0_i32, %c0_i32_0 : i32, i32, i32
  }
  func.func @transform_1(%arg0: i32) -> (i32, i32) {
    %c0_i32 = arith.constant 0 : i32
    %c0_i32_0 = arith.constant 0 : i32
    %c0_i32_1 = arith.constant 0 : i32
    return %c0_i32, %c0_i32_0 : i32, i32
  }
  func.func @transform_2(%arg0: i32) -> (i32, i32) {
    %c0_i32 = arith.constant 0 : i32
    %c0_i32_0 = arith.constant 0 : i32
    %c0_i32_1 = arith.constant 0 : i32
    return %c0_i32, %c0_i32_0 : i32, i32
  }
  func.func @transform_3(%arg0: i32) -> (i32, i32) {
    %c0_i32 = arith.constant 0 : i32
    %c0_i32_0 = arith.constant 0 : i32
    %c0_i32_1 = arith.constant 0 : i32
    return %c0_i32, %c0_i32_0 : i32, i32
  }
  func.func @transform_4(%arg0: i32) -> (i32, i32, i32) {
    %c0_i32 = arith.constant 0 : i32
    %c0_i32_0 = arith.constant 0 : i32
    %c0_i32_1 = arith.constant 0 : i32
    return %arg0, %c0_i32, %c0_i32_0 : i32, i32, i32
  }
  func.func @transform_5(%arg0: i32) -> (i32, i32, i32) {
    %c0_i32 = arith.constant 0 : i32
    %c0_i32_0 = arith.constant 0 : i32
    %c0_i32_1 = arith.constant 0 : i32
    return %arg0, %c0_i32, %c0_i32_0 : i32, i32, i32
  }
}

module attributes {stable_mosaic.version = 11 : i64} {
  func.func @_conv_kernel(%arg0: i32, %arg1: memref<1x2x1664xbf16, #tpu.memory_space<vmem>>, %arg2: memref<1664x128xbf16, #tpu.memory_space<vmem>>, %arg3: memref<1x1664xf32, #tpu.memory_space<vmem>>, %arg4: memref<1x1664xf32, #tpu.memory_space<vmem>>, %arg5: memref<1x2x128xf32, #tpu.memory_space<vmem>>, %arg6: memref<1x2x128xf32, #tpu.memory_space<vmem>>) attributes {dimension_semantics = [#tpu.dimension_semantics<parallel>], iteration_bounds = array<i64: 1>, scalar_prefetch = 0 : i64, scratch_operands = 0 : i64, tpu.core_type = #tpu.core_type<tc>, window_params = [{transform_indices = @transform_0, window_bounds = array<i64: 1, 2, 1664>}, {pipeline_mode = #tpu.pipeline_mode<synchronous>, transform_indices = @transform_1, window_bounds = array<i64: 1664, 128>}, {pipeline_mode = #tpu.pipeline_mode<synchronous>, transform_indices = @transform_2, window_bounds = array<i64: 1, 1664>}, {pipeline_mode = #tpu.pipeline_mode<synchronous>, transform_indices = @transform_3, window_bounds = array<i64: 1, 1664>}, {transform_indices = @transform_4, window_bounds = array<i64: 1, 2, 128>}, {transform_indices = @transform_5, window_bounds = array<i64: 1, 2, 128>}]} {
    %c0 = arith.constant 0 : index
    %c0_0 = arith.constant 0 : index
    %c0_1 = arith.constant 0 : index
    %0 = vector.load %arg1[%c0, %c0_0, %c0_1] : memref<1x2x1664xbf16, #tpu.memory_space<vmem>>, vector<1x2x1664xbf16>
    %1 = vector.shape_cast %0 : vector<1x2x1664xbf16> to vector<2x1664xbf16>
    %2 = arith.extf %1 : vector<2x1664xbf16> to vector<2x1664xf32>
    %c0_2 = arith.constant 0 : index
    %c0_3 = arith.constant 0 : index
    %3 = vector.load %arg3[%c0_2, %c0_3] : memref<1x1664xf32, #tpu.memory_space<vmem>>, vector<1x1664xf32>
    %4 = vector.broadcast %3 : vector<1x1664xf32> to vector<2x1664xf32>
    %5 = arith.mulf %2, %4 : vector<2x1664xf32>
    %c0_4 = arith.constant 0 : index
    %c0_5 = arith.constant 0 : index
    %6 = vector.load %arg4[%c0_4, %c0_5] : memref<1x1664xf32, #tpu.memory_space<vmem>>, vector<1x1664xf32>
    %7 = vector.broadcast %6 : vector<1x1664xf32> to vector<2x1664xf32>
    %8 = arith.addf %5, %7 : vector<2x1664xf32>
    %cst = arith.constant 0.000000e+00 : f32
    %9 = vector.broadcast %cst : f32 to vector<2x1664xf32>
    %10 = arith.cmpf oge, %8, %9 : vector<2x1664xf32>
    %cst_6 = arith.constant 2.000000e-01 : f32
    %11 = vector.broadcast %cst_6 : f32 to vector<2x1664xf32>
    %12 = arith.mulf %11, %8 : vector<2x1664xf32>
    %13 = arith.select %10, %8, %12 : vector<2x1664xi1>, vector<2x1664xf32>
    %14 = arith.truncf %13 : vector<2x1664xf32> to vector<2x1664xbf16>
    %c0_7 = arith.constant 0 : index
    %c0_8 = arith.constant 0 : index
    %15 = vector.load %arg2[%c0_7, %c0_8] : memref<1664x128xbf16, #tpu.memory_space<vmem>>, vector<1664x128xbf16>
    %cst_9 = arith.constant dense<0.000000e+00> : vector<2x128xf32>
    %16 = tpu.matmul %14, %15, %cst_9 {dimension_numbers = #tpu.dot_dimension_numbers<[1], [0], [0], [1], [0, 0, 1, 1], [], []>} : vector<2x1664xbf16>, vector<1664x128xbf16>, vector<2x128xf32> -> vector<2x128xf32>
    %cst_10 = arith.constant dense<0.000000e+00> : vector<128xf32>
    %17 = vector.multi_reduction <add>, %16, %cst_10 [0] : vector<2x128xf32> to vector<128xf32>
    %18 = vector.shape_cast %17 : vector<128xf32> to vector<1x128xf32>
    %19 = arith.mulf %16, %16 : vector<2x128xf32>
    %cst_11 = arith.constant dense<0.000000e+00> : vector<128xf32>
    %20 = vector.multi_reduction <add>, %19, %cst_11 [0] : vector<2x128xf32> to vector<128xf32>
    %21 = vector.shape_cast %20 : vector<128xf32> to vector<1x128xf32>
    %22 = tpu.concatenate %18, %21 in 0 : vector<1x128xf32>, vector<1x128xf32> -> vector<2x128xf32>
    %c0_12 = arith.constant 0 : index
    %c0_13 = arith.constant 0 : index
    %c0_14 = arith.constant 0 : index
    %23 = vector.load %arg6[%c0_12, %c0_13, %c0_14] : memref<1x2x128xf32, #tpu.memory_space<vmem>>, vector<1x2x128xf32>
    %24 = vector.shape_cast %23 : vector<1x2x128xf32> to vector<2x128xf32>
    %25 = vector.shape_cast %22 : vector<2x128xf32> to vector<1x2x128xf32>
    tpu.vector_store %arg6[%c0_12, %c0_13, %c0_14], %25 {strides = array<i32>} : memref<1x2x128xf32, #tpu.memory_space<vmem>>, vector<1x2x128xf32>,
    %26 = arith.negf %16 : vector<2x128xf32>
    %27 = math.exp %26 : vector<2x128xf32>
    %cst_15 = arith.constant 1.000000e+00 : f32
    %28 = vector.broadcast %cst_15 : f32 to vector<2x128xf32>
    %29 = arith.addf %28, %27 : vector<2x128xf32>
    %30 = arith.divf %28, %29 : vector<2x128xf32>
    %c0_16 = arith.constant 0 : index
    %c0_17 = arith.constant 0 : index
    %c0_18 = arith.constant 0 : index
    %31 = vector.load %arg5[%c0_16, %c0_17, %c0_18] : memref<1x2x128xf32, #tpu.memory_space<vmem>>, vector<1x2x128xf32>
    %32 = vector.shape_cast %31 : vector<1x2x128xf32> to vector<2x128xf32>
    %33 = vector.shape_cast %30 : vector<2x128xf32> to vector<1x2x128xf32>
    tpu.vector_store %arg5[%c0_16, %c0_17, %c0_18], %33 {strides = array<i32>} : memref<1x2x128xf32, #tpu.memory_space<vmem>>, vector<1x2x128xf32>,
    return
  }
  func.func @transform_0(%arg0: i32) -> (i32, i32, i32) {
    %c0_i32 = arith.constant 0 : i32
    %c0_i32_0 = arith.constant 0 : i32
    %c0_i32_1 = arith.constant 0 : i32
    return %arg0, %c0_i32, %c0_i32_0 : i32, i32, i32
  }
  func.func @transform_1(%arg0: i32) -> (i32, i32) {
    %c0_i32 = arith.constant 0 : i32
    %c0_i32_0 = arith.constant 0 : i32
    %c0_i32_1 = arith.constant 0 : i32
    return %c0_i32, %c0_i32_0 : i32, i32
  }
  func.func @transform_2(%arg0: i32) -> (i32, i32) {
    %c0_i32 = arith.constant 0 : i32
    %c0_i32_0 = arith.constant 0 : i32
    %c0_i32_1 = arith.constant 0 : i32
    return %c0_i32, %c0_i32_0 : i32, i32
  }
  func.func @transform_3(%arg0: i32) -> (i32, i32) {
    %c0_i32 = arith.constant 0 : i32
    %c0_i32_0 = arith.constant 0 : i32
    %c0_i32_1 = arith.constant 0 : i32
    return %c0_i32, %c0_i32_0 : i32, i32
  }
  func.func @transform_4(%arg0: i32) -> (i32, i32, i32) {
    %c0_i32 = arith.constant 0 : i32
    %c0_i32_0 = arith.constant 0 : i32
    %c0_i32_1 = arith.constant 0 : i32
    return %arg0, %c0_i32, %c0_i32_0 : i32, i32, i32
  }
  func.func @transform_5(%arg0: i32) -> (i32, i32, i32) {
    %c0_i32 = arith.constant 0 : i32
    %c0_i32_0 = arith.constant 0 : i32
    %c0_i32_1 = arith.constant 0 : i32
    return %arg0, %c0_i32, %c0_i32_0 : i32, i32, i32
  }
}

</mosaic_0001>

<bundles_post_ra>
// kernel: discriminator_forward.5
= control target key start
LH: loop header
LB: loop body
LE: loop exit
PB: predicated region body
PF: predicated region fallthrough
CT: control target
= control target key end

     0   :  { %s7348_s18 = smov 0   ;;  %s8942_s0 = inlined_call_operand.vmem [shape: bf16[2,2209,128], index: 0, kind: input, shape index: {}]   ;;  %s8943_s1 = inlined_call_operand.vmem [shape: bf16[128,128], index: 1, kind: input, shape index: {}]   ;;  %s8944_s2 = inlined_call_operand.vmem [shape: f32[1,128], index: 2, kind: input, shape index: {}, may-alias: {2,3}]   ;;  %s8945_s3 = inlined_call_operand.vmem [shape: f32[1,128], index: 3, kind: input, shape index: {}, may-alias: {2,3}]   ;;  %s8946_s4 = inlined_call_operand.vmem [shape: bf16[2,2209,128], index: 4, kind: output, shape index: {0}]   ;;  %s8947_s5 = inlined_call_operand.vmem [shape: f32[2,2,128], index: 5, kind: output, shape index: {1}]  }
   0x1 LB: > { %s4877_s2 = sadd.s32 4294967295, %s7314_s18   ;;  %p4881_p0 = scmp.ge.s32.totalorder %s7314_s18, 1  ;;  %s7314_s18 = sphi %s7348_s18, %s16_s18  }
   0x2   : > { %p190_p1 = scmp.lt.s32.totalorder %s7314_s18, 3 }
   0x4   : > { %p191_p2 = pnand %p4881_p0, %p190_p1 }
   0x6   : > { %194 = sbr.rel (%p191_p2) target bundleno = 1085 (0x43d), region = 36 }
   0xb   : > { %v7161_v0 = vld [vmem:[%s8943_s1 + $0x38] sm:$0xff]   ;;  %v8950_v1 = vmov 0.0   ;;  %v7162_v2 = vld [vmem:[%s8943_s1 + $0x30] sm:$0xff]   ;;  %vm7317_vm0 = vmmov 0   ;;  %p222_p3 = scmp.lt.s32.totalorder %s4877_s2, 1  ;;  %v7163_v3 = vld [vmem:[%s8943_s1 + $0x28] sm:$0xff]  }
   0xc   : > { %6562 = vmatprep.subr.bf16.mxu0 %v8950_v1  ;;  %7134 = vmatprep.subr.bf16.mxu1 %v8950_v1  ;;  %v7164_v4 = vld [vmem:[%s8943_s1 + $0x20] sm:$0xff]   ;;  %v7165_v5 = vld [vmem:[%s8943_s1 + $0x18] sm:$0xff]   ;;  %v7166_v6 = vld [vmem:[%s8943_s1 + $0x10] sm:$0xff]   ;;  %vm2829_vm1 = vcmask 1040384   ;;  %vm4786_vm2 = vsmask.f32 256 }
   0xd   : > { %6563 = vmatpush3.bf16.msra.mxu0 %v7161_v0  ;;  %6578 = vmatprep.mubr.msk.bf16.mxu0 %vm7317_vm0, %v8950_v1  ;;  %s9192_s2 = smov (!%p222_p3, %s4877_s2), 1  ;;  %v7167_v7 = vld [vmem:[%s8943_s1 + $0x8] sm:$0xff]   ;;  %v7168_v8 = vld [vmem:[%s8943_s1] sm:$0xff]   ;;  %vm4787_vm3 = vmand %vm2829_vm1, %vm4786_vm2 }
   0xe   : > { %6564 = vmatprep.subr.bf16.mxu0 %v8950_v1  ;;  %7142 = vmatpush3.bf16.msra.mxu1 %v7161_v0  ;;  %s7150_s24 = smul.u32 1108, %s9192_s2  ;;  %s4884_s16 = sshll.u32 %s9192_s2, 1 }
   0xf   : > { %7135 = vmatprep.subr.bf16.mxu1 %v8950_v1  ;;  %6858 = vmatprep.mubr.msk.bf16.mxu1 %vm7317_vm0, %v8950_v1  ;;  %s235_s19 = scalar_lea.vmem %s8947_s5, %s4884_s16 }
  0x10   : > { %s7382_s27 = scalar_lea.vmem %s8942_s0, %s7150_s24  ;;  %s7508_s15 = scalar_lea.vmem %s8946_s4, %s7150_s24 }
  0x11   : > { %6565 = vmatpush3.bf16.msra.mxu0 %v7162_v2  ;;  %v7169_v9 = vld [vmem:[%s7382_s27] sm:$0xff]   ;;  %v7170_v10 = vld [vmem:[%s7382_s27 + $0x8] sm:$0xff]   ;;  %v7171_v11 = vld [vmem:[%s7382_s27 + $0x10] sm:$0xff]  }
  0x12   : > { %6566 = vmatprep.subr.bf16.mxu0 %v8950_v1  ;;  %7143 = vmatpush3.bf16.msra.mxu1 %v7162_v2  ;;  %v7172_v12 = vld [vmem:[%s7382_s27 + $0x18] sm:$0xff]   ;;  %v7173_v13 = vld [vmem:[%s7382_s27 + $0x20] sm:$0xff]   ;;  %v7174_v14 = vld [vmem:[%s7382_s27 + $0x28] sm:$0xff]  }
  0x13   : > { %7136 = vmatprep.subr.bf16.mxu1 %v8950_v1  ;;  %v7175_v15 = vld [vmem:[%s7382_s27 + $0x30] sm:$0xff]   ;;  %v7176_v16 = vld [vmem:[%s7382_s27 + $0x38] sm:$0xff]   ;;  %v7177_v17 = vld [vmem:[%s7382_s27 + $0x40] sm:$0xff]  }
  0x14   : > { %v7178_v18 = vld [vmem:[%s7382_s27 + $0x48] sm:$0xff]   ;;  %v7179_v19 = vld [vmem:[%s7382_s27 + $0x50] sm:$0xff]   ;;  %v7180_v20 = vld [vmem:[%s7382_s27 + $0x58] sm:$0xff]  }
  0x15   : > { %6567 = vmatpush3.bf16.msra.mxu0 %v7163_v3  ;;  %v7181_v21 = vld [vmem:[%s7382_s27 + $0x60] sm:$0xff]   ;;  %v7182_v22 = vld [vmem:[%s7382_s27 + $0x68] sm:$0xff]   ;;  %v7183_v23 = vld [vmem:[%s7382_s27 + $0x70] sm:$0xff]  }
  0x16   : > { %6568 = vmatprep.subr.bf16.mxu0 %v8950_v1  ;;  %7144 = vmatpush3.bf16.msra.mxu1 %v7163_v3  ;;  %v7184_v24 = vld [vmem:[%s7382_s27 + $0x78] sm:$0xff]   ;;  %v7185_v25 = vld [vmem:[%s7382_s27 + $0x80] sm:$0xff]   ;;  %v7186_v26 = vld [vmem:[%s7382_s27 + $0x88] sm:$0xff]  }
  0x17   : > { %7137 = vmatprep.subr.bf16.mxu1 %v8950_v1  ;;  %v7187_v27 = vld [vmem:[%s7382_s27 + $0x90] sm:$0xff]   ;;  %v7188_v28 = vld [vmem:[%s7382_s27 + $0x98] sm:$0xff]   ;;  %v7189_v30 = vld [vmem:[%s7382_s27 + $0xa0] sm:$0xff]  }
  0x18   : > { %v7204_v29 = vld [vmem:[%s7382_s27 + $0x230] sm:$0xff]   ;;  %v7206_v31 = vld [vmem:[%s7382_s27 + $0x238] sm:$0xff]   ;;  %v7190_v32 = vld [vmem:[%s7382_s27 + $0xa8] sm:$0xff]  }
  0x19   : > { %6569 = vmatpush3.bf16.msra.mxu0 %v7164_v4  ;;  %v7208_v33 = vld [vmem:[%s7382_s27 + $0x240] sm:$0xff]   ;;  %v7191_v34 = vld [vmem:[%s7382_s27 + $0xb0] sm:$0xff]   ;;  %v7210_v35 = vld [vmem:[%s7382_s27 + $0x248] sm:$0xff]  }
  0x1a   : > { %6570 = vmatprep.subr.bf16.mxu0 %v8950_v1  ;;  %7145 = vmatpush3.bf16.msra.mxu1 %v7164_v4  ;;  %v7192_v36 = vld [vmem:[%s7382_s27 + $0xb8] sm:$0xff]   ;;  %v7212_v37 = vld [vmem:[%s7382_s27 + $0x250] sm:$0xff]   ;;  %v7193_v38 = vld [vmem:[%s7382_s27 + $0xc0] sm:$0xff]  }
  0x1b   : > { %7138 = vmatprep.subr.bf16.mxu1 %v8950_v1  ;;  %v7214_v39 = vld [vmem:[%s7382_s27 + $0x258] sm:$0xff]   ;;  %v7194_v43 = vld [vmem:[%s7382_s27 + $0xc8] sm:$0xff]   ;;  %v7216_v48 = vld [vmem:[%s7382_s27 + $0x260] sm:$0xff]  }
  0x1c   : > { %v7195_v57 = vld [vmem:[%s7382_s27 + $0xd0] sm:$0xff]   ;;  %v7218_v61 = vld [vmem:[%s7382_s27 + $0x268] sm:$0xff]  }
  0x1d   : > { %6571 = vmatpush3.bf16.msra.mxu0 %v7165_v5 }
  0x1e   : > { %6572 = vmatprep.subr.bf16.mxu0 %v8950_v1  ;;  %7146 = vmatpush3.bf16.msra.mxu1 %v7165_v5 }
  0x1f   : > { %7139 = vmatprep.subr.bf16.mxu1 %v8950_v1 }
  0x21   : > { %6573 = vmatpush3.bf16.msra.mxu0 %v7166_v6 }
  0x22   : > { %6574 = vmatprep.subr.bf16.mxu0 %v8950_v1  ;;  %7147 = vmatpush3.bf16.msra.mxu1 %v7166_v6 }
  0x23   : > { %7140 = vmatprep.subr.bf16.mxu1 %v8950_v1 }
  0x25   : > { %6575 = vmatpush3.bf16.msra.mxu0 %v7167_v7 }
  0x26   : > { %6576 = vmatprep.subr.bf16.mxu0 %v8950_v1  ;;  %7148 = vmatpush3.bf16.msra.mxu1 %v7167_v7  ;;  %v7196_v7 = vld [vmem:[%s7382_s27 + $0xd8] sm:$0xff]  }
  0x27   : > { %7141 = vmatprep.subr.bf16.mxu1 %v8950_v1 }
  0x29   : > { %6577 = vmatpush3.bf16.msra.mxu0 %v7168_v8 }
  0x2a   : > { %7149 = vmatpush3.bf16.msra.mxu1 %v7168_v8 }
  0x2c   : > { %6579 = vmatmul.mubr.bf16.vlgmr.msra.gmra.mxu0 %v7169_v9 }
  0x2d   : > { %6582 = vmatprep.mubr.msk.bf16.mxu0 %vm7317_vm0, %v8950_v1  ;;  %6859 = vmatmul.mubr.bf16.vlgmr.msra.gmra.mxu1 %v7204_v29 }
  0x2e   : > { %6862 = vmatprep.mubr.msk.bf16.mxu1 %vm7317_vm0, %v8950_v1 }
  0x34   : > { %6583 = vmatmul.mubr.bf16.gmra.mxu0 %v7170_v10 }
  0x35   : > { %6586 = vmatprep.mubr.msk.bf16.mxu0 %vm7317_vm0, %v8950_v1  ;;  %6863 = vmatmul.mubr.bf16.gmra.mxu1 %v7206_v31 }
  0x36   : > { %6866 = vmatprep.mubr.msk.bf16.mxu1 %vm7317_vm0, %v8950_v1 }
  0x3c   : > { %6587 = vmatmul.mubr.bf16.gmra.mxu0 %v7171_v11  ;;  %v7220_v11 = vld [vmem:[%s7382_s27 + $0x270] sm:$0xff]  }
  0x3d   : > { %6590 = vmatprep.mubr.msk.bf16.mxu0 %vm7317_vm0, %v8950_v1  ;;  %6867 = vmatmul.mubr.bf16.gmra.mxu1 %v7208_v33  ;;  %v7198_v33 = vld [vmem:[%s7382_s27 + $0xe8] sm:$0xff]  }
  0x3e   : > { %6870 = vmatprep.mubr.msk.bf16.mxu1 %vm7317_vm0, %v8950_v1 }
  0x44   : > { %6591 = vmatmul.mubr.bf16.gmra.mxu0 %v7172_v12 }
  0x45   : > { %6594 = vmatprep.mubr.msk.bf16.mxu0 %vm7317_vm0, %v8950_v1  ;;  %6871 = vmatmul.mubr.bf16.gmra.mxu1 %v7210_v35 }
  0x46   : > { %6874 = vmatprep.mubr.msk.bf16.mxu1 %vm7317_vm0, %v8950_v1 }
  0x4c   : > { %6595 = vmatmul.mubr.bf16.gmra.mxu0 %v7173_v13 }
  0x4d   : > { %6598 = vmatprep.mubr.msk.bf16.mxu0 %vm7317_vm0, %v8950_v1  ;;  %6875 = vmatmul.mubr.bf16.gmra.mxu1 %v7212_v37  ;;  %v7224_v37 = vld [vmem:[%s7382_s27 + $0x280] sm:$0xff]  }
  0x4e   : > { %6878 = vmatprep.mubr.msk.bf16.mxu1 %vm7317_vm0, %v8950_v1 }
  0x54   : > { %6599 = vmatmul.mubr.bf16.gmra.mxu0 %v7174_v14 }
  0x55   : > { %6602 = vmatprep.mubr.msk.bf16.mxu0 %vm7317_vm0, %v8950_v1  ;;  %6879 = vmatmul.mubr.bf16.gmra.mxu1 %v7214_v39 }
  0x56   : > { %6882 = vmatprep.mubr.msk.bf16.mxu1 %vm7317_vm0, %v8950_v1 }
  0x5c   : > { %6603 = vmatmul.mubr.bf16.gmra.mxu0 %v7175_v15 }
  0x5d   : > { %6606 = vmatprep.mubr.msk.bf16.mxu0 %vm7317_vm0, %v8950_v1  ;;  %6883 = vmatmul.mubr.bf16.gmra.mxu1 %v7216_v48 }
  0x5e   : > { %6886 = vmatprep.mubr.msk.bf16.mxu1 %vm7317_vm0, %v8950_v1 }
  0x64   : > { %6607 = vmatmul.mubr.bf16.gmra.mxu0 %v7176_v16 }
  0x65   : > { %6610 = vmatprep.mubr.msk.bf16.mxu0 %vm7317_vm0, %v8950_v1  ;;  %6887 = vmatmul.mubr.bf16.gmra.mxu1 %v7218_v61 }
  0x66   : > { %6890 = vmatprep.mubr.msk.bf16.mxu1 %vm7317_vm0, %v8950_v1 }
  0x6c   : > { %6611 = vmatmul.mubr.bf16.gmra.mxu0 %v7177_v17 }
  0x6d   : > { %6614 = vmatprep.mubr.msk.bf16.mxu0 %vm7317_vm0, %v8950_v1  ;;  %6891 = vmatmul.mubr.bf16.gmra.mxu1 %v7220_v11 }
  0x6e   : > { %6894 = vmatprep.mubr.msk.bf16.mxu1 %vm7317_vm0, %v8950_v1 }
  0x74   : > { %6615 = vmatmul.mubr.bf16.gmra.mxu0 %v7178_v18 }
  0x75   : > { %6618 = vmatprep.mubr.msk.bf16.mxu0 %vm7317_vm0, %v8950_v1 }
  0x7c   : > { %6619 = vmatmul.mubr.bf16.gmra.mxu0 %v7179_v19 }
  0x7d   : > { %6622 = vmatprep.mubr.msk.bf16.mxu0 %vm7317_vm0, %v8950_v1 }
  0x84   : > { %6623 = vmatmul.mubr.bf16.gmra.mxu0 %v7180_v20  ;;  %v7197_v20 = vld [vmem:[%s7382_s27 + $0xe0] sm:$0xff]  }
  0x85   : > { %6626 = vmatprep.mubr.msk.bf16.mxu0 %vm7317_vm0, %v8950_v1 }
  0x8c   : > { %6627 = vmatmul.mubr.bf16.gmra.mxu0 %v7181_v21 }
  0x8d   : > { %6630 = vmatprep.mubr.msk.bf16.mxu0 %vm7317_vm0, %v8950_v1 }
  0x94   : > { %6631 = vmatmul.mubr.bf16.gmra.mxu0 %v7182_v22 }
  0x95   : > { %6634 = vmatprep.mubr.msk.bf16.mxu0 %vm7317_vm0, %v8950_v1 }
  0x9c   : > { %6635 = vmatmul.mubr.bf16.gmra.mxu0 %v7183_v23 }
  0x9d   : > { %6638 = vmatprep.mubr.msk.bf16.mxu0 %vm7317_vm0, %v8950_v1 }
  0xa4   : > { %6639 = vmatmul.mubr.bf16.gmra.mxu0 %v7184_v24  ;;  %v7222_v24 = vld [vmem:[%s7382_s27 + $0x278] sm:$0xff]  }
  0xa5   : > { %6642 = vmatprep.mubr.msk.bf16.mxu0 %vm7317_vm0, %v8950_v1  ;;  %6895 = vmatmul.mubr.bf16.gmra.mxu1 %v7222_v24 }
  0xa6   : > { %6898 = vmatprep.mubr.msk.bf16.mxu1 %vm7317_vm0, %v8950_v1 }
  0xac   : > { %6643 = vmatmul.mubr.bf16.gmra.mxu0 %v7185_v25 }
  0xad   : > { %6646 = vmatprep.mubr.msk.bf16.mxu0 %vm7317_vm0, %v8950_v1  ;;  %6899 = vmatmul.mubr.bf16.gmra.mxu1 %v7224_v37 }
  0xae   : > { %6902 = vmatprep.mubr.msk.bf16.mxu1 %vm7317_vm0, %v8950_v1 }
  0xb4   : > { %6647 = vmatmul.mubr.bf16.gmra.mxu0 %v7186_v26 }
  0xb5   : > { %6650 = vmatprep.mubr.msk.bf16.mxu0 %vm7317_vm0, %v8950_v1 }
  0xbc   : > { %6651 = vmatmul.mubr.bf16.gmra.mxu0 %v7187_v27 }
  0xbd   : > { %6654 = vmatprep.mubr.msk.bf16.mxu0 %vm7317_vm0, %v8950_v1 }
  0xc4   : > { %6655 = vmatmul.mubr.bf16.gmra.mxu0 %v7188_v28 }
  0xc5   : > { %6658 = vmatprep.mubr.msk.bf16.mxu0 %vm7317_vm0, %v8950_v1 }
  0xcc   : > { %6659 = vmatmul.mubr.bf16.gmra.mxu0 %v7189_v30 }
  0xcd   : > { %6662 = vmatprep.mubr.msk.bf16.mxu0 %vm7317_vm0, %v8950_v1 }
  0xd4   : > { %6663 = vmatmul.mubr.bf16.gmra.mxu0 %v7190_v32 }
  0xd5   : > { %6666 = vmatprep.mubr.msk.bf16.mxu0 %vm7317_vm0, %v8950_v1 }
  0xdc   : > { %6667 = vmatmul.mubr.bf16.gmra.mxu0 %v7191_v34 }
  0xdd   : > { %6670 = vmatprep.mubr.msk.bf16.mxu0 %vm7317_vm0, %v8950_v1 }
  0xe4   : > { %6671 = vmatmul.mubr.bf16.gmra.mxu0 %v7192_v36 }
  0xe5   : > { %6674 = vmatprep.mubr.msk.bf16.mxu0 %vm7317_vm0, %v8950_v1 }
  0xec   : > { %v1444_v40 = vpop.f32.mrf.mxu0  ;;  %6675 = vmatmul.mubr.bf16.gmra.mxu0 %v7193_v38 }
  0xed   : > { %6678 = vmatprep.mubr.msk.bf16.mxu0 %vm7317_vm0, %v8950_v1  ;;  %v2838_v44 = vmul.f32 %v1444_v40, %v1444_v40 }
  0xee   : > { %v6580_v41 = vpop.f32.mrf.mxu0 }
  0xf0   : > { %v1447_v42 = vpop.f32.mrf.mxu0 }
  0xf1   : > { %v2554_v45 = vadd.f32 %v1447_v42, %v1444_v40  ;;  %v2839_v46 = vmul.f32 %v1447_v42, %v1447_v42  ;;  %v5591_v47 = vpack.c.bf16 %v1447_v42, %v1444_v40 }
  0xf2   : > { %v6581_v49 = vpop.f32.mrf.mxu0 }
  0xf3   : > { %v3115_v50 = vadd.f32 %v2839_v46, %v2838_v44  ;;  %5592 = vst [vmem:[%s7508_s15] sm:$0xff] %v5591_v47   ;;  %v7199_v46 = vld [vmem:[%s7382_s27 + $0xf0] sm:$0xff]  }
  0xf4   : > { %v1452_v51 = vpop.f32.mrf.mxu0  ;;  %6679 = vmatmul.mubr.bf16.gmra.mxu0 %v7194_v43 }
  0xf5   : > { %v2555_v52 = vadd.f32 %v2554_v45, %v1452_v51  ;;  %v2840_v53 = vmul.f32 %v1452_v51, %v1452_v51  ;;  %6682 = vmatprep.mubr.msk.bf16.mxu0 %vm7317_vm0, %v8950_v1 }
  0xf6   : > { %v6584_v54 = vpop.f32.mrf.mxu0 }
  0xf7   : > { %v3116_v55 = vadd.f32 %v3115_v50, %v2840_v53  ;;  %v7226_v50 = vld [vmem:[%s7382_s27 + $0x288] sm:$0xff]  }
  0xf8   : > { %v1455_v56 = vpop.f32.mrf.mxu0  ;;  %6903 = vmatmul.mubr.bf16.gmra.mxu1 %v7226_v50 }
  0xf9   : > { %v2556_v58 = vadd.f32 %v2555_v52, %v1455_v56  ;;  %v2841_v59 = vmul.f32 %v1455_v56, %v1455_v56  ;;  %v5596_v60 = vpack.c.bf16 %v1455_v56, %v1452_v51  ;;  %6906 = vmatprep.mubr.msk.bf16.mxu1 %vm7317_vm0, %v8950_v1 }
  0xfa   : > { %v6585_v62 = vpop.f32.mrf.mxu0 }
  0xfb   : > { %v3117_v63 = vadd.f32 %v3116_v55, %v2841_v59  ;;  %6278 = vst [vmem:[%s7508_s15 + $0x8] sm:$0xff] %v5596_v60   ;;  %v7200_v59 = vld [vmem:[%s7382_s27 + $0xf8] sm:$0xff]  }
  0xfc   : > { %v1460_v0 = vpop.f32.mrf.mxu0  ;;  %6683 = vmatmul.mubr.bf16.gmra.mxu0 %v7195_v57 }
  0xfd   : > { %v2557_v2 = vadd.f32 %v2556_v58, %v1460_v0  ;;  %v2842_v3 = vmul.f32 %v1460_v0, %v1460_v0  ;;  %6686 = vmatprep.mubr.msk.bf16.mxu0 %vm7317_vm0, %v8950_v1 }
  0xfe   : > { %v6588_v4 = vpop.f32.mrf.mxu0 }
  0xff   : > { %v3118_v5 = vadd.f32 %v3117_v63, %v2842_v3  ;;  %v7228_v63 = vld [vmem:[%s7382_s27 + $0x290] sm:$0xff]  }
 0x100   : > { %v1463_v6 = vpop.f32.mrf.mxu0  ;;  %6907 = vmatmul.mubr.bf16.gmra.mxu1 %v7228_v63 }
 0x101   : > { %v2558_v8 = vadd.f32 %v2557_v2, %v1463_v6  ;;  %v2843_v9 = vmul.f32 %v1463_v6, %v1463_v6  ;;  %v5601_v10 = vpack.c.bf16 %v1463_v6, %v1460_v0  ;;  %6910 = vmatprep.mubr.msk.bf16.mxu1 %vm7317_vm0, %v8950_v1 }
 0x102   : > { %v6589_v12 = vpop.f32.mrf.mxu0 }
 0x103   : > { %v3119_v13 = vadd.f32 %v3118_v5, %v2843_v9  ;;  %6279 = vst [vmem:[%s7508_s15 + $0x10] sm:$0xff] %v5601_v10   ;;  %v7201_v9 = vld [vmem:[%s7382_s27 + $0x100] sm:$0xff]  }
 0x104   : > { %v1468_v14 = vpop.f32.mrf.mxu0  ;;  %6687 = vmatmul.mubr.bf16.gmra.mxu0 %v7196_v7 }
 0x105   : > { %v2559_v15 = vadd.f32 %v2558_v8, %v1468_v14  ;;  %v2844_v16 = vmul.f32 %v1468_v14, %v1468_v14  ;;  %6690 = vmatprep.mubr.msk.bf16.mxu0 %vm7317_vm0, %v8950_v1 }
 0x106   : > { %v6592_v17 = vpop.f32.mrf.mxu0 }
 0x107   : > { %v3120_v18 = vadd.f32 %v3119_v13, %v2844_v16  ;;  %v7230_v13 = vld [vmem:[%s7382_s27 + $0x298] sm:$0xff]  }
 0x108   : > { %v1471_v19 = vpop.f32.mrf.mxu0  ;;  %6911 = vmatmul.mubr.bf16.gmra.mxu1 %v7230_v13 }
 0x109   : > { %v2560_v21 = vadd.f32 %v2559_v15, %v1471_v19  ;;  %v2845_v22 = vmul.f32 %v1471_v19, %v1471_v19  ;;  %v5606_v23 = vpack.c.bf16 %v1471_v19, %v1468_v14  ;;  %6914 = vmatprep.mubr.msk.bf16.mxu1 %vm7317_vm0, %v8950_v1 }
 0x10a   : > { %v6593_v25 = vpop.f32.mrf.mxu0 }
 0x10b   : > { %v3121_v26 = vadd.f32 %v3120_v18, %v2845_v22  ;;  %6280 = vst [vmem:[%s7508_s15 + $0x18] sm:$0xff] %v5606_v23   ;;  %v7202_v22 = vld [vmem:[%s7382_s27 + $0x108] sm:$0xff]  }
 0x10c   : > { %v1476_v27 = vpop.f32.mrf.mxu0  ;;  %6691 = vmatmul.mubr.bf16.gmra.mxu0 %v7197_v20 }
 0x10d   : > { %v2561_v28 = vadd.f32 %v2560_v21, %v1476_v27  ;;  %v2846_v29 = vmul.f32 %v1476_v27, %v1476_v27  ;;  %6694 = vmatprep.mubr.msk.bf16.mxu0 %vm7317_vm0, %v8950_v1 }
 0x10e   : > { %v6596_v30 = vpop.f32.mrf.mxu0 }
 0x10f   : > { %v3122_v31 = vadd.f32 %v3121_v26, %v2846_v29  ;;  %v7232_v26 = vld [vmem:[%s7382_s27 + $0x2a0] sm:$0xff]  }
 0x110   : > { %v1479_v32 = vpop.f32.mrf.mxu0  ;;  %6915 = vmatmul.mubr.bf16.gmra.mxu1 %v7232_v26 }
 0x111   : > { %v2562_v34 = vadd.f32 %v2561_v28, %v1479_v32  ;;  %v2847_v35 = vmul.f32 %v1479_v32, %v1479_v32  ;;  %v5611_v36 = vpack.c.bf16 %v1479_v32, %v1476_v27  ;;  %6918 = vmatprep.mubr.msk.bf16.mxu1 %vm7317_vm0, %v8950_v1 }
 0x112   : > { %v6597_v38 = vpop.f32.mrf.mxu0 }
 0x113   : > { %v3123_v39 = vadd.f32 %v3122_v31, %v2847_v35  ;;  %6281 = vst [vmem:[%s7508_s15 + $0x20] sm:$0xff] %v5611_v36   ;;  %v7203_v35 = vld [vmem:[%s7382_s27 + $0x110] sm:$0xff]  }
 0x114   : > { %v1484_v40 = vpop.f32.mrf.mxu0  ;;  %6695 = vmatmul.mubr.bf16.gmra.mxu0 %v7198_v33 }
 0x115   : > { %v2563_v41 = vadd.f32 %v2562_v34, %v1484_v40  ;;  %v2848_v42 = vmul.f32 %v1484_v40, %v1484_v40  ;;  %6698 = vmatprep.mubr.msk.bf16.mxu0 %vm7317_vm0, %v8950_v1 }
 0x116   : > { %v6600_v43 = vpop.f32.mrf.mxu0 }
 0x117   : > { %v3124_v44 = vadd.f32 %v3123_v39, %v2848_v42  ;;  %v7234_v39 = vld [vmem:[%s7382_s27 + $0x2a8] sm:$0xff]  }
 0x118   : > { %v1487_v45 = vpop.f32.mrf.mxu0  ;;  %6919 = vmatmul.mubr.bf16.gmra.mxu1 %v7234_v39 }
 0x119   : > { %v2564_v47 = vadd.f32 %v2563_v41, %v1487_v45  ;;  %v2849_v48 = vmul.f32 %v1487_v45, %v1487_v45  ;;  %v5616_v49 = vpack.c.bf16 %v1487_v45, %v1484_v40  ;;  %6922 = vmatprep.mubr.msk.bf16.mxu1 %vm7317_vm0, %v8950_v1 }
 0x11a   : > { %v6601_v51 = vpop.f32.mrf.mxu0 }
 0x11b   : > { %v3125_v52 = vadd.f32 %v3124_v44, %v2849_v48  ;;  %6282 = vst [vmem:[%s7508_s15 + $0x28] sm:$0xff] %v5616_v49   ;;  %v7205_v48 = vld [vmem:[%s7382_s27 + $0x118] sm:$0xff]  }
 0x11c   : > { %v1492_v53 = vpop.f32.mrf.mxu0  ;;  %6699 = vmatmul.mubr.bf16.gmra.mxu0 %v7199_v46 }
 0x11d   : > { %v2565_v54 = vadd.f32 %v2564_v47, %v1492_v53  ;;  %v2850_v55 = vmul.f32 %v1492_v53, %v1492_v53  ;;  %6702 = vmatprep.mubr.msk.bf16.mxu0 %vm7317_vm0, %v8950_v1 }
 0x11e   : > { %v6604_v56 = vpop.f32.mrf.mxu0 }
 0x11f   : > { %v3126_v57 = vadd.f32 %v3125_v52, %v2850_v55  ;;  %v7236_v52 = vld [vmem:[%s7382_s27 + $0x2b0] sm:$0xff]  }
 0x120   : > { %v1495_v58 = vpop.f32.mrf.mxu0  ;;  %6923 = vmatmul.mubr.bf16.gmra.mxu1 %v7236_v52 }
 0x121   : > { %v2566_v60 = vadd.f32 %v2565_v54, %v1495_v58  ;;  %v2851_v61 = vmul.f32 %v1495_v58, %v1495_v58  ;;  %v5621_v62 = vpack.c.bf16 %v1495_v58, %v1492_v53  ;;  %6926 = vmatprep.mubr.msk.bf16.mxu1 %vm7317_vm0, %v8950_v1 }
 0x122   : > { %v6605_v0 = vpop.f32.mrf.mxu0 }
 0x123   : > { %v3127_v2 = vadd.f32 %v3126_v57, %v2851_v61  ;;  %6283 = vst [vmem:[%s7508_s15 + $0x30] sm:$0xff] %v5621_v62   ;;  %v7207_v61 = vld [vmem:[%s7382_s27 + $0x120] sm:$0xff]  }
 0x124   : > { %v1500_v3 = vpop.f32.mrf.mxu0  ;;  %6703 = vmatmul.mubr.bf16.gmra.mxu0 %v7200_v59 }
 0x125   : > { %v2567_v4 = vadd.f32 %v2566_v60, %v1500_v3  ;;  %v2852_v5 = vmul.f32 %v1500_v3, %v1500_v3  ;;  %6706 = vmatprep.mubr.msk.bf16.mxu0 %vm7317_vm0, %v8950_v1 }
 0x126   : > { %v6608_v6 = vpop.f32.mrf.mxu0 }
 0x127   : > { %v3128_v7 = vadd.f32 %v3127_v2, %v2852_v5  ;;  %v7238_v2 = vld [vmem:[%s7382_s27 + $0x2b8] sm:$0xff]  }
 0x128   : > { %v1503_v8 = vpop.f32.mrf.mxu0  ;;  %6927 = vmatmul.mubr.bf16.gmra.mxu1 %v7238_v2 }
 0x129   : > { %v2568_v10 = vadd.f32 %v2567_v4, %v1503_v8  ;;  %v2853_v11 = vmul.f32 %v1503_v8, %v1503_v8  ;;  %v5626_v12 = vpack.c.bf16 %v1503_v8, %v1500_v3  ;;  %6930 = vmatprep.mubr.msk.bf16.mxu1 %vm7317_vm0, %v8950_v1 }
 0x12a   : > { %v6609_v14 = vpop.f32.mrf.mxu0 }
 0x12b   : > { %v3129_v15 = vadd.f32 %v3128_v7, %v2853_v11  ;;  %6284 = vst [vmem:[%s7508_s15 + $0x38] sm:$0xff] %v5626_v12   ;;  %v7209_v11 = vld [vmem:[%s7382_s27 + $0x128] sm:$0xff]  }
 0x12c   : > { %v1508_v16 = vpop.f32.mrf.mxu0  ;;  %6707 = vmatmul.mubr.bf16.gmra.mxu0 %v7201_v9 }
 0x12d   : > { %v2569_v17 = vadd.f32 %v2568_v10, %v1508_v16  ;;  %v2854_v18 = vmul.f32 %v1508_v16, %v1508_v16  ;;  %6710 = vmatprep.mubr.msk.bf16.mxu0 %vm7317_vm0, %v8950_v1 }
 0x12e   : > { %v6612_v19 = vpop.f32.mrf.mxu0 }
 0x12f   : > { %v3130_v20 = vadd.f32 %v3129_v15, %v2854_v18  ;;  %v7240_v15 = vld [vmem:[%s7382_s27 + $0x2c0] sm:$0xff]  }
 0x130   : > { %v1511_v21 = vpop.f32.mrf.mxu0  ;;  %6931 = vmatmul.mubr.bf16.gmra.mxu1 %v7240_v15 }
 0x131   : > { %v2570_v23 = vadd.f32 %v2569_v17, %v1511_v21  ;;  %v2855_v24 = vmul.f32 %v1511_v21, %v1511_v21  ;;  %v5631_v25 = vpack.c.bf16 %v1511_v21, %v1508_v16  ;;  %6934 = vmatprep.mubr.msk.bf16.mxu1 %vm7317_vm0, %v8950_v1 }
 0x132   : > { %v6613_v27 = vpop.f32.mrf.mxu0 }
 0x133   : > { %v3131_v28 = vadd.f32 %v3130_v20, %v2855_v24  ;;  %6285 = vst [vmem:[%s7508_s15 + $0x40] sm:$0xff] %v5631_v25   ;;  %v7211_v24 = vld [vmem:[%s7382_s27 + $0x130] sm:$0xff]  }
 0x134   : > { %v1516_v29 = vpop.f32.mrf.mxu0  ;;  %6711 = vmatmul.mubr.bf16.gmra.mxu0 %v7202_v22 }
 0x135   : > { %v2571_v30 = vadd.f32 %v2570_v23, %v1516_v29  ;;  %v2856_v31 = vmul.f32 %v1516_v29, %v1516_v29  ;;  %6714 = vmatprep.mubr.msk.bf16.mxu0 %vm7317_vm0, %v8950_v1 }
 0x136   : > { %v6616_v32 = vpop.f32.mrf.mxu0 }
 0x137   : > { %v3132_v33 = vadd.f32 %v3131_v28, %v2856_v31  ;;  %v7242_v28 = vld [vmem:[%s7382_s27 + $0x2c8] sm:$0xff]  }
 0x138   : > { %v1519_v34 = vpop.f32.mrf.mxu0  ;;  %6935 = vmatmul.mubr.bf16.gmra.mxu1 %v7242_v28 }
 0x139   : > { %v2572_v36 = vadd.f32 %v2571_v30, %v1519_v34  ;;  %v2857_v37 = vmul.f32 %v1519_v34, %v1519_v34  ;;  %v5636_v38 = vpack.c.bf16 %v1519_v34, %v1516_v29  ;;  %6938 = vmatprep.mubr.msk.bf16.mxu1 %vm7317_vm0, %v8950_v1 }
 0x13a   : > { %v6617_v40 = vpop.f32.mrf.mxu0 }
 0x13b   : > { %v3133_v41 = vadd.f32 %v3132_v33, %v2857_v37  ;;  %6286 = vst [vmem:[%s7508_s15 + $0x48] sm:$0xff] %v5636_v38   ;;  %v7213_v37 = vld [vmem:[%s7382_s27 + $0x138] sm:$0xff]  }
 0x13c   : > { %v1524_v42 = vpop.f32.mrf.mxu0  ;;  %6715 = vmatmul.mubr.bf16.gmra.mxu0 %v7203_v35 }
 0x13d   : > { %v2573_v43 = vadd.f32 %v2572_v36, %v1524_v42  ;;  %v2858_v44 = vmul.f32 %v1524_v42, %v1524_v42  ;;  %6718 = vmatprep.mubr.msk.bf16.mxu0 %vm7317_vm0, %v8950_v1 }
 0x13e   : > { %v6620_v45 = vpop.f32.mrf.mxu0 }
 0x13f   : > { %v3134_v46 = vadd.f32 %v3133_v41, %v2858_v44  ;;  %v7244_v41 = vld [vmem:[%s7382_s27 + $0x2d0] sm:$0xff]  }
 0x140   : > { %v1527_v47 = vpop.f32.mrf.mxu0  ;;  %6939 = vmatmul.mubr.bf16.gmra.mxu1 %v7244_v41 }
 0x141   : > { %v2574_v49 = vadd.f32 %v2573_v43, %v1527_v47  ;;  %v2859_v50 = vmul.f32 %v1527_v47, %v1527_v47  ;;  %v5641_v51 = vpack.c.bf16 %v1527_v47, %v1524_v42  ;;  %6942 = vmatprep.mubr.msk.bf16.mxu1 %vm7317_vm0, %v8950_v1 }
 0x142   : > { %v6621_v53 = vpop.f32.mrf.mxu0 }
 0x143   : > { %v3135_v54 = vadd.f32 %v3134_v46, %v2859_v50  ;;  %6287 = vst [vmem:[%s7508_s15 + $0x50] sm:$0xff] %v5641_v51   ;;  %v7215_v50 = vld [vmem:[%s7382_s27 + $0x140] sm:$0xff]  }
 0x144   : > { %v1532_v55 = vpop.f32.mrf.mxu0  ;;  %6719 = vmatmul.mubr.bf16.gmra.mxu0 %v7205_v48 }
 0x145   : > { %v2575_v56 = vadd.f32 %v2574_v49, %v1532_v55  ;;  %v2860_v57 = vmul.f32 %v1532_v55, %v1532_v55  ;;  %6722 = vmatprep.mubr.msk.bf16.mxu0 %vm7317_vm0, %v8950_v1 }
 0x146   : > { %v6624_v58 = vpop.f32.mrf.mxu0 }
 0x147   : > { %v3136_v59 = vadd.f32 %v3135_v54, %v2860_v57  ;;  %v7246_v54 = vld [vmem:[%s7382_s27 + $0x2d8] sm:$0xff]  }
 0x148   : > { %v1535_v60 = vpop.f32.mrf.mxu0  ;;  %6943 = vmatmul.mubr.bf16.gmra.mxu1 %v7246_v54 }
 0x149   : > { %v2576_v62 = vadd.f32 %v2575_v56, %v1535_v60  ;;  %v2861_v63 = vmul.f32 %v1535_v60, %v1535_v60  ;;  %v5646_v0 = vpack.c.bf16 %v1535_v60, %v1532_v55  ;;  %6946 = vmatprep.mubr.msk.bf16.mxu1 %vm7317_vm0, %v8950_v1 }
 0x14a   : > { %v6625_v3 = vpop.f32.mrf.mxu0 }
 0x14b   : > { %v3137_v4 = vadd.f32 %v3136_v59, %v2861_v63  ;;  %6288 = vst [vmem:[%s7508_s15 + $0x58] sm:$0xff] %v5646_v0   ;;  %v7217_v63 = vld [vmem:[%s7382_s27 + $0x148] sm:$0xff]  }
 0x14c   : > { %v1540_v5 = vpop.f32.mrf.mxu0  ;;  %6723 = vmatmul.mubr.bf16.gmra.mxu0 %v7207_v61 }
 0x14d   : > { %v2577_v6 = vadd.f32 %v2576_v62, %v1540_v5  ;;  %v2862_v7 = vmul.f32 %v1540_v5, %v1540_v5  ;;  %6726 = vmatprep.mubr.msk.bf16.mxu0 %vm7317_vm0, %v8950_v1 }
 0x14e   : > { %v6628_v8 = vpop.f32.mrf.mxu0 }
 0x14f   : > { %v3138_v9 = vadd.f32 %v3137_v4, %v2862_v7  ;;  %v7248_v4 = vld [vmem:[%s7382_s27 + $0x2e0] sm:$0xff]  }
 0x150   : > { %v1543_v10 = vpop.f32.mrf.mxu0  ;;  %6947 = vmatmul.mubr.bf16.gmra.mxu1 %v7248_v4 }
 0x151   : > { %v2578_v12 = vadd.f32 %v2577_v6, %v1543_v10  ;;  %v2863_v13 = vmul.f32 %v1543_v10, %v1543_v10  ;;  %v5651_v14 = vpack.c.bf16 %v1543_v10, %v1540_v5  ;;  %6950 = vmatprep.mubr.msk.bf16.mxu1 %vm7317_vm0, %v8950_v1 }
 0x152   : > { %v6629_v16 = vpop.f32.mrf.mxu0 }
 0x153   : > { %v3139_v17 = vadd.f32 %v3138_v9, %v2863_v13  ;;  %6289 = vst [vmem:[%s7508_s15 + $0x60] sm:$0xff] %v5651_v14   ;;  %v7219_v13 = vld [vmem:[%s7382_s27 + $0x150] sm:$0xff]  }
 0x154   : > { %v1548_v18 = vpop.f32.mrf.mxu0  ;;  %6727 = vmatmul.mubr.bf16.gmra.mxu0 %v7209_v11 }
 0x155   : > { %v2579_v19 = vadd.f32 %v2578_v12, %v1548_v18  ;;  %v2864_v20 = vmul.f32 %v1548_v18, %v1548_v18  ;;  %6730 = vmatprep.mubr.msk.bf16.mxu0 %vm7317_vm0, %v8950_v1 }
 0x156   : > { %v6632_v21 = vpop.f32.mrf.mxu0 }
 0x157   : > { %v3140_v22 = vadd.f32 %v3139_v17, %v2864_v20  ;;  %v7250_v17 = vld [vmem:[%s7382_s27 + $0x2e8] sm:$0xff]  }
 0x158   : > { %v1551_v23 = vpop.f32.mrf.mxu0  ;;  %6951 = vmatmul.mubr.bf16.gmra.mxu1 %v7250_v17 }
 0x159   : > { %v2580_v25 = vadd.f32 %v2579_v19, %v1551_v23  ;;  %v2865_v26 = vmul.f32 %v1551_v23, %v1551_v23  ;;  %v5656_v27 = vpack.c.bf16 %v1551_v23, %v1548_v18  ;;  %6954 = vmatprep.mubr.msk.bf16.mxu1 %vm7317_vm0, %v8950_v1 }
 0x15a   : > { %v6633_v29 = vpop.f32.mrf.mxu0 }
 0x15b   : > { %v3141_v30 = vadd.f32 %v3140_v22, %v2865_v26  ;;  %6290 = vst [vmem:[%s7508_s15 + $0x68] sm:$0xff] %v5656_v27   ;;  %v7221_v26 = vld [vmem:[%s7382_s27 + $0x158] sm:$0xff]  }
 0x15c   : > { %v1556_v31 = vpop.f32.mrf.mxu0  ;;  %6731 = vmatmul.mubr.bf16.gmra.mxu0 %v7211_v24 }
 0x15d   : > { %v2581_v32 = vadd.f32 %v2580_v25, %v1556_v31  ;;  %v2866_v33 = vmul.f32 %v1556_v31, %v1556_v31  ;;  %6734 = vmatprep.mubr.msk.bf16.mxu0 %vm7317_vm0, %v8950_v1 }
 0x15e   : > { %v6636_v34 = vpop.f32.mrf.mxu0 }
 0x15f   : > { %v3142_v35 = vadd.f32 %v3141_v30, %v2866_v33  ;;  %v7252_v30 = vld [vmem:[%s7382_s27 + $0x2f0] sm:$0xff]   ;;  %v7639_v33 = vpop.f32.mrf.mxu1 }
 0x160   : > { %v1559_v36 = vpop.f32.mrf.mxu0  ;;  %6955 = vmatmul.mubr.bf16.gmra.mxu1 %v7252_v30 }
 0x161   : > { %v2582_v38 = vadd.f32 %v2581_v32, %v1559_v36  ;;  %v2867_v39 = vmul.f32 %v1559_v36, %v1559_v36  ;;  %v5661_v40 = vpack.c.bf16 %v1559_v36, %v1556_v31  ;;  %6958 = vmatprep.mubr.msk.bf16.mxu1 %vm7317_vm0, %v8950_v1 }
 0x162   : > { %v6637_v42 = vpop.f32.mrf.mxu0 }
 0x163   : > { %v3143_v43 = vadd.f32 %v3142_v35, %v2867_v39  ;;  %6291 = vst [vmem:[%s7508_s15 + $0x70] sm:$0xff] %v5661_v40   ;;  %v7223_v42 = vld [vmem:[%s7382_s27 + $0x160] sm:$0xff]  }
 0x164   : > { %v1564_v44 = vpop.f32.mrf.mxu0  ;;  %6735 = vmatmul.mubr.bf16.gmra.mxu0 %v7213_v37  ;;  %v6860_v37 = vpop.f32.mrf.mxu1 }
 0x165   : > { %v2583_v45 = vadd.f32 %v2582_v38, %v1564_v44  ;;  %v2868_v46 = vmul.f32 %v1564_v44, %v1564_v44  ;;  %6738 = vmatprep.mubr.msk.bf16.mxu0 %vm7317_vm0, %v8950_v1 }
 0x166   : > { %v6640_v47 = vpop.f32.mrf.mxu0  ;;  %v7645_v40 = vpop.f32.mrf.mxu1 }
 0x167   : > { %v3144_v48 = vadd.f32 %v3143_v43, %v2868_v46  ;;  %v5941_v43 = vpack.c.bf16 %v7645_v40, %v7639_v33 }
 0x168   : > { %v1567_v49 = vpop.f32.mrf.mxu0  ;;  %v6861_v47 = vpop.f32.mrf.mxu1 }
 0x169   : > { %v2584_v51 = vadd.f32 %v2583_v45, %v1567_v49  ;;  %v2869_v52 = vmul.f32 %v1567_v49, %v1567_v49  ;;  %v5666_v53 = vpack.c.bf16 %v1567_v49, %v1564_v44  ;;  %6347 = vst [vmem:[%s7508_s15 + $0x230] sm:$0xff] %v5941_v43  }
 0x16a   : > { %v6641_v55 = vpop.f32.mrf.mxu0 }
 0x16b   : > { %v3145_v56 = vadd.f32 %v3144_v48, %v2869_v52  ;;  %6292 = vst [vmem:[%s7508_s15 + $0x78] sm:$0xff] %v5666_v53   ;;  %v7254_v48 = vld [vmem:[%s7382_s27 + $0x2f8] sm:$0xff]  }
 0x16c   : > { %v1572_v57 = vpop.f32.mrf.mxu0  ;;  %6739 = vmatmul.mubr.bf16.gmra.mxu0 %v7215_v50  ;;  %6959 = vmatmul.mubr.bf16.gmra.mxu1 %v7254_v48 }
 0x16d   : > { %v2585_v58 = vadd.f32 %v2584_v51, %v1572_v57  ;;  %v2870_v59 = vmul.f32 %v1572_v57, %v1572_v57  ;;  %6742 = vmatprep.mubr.msk.bf16.mxu0 %vm7317_vm0, %v8950_v1  ;;  %v7653_v51 = vpop.f32.mrf.mxu1  ;;  %6962 = vmatprep.mubr.msk.bf16.mxu1 %vm7317_vm0, %v8950_v1 }
 0x16e   : > { %v6644_v60 = vpop.f32.mrf.mxu0 }
 0x16f   : > { %v3146_v61 = vadd.f32 %v3145_v56, %v2870_v59  ;;  %v6864_v55 = vpop.f32.mrf.mxu1  ;;  %v7225_v60 = vld [vmem:[%s7382_s27 + $0x168] sm:$0xff]  }
 0x170   : > { %v1575_v62 = vpop.f32.mrf.mxu0 }
 0x171   : > { %v2586_v0 = vadd.f32 %v2585_v58, %v1575_v62  ;;  %v2871_v2 = vmul.f32 %v1575_v62, %v1575_v62  ;;  %v5671_v3 = vpack.c.bf16 %v1575_v62, %v1572_v57  ;;  %v7659_v58 = vpop.f32.mrf.mxu1 }
 0x172   : > { %v6645_v5 = vpop.f32.mrf.mxu0 }
 0x173   : > { %v3147_v6 = vadd.f32 %v3146_v61, %v2871_v2  ;;  %6293 = vst [vmem:[%s7508_s15 + $0x80] sm:$0xff] %v5671_v3   ;;  %v5946_v61 = vpack.c.bf16 %v7659_v58, %v7653_v51  ;;  %v6865_v2 = vpop.f32.mrf.mxu1  ;;  %v7256_v3 = vld [vmem:[%s7382_s27 + $0x300] sm:$0xff]  }
 0x174   : > { %v1580_v7 = vpop.f32.mrf.mxu0  ;;  %6743 = vmatmul.mubr.bf16.gmra.mxu0 %v7217_v63  ;;  %6963 = vmatmul.mubr.bf16.gmra.mxu1 %v7256_v3 }
 0x175   : > { %v2587_v8 = vadd.f32 %v2586_v0, %v1580_v7  ;;  %v2872_v9 = vmul.f32 %v1580_v7, %v1580_v7  ;;  %6746 = vmatprep.mubr.msk.bf16.mxu0 %vm7317_vm0, %v8950_v1  ;;  %6348 = vst [vmem:[%s7508_s15 + $0x238] sm:$0xff] %v5946_v61   ;;  %6966 = vmatprep.mubr.msk.bf16.mxu1 %vm7317_vm0, %v8950_v1  ;;  %v7262_v61 = vld [vmem:[%s7382_s27 + $0x318] sm:$0xff]  }
 0x176   : > { %v6648_v10 = vpop.f32.mrf.mxu0 }
 0x177   : > { %v3148_v11 = vadd.f32 %v3147_v6, %v2872_v9  ;;  %v7667_v6 = vpop.f32.mrf.mxu1 }
 0x178   : > { %v1583_v12 = vpop.f32.mrf.mxu0 }
 0x179   : > { %v2588_v14 = vadd.f32 %v2587_v8, %v1583_v12  ;;  %v2873_v15 = vmul.f32 %v1583_v12, %v1583_v12  ;;  %v5676_v16 = vpack.c.bf16 %v1583_v12, %v1580_v7  ;;  %v6868_v10 = vpop.f32.mrf.mxu1 }
 0x17a   : > { %v6649_v18 = vpop.f32.mrf.mxu0 }
 0x17b   : > { %v3149_v19 = vadd.f32 %v3148_v11, %v2873_v15  ;;  %6294 = vst [vmem:[%s7508_s15 + $0x88] sm:$0xff] %v5676_v16   ;;  %v7227_v15 = vld [vmem:[%s7382_s27 + $0x170] sm:$0xff]  }
 0x17c   : > { %v1588_v20 = vpop.f32.mrf.mxu0  ;;  %6747 = vmatmul.mubr.bf16.gmra.mxu0 %v7219_v13  ;;  %v7673_v13 = vpop.f32.mrf.mxu1 }
 0x17d   : > { %v2589_v21 = vadd.f32 %v2588_v14, %v1588_v20  ;;  %v2874_v22 = vmul.f32 %v1588_v20, %v1588_v20  ;;  %6750 = vmatprep.mubr.msk.bf16.mxu0 %vm7317_vm0, %v8950_v1  ;;  %v5951_v16 = vpack.c.bf16 %v7673_v13, %v7667_v6 }
 0x17e   : > { %v6652_v23 = vpop.f32.mrf.mxu0 }
 0x17f   : > { %v3150_v24 = vadd.f32 %v3149_v19, %v2874_v22  ;;  %6349 = vst [vmem:[%s7508_s15 + $0x240] sm:$0xff] %v5951_v16  }
 0x180   : > { %v1591_v25 = vpop.f32.mrf.mxu0 }
 0x181   : > { %v2590_v27 = vadd.f32 %v2589_v21, %v1591_v25  ;;  %v2875_v28 = vmul.f32 %v1591_v25, %v1591_v25  ;;  %v5681_v29 = vpack.c.bf16 %v1591_v25, %v1588_v20  ;;  %v6869_v20 = vpop.f32.mrf.mxu1  ;;  %v7258_v21 = vld [vmem:[%s7382_s27 + $0x308] sm:$0xff]  }
 0x182   : > { %v6653_v31 = vpop.f32.mrf.mxu0  ;;  %6967 = vmatmul.mubr.bf16.gmra.mxu1 %v7258_v21 }
 0x183   : > { %v3151_v32 = vadd.f32 %v3150_v24, %v2875_v28  ;;  %6295 = vst [vmem:[%s7508_s15 + $0x90] sm:$0xff] %v5681_v29   ;;  %v7681_v24 = vpop.f32.mrf.mxu1  ;;  %6970 = vmatprep.mubr.msk.bf16.mxu1 %vm7317_vm0, %v8950_v1 }
 0x184   : > { %v1596_v34 = vpop.f32.mrf.mxu0  ;;  %6751 = vmatmul.mubr.bf16.gmra.mxu0 %v7221_v26 }
 0x185   : > { %v2591_v35 = vadd.f32 %v2590_v27, %v1596_v34  ;;  %v2876_v36 = vmul.f32 %v1596_v34, %v1596_v34  ;;  %6754 = vmatprep.mubr.msk.bf16.mxu0 %vm7317_vm0, %v8950_v1  ;;  %v6872_v28 = vpop.f32.mrf.mxu1 }
 0x186   : > { %v6656_v38 = vpop.f32.mrf.mxu0 }
 0x187   : > { %v3152_v39 = vadd.f32 %v3151_v32, %v2876_v36  ;;  %v7687_v31 = vpop.f32.mrf.mxu1 }
 0x188   : > { %v1599_v41 = vpop.f32.mrf.mxu0 }
 0x189   : > { %v2592_v44 = vadd.f32 %v2591_v35, %v1599_v41  ;;  %v2877_v45 = vmul.f32 %v1599_v41, %v1599_v41  ;;  %v5686_v46 = vpack.c.bf16 %v1599_v41, %v1596_v34  ;;  %v7229_v34 = vld [vmem:[%s7382_s27 + $0x178] sm:$0xff]   ;;  %v5956_v35 = vpack.c.bf16 %v7687_v31, %v7681_v24  ;;  %v7260_v41 = vld [vmem:[%s7382_s27 + $0x310] sm:$0xff]  }
 0x18a   : > { %v6657_v49 = vpop.f32.mrf.mxu0  ;;  %6971 = vmatmul.mubr.bf16.gmra.mxu1 %v7260_v41 }
 0x18b   : > { %v3153_v50 = vadd.f32 %v3152_v39, %v2877_v45  ;;  %6296 = vst [vmem:[%s7508_s15 + $0x98] sm:$0xff] %v5686_v46   ;;  %v6873_v39 = vpop.f32.mrf.mxu1  ;;  %6350 = vst [vmem:[%s7508_s15 + $0x248] sm:$0xff] %v5956_v35   ;;  %6974 = vmatprep.mubr.msk.bf16.mxu1 %vm7317_vm0, %v8950_v1 }
 0x18c   : > { %v1604_v52 = vpop.f32.mrf.mxu0  ;;  %6755 = vmatmul.mubr.bf16.gmra.mxu0 %v7223_v42  ;;  %v7266_v39 = vld [vmem:[%s7382_s27 + $0x328] sm:$0xff]  }
 0x18d   : > { %v2593_v53 = vadd.f32 %v2592_v44, %v1604_v52  ;;  %v2878_v54 = vmul.f32 %v1604_v52, %v1604_v52  ;;  %6758 = vmatprep.mubr.msk.bf16.mxu0 %vm7317_vm0, %v8950_v1  ;;  %v7695_v44 = vpop.f32.mrf.mxu1 }
 0x18e   : > { %v6660_v56 = vpop.f32.mrf.mxu0 }
 0x18f   : > { %v3154_v57 = vadd.f32 %v3153_v50, %v2878_v54  ;;  %v6876_v48 = vpop.f32.mrf.mxu1  ;;  %v7231_v54 = vld [vmem:[%s7382_s27 + $0x180] sm:$0xff]  }
 0x190   : > { %v1607_v59 = vpop.f32.mrf.mxu0 }
 0x191   : > { %v2594_v62 = vadd.f32 %v2593_v53, %v1607_v59  ;;  %v2879_v63 = vmul.f32 %v1607_v59, %v1607_v59  ;;  %v5691_v0 = vpack.c.bf16 %v1607_v59, %v1604_v52  ;;  %v7701_v52 = vpop.f32.mrf.mxu1 }
 0x192   : > { %v6661_v4 = vpop.f32.mrf.mxu0  ;;  %v5961_v55 = vpack.c.bf16 %v7701_v52, %v7695_v44  ;;  %6975 = vmatmul.mubr.bf16.gmra.mxu1 %v7262_v61 }
 0x193   : > { %v3155_v5 = vadd.f32 %v3154_v57, %v2879_v63  ;;  %6297 = vst [vmem:[%s7508_s15 + $0xa0] sm:$0xff] %v5691_v0   ;;  %6978 = vmatprep.mubr.msk.bf16.mxu1 %vm7317_vm0, %v8950_v1 }
 0x194   : > { %v1612_v7 = vpop.f32.mrf.mxu0  ;;  %6759 = vmatmul.mubr.bf16.gmra.mxu0 %v7225_v60  ;;  %v6877_v60 = vpop.f32.mrf.mxu1  ;;  %6351 = vst [vmem:[%s7508_s15 + $0x250] sm:$0xff] %v5961_v55   ;;  %v7237_v55 = vld [vmem:[%s7382_s27 + $0x198] sm:$0xff]  }
 0x195   : > { %v2595_v8 = vadd.f32 %v2594_v62, %v1612_v7  ;;  %v2880_v9 = vmul.f32 %v1612_v7, %v1612_v7  ;;  %6762 = vmatprep.mubr.msk.bf16.mxu0 %vm7317_vm0, %v8950_v1 }
 0x196   : > { %v6664_v11 = vpop.f32.mrf.mxu0  ;;  %v7709_v0 = vpop.f32.mrf.mxu1 }
 0x197   : > { %v3156_v12 = vadd.f32 %v3155_v5, %v2880_v9  ;;  %v7233_v11 = vld [vmem:[%s7382_s27 + $0x188] sm:$0xff]  }
 0x198   : > { %v1615_v14 = vpop.f32.mrf.mxu0  ;;  %v6880_v5 = vpop.f32.mrf.mxu1 }
 0x199   : > { %v2596_v17 = vadd.f32 %v2595_v8, %v1615_v14  ;;  %v2881_v18 = vmul.f32 %v1615_v14, %v1615_v14  ;;  %v5696_v19 = vpack.c.bf16 %v1615_v14, %v1612_v7 }
 0x19a   : > { %v6665_v22 = vpop.f32.mrf.mxu0  ;;  %v7715_v9 = vpop.f32.mrf.mxu1 }
 0x19b   : > { %v3157_v23 = vadd.f32 %v3156_v12, %v2881_v18  ;;  %6298 = vst [vmem:[%s7508_s15 + $0xa8] sm:$0xff] %v5696_v19   ;;  %v5966_v12 = vpack.c.bf16 %v7715_v9, %v7709_v0  ;;  %v7264_v18 = vld [vmem:[%s7382_s27 + $0x320] sm:$0xff]  }
 0x19c   : > { %v1620_v25 = vpop.f32.mrf.mxu0  ;;  %6763 = vmatmul.mubr.bf16.gmra.mxu0 %v7227_v15  ;;  %6979 = vmatmul.mubr.bf16.gmra.mxu1 %v7264_v18 }
 0x19d   : > { %v2597_v26 = vadd.f32 %v2596_v17, %v1620_v25  ;;  %v2882_v27 = vmul.f32 %v1620_v25, %v1620_v25  ;;  %6766 = vmatprep.mubr.msk.bf16.mxu0 %vm7317_vm0, %v8950_v1  ;;  %v6881_v17 = vpop.f32.mrf.mxu1  ;;  %6352 = vst [vmem:[%s7508_s15 + $0x258] sm:$0xff] %v5966_v12   ;;  %6982 = vmatprep.mubr.msk.bf16.mxu1 %vm7317_vm0, %v8950_v1 }
 0x19e   : > { %v6668_v29 = vpop.f32.mrf.mxu0 }
 0x19f   : > { %v3158_v30 = vadd.f32 %v3157_v23, %v2882_v27  ;;  %v7723_v21 = vpop.f32.mrf.mxu1 }
 0x1a0   : > { %v1623_v32 = vpop.f32.mrf.mxu0 }
 0x1a1   : > { %v2598_v36 = vadd.f32 %v2597_v26, %v1623_v32  ;;  %v2883_v37 = vmul.f32 %v1623_v32, %v1623_v32  ;;  %v5701_v38 = vpack.c.bf16 %v1623_v32, %v1620_v25  ;;  %v6884_v26 = vpop.f32.mrf.mxu1  ;;  %v7235_v32 = vld [vmem:[%s7382_s27 + $0x190] sm:$0xff]  }
 0x1a2   : > { %v6669_v42 = vpop.f32.mrf.mxu0 }
 0x1a3   : > { %v3159_v43 = vadd.f32 %v3158_v30, %v2883_v37  ;;  %6299 = vst [vmem:[%s7508_s15 + $0xb0] sm:$0xff] %v5701_v38   ;;  %v7729_v29 = vpop.f32.mrf.mxu1 }
 0x1a4   : > { %v1628_v45 = vpop.f32.mrf.mxu0  ;;  %6767 = vmatmul.mubr.bf16.gmra.mxu0 %v7229_v34  ;;  %v5971_v34 = vpack.c.bf16 %v7729_v29, %v7723_v21  ;;  %6983 = vmatmul.mubr.bf16.gmra.mxu1 %v7266_v39 }
 0x1a5   : > { %v2599_v46 = vadd.f32 %v2598_v36, %v1628_v45  ;;  %v2884_v47 = vmul.f32 %v1628_v45, %v1628_v45  ;;  %6770 = vmatprep.mubr.msk.bf16.mxu0 %vm7317_vm0, %v8950_v1  ;;  %v6885_v38 = vpop.f32.mrf.mxu1  ;;  %6986 = vmatprep.mubr.msk.bf16.mxu1 %vm7317_vm0, %v8950_v1 }
 0x1a6   : > { %v6672_v49 = vpop.f32.mrf.mxu0  ;;  %6353 = vst [vmem:[%s7508_s15 + $0x260] sm:$0xff] %v5971_v34   ;;  %v7241_v38 = vld [vmem:[%s7382_s27 + $0x1a8] sm:$0xff]  }
 0x1a7   : > { %v3160_v50 = vadd.f32 %v3159_v43, %v2884_v47  ;;  %v7737_v43 = vpop.f32.mrf.mxu1 }
 0x1a8   : > { %v1631_v53 = vpop.f32.mrf.mxu0 }
 0x1a9   : > { %v2600_v56 = vadd.f32 %v2599_v46, %v1631_v53  ;;  %v2885_v57 = vmul.f32 %v1631_v53, %v1631_v53  ;;  %v5706_v59 = vpack.c.bf16 %v1631_v53, %v1628_v45  ;;  %v6888_v48 = vpop.f32.mrf.mxu1 }
 0x1aa   : > { %v6673_v62 = vpop.f32.mrf.mxu0 }
 0x1ab   : > { %v3161_v63 = vadd.f32 %v3160_v50, %v2885_v57  ;;  %6300 = vst [vmem:[%s7508_s15 + $0xb8] sm:$0xff] %v5706_v59   ;;  %v7743_v53 = vpop.f32.mrf.mxu1  ;;  %v7268_v62 = vld [vmem:[%s7382_s27 + $0x330] sm:$0xff]  }
 0x1ac   : > { %v1636_v2 = vpop.f32.mrf.mxu0  ;;  %6771 = vmatmul.mubr.bf16.gmra.mxu0 %v7231_v54  ;;  %6987 = vmatmul.mubr.bf16.gmra.mxu1 %v7268_v62 }
 0x1ad   : > { %v2601_v3 = vadd.f32 %v2600_v56, %v1636_v2  ;;  %v2886_v4 = vmul.f32 %v1636_v2, %v1636_v2  ;;  %6774 = vmatprep.mubr.msk.bf16.mxu0 %vm7317_vm0, %v8950_v1  ;;  %v5976_v56 = vpack.c.bf16 %v7743_v53, %v7737_v43  ;;  %v6889_v61 = vpop.f32.mrf.mxu1  ;;  %6990 = vmatprep.mubr.msk.bf16.mxu1 %vm7317_vm0, %v8950_v1 }
 0x1ae   : > { %v6676_v7 = vpop.f32.mrf.mxu0 }
 0x1af   : > { %v3162_v8 = vadd.f32 %v3161_v63, %v2886_v4  ;;  %6354 = vst [vmem:[%s7508_s15 + $0x268] sm:$0xff] %v5976_v56  }
 0x1b0   : > { %v1639_v10 = vpop.f32.mrf.mxu0 }
 0x1b1   : > { %v2602_v14 = vadd.f32 %v2601_v3, %v1639_v10  ;;  %v2887_v15 = vmul.f32 %v1639_v10, %v1639_v10  ;;  %v5711_v16 = vpack.c.bf16 %v1639_v10, %v1636_v2  ;;  %v7751_v3 = vpop.f32.mrf.mxu1 }
 0x1b2   : > { %v6677_v19 = vpop.f32.mrf.mxu0 }
 0x1b3   : > { %v3163_v20 = vadd.f32 %v3162_v8, %v2887_v15  ;;  %6301 = vst [vmem:[%s7508_s15 + $0xc0] sm:$0xff] %v5711_v16   ;;  %v6892_v8 = vpop.f32.mrf.mxu1  ;;  %v7239_v15 = vld [vmem:[%s7382_s27 + $0x1a0] sm:$0xff]  }
 0x1b4   : > { %v1644_v22 = vpop.f32.mrf.mxu0  ;;  %6775 = vmatmul.mubr.bf16.gmra.mxu0 %v7233_v11 }
 0x1b5   : > { %v2603_v23 = vadd.f32 %v2602_v14, %v1644_v22  ;;  %v2888_v25 = vmul.f32 %v1644_v22, %v1644_v22  ;;  %6778 = vmatprep.mubr.msk.bf16.mxu0 %vm7317_vm0, %v8950_v1  ;;  %v7757_v12 = vpop.f32.mrf.mxu1 }
 0x1b6   : > { %v6680_v27 = vpop.f32.mrf.mxu0  ;;  %v5981_v16 = vpack.c.bf16 %v7757_v12, %v7751_v3 }
 0x1b7   : > { %v3164_v28 = vadd.f32 %v3163_v20, %v2888_v25  ;;  %v6893_v20 = vpop.f32.mrf.mxu1 }
 0x1b8   : > { %v1647_v30 = vpop.f32.mrf.mxu0  ;;  %6355 = vst [vmem:[%s7508_s15 + $0x270] sm:$0xff] %v5981_v16  }
 0x1b9   : > { %v2604_v35 = vadd.f32 %v2603_v23, %v1647_v30  ;;  %v2889_v36 = vmul.f32 %v1647_v30, %v1647_v30  ;;  %v5716_v37 = vpack.c.bf16 %v1647_v30, %v1644_v22  ;;  %v7270_v22 = vld [vmem:[%s7382_s27 + $0x338] sm:$0xff]   ;;  %v7765_v26 = vpop.f32.mrf.mxu1 }
 0x1ba   : > { %v6681_v41 = vpop.f32.mrf.mxu0  ;;  %6991 = vmatmul.mubr.bf16.gmra.mxu1 %v7270_v22 }
 0x1bb   : > { %v3165_v42 = vadd.f32 %v3164_v28, %v2889_v36  ;;  %6302 = vst [vmem:[%s7508_s15 + $0xc8] sm:$0xff] %v5716_v37   ;;  %6994 = vmatprep.mubr.msk.bf16.mxu1 %vm7317_vm0, %v8950_v1 }
 0x1bc   : > { %v1652_v45 = vpop.f32.mrf.mxu0  ;;  %6779 = vmatmul.mubr.bf16.gmra.mxu0 %v7235_v32  ;;  %v6896_v32 = vpop.f32.mrf.mxu1 }
 0x1bd   : > { %v2605_v46 = vadd.f32 %v2604_v35, %v1652_v45  ;;  %v2890_v47 = vmul.f32 %v1652_v45, %v1652_v45  ;;  %6782 = vmatprep.mubr.msk.bf16.mxu0 %vm7317_vm0, %v8950_v1 }
 0x1be   : > { %v6684_v49 = vpop.f32.mrf.mxu0  ;;  %v7771_v36 = vpop.f32.mrf.mxu1 }
 0x1bf   : > { %v3166_v50 = vadd.f32 %v3165_v42, %v2890_v47  ;;  %v5986_v39 = vpack.c.bf16 %v7771_v36, %v7765_v26  ;;  %v7272_v47 = vld [vmem:[%s7382_s27 + $0x340] sm:$0xff]  }
 0x1c0   : > { %v1655_v54 = vpop.f32.mrf.mxu0 }
 0x1c1   : > { %v2606_v57 = vadd.f32 %v2605_v46, %v1655_v54  ;;  %v2891_v59 = vmul.f32 %v1655_v54, %v1655_v54  ;;  %v5721_v60 = vpack.c.bf16 %v1655_v54, %v1652_v45  ;;  %v6897_v46 = vpop.f32.mrf.mxu1  ;;  %6356 = vst [vmem:[%s7508_s15 + $0x278] sm:$0xff] %v5986_v39  }
 0x1c2   : > { %v6685_v63 = vpop.f32.mrf.mxu0  ;;  %6995 = vmatmul.mubr.bf16.gmra.mxu1 %v7272_v47 }
 0x1c3   : > { %v3167_v2 = vadd.f32 %v3166_v50, %v2891_v59  ;;  %6303 = vst [vmem:[%s7508_s15 + $0xd0] sm:$0xff] %v5721_v60   ;;  %v7779_v50 = vpop.f32.mrf.mxu1  ;;  %6998 = vmatprep.mubr.msk.bf16.mxu1 %vm7317_vm0, %v8950_v1  ;;  %v7243_v63 = vld [vmem:[%s7382_s27 + $0x1b0] sm:$0xff]  }
 0x1c4   : > { %v1660_v4 = vpop.f32.mrf.mxu0  ;;  %6783 = vmatmul.mubr.bf16.gmra.mxu0 %v7237_v55 }
 0x1c5   : > { %v2607_v5 = vadd.f32 %v2606_v57, %v1660_v4  ;;  %v2892_v7 = vmul.f32 %v1660_v4, %v1660_v4  ;;  %6786 = vmatprep.mubr.msk.bf16.mxu0 %vm7317_vm0, %v8950_v1  ;;  %v6900_v57 = vpop.f32.mrf.mxu1 }
 0x1c6   : > { %v6688_v10 = vpop.f32.mrf.mxu0 }
 0x1c7   : > { %v3168_v11 = vadd.f32 %v3167_v2, %v2892_v7  ;;  %v7785_v61 = vpop.f32.mrf.mxu1  ;;  %v7274_v10 = vld [vmem:[%s7382_s27 + $0x348] sm:$0xff]  }
 0x1c8   : > { %v1663_v14 = vpop.f32.mrf.mxu0  ;;  %v5991_v2 = vpack.c.bf16 %v7785_v61, %v7779_v50 }
 0x1c9   : > { %v2608_v17 = vadd.f32 %v2607_v5, %v1663_v14  ;;  %v2893_v18 = vmul.f32 %v1663_v14, %v1663_v14  ;;  %v5726_v19 = vpack.c.bf16 %v1663_v14, %v1660_v4  ;;  %v6901_v8 = vpop.f32.mrf.mxu1 }
 0x1ca   : > { %v6689_v23 = vpop.f32.mrf.mxu0  ;;  %6357 = vst [vmem:[%s7508_s15 + $0x280] sm:$0xff] %v5991_v2   ;;  %6999 = vmatmul.mubr.bf16.gmra.mxu1 %v7274_v10  ;;  %v7276_v2 = vld [vmem:[%s7382_s27 + $0x358] sm:$0xff]  }
 0x1cb   : > { %v3169_v25 = vadd.f32 %v3168_v11, %v2893_v18  ;;  %6304 = vst [vmem:[%s7508_s15 + $0xd8] sm:$0xff] %v5726_v19   ;;  %7002 = vmatprep.mubr.msk.bf16.mxu1 %vm7317_vm0, %v8950_v1 }
 0x1cc   : > { %v1668_v27 = vpop.f32.mrf.mxu0  ;;  %6787 = vmatmul.mubr.bf16.gmra.mxu0 %v7239_v15  ;;  %v7793_v15 = vpop.f32.mrf.mxu1 }
 0x1cd   : > { %v2609_v28 = vadd.f32 %v2608_v17, %v1668_v27  ;;  %v2894_v30 = vmul.f32 %v1668_v27, %v1668_v27  ;;  %6790 = vmatprep.mubr.msk.bf16.mxu0 %vm7317_vm0, %v8950_v1 }
 0x1ce   : > { %v6692_v34 = vpop.f32.mrf.mxu0  ;;  %v6904_v19 = vpop.f32.mrf.mxu1 }
 0x1cf   : > { %v3170_v35 = vadd.f32 %v3169_v25, %v2894_v30 }
 0x1d0   : > { %v1671_v37 = vpop.f32.mrf.mxu0  ;;  %v7799_v23 = vpop.f32.mrf.mxu1 }
 0x1d1   : > { %v2610_v41 = vadd.f32 %v2609_v28, %v1671_v37  ;;  %v2895_v42 = vmul.f32 %v1671_v37, %v1671_v37  ;;  %v5731_v45 = vpack.c.bf16 %v1671_v37, %v1668_v27  ;;  %v7245_v27 = vld [vmem:[%s7382_s27 + $0x1b8] sm:$0xff]   ;;  %v5996_v28 = vpack.c.bf16 %v7799_v23, %v7793_v15  ;;  %v7275_v37 = vld [vmem:[%s7382_s27 + $0x350] sm:$0xff]  }
 0x1d2   : > { %v6693_v48 = vpop.f32.mrf.mxu0  ;;  %7003 = vmatmul.mubr.bf16.gmra.mxu1 %v7275_v37 }
 0x1d3   : > { %v3171_v49 = vadd.f32 %v3170_v35, %v2895_v42  ;;  %6305 = vst [vmem:[%s7508_s15 + $0xe0] sm:$0xff] %v5731_v45   ;;  %v6905_v35 = vpop.f32.mrf.mxu1  ;;  %6358 = vst [vmem:[%s7508_s15 + $0x288] sm:$0xff] %v5996_v28   ;;  %7006 = vmatprep.mubr.msk.bf16.mxu1 %vm7317_vm0, %v8950_v1 }
 0x1d4   : > { %v1676_v54 = vpop.f32.mrf.mxu0  ;;  %6791 = vmatmul.mubr.bf16.gmra.mxu0 %v7241_v38 }
 0x1d5   : > { %v2611_v55 = vadd.f32 %v2610_v41, %v1676_v54  ;;  %v2896_v56 = vmul.f32 %v1676_v54, %v1676_v54  ;;  %6794 = vmatprep.mubr.msk.bf16.mxu0 %vm7317_vm0, %v8950_v1  ;;  %v7807_v41 = vpop.f32.mrf.mxu1 }
 0x1d6   : > { %v6696_v59 = vpop.f32.mrf.mxu0 }
 0x1d7   : > { %v3172_v60 = vadd.f32 %v3171_v49, %v2896_v56  ;;  %v6908_v47 = vpop.f32.mrf.mxu1  ;;  %v7247_v56 = vld [vmem:[%s7382_s27 + $0x1c0] sm:$0xff]  }
 0x1d8   : > { %v1679_v62 = vpop.f32.mrf.mxu0 }
 0x1d9   : > { %v2612_v4 = vadd.f32 %v2611_v55, %v1679_v62  ;;  %v2897_v5 = vmul.f32 %v1679_v62, %v1679_v62  ;;  %v5736_v7 = vpack.c.bf16 %v1679_v62, %v1676_v54  ;;  %v7813_v54 = vpop.f32.mrf.mxu1 }
 0x1da   : > { %v6697_v11 = vpop.f32.mrf.mxu0  ;;  %v6001_v57 = vpack.c.bf16 %v7813_v54, %v7807_v41  ;;  %7007 = vmatmul.mubr.bf16.gmra.mxu1 %v7276_v2 }
 0x1db   : > { %v3173_v14 = vadd.f32 %v3172_v60, %v2897_v5  ;;  %6306 = vst [vmem:[%s7508_s15 + $0xe8] sm:$0xff] %v5736_v7   ;;  %7010 = vmatprep.mubr.msk.bf16.mxu1 %vm7317_vm0, %v8950_v1 }
 0x1dc   : > { %v1684_v16 = vpop.f32.mrf.mxu0  ;;  %6795 = vmatmul.mubr.bf16.gmra.mxu0 %v7243_v63  ;;  %v6909_v63 = vpop.f32.mrf.mxu1  ;;  %6359 = vst [vmem:[%s7508_s15 + $0x290] sm:$0xff] %v6001_v57  }
 0x1dd   : > { %v2613_v17 = vadd.f32 %v2612_v4, %v1684_v16  ;;  %v2898_v18 = vmul.f32 %v1684_v16, %v1684_v16  ;;  %6798 = vmatprep.mubr.msk.bf16.mxu0 %vm7317_vm0, %v8950_v1  ;;  %v7278_v63 = vld [vmem:[%s7382_s27 + $0x368] sm:$0xff]  }
 0x1de   : > { %v6700_v20 = vpop.f32.mrf.mxu0  ;;  %v7821_v7 = vpop.f32.mrf.mxu1 }
 0x1df   : > { %v3174_v22 = vadd.f32 %v3173_v14, %v2898_v18  ;;  %v7249_v20 = vld [vmem:[%s7382_s27 + $0x1c8] sm:$0xff]  }
 0x1e0   : > { %v1687_v25 = vpop.f32.mrf.mxu0  ;;  %v6912_v14 = vpop.f32.mrf.mxu1 }
 0x1e1   : > { %v2614_v30 = vadd.f32 %v2613_v17, %v1687_v25  ;;  %v2899_v32 = vmul.f32 %v1687_v25, %v1687_v25  ;;  %v5741_v34 = vpack.c.bf16 %v1687_v25, %v1684_v16 }
 0x1e2   : > { %v6701_v38 = vpop.f32.mrf.mxu0  ;;  %v7827_v18 = vpop.f32.mrf.mxu1 }
 0x1e3   : > { %v3175_v39 = vadd.f32 %v3174_v22, %v2899_v32  ;;  %6307 = vst [vmem:[%s7508_s15 + $0xf0] sm:$0xff] %v5741_v34   ;;  %v6006_v22 = vpack.c.bf16 %v7827_v18, %v7821_v7  ;;  %v7277_v32 = vld [vmem:[%s7382_s27 + $0x360] sm:$0xff]  }
 0x1e4   : > { %v1692_v42 = vpop.f32.mrf.mxu0  ;;  %6799 = vmatmul.mubr.bf16.gmra.mxu0 %v7245_v27  ;;  %7011 = vmatmul.mubr.bf16.gmra.mxu1 %v7277_v32 }
 0x1e5   : > { %v2615_v45 = vadd.f32 %v2614_v30, %v1692_v42  ;;  %v2900_v46 = vmul.f32 %v1692_v42, %v1692_v42  ;;  %6802 = vmatprep.mubr.msk.bf16.mxu0 %vm7317_vm0, %v8950_v1  ;;  %v6913_v30 = vpop.f32.mrf.mxu1  ;;  %6360 = vst [vmem:[%s7508_s15 + $0x298] sm:$0xff] %v6006_v22   ;;  %7014 = vmatprep.mubr.msk.bf16.mxu1 %vm7317_vm0, %v8950_v1  ;;  %v7253_v22 = vld [vmem:[%s7382_s27 + $0x1d8] sm:$0xff]  }
 0x1e6   : > { %v6704_v48 = vpop.f32.mrf.mxu0 }
 0x1e7   : > { %v3176_v49 = vadd.f32 %v3175_v39, %v2900_v46  ;;  %v7835_v37 = vpop.f32.mrf.mxu1 }
 0x1e8   : > { %v1695_v55 = vpop.f32.mrf.mxu0 }
 0x1e9   : > { %v2616_v59 = vadd.f32 %v2615_v45, %v1695_v55  ;;  %v2901_v60 = vmul.f32 %v1695_v55, %v1695_v55  ;;  %v5746_v62 = vpack.c.bf16 %v1695_v55, %v1692_v42  ;;  %v6916_v45 = vpop.f32.mrf.mxu1  ;;  %v7251_v55 = vld [vmem:[%s7382_s27 + $0x1d0] sm:$0xff]  }
 0x1ea   : > { %v6705_v4 = vpop.f32.mrf.mxu0 }
 0x1eb   : > { %v3177_v5 = vadd.f32 %v3176_v49, %v2901_v60  ;;  %6308 = vst [vmem:[%s7508_s15 + $0xf8] sm:$0xff] %v5746_v62   ;;  %v7841_v48 = vpop.f32.mrf.mxu1 }
 0x1ec   : > { %v1700_v8 = vpop.f32.mrf.mxu0  ;;  %6803 = vmatmul.mubr.bf16.gmra.mxu0 %v7247_v56  ;;  %v6011_v56 = vpack.c.bf16 %v7841_v48, %v7835_v37  ;;  %7015 = vmatmul.mubr.bf16.gmra.mxu1 %v7278_v63 }
 0x1ed   : > { %v2617_v10 = vadd.f32 %v2616_v59, %v1700_v8  ;;  %v2902_v11 = vmul.f32 %v1700_v8, %v1700_v8  ;;  %6806 = vmatprep.mubr.msk.bf16.mxu0 %vm7317_vm0, %v8950_v1  ;;  %v6917_v62 = vpop.f32.mrf.mxu1  ;;  %7018 = vmatprep.mubr.msk.bf16.mxu1 %vm7317_vm0, %v8950_v1 }
 0x1ee   : > { %v6708_v16 = vpop.f32.mrf.mxu0  ;;  %6361 = vst [vmem:[%s7508_s15 + $0x2a0] sm:$0xff] %v6011_v56  }
 0x1ef   : > { %v3178_v17 = vadd.f32 %v3177_v5, %v2902_v11  ;;  %v7849_v5 = vpop.f32.mrf.mxu1 }
 0x1f0   : > { %v1703_v19 = vpop.f32.mrf.mxu0 }
 0x1f1   : > { %v2618_v25 = vadd.f32 %v2617_v10, %v1703_v19  ;;  %v2903_v27 = vmul.f32 %v1703_v19, %v1703_v19  ;;  %v5751_v28 = vpack.c.bf16 %v1703_v19, %v1700_v8  ;;  %v6920_v14 = vpop.f32.mrf.mxu1 }
 0x1f2   : > { %v6709_v34 = vpop.f32.mrf.mxu0 }
 0x1f3   : > { %v3179_v35 = vadd.f32 %v3178_v17, %v2903_v27  ;;  %6309 = vst [vmem:[%s7508_s15 + $0x100] sm:$0xff] %v5751_v28   ;;  %v7855_v19 = vpop.f32.mrf.mxu1  ;;  %v7279_v34 = vld [vmem:[%s7382_s27 + $0x370] sm:$0xff]  }
 0x1f4   : > { %v1708_v38 = vpop.f32.mrf.mxu0  ;;  %6807 = vmatmul.mubr.bf16.gmra.mxu0 %v7249_v20  ;;  %7019 = vmatmul.mubr.bf16.gmra.mxu1 %v7279_v34 }
 0x1f5   : > { %v2619_v39 = vadd.f32 %v2618_v25, %v1708_v38  ;;  %v2904_v42 = vmul.f32 %v1708_v38, %v1708_v38  ;;  %6810 = vmatprep.mubr.msk.bf16.mxu0 %vm7317_vm0, %v8950_v1  ;;  %v6016_v25 = vpack.c.bf16 %v7855_v19, %v7849_v5  ;;  %v6921_v32 = vpop.f32.mrf.mxu1  ;;  %7022 = vmatprep.mubr.msk.bf16.mxu1 %vm7317_vm0, %v8950_v1 }
 0x1f6   : > { %v6712_v46 = vpop.f32.mrf.mxu0  ;;  %v7257_v32 = vld [vmem:[%s7382_s27 + $0x1e8] sm:$0xff]  }
 0x1f7   : > { %v3180_v47 = vadd.f32 %v3179_v35, %v2904_v42  ;;  %6362 = vst [vmem:[%s7508_s15 + $0x2a8] sm:$0xff] %v6016_v25  }
 0x1f8   : > { %v1711_v49 = vpop.f32.mrf.mxu0 }
 0x1f9   : > { %v2620_v57 = vadd.f32 %v2619_v39, %v1711_v49  ;;  %v2905_v59 = vmul.f32 %v1711_v49, %v1711_v49  ;;  %v5756_v60 = vpack.c.bf16 %v1711_v49, %v1708_v38  ;;  %v7863_v39 = vpop.f32.mrf.mxu1 }
 0x1fa   : > { %v6713_v2 = vpop.f32.mrf.mxu0 }
 0x1fb   : > { %v3181_v4 = vadd.f32 %v3180_v47, %v2905_v59  ;;  %6310 = vst [vmem:[%s7508_s15 + $0x108] sm:$0xff] %v5756_v60   ;;  %v6924_v47 = vpop.f32.mrf.mxu1  ;;  %v7255_v59 = vld [vmem:[%s7382_s27 + $0x1e0] sm:$0xff]  }
 0x1fc   : > { %v1716_v8 = vpop.f32.mrf.mxu0  ;;  %6811 = vmatmul.mubr.bf16.gmra.mxu0 %v7251_v55 }
 0x1fd   : > { %v2621_v10 = vadd.f32 %v2620_v57, %v1716_v8  ;;  %v2906_v11 = vmul.f32 %v1716_v8, %v1716_v8  ;;  %6814 = vmatprep.mubr.msk.bf16.mxu0 %vm7317_vm0, %v8950_v1  ;;  %v7869_v56 = vpop.f32.mrf.mxu1 }
 0x1fe   : > { %v6716_v16 = vpop.f32.mrf.mxu0  ;;  %9070 = vst [vmem:[#allocation2_spill] sm:$0xff] %v7869_v56  ;;  %v6021_v60 = vpack.c.bf16 %v7869_v56, %v7863_v39 }
 0x1ff   : > { %v3182_v17 = vadd.f32 %v3181_v4, %v2906_v11  ;;  %v6925_v4 = vpop.f32.mrf.mxu1 }
 0x200   : > { %v1719_v20 = vpop.f32.mrf.mxu0  ;;  %6363 = vst [vmem:[%s7508_s15 + $0x2b0] sm:$0xff] %v6021_v60  }
 0x201   : > { %v2622_v27 = vadd.f32 %v2621_v10, %v1719_v20  ;;  %v2907_v28 = vmul.f32 %v1719_v20, %v1719_v20  ;;  %v5761_v30 = vpack.c.bf16 %v1719_v20, %v1716_v8  ;;  %v7280_v8 = vld [vmem:[%s7382_s27 + $0x378] sm:$0xff]   ;;  %v7877_v14 = vpop.f32.mrf.mxu1 }
 0x202   : > { %v6717_v35 = vpop.f32.mrf.mxu0  ;;  %9071 = vst [vmem:[#allocation3_spill] sm:$0xff] %v7877_v14  ;;  %7023 = vmatmul.mubr.bf16.gmra.mxu1 %v7280_v8 }
 0x203   : > { %v3183_v38 = vadd.f32 %v3182_v17, %v2907_v28  ;;  %6311 = vst [vmem:[%s7508_s15 + $0x110] sm:$0xff] %v5761_v30   ;;  %7026 = vmatprep.mubr.msk.bf16.mxu1 %vm7317_vm0, %v8950_v1 }
 0x204   : > { %v1724_v42 = vpop.f32.mrf.mxu0  ;;  %6815 = vmatmul.mubr.bf16.gmra.mxu0 %v7253_v22  ;;  %v6928_v22 = vpop.f32.mrf.mxu1 }
 0x205   : > { %v2623_v45 = vadd.f32 %v2622_v27, %v1724_v42  ;;  %v2908_v46 = vmul.f32 %v1724_v42, %v1724_v42  ;;  %6818 = vmatprep.mubr.msk.bf16.mxu0 %vm7317_vm0, %v8950_v1 }
 0x206   : > { %v6720_v49 = vpop.f32.mrf.mxu0  ;;  %v7883_v28 = vpop.f32.mrf.mxu1 }
 0x207   : > { %v3184_v55 = vadd.f32 %v3183_v38, %v2908_v46  ;;  %9072 = vst [vmem:[#allocation4_spill] sm:$0xff] %v7883_v28  ;;  %v6026_v34 = vpack.c.bf16 %v7883_v28, %v7877_v14  ;;  %v7281_v46 = vld [vmem:[%s7382_s27 + $0x380] sm:$0xff]  }
 0x208   : > { %v1727_v57 = vpop.f32.mrf.mxu0 }
 0x209   : > { %v2624_v62 = vadd.f32 %v2623_v45, %v1727_v57  ;;  %v2909_v63 = vmul.f32 %v1727_v57, %v1727_v57  ;;  %v5766_v2 = vpack.c.bf16 %v1727_v57, %v1724_v42  ;;  %v6929_v45 = vpop.f32.mrf.mxu1  ;;  %6364 = vst [vmem:[%s7508_s15 + $0x2b8] sm:$0xff] %v6026_v34  }
 0x20a   : > { %v6721_v10 = vpop.f32.mrf.mxu0  ;;  %7027 = vmatmul.mubr.bf16.gmra.mxu1 %v7281_v46 }
 0x20b   : > { %v3185_v11 = vadd.f32 %v3184_v55, %v2909_v63  ;;  %6312 = vst [vmem:[%s7508_s15 + $0x118] sm:$0xff] %v5766_v2   ;;  %v7891_v55 = vpop.f32.mrf.mxu1  ;;  %7030 = vmatprep.mubr.msk.bf16.mxu1 %vm7317_vm0, %v8950_v1  ;;  %v7259_v10 = vld [vmem:[%s7382_s27 + $0x1f0] sm:$0xff]  }
 0x20c   : > { %v1732_v16 = vpop.f32.mrf.mxu0  ;;  %6819 = vmatmul.mubr.bf16.gmra.mxu0 %v7255_v59  ;;  %9073 = vst [vmem:[#allocation5_spill] sm:$0xff] %v7891_v55 }
 0x20d   : > { %v2625_v17 = vadd.f32 %v2624_v62, %v1732_v16  ;;  %v2910_v20 = vmul.f32 %v1732_v16, %v1732_v16  ;;  %6822 = vmatprep.mubr.msk.bf16.mxu0 %vm7317_vm0, %v8950_v1  ;;  %v6932_v62 = vpop.f32.mrf.mxu1 }
 0x20e   : > { %v6724_v25 = vpop.f32.mrf.mxu0 }
 0x20f   : > { %v3186_v27 = vadd.f32 %v3185_v11, %v2910_v20  ;;  %v7897_v4 = vpop.f32.mrf.mxu1  ;;  %v7282_v25 = vld [vmem:[%s7382_s27 + $0x388] sm:$0xff]  }
 0x210   : > { %v1735_v30 = vpop.f32.mrf.mxu0  ;;  %9074 = vst [vmem:[#allocation6_spill] sm:$0xff] %v7897_v4  ;;  %v6031_v11 = vpack.c.bf16 %v7897_v4, %v7891_v55 }
 0x211   : > { %v2626_v35 = vadd.f32 %v2625_v17, %v1735_v30  ;;  %v2911_v38 = vmul.f32 %v1735_v30, %v1735_v30  ;;  %v5771_v42 = vpack.c.bf16 %v1735_v30, %v1732_v16  ;;  %v6933_v22 = vpop.f32.mrf.mxu1 }
 0x212   : > { %v6725_v47 = vpop.f32.mrf.mxu0  ;;  %6365 = vst [vmem:[%s7508_s15 + $0x2c0] sm:$0xff] %v6031_v11   ;;  %7031 = vmatmul.mubr.bf16.gmra.mxu1 %v7282_v25 }
 0x213   : > { %v3187_v49 = vadd.f32 %v3186_v27, %v2911_v38  ;;  %6313 = vst [vmem:[%s7508_s15 + $0x120] sm:$0xff] %v5771_v42   ;;  %7034 = vmatprep.mubr.msk.bf16.mxu1 %vm7317_vm0, %v8950_v1 }
 0x214   : > { %v1740_v57 = vpop.f32.mrf.mxu0  ;;  %6823 = vmatmul.mubr.bf16.gmra.mxu0 %v7257_v32  ;;  %v7905_v32 = vpop.f32.mrf.mxu1 }
 0x215   : > { %v2627_v59 = vadd.f32 %v2626_v35, %v1740_v57  ;;  %v2912_v60 = vmul.f32 %v1740_v57, %v1740_v57  ;;  %6826 = vmatprep.mubr.msk.bf16.mxu0 %vm7317_vm0, %v8950_v1  ;;  %9075 = vst [vmem:[#allocation7_spill] sm:$0xff] %v7905_v32 }
 0x216   : > { %v6728_v63 = vpop.f32.mrf.mxu0  ;;  %v6936_v42 = vpop.f32.mrf.mxu1 }
 0x217   : > { %v3188_v2 = vadd.f32 %v3187_v49, %v2912_v60 }
 0x218   : > { %v1743_v8 = vpop.f32.mrf.mxu0  ;;  %v7911_v47 = vpop.f32.mrf.mxu1 }
 0x219   : > { %v2628_v16 = vadd.f32 %v2627_v59, %v1743_v8  ;;  %v2913_v17 = vmul.f32 %v1743_v8, %v1743_v8  ;;  %v5776_v20 = vpack.c.bf16 %v1743_v8, %v1740_v57  ;;  %9076 = vst [vmem:[#allocation8_spill] sm:$0xff] %v7911_v47  ;;  %v7261_v57 = vld [vmem:[%s7382_s27 + $0x1f8] sm:$0xff]   ;;  %v6036_v59 = vpack.c.bf16 %v7911_v47, %v7905_v32  ;;  %v7283_v8 = vld [vmem:[%s7382_s27 + $0x390] sm:$0xff]  }
 0x21a   : > { %v6729_v27 = vpop.f32.mrf.mxu0  ;;  %7035 = vmatmul.mubr.bf16.gmra.mxu1 %v7283_v8 }
 0x21b   : > { %v3189_v30 = vadd.f32 %v3188_v2, %v2913_v17  ;;  %6314 = vst [vmem:[%s7508_s15 + $0x128] sm:$0xff] %v5776_v20   ;;  %v6937_v2 = vpop.f32.mrf.mxu1  ;;  %6366 = vst [vmem:[%s7508_s15 + $0x2c8] sm:$0xff] %v6036_v59   ;;  %7038 = vmatprep.mubr.msk.bf16.mxu1 %vm7317_vm0, %v8950_v1  ;;  %v7284_v59 = vld [vmem:[%s7382_s27 + $0x398] sm:$0xff]  }
 0x21c   : > { %v1748_v34 = vpop.f32.mrf.mxu0  ;;  %6827 = vmatmul.mubr.bf16.gmra.mxu0 %v7259_v10 }
 0x21d   : > { %v2629_v35 = vadd.f32 %v2628_v16, %v1748_v34  ;;  %v2914_v38 = vmul.f32 %v1748_v34, %v1748_v34  ;;  %6830 = vmatprep.mubr.msk.bf16.mxu0 %vm7317_vm0, %v8950_v1  ;;  %v7919_v16 = vpop.f32.mrf.mxu1 }
 0x21e   : > { %v6732_v45 = vpop.f32.mrf.mxu0  ;;  %9077 = vst [vmem:[#allocation9_spill] sm:$0xff] %v7919_v16 }
 0x21f   : > { %v3190_v46 = vadd.f32 %v3189_v30, %v2914_v38  ;;  %v6940_v25 = vpop.f32.mrf.mxu1  ;;  %v7263_v38 = vld [vmem:[%s7382_s27 + $0x200] sm:$0xff]  }
 0x220   : > { %v1751_v49 = vpop.f32.mrf.mxu0 }
 0x221   : > { %v2630_v60 = vadd.f32 %v2629_v35, %v1751_v49  ;;  %v2915_v62 = vmul.f32 %v1751_v49, %v1751_v49  ;;  %v5781_v63 = vpack.c.bf16 %v1751_v49, %v1748_v34  ;;  %v7925_v34 = vpop.f32.mrf.mxu1 }
 0x222   : > { %v6733_v10 = vpop.f32.mrf.mxu0  ;;  %9078 = vst [vmem:[#allocation10_spill] sm:$0xff] %v7925_v34  ;;  %v6041_v42 = vpack.c.bf16 %v7925_v34, %v7919_v16  ;;  %7039 = vmatmul.mubr.bf16.gmra.mxu1 %v7284_v59 }
 0x223   : > { %v3191_v11 = vadd.f32 %v3190_v46, %v2915_v62  ;;  %6315 = vst [vmem:[%s7508_s15 + $0x130] sm:$0xff] %v5781_v63   ;;  %7042 = vmatprep.mubr.msk.bf16.mxu1 %vm7317_vm0, %v8950_v1 }
 0x224   : > { %v1756_v17 = vpop.f32.mrf.mxu0  ;;  %6831 = vmatmul.mubr.bf16.gmra.mxu0 %v7261_v57  ;;  %v6941_v57 = vpop.f32.mrf.mxu1  ;;  %6367 = vst [vmem:[%s7508_s15 + $0x2d0] sm:$0xff] %v6041_v42  }
 0x225   : > { %v2631_v20 = vadd.f32 %v2630_v60, %v1756_v17  ;;  %v2916_v22 = vmul.f32 %v1756_v17, %v1756_v17  ;;  %6834 = vmatprep.mubr.msk.bf16.mxu0 %vm7317_vm0, %v8950_v1 }
 0x226   : > { %v6736_v27 = vpop.f32.mrf.mxu0  ;;  %v7933_v63 = vpop.f32.mrf.mxu1 }
 0x227   : > { %v3192_v30 = vadd.f32 %v3191_v11, %v2916_v22  ;;  %9079 = vst [vmem:[#allocation11_spill] sm:$0xff] %v7933_v63  ;;  %v7265_v27 = vld [vmem:[%s7382_s27 + $0x208] sm:$0xff]  }
 0x228   : > { %v1759_v35 = vpop.f32.mrf.mxu0  ;;  %v6944_v11 = vpop.f32.mrf.mxu1 }
 0x229   : > { %v2632_v45 = vadd.f32 %v2631_v20, %v1759_v35  ;;  %v2917_v46 = vmul.f32 %v1759_v35, %v1759_v35  ;;  %v5786_v49 = vpack.c.bf16 %v1759_v35, %v1756_v17 }
 0x22a   : > { %v6737_v60 = vpop.f32.mrf.mxu0  ;;  %v7939_v22 = vpop.f32.mrf.mxu1 }
 0x22b   : > { %v3193_v62 = vadd.f32 %v3192_v30, %v2917_v46  ;;  %6316 = vst [vmem:[%s7508_s15 + $0x138] sm:$0xff] %v5786_v49   ;;  %9080 = vst [vmem:[#allocation12_spill] sm:$0xff] %v7939_v22  ;;  %v6046_v30 = vpack.c.bf16 %v7939_v22, %v7933_v63  ;;  %v7285_v46 = vld [vmem:[%s7382_s27 + $0x3a0] sm:$0xff]  }
 0x22c   : > { %v1764_v2 = vpop.f32.mrf.mxu0  ;;  %6835 = vmatmul.mubr.bf16.gmra.mxu0 %v7263_v38  ;;  %7043 = vmatmul.mubr.bf16.gmra.mxu1 %v7285_v46 }
 0x22d   : > { %v2633_v8 = vadd.f32 %v2632_v45, %v1764_v2  ;;  %v2918_v10 = vmul.f32 %v1764_v2, %v1764_v2  ;;  %6838 = vmatprep.mubr.msk.bf16.mxu0 %vm7317_vm0, %v8950_v1  ;;  %v6945_v45 = vpop.f32.mrf.mxu1  ;;  %6368 = vst [vmem:[%s7508_s15 + $0x2d8] sm:$0xff] %v6046_v30   ;;  %7046 = vmatprep.mubr.msk.bf16.mxu1 %vm7317_vm0, %v8950_v1 }
 0x22e   : > { %v6740_v17 = vpop.f32.mrf.mxu0  ;;  %v7286_v45 = vld [vmem:[%s7382_s27 + $0x3a8] sm:$0xff]  }
 0x22f   : > { %v3194_v20 = vadd.f32 %v3193_v62, %v2918_v10  ;;  %v7947_v59 = vpop.f32.mrf.mxu1 }
 0x230   : > { %v1767_v25 = vpop.f32.mrf.mxu0  ;;  %9081 = vst [vmem:[#allocation13_spill] sm:$0xff] %v7947_v59 }
 0x231   : > { %v2634_v35 = vadd.f32 %v2633_v8, %v1767_v25  ;;  %v2919_v38 = vmul.f32 %v1767_v25, %v1767_v25  ;;  %v5791_v42 = vpack.c.bf16 %v1767_v25, %v1764_v2  ;;  %v6948_v2 = vpop.f32.mrf.mxu1  ;;  %v7267_v25 = vld [vmem:[%s7382_s27 + $0x210] sm:$0xff]  }
 0x232   : > { %v6741_v49 = vpop.f32.mrf.mxu0 }
 0x233   : > { %v3195_v57 = vadd.f32 %v3194_v20, %v2919_v38  ;;  %6317 = vst [vmem:[%s7508_s15 + $0x140] sm:$0xff] %v5791_v42   ;;  %v7953_v17 = vpop.f32.mrf.mxu1 }
 0x234   : > { %v1772_v60 = vpop.f32.mrf.mxu0  ;;  %6839 = vmatmul.mubr.bf16.gmra.mxu0 %v7265_v27  ;;  %9082 = vst [vmem:[#allocation14_spill] sm:$0xff] %v7953_v17  ;;  %v6051_v27 = vpack.c.bf16 %v7953_v17, %v7947_v59  ;;  %7047 = vmatmul.mubr.bf16.gmra.mxu1 %v7286_v45 }
 0x235   : > { %v2635_v62 = vadd.f32 %v2634_v35, %v1772_v60  ;;  %v2920_v8 = vmul.f32 %v1772_v60, %v1772_v60  ;;  %6842 = vmatprep.mubr.msk.bf16.mxu0 %vm7317_vm0, %v8950_v1  ;;  %v6949_v35 = vpop.f32.mrf.mxu1  ;;  %7050 = vmatprep.mubr.msk.bf16.mxu1 %vm7317_vm0, %v8950_v1 }
 0x236   : > { %v6744_v10 = vpop.f32.mrf.mxu0  ;;  %6369 = vst [vmem:[%s7508_s15 + $0x2e0] sm:$0xff] %v6051_v27  }
 0x237   : > { %v3196_v11 = vadd.f32 %v3195_v57, %v2920_v8  ;;  %v7961_v2 = vpop.f32.mrf.mxu1 }
 0x238   : > { %v1775_v20 = vpop.f32.mrf.mxu0  ;;  %9083 = vst [vmem:[#allocation15_spill] sm:$0xff] %v7961_v2 }
 0x239   : > { %v2636_v30 = vadd.f32 %v2635_v62, %v1775_v20  ;;  %v2921_v38 = vmul.f32 %v1775_v20, %v1775_v20  ;;  %v5796_v42 = vpack.c.bf16 %v1775_v20, %v1772_v60  ;;  %v6952_v60 = vpop.f32.mrf.mxu1 }
 0x23a   : > { %v6745_v46 = vpop.f32.mrf.mxu0 }
 0x23b   : > { %v3197_v49 = vadd.f32 %v3196_v11, %v2921_v38  ;;  %6318 = vst [vmem:[%s7508_s15 + $0x148] sm:$0xff] %v5796_v42   ;;  %v7967_v20 = vpop.f32.mrf.mxu1  ;;  %v7269_v38 = vld [vmem:[%s7382_s27 + $0x218] sm:$0xff]   ;;  %v7287_v46 = vld [vmem:[%s7382_s27 + $0x3b0] sm:$0xff]  }
 0x23c   : > { %v1780_v57 = vpop.f32.mrf.mxu0  ;;  %6843 = vmatmul.mubr.bf16.gmra.mxu0 %v7267_v25  ;;  %9084 = vst [vmem:[#allocation16_spill] sm:$0xff] %v7967_v20  ;;  %v6056_v25 = vpack.c.bf16 %v7967_v20, %v7961_v2  ;;  %7051 = vmatmul.mubr.bf16.gmra.mxu1 %v7287_v46  ;;  %v7288_v20 = vld [vmem:[%s7382_s27 + $0x3b8] sm:$0xff]  }
 0x23d   : > { %v2637_v8 = vadd.f32 %v2636_v30, %v1780_v57  ;;  %v2922_v62 = vmul.f32 %v1780_v57, %v1780_v57  ;;  %6846 = vmatprep.mubr.msk.bf16.mxu0 %vm7317_vm0, %v8950_v1  ;;  %v6953_v30 = vpop.f32.mrf.mxu1 }
 0x23e   : > { %v6748_v10 = vpop.f32.mrf.mxu0  ;;  %6370 = vst [vmem:[%s7508_s15 + $0x2e8] sm:$0xff] %v6056_v25  }
 0x23f   : > { %v3198_v11 = vadd.f32 %v3197_v49, %v2922_v62  ;;  %v7975_v60 = vpop.f32.mrf.mxu1  ;;  %v9086_v62 = vmov 0.0  }
 0x240   : > { %v1783_v27 = vpop.f32.mrf.mxu0  ;;  %9085 = vst [vmem:[#allocation17_spill] sm:$0xff] %v7975_v60  ;;  %7054 = vmatprep.mubr.msk.bf16.mxu1 %vm7317_vm0, %v9086_v62 }
 0x241   : > { %v2638_v42 = vadd.f32 %v2637_v8, %v1783_v27  ;;  %v2923_v35 = vmul.f32 %v1783_v27, %v1783_v27  ;;  %v5801_v45 = vpack.c.bf16 %v1783_v27, %v1780_v57 }
 0x242   : > { %v6749_v17 = vpop.f32.mrf.mxu0 }
 0x243   : > { %v3199_v1 = vadd.f32 %v3198_v11, %v2923_v35  ;;  %6319 = vst [vmem:[%s7508_s15 + $0x150] sm:$0xff] %v5801_v45   ;;  %v6956_v17 = vpop.f32.mrf.mxu1  ;;  %v7271_v35 = vld [vmem:[%s7382_s27 + $0x220] sm:$0xff]  }
 0x244   : > { %v1788_v49 = vpop.f32.mrf.mxu0  ;;  %6847 = vmatmul.mubr.bf16.gmra.mxu0 %v7269_v38  ;;  %7055 = vmatmul.mubr.bf16.gmra.mxu1 %v7288_v20  ;;  %v7273_v20 = vld [vmem:[%s7382_s27 + $0x228] sm:$0xff]  }
 0x245   : > { %v2639_v10 = vadd.f32 %v2638_v42, %v1788_v49  ;;  %v2924_v8 = vmul.f32 %v1788_v49, %v1788_v49  ;;  %6850 = vmatprep.mubr.msk.bf16.mxu0 %vm7317_vm0, %v9086_v62  ;;  %v7981_v27 = vpop.f32.mrf.mxu1  ;;  %7058 = vmatprep.mubr.msk.bf16.mxu1 %vm7317_vm0, %v9086_v62 }
 0x246   : > { %v6752_v57 = vpop.f32.mrf.mxu0  ;;  %9087 = vst [vmem:[#allocation18_spill] sm:$0xff] %v7981_v27  ;;  %v6061_v38 = vpack.c.bf16 %v7981_v27, %v7975_v60 }
 0x247   : > { %v3200_v11 = vadd.f32 %v3199_v1, %v2924_v8  ;;  %v6957_v42 = vpop.f32.mrf.mxu1 }
 0x248   : > { %v1791_v25 = vpop.f32.mrf.mxu0  ;;  %6371 = vst [vmem:[%s7508_s15 + $0x2f0] sm:$0xff] %v6061_v38   ;;  %v7289_v42 = vld [vmem:[%s7382_s27 + $0x3c0] sm:$0xff]  }
 0x249   : > { %v2640_v45 = vadd.f32 %v2639_v10, %v1791_v25  ;;  %v2925_v30 = vmul.f32 %v1791_v25, %v1791_v25  ;;  %v5806_v46 = vpack.c.bf16 %v1791_v25, %v1788_v49  ;;  %v7989_v17 = vpop.f32.mrf.mxu1 }
 0x24a   : > { %v6753_v2 = vpop.f32.mrf.mxu0  ;;  %9088 = vst [vmem:[#allocation19_spill] sm:$0xff] %v7989_v17 }
 0x24b   : > { %v3201_v59 = vadd.f32 %v3200_v11, %v2925_v30  ;;  %6320 = vst [vmem:[%s7508_s15 + $0x158] sm:$0xff] %v5806_v46   ;;  %v6960_v2 = vpop.f32.mrf.mxu1 }
 0x24c   : > { %v1796_v1 = vpop.f32.mrf.mxu0  ;;  %6851 = vmatmul.mubr.bf16.gmra.mxu0 %v7271_v35  ;;  %7059 = vmatmul.mubr.bf16.gmra.mxu1 %v7289_v42 }
 0x24d   : > { %v2641_v8 = vadd.f32 %v2640_v45, %v1796_v1  ;;  %v2926_v10 = vmul.f32 %v1796_v1, %v1796_v1  ;;  %6854 = vmatprep.mubr.msk.bf16.mxu0 %vm7317_vm0, %v9086_v62  ;;  %v7995_v11 = vpop.f32.mrf.mxu1  ;;  %7062 = vmatprep.mubr.msk.bf16.mxu1 %vm7317_vm0, %v9086_v62 }
 0x24e   : > { %v6756_v49 = vpop.f32.mrf.mxu0  ;;  %9089 = vst [vmem:[#allocation20_spill] sm:$0xff] %v7995_v11  ;;  %v6066_v35 = vpack.c.bf16 %v7995_v11, %v7989_v17 }
 0x24f   : > { %v3202_v57 = vadd.f32 %v3201_v59, %v2926_v10  ;;  %v6961_v45 = vpop.f32.mrf.mxu1 }
 0x250   : > { %v1799_v25 = vpop.f32.mrf.mxu0  ;;  %6372 = vst [vmem:[%s7508_s15 + $0x2f8] sm:$0xff] %v6066_v35   ;;  %v7290_v45 = vld [vmem:[%s7382_s27 + $0x3c8] sm:$0xff]  }
 0x251   : > { %v2642_v38 = vadd.f32 %v2641_v8, %v1799_v25  ;;  %v2927_v30 = vmul.f32 %v1799_v25, %v1799_v25  ;;  %v5811_v46 = vpack.c.bf16 %v1799_v25, %v1796_v1  ;;  %v8003_v22 = vpop.f32.mrf.mxu1 }
 0x252   : > { %v6757_v27 = vpop.f32.mrf.mxu0  ;;  %9090 = vst [vmem:[#allocation21_spill] sm:$0xff] %v8003_v22 }
 0x253   : > { %v3203_v60 = vadd.f32 %v3202_v57, %v2927_v30  ;;  %6321 = vst [vmem:[%s7508_s15 + $0x160] sm:$0xff] %v5811_v46   ;;  %v6964_v1 = vpop.f32.mrf.mxu1 }
 0x254   : > { %v1804_v59 = vpop.f32.mrf.mxu0  ;;  %6855 = vmatmul.mubr.bf16.gmra.mxu0 %v7273_v20  ;;  %7063 = vmatmul.mubr.bf16.gmra.mxu1 %v7290_v45 }
 0x255   : > { %v2643_v10 = vadd.f32 %v2642_v38, %v1804_v59  ;;  %v2928_v8 = vmul.f32 %v1804_v59, %v1804_v59  ;;  %v8007_v27 = vpop.f32.mrf.mxu1  ;;  %7066 = vmatprep.mubr.msk.bf16.mxu1 %vm7317_vm0, %v9086_v62 }
 0x256   : > { %v6760_v2 = vpop.f32.mrf.mxu0  ;;  %9091 = vst [vmem:[#allocation22_spill] sm:$0xff] %v8007_v27  ;;  %v6071_v25 = vpack.c.bf16 %v8007_v27, %v8003_v22 }
 0x257   : > { %v3204_v49 = vadd.f32 %v3203_v60, %v2928_v8  ;;  %v6965_v20 = vpop.f32.mrf.mxu1 }
 0x258   : > { %v1807_v57 = vpop.f32.mrf.mxu0  ;;  %6373 = vst [vmem:[%s7508_s15 + $0x300] sm:$0xff] %v6071_v25  }
 0x259   : > { %v2644_v35 = vadd.f32 %v2643_v10, %v1807_v57  ;;  %v2929_v30 = vmul.f32 %v1807_v57, %v1807_v57  ;;  %v5816_v46 = vpack.c.bf16 %v1807_v57, %v1804_v59  ;;  %v8014_v38 = vpop.f32.mrf.mxu1 }
 0x25a   : > { %v6761_v42 = vpop.f32.mrf.mxu0  ;;  %9092 = vst [vmem:[#allocation23_spill] sm:$0xff] %v8014_v38 }
 0x25b   : > { %v3205_v11 = vadd.f32 %v3204_v49, %v2929_v30  ;;  %6322 = vst [vmem:[%s7508_s15 + $0x168] sm:$0xff] %v5816_v46   ;;  %v6968_v1 = vpop.f32.mrf.mxu1  ;;  %v7291_v42 = vld [vmem:[%s7382_s27 + $0x3d0] sm:$0xff]  }
 0x25c   : > { %v1812_v60 = vpop.f32.mrf.mxu0  ;;  %7067 = vmatmul.mubr.bf16.gmra.mxu1 %v7291_v42  ;;  %v7292_v42 = vld [vmem:[%s7382_s27 + $0x3d8] sm:$0xff]  }
 0x25d   : > { %v2645_v8 = vadd.f32 %v2644_v35, %v1812_v60  ;;  %v2930_v10 = vmul.f32 %v1812_v60, %v1812_v60  ;;  %v8018_v57 = vpop.f32.mrf.mxu1  ;;  %7070 = vmatprep.mubr.msk.bf16.mxu1 %vm7317_vm0, %v9086_v62 }
 0x25e   : > { %v6764_v59 = vpop.f32.mrf.mxu0  ;;  %9093 = vst [vmem:[#allocation24_spill] sm:$0xff] %v8018_v57  ;;  %v6076_v49 = vpack.c.bf16 %v8018_v57, %v8014_v38 }
 0x25f   : > { %v3206_v2 = vadd.f32 %v3205_v11, %v2930_v10  ;;  %v6969_v45 = vpop.f32.mrf.mxu1 }
 0x260   : > { %v1815_v25 = vpop.f32.mrf.mxu0  ;;  %6374 = vst [vmem:[%s7508_s15 + $0x308] sm:$0xff] %v6076_v49  }
 0x261   : > { %v2646_v30 = vadd.f32 %v2645_v8, %v1815_v25  ;;  %v2931_v46 = vmul.f32 %v1815_v25, %v1815_v25  ;;  %v5821_v20 = vpack.c.bf16 %v1815_v25, %v1812_v60  ;;  %v8025_v35 = vpop.f32.mrf.mxu1 }
 0x262   : > { %v6765_v27 = vpop.f32.mrf.mxu0  ;;  %9094 = vst [vmem:[#allocation25_spill] sm:$0xff] %v8025_v35 }
 0x263   : > { %v3207_v22 = vadd.f32 %v3206_v2, %v2931_v46  ;;  %6323 = vst [vmem:[%s7508_s15 + $0x170] sm:$0xff] %v5821_v20   ;;  %v6972_v1 = vpop.f32.mrf.mxu1 }
 0x264   : > { %v1820_v11 = vpop.f32.mrf.mxu0  ;;  %7071 = vmatmul.mubr.bf16.gmra.mxu1 %v7292_v42  ;;  %v7293_v42 = vld [vmem:[%s7382_s27 + $0x3e0] sm:$0xff]  }
 0x265   : > { %v2647_v10 = vadd.f32 %v2646_v30, %v1820_v11  ;;  %v2932_v8 = vmul.f32 %v1820_v11, %v1820_v11  ;;  %v8029_v25 = vpop.f32.mrf.mxu1  ;;  %7074 = vmatprep.mubr.msk.bf16.mxu1 %vm7317_vm0, %v9086_v62 }
 0x266   : > { %v6768_v60 = vpop.f32.mrf.mxu0  ;;  %9095 = vst [vmem:[#allocation26_spill] sm:$0xff] %v8029_v25  ;;  %v6081_v2 = vpack.c.bf16 %v8029_v25, %v8025_v35 }
 0x267   : > { %v3208_v59 = vadd.f32 %v3207_v22, %v2932_v8  ;;  %v6973_v45 = vpop.f32.mrf.mxu1 }
 0x268   : > { %v1823_v27 = vpop.f32.mrf.mxu0  ;;  %6375 = vst [vmem:[%s7508_s15 + $0x310] sm:$0xff] %v6081_v2  }
 0x269   : > { %v2648_v49 = vadd.f32 %v2647_v10, %v1823_v27  ;;  %v2933_v46 = vmul.f32 %v1823_v27, %v1823_v27  ;;  %v5826_v20 = vpack.c.bf16 %v1823_v27, %v1820_v11  ;;  %v8036_v30 = vpop.f32.mrf.mxu1 }
 0x26a   : > { %v6769_v57 = vpop.f32.mrf.mxu0  ;;  %9096 = vst [vmem:[#allocation27_spill] sm:$0xff] %v8036_v30 }
 0x26b   : > { %v3209_v38 = vadd.f32 %v3208_v59, %v2933_v46  ;;  %6324 = vst [vmem:[%s7508_s15 + $0x178] sm:$0xff] %v5826_v20   ;;  %v6976_v1 = vpop.f32.mrf.mxu1 }
 0x26c   : > { %v1828_v22 = vpop.f32.mrf.mxu0  ;;  %7075 = vmatmul.mubr.bf16.gmra.mxu1 %v7293_v42  ;;  %v7294_v42 = vld [vmem:[%s7382_s27 + $0x3e8] sm:$0xff]  }
 0x26d   : > { %v2649_v8 = vadd.f32 %v2648_v49, %v1828_v22  ;;  %v2934_v10 = vmul.f32 %v1828_v22, %v1828_v22  ;;  %v8040_v27 = vpop.f32.mrf.mxu1  ;;  %7078 = vmatprep.mubr.msk.bf16.mxu1 %vm7317_vm0, %v9086_v62 }
 0x26e   : > { %v6772_v11 = vpop.f32.mrf.mxu0  ;;  %9097 = vst [vmem:[#allocation28_spill] sm:$0xff] %v8040_v27  ;;  %v6086_v59 = vpack.c.bf16 %v8040_v27, %v8036_v30 }
 0x26f   : > { %v3210_v60 = vadd.f32 %v3209_v38, %v2934_v10  ;;  %v6977_v45 = vpop.f32.mrf.mxu1 }
 0x270   : > { %v1831_v57 = vpop.f32.mrf.mxu0  ;;  %6376 = vst [vmem:[%s7508_s15 + $0x318] sm:$0xff] %v6086_v59  }
 0x271   : > { %v2650_v2 = vadd.f32 %v2649_v8, %v1831_v57  ;;  %v2935_v46 = vmul.f32 %v1831_v57, %v1831_v57  ;;  %v5831_v20 = vpack.c.bf16 %v1831_v57, %v1828_v22  ;;  %v8047_v49 = vpop.f32.mrf.mxu1 }
 0x272   : > { %v6773_v25 = vpop.f32.mrf.mxu0  ;;  %9098 = vst [vmem:[#allocation29_spill] sm:$0xff] %v8047_v49 }
 0x273   : > { %v3211_v35 = vadd.f32 %v3210_v60, %v2935_v46  ;;  %6325 = vst [vmem:[%s7508_s15 + $0x180] sm:$0xff] %v5831_v20   ;;  %v6980_v1 = vpop.f32.mrf.mxu1 }
 0x274   : > { %v1836_v38 = vpop.f32.mrf.mxu0  ;;  %7079 = vmatmul.mubr.bf16.gmra.mxu1 %v7294_v42  ;;  %v7295_v42 = vld [vmem:[%s7382_s27 + $0x3f0] sm:$0xff]  }
 0x275   : > { %v2651_v10 = vadd.f32 %v2650_v2, %v1836_v38  ;;  %v2936_v8 = vmul.f32 %v1836_v38, %v1836_v38  ;;  %v8051_v57 = vpop.f32.mrf.mxu1  ;;  %7082 = vmatprep.mubr.msk.bf16.mxu1 %vm7317_vm0, %v9086_v62 }
 0x276   : > { %v6776_v22 = vpop.f32.mrf.mxu0  ;;  %9099 = vst [vmem:[#allocation30_spill] sm:$0xff] %v8051_v57  ;;  %v6091_v60 = vpack.c.bf16 %v8051_v57, %v8047_v49 }
 0x277   : > { %v3212_v11 = vadd.f32 %v3211_v35, %v2936_v8  ;;  %v6981_v45 = vpop.f32.mrf.mxu1 }
 0x278   : > { %v1839_v25 = vpop.f32.mrf.mxu0  ;;  %6377 = vst [vmem:[%s7508_s15 + $0x320] sm:$0xff] %v6091_v60  }
 0x279   : > { %v2652_v59 = vadd.f32 %v2651_v10, %v1839_v25  ;;  %v2937_v46 = vmul.f32 %v1839_v25, %v1839_v25  ;;  %v5836_v20 = vpack.c.bf16 %v1839_v25, %v1836_v38  ;;  %v8058_v2 = vpop.f32.mrf.mxu1 }
 0x27a   : > { %v6777_v27 = vpop.f32.mrf.mxu0  ;;  %9100 = vst [vmem:[#allocation31_spill] sm:$0xff] %v8058_v2 }
 0x27b   : > { %v3213_v30 = vadd.f32 %v3212_v11, %v2937_v46  ;;  %6326 = vst [vmem:[%s7508_s15 + $0x188] sm:$0xff] %v5836_v20   ;;  %v6984_v1 = vpop.f32.mrf.mxu1 }
 0x27c   : > { %v1844_v35 = vpop.f32.mrf.mxu0  ;;  %7083 = vmatmul.mubr.bf16.gmra.mxu1 %v7295_v42  ;;  %v7296_v42 = vld [vmem:[%s7382_s27 + $0x3f8] sm:$0xff]  }
 0x27d   : > { %v2653_v8 = vadd.f32 %v2652_v59, %v1844_v35  ;;  %v2938_v10 = vmul.f32 %v1844_v35, %v1844_v35  ;;  %v8062_v25 = vpop.f32.mrf.mxu1  ;;  %7086 = vmatprep.mubr.msk.bf16.mxu1 %vm7317_vm0, %v9086_v62 }
 0x27e   : > { %v6780_v38 = vpop.f32.mrf.mxu0  ;;  %9101 = vst [vmem:[#allocation32_spill] sm:$0xff] %v8062_v25  ;;  %v6096_v11 = vpack.c.bf16 %v8062_v25, %v8058_v2 }
 0x27f   : > { %v3214_v22 = vadd.f32 %v3213_v30, %v2938_v10  ;;  %v6985_v45 = vpop.f32.mrf.mxu1 }
 0x280   : > { %v1847_v27 = vpop.f32.mrf.mxu0  ;;  %6378 = vst [vmem:[%s7508_s15 + $0x328] sm:$0xff] %v6096_v11  }
 0x281   : > { %v2654_v60 = vadd.f32 %v2653_v8, %v1847_v27  ;;  %v2939_v46 = vmul.f32 %v1847_v27, %v1847_v27  ;;  %v5841_v20 = vpack.c.bf16 %v1847_v27, %v1844_v35  ;;  %v8069_v59 = vpop.f32.mrf.mxu1 }
 0x282   : > { %v6781_v57 = vpop.f32.mrf.mxu0  ;;  %9102 = vst [vmem:[#allocation33_spill] sm:$0xff] %v8069_v59 }
 0x283   : > { %v3215_v49 = vadd.f32 %v3214_v22, %v2939_v46  ;;  %6327 = vst [vmem:[%s7508_s15 + $0x190] sm:$0xff] %v5841_v20   ;;  %v6988_v1 = vpop.f32.mrf.mxu1 }
 0x284   : > { %v1852_v30 = vpop.f32.mrf.mxu0  ;;  %7087 = vmatmul.mubr.bf16.gmra.mxu1 %v7296_v42  ;;  %v7297_v42 = vld [vmem:[%s7382_s27 + $0x400] sm:$0xff]  }
 0x285   : > { %v2655_v10 = vadd.f32 %v2654_v60, %v1852_v30  ;;  %v2940_v8 = vmul.f32 %v1852_v30, %v1852_v30  ;;  %v8073_v27 = vpop.f32.mrf.mxu1  ;;  %7090 = vmatprep.mubr.msk.bf16.mxu1 %vm7317_vm0, %v9086_v62 }
 0x286   : > { %v6784_v35 = vpop.f32.mrf.mxu0  ;;  %9103 = vst [vmem:[#allocation34_spill] sm:$0xff] %v8073_v27  ;;  %v6101_v22 = vpack.c.bf16 %v8073_v27, %v8069_v59 }
 0x287   : > { %v3216_v38 = vadd.f32 %v3215_v49, %v2940_v8  ;;  %v6989_v45 = vpop.f32.mrf.mxu1 }
 0x288   : > { %v1855_v57 = vpop.f32.mrf.mxu0  ;;  %6379 = vst [vmem:[%s7508_s15 + $0x330] sm:$0xff] %v6101_v22  }
 0x289   : > { %v2656_v11 = vadd.f32 %v2655_v10, %v1855_v57  ;;  %v2941_v46 = vmul.f32 %v1855_v57, %v1855_v57  ;;  %v5846_v20 = vpack.c.bf16 %v1855_v57, %v1852_v30  ;;  %v8080_v60 = vpop.f32.mrf.mxu1 }
 0x28a   : > { %v6785_v25 = vpop.f32.mrf.mxu0  ;;  %9104 = vst [vmem:[#allocation35_spill] sm:$0xff] %v8080_v60 }
 0x28b   : > { %v3217_v2 = vadd.f32 %v3216_v38, %v2941_v46  ;;  %6328 = vst [vmem:[%s7508_s15 + $0x198] sm:$0xff] %v5846_v20   ;;  %v6992_v1 = vpop.f32.mrf.mxu1 }
 0x28c   : > { %v1860_v49 = vpop.f32.mrf.mxu0  ;;  %7091 = vmatmul.mubr.bf16.gmra.mxu1 %v7297_v42  ;;  %v7298_v42 = vld [vmem:[%s7382_s27 + $0x408] sm:$0xff]  }
 0x28d   : > { %v2657_v8 = vadd.f32 %v2656_v11, %v1860_v49  ;;  %v2942_v10 = vmul.f32 %v1860_v49, %v1860_v49  ;;  %v8084_v57 = vpop.f32.mrf.mxu1  ;;  %7094 = vmatprep.mubr.msk.bf16.mxu1 %vm7317_vm0, %v9086_v62 }
 0x28e   : > { %v6788_v30 = vpop.f32.mrf.mxu0  ;;  %9105 = vst [vmem:[#allocation36_spill] sm:$0xff] %v8084_v57  ;;  %v6106_v38 = vpack.c.bf16 %v8084_v57, %v8080_v60 }
 0x28f   : > { %v3218_v35 = vadd.f32 %v3217_v2, %v2942_v10  ;;  %v6993_v45 = vpop.f32.mrf.mxu1 }
 0x290   : > { %v1863_v25 = vpop.f32.mrf.mxu0  ;;  %6380 = vst [vmem:[%s7508_s15 + $0x338] sm:$0xff] %v6106_v38  }
 0x291   : > { %v2658_v22 = vadd.f32 %v2657_v8, %v1863_v25  ;;  %v2943_v46 = vmul.f32 %v1863_v25, %v1863_v25  ;;  %v5851_v20 = vpack.c.bf16 %v1863_v25, %v1860_v49  ;;  %v8091_v11 = vpop.f32.mrf.mxu1 }
 0x292   : > { %v6789_v27 = vpop.f32.mrf.mxu0  ;;  %9106 = vst [vmem:[#allocation37_spill] sm:$0xff] %v8091_v11 }
 0x293   : > { %v3219_v59 = vadd.f32 %v3218_v35, %v2943_v46  ;;  %6329 = vst [vmem:[%s7508_s15 + $0x1a0] sm:$0xff] %v5851_v20   ;;  %v6996_v1 = vpop.f32.mrf.mxu1 }
 0x294   : > { %v1868_v2 = vpop.f32.mrf.mxu0  ;;  %7095 = vmatmul.mubr.bf16.gmra.mxu1 %v7298_v42 }
 0x295   : > { %v2659_v10 = vadd.f32 %v2658_v22, %v1868_v2  ;;  %v2944_v8 = vmul.f32 %v1868_v2, %v1868_v2  ;;  %v8095_v25 = vpop.f32.mrf.mxu1  ;;  %7098 = vmatprep.mubr.msk.bf16.mxu1 %vm7317_vm0, %v9086_v62 }
 0x296   : > { %v6792_v49 = vpop.f32.mrf.mxu0  ;;  %9107 = vst [vmem:[#allocation38_spill] sm:$0xff] %v8095_v25  ;;  %v6111_v35 = vpack.c.bf16 %v8095_v25, %v8091_v11 }
 0x297   : > { %v3220_v30 = vadd.f32 %v3219_v59, %v2944_v8  ;;  %v6997_v45 = vpop.f32.mrf.mxu1 }
 0x298   : > { %v1871_v27 = vpop.f32.mrf.mxu0  ;;  %6381 = vst [vmem:[%s7508_s15 + $0x340] sm:$0xff] %v6111_v35   ;;  %v7299_v35 = vld [vmem:[%s7382_s27 + $0x410] sm:$0xff]  }
 0x299   : > { %v2660_v38 = vadd.f32 %v2659_v10, %v1871_v27  ;;  %v2945_v46 = vmul.f32 %v1871_v27, %v1871_v27  ;;  %v5856_v20 = vpack.c.bf16 %v1871_v27, %v1868_v2  ;;  %v8104_v1 = vpop.f32.mrf.mxu1 }
 0x29a   : > { %v6793_v57 = vpop.f32.mrf.mxu0  ;;  %9108 = vst [vmem:[#allocation39_spill] sm:$0xff] %v8104_v1 }
 0x29b   : > { %v8101_v22 = vadd.f32 %v3220_v30, %v2945_v46  ;;  %6330 = vst [vmem:[%s7508_s15 + $0x1a8] sm:$0xff] %v5856_v20   ;;  %v7000_v10 = vpop.f32.mrf.mxu1 }
 0x29c   : > { %v8106_v59 = vpop.f32.mrf.mxu0  ;;  %7099 = vmatmul.mubr.bf16.gmra.mxu1 %v7299_v35 }
 0x29d   : > { %v8111_v2 = vadd.f32 %v2660_v38, %v8106_v59  ;;  %v8113_v57 = vpop.f32.mrf.mxu1  ;;  %7102 = vmatprep.mubr.msk.bf16.mxu1 %vm7317_vm0, %v9086_v62 }
 0x29e   : > { %v6796_v8 = vpop.f32.mrf.mxu0  ;;  %9109 = vst [vmem:[#allocation40_spill] sm:$0xff] %v8113_v57  ;;  %v6116_v20 = vpack.c.bf16 %v8113_v57, %v8104_v1  ;;  %v7300_v57 = vld [vmem:[%s7382_s27 + $0x418] sm:$0xff]  }
 0x29f   : > { %v7001_v27 = vpop.f32.mrf.mxu1 }
 0x2a0   : > { %v8115_v49 = vpop.f32.mrf.mxu0  ;;  %6382 = vst [vmem:[%s7508_s15 + $0x348] sm:$0xff] %v6116_v20  }
 0x2a1   : > { %v5861_v30 = vpack.c.bf16 %v8115_v49, %v8106_v59  ;;  %v8123_v38 = vpop.f32.mrf.mxu1 }
 0x2a2   : > { %v6797_v46 = vpop.f32.mrf.mxu0  ;;  %9110 = vst [vmem:[#allocation41_spill] sm:$0xff] %v8123_v38 }
 0x2a3   : > { %6331 = vst [vmem:[%s7508_s15 + $0x1b0] sm:$0xff] %v5861_v30   ;;  %v7004_v42 = vpop.f32.mrf.mxu1 }
 0x2a4   : > { %v8125_v45 = vpop.f32.mrf.mxu0  ;;  %7103 = vmatmul.mubr.bf16.gmra.mxu1 %v7300_v57 }
 0x2a5   : > { %v8130_v8 = vpop.f32.mrf.mxu1  ;;  %7106 = vmatprep.mubr.msk.bf16.mxu1 %vm7317_vm0, %v9086_v62 }
 0x2a6   : > { %v6800_v10 = vpop.f32.mrf.mxu0  ;;  %9111 = vst [vmem:[#allocation42_spill] sm:$0xff] %v8130_v8  ;;  %v6121_v1 = vpack.c.bf16 %v8130_v8, %v8123_v38  ;;  %v7301_v38 = vld [vmem:[%s7382_s27 + $0x420] sm:$0xff]  }
 0x2a7   : > { %v7005_v30 = vpop.f32.mrf.mxu1 }
 0x2a8   : > { %v8132_v27 = vpop.f32.mrf.mxu0  ;;  %6383 = vst [vmem:[%s7508_s15 + $0x350] sm:$0xff] %v6121_v1  }
 0x2a9   : > { %v5866_v46 = vpack.c.bf16 %v8132_v27, %v8125_v45  ;;  %v8140_v20 = vpop.f32.mrf.mxu1 }
 0x2aa   : > { %v6801_v35 = vpop.f32.mrf.mxu0  ;;  %9112 = vst [vmem:[#allocation43_spill] sm:$0xff] %v8140_v20 }
 0x2ab   : > { %6332 = vst [vmem:[%s7508_s15 + $0x1b8] sm:$0xff] %v5866_v46   ;;  %v7008_v10 = vpop.f32.mrf.mxu1 }
 0x2ac   : > { %v8142_v42 = vpop.f32.mrf.mxu0  ;;  %7107 = vmatmul.mubr.bf16.gmra.mxu1 %v7301_v38 }
 0x2ad   : > { %v8147_v25 = vpop.f32.mrf.mxu1  ;;  %7110 = vmatprep.mubr.msk.bf16.mxu1 %vm7317_vm0, %v9086_v62 }
 0x2ae   : > { %v6804_v30 = vpop.f32.mrf.mxu0  ;;  %9113 = vst [vmem:[#allocation44_spill] sm:$0xff] %v8147_v25  ;;  %v6126_v11 = vpack.c.bf16 %v8147_v25, %v8140_v20  ;;  %v7302_v20 = vld [vmem:[%s7382_s27 + $0x428] sm:$0xff]  }
 0x2af   : > { %v7009_v46 = vpop.f32.mrf.mxu1 }
 0x2b0   : > { %v8149_v35 = vpop.f32.mrf.mxu0  ;;  %6384 = vst [vmem:[%s7508_s15 + $0x358] sm:$0xff] %v6126_v11  }
 0x2b1   : > { %v5871_v8 = vpack.c.bf16 %v8149_v35, %v8142_v42  ;;  %v8157_v1 = vpop.f32.mrf.mxu1 }
 0x2b2   : > { %v6805_v57 = vpop.f32.mrf.mxu0  ;;  %9114 = vst [vmem:[#allocation45_spill] sm:$0xff] %v8157_v1 }
 0x2b3   : > { %6333 = vst [vmem:[%s7508_s15 + $0x1c0] sm:$0xff] %v5871_v8   ;;  %v7012_v30 = vpop.f32.mrf.mxu1 }
 0x2b4   : > { %v8159_v10 = vpop.f32.mrf.mxu0  ;;  %7111 = vmatmul.mubr.bf16.gmra.mxu1 %v7302_v20 }
 0x2b5   : > { %v8164_v60 = vpop.f32.mrf.mxu1  ;;  %7114 = vmatprep.mubr.msk.bf16.mxu1 %vm7317_vm0, %v9086_v62 }
 0x2b6   : > { %v6808_v46 = vpop.f32.mrf.mxu0  ;;  %9115 = vst [vmem:[#allocation46_spill] sm:$0xff] %v8164_v60  ;;  %v6131_v17 = vpack.c.bf16 %v8164_v60, %v8157_v1  ;;  %v7303_v1 = vld [vmem:[%s7382_s27 + $0x430] sm:$0xff]  }
 0x2b7   : > { %v7013_v8 = vpop.f32.mrf.mxu1 }
 0x2b8   : > { %v8166_v57 = vpop.f32.mrf.mxu0  ;;  %6385 = vst [vmem:[%s7508_s15 + $0x360] sm:$0xff] %v6131_v17  }
 0x2b9   : > { %v5876_v25 = vpack.c.bf16 %v8166_v57, %v8159_v10  ;;  %v8174_v11 = vpop.f32.mrf.mxu1 }
 0x2ba   : > { %v6809_v38 = vpop.f32.mrf.mxu0  ;;  %9116 = vst [vmem:[#allocation47_spill] sm:$0xff] %v8174_v11 }
 0x2bb   : > { %6334 = vst [vmem:[%s7508_s15 + $0x1c8] sm:$0xff] %v5876_v25   ;;  %v7016_v46 = vpop.f32.mrf.mxu1 }
 0x2bc   : > { %v8176_v30 = vpop.f32.mrf.mxu0  ;;  %7115 = vmatmul.mubr.bf16.gmra.mxu1 %v7303_v1 }
 0x2bd   : > { %v8181_v63 = vpop.f32.mrf.mxu1  ;;  %7118 = vmatprep.mubr.msk.bf16.mxu1 %vm7317_vm0, %v9086_v62 }
 0x2be   : > { %v6812_v8 = vpop.f32.mrf.mxu0  ;;  %9117 = vst [vmem:[#allocation48_spill] sm:$0xff] %v8181_v63  ;;  %v6136_v34 = vpack.c.bf16 %v8181_v63, %v8174_v11  ;;  %v7304_v11 = vld [vmem:[%s7382_s27 + $0x438] sm:$0xff]  }
 0x2bf   : > { %v7017_v25 = vpop.f32.mrf.mxu1 }
 0x2c0   : > { %v8183_v38 = vpop.f32.mrf.mxu0  ;;  %6386 = vst [vmem:[%s7508_s15 + $0x368] sm:$0xff] %v6136_v34  }
 0x2c1   : > { %v5881_v60 = vpack.c.bf16 %v8183_v38, %v8176_v30  ;;  %v8191_v17 = vpop.f32.mrf.mxu1 }
 0x2c2   : > { %v6813_v20 = vpop.f32.mrf.mxu0  ;;  %9118 = vst [vmem:[#allocation49_spill] sm:$0xff] %v8191_v17 }
 0x2c3   : > { %6335 = vst [vmem:[%s7508_s15 + $0x1d0] sm:$0xff] %v5881_v60   ;;  %v7020_v8 = vpop.f32.mrf.mxu1 }
 0x2c4   : > { %v8193_v46 = vpop.f32.mrf.mxu0  ;;  %7119 = vmatmul.mubr.bf16.gmra.mxu1 %v7304_v11 }
 0x2c5   : > { %v8198_v16 = vpop.f32.mrf.mxu1  ;;  %7122 = vmatprep.mubr.msk.bf16.mxu1 %vm7317_vm0, %v9086_v62 }
 0x2c6   : > { %v6816_v25 = vpop.f32.mrf.mxu0  ;;  %9119 = vst [vmem:[#allocation50_spill] sm:$0xff] %v8198_v16  ;;  %v6141_v47 = vpack.c.bf16 %v8198_v16, %v8191_v17  ;;  %v7305_v17 = vld [vmem:[%s7382_s27 + $0x440] sm:$0xff]  }
 0x2c7   : > { %v7021_v60 = vpop.f32.mrf.mxu1 }
 0x2c8   : > { %v8200_v20 = vpop.f32.mrf.mxu0  ;;  %6387 = vst [vmem:[%s7508_s15 + $0x370] sm:$0xff] %v6141_v47  }
 0x2c9   : > { %v5886_v63 = vpack.c.bf16 %v8200_v20, %v8193_v46  ;;  %v8208_v34 = vpop.f32.mrf.mxu1 }
 0x2ca   : > { %v6817_v1 = vpop.f32.mrf.mxu0  ;;  %9120 = vst [vmem:[#allocation51_spill] sm:$0xff] %v8208_v34 }
 0x2cb   : > { %6336 = vst [vmem:[%s7508_s15 + $0x1d8] sm:$0xff] %v5886_v63   ;;  %v7024_v25 = vpop.f32.mrf.mxu1 }
 0x2cc   : > { %v8210_v8 = vpop.f32.mrf.mxu0  ;;  %7123 = vmatmul.mubr.bf16.gmra.mxu1 %v7305_v17 }
 0x2cd   : > { %v8215_v32 = vpop.f32.mrf.mxu1  ;;  %7126 = vmatprep.mubr.msk.bf16.mxu1 %vm7317_vm0, %v9086_v62 }
 0x2ce   : > { %v6820_v60 = vpop.f32.mrf.mxu0  ;;  %9121 = vst [vmem:[#allocation52_spill] sm:$0xff] %v8215_v32  ;;  %v6146_v4 = vpack.c.bf16 %v8215_v32, %v8208_v34  ;;  %v7306_v34 = vld [vmem:[%s7382_s27 + $0x448] sm:$0xff]  }
 0x2cf   : > { %v7025_v63 = vpop.f32.mrf.mxu1 }
 0x2d0   : > { %v8217_v1 = vpop.f32.mrf.mxu0  ;;  %6388 = vst [vmem:[%s7508_s15 + $0x378] sm:$0xff] %v6146_v4  }
 0x2d1   : > { %v5891_v16 = vpack.c.bf16 %v8217_v1, %v8210_v8  ;;  %v8225_v47 = vpop.f32.mrf.mxu1 }
 0x2d2   : > { %v6821_v11 = vpop.f32.mrf.mxu0  ;;  %9122 = vst [vmem:[#allocation53_spill] sm:$0xff] %v8225_v47 }
 0x2d3   : > { %6337 = vst [vmem:[%s7508_s15 + $0x1e0] sm:$0xff] %v5891_v16   ;;  %v7028_v60 = vpop.f32.mrf.mxu1  ;;  %v2946_v16 = vmul.f32 %v8106_v59, %v8106_v59 }
 0x2d4   : > { %v8227_v25 = vpop.f32.mrf.mxu0  ;;  %v2947_v60 = vmul.f32 %v8115_v49, %v8115_v49  ;;  %7127 = vmatmul.mubr.bf16.gmra.mxu1 %v7306_v34 }
 0x2d5   : > { %v8232_v55 = vpop.f32.mrf.mxu1  ;;  %7130 = vmatprep.mubr.msk.bf16.mxu1 %vm7317_vm0, %v9086_v62  ;;  %v3222_v59 = vadd.f32 %v8101_v22, %v2946_v16 }
 0x2d6   : > { %v6824_v63 = vpop.f32.mrf.mxu0  ;;  %9123 = vst [vmem:[#allocation54_spill] sm:$0xff] %v8232_v55  ;;  %v6151_v4 = vpack.c.bf16 %v8232_v55, %v8225_v47 }
 0x2d7   : > { %v7029_v17 = vpop.f32.mrf.mxu1  ;;  %v3223_v47 = vadd.f32 %v3222_v59, %v2947_v60  ;;  %v7307_v60 = vld [vmem:[%s7382_s27 + $0x450] ss:$0 sps:$4 sm:$0x11]  }
 0x2d8   : > { %v8234_v11 = vpop.f32.mrf.mxu0  ;;  %6389 = vst [vmem:[%s7508_s15 + $0x380] sm:$0xff] %v6151_v4   ;;  %v2948_v17 = vmul.f32 %v8125_v45, %v8125_v45  ;;  %v2949_v4 = vmul.f32 %v8132_v27, %v8132_v27 }
 0x2d9   : > { %v5896_v32 = vpack.c.bf16 %v8234_v11, %v8227_v25  ;;  %v8246_v63 = vpop.f32.mrf.mxu1 }
 0x2da   : > { %v6825_v28 = vpop.f32.mrf.mxu0  ;;  %v3224_v22 = vadd.f32 %v3223_v47, %v2948_v17  ;;  %v2951_v47 = vmul.f32 %v8149_v35, %v8149_v35 }
 0x2db   : > { %6338 = vst [vmem:[%s7508_s15 + $0x1e8] sm:$0xff] %v5896_v32   ;;  %v2662_v28 = vadd.f32 %v8111_v2, %v8115_v49  ;;  %v7032_v55 = vpop.f32.mrf.mxu1  ;;  %v2950_v49 = vmul.f32 %v8142_v42, %v8142_v42 }
 0x2dc   : > { %v8248_v14 = vpop.f32.mrf.mxu0  ;;  %7131 = vmatmul.mubr.bf16.gmra.mxu1 %v7307_v60 }
 0x2dd   : > { %v2663_v34 = vadd.f32 %v2662_v28, %v8125_v45  ;;  %v8261_v56 = vpop.f32.mrf.mxu1  ;;  %v3225_v28 = vadd.f32 %v3224_v22, %v2949_v4 }
 0x2de   : > { %v6828_v32 = vpop.f32.mrf.mxu0  ;;  %9124 = vst [vmem:[#allocation55_spill] sm:$0xff] %v8261_v56  ;;  %v6156_v59 = vpack.c.bf16 %v8261_v56, %v8246_v63 }
 0x2df   : > { %v2664_v2 = vadd.f32 %v2663_v34, %v8132_v27  ;;  %v7033_v16 = vpop.f32.mrf.mxu1  ;;  %v3226_v34 = vadd.f32 %v3225_v28, %v2950_v49 }
 0x2e0   : > { %v8263_v62 = vpop.f32.mrf.mxu0  ;;  %6390 = vst [vmem:[%s7508_s15 + $0x388] sm:$0xff] %v6156_v59   ;;  %v2954_v59 = vmul.f32 %v8176_v30, %v8176_v30 }
 0x2e1   : > { %v5901_v55 = vpack.c.bf16 %v8263_v62, %v8248_v14  ;;  %v2665_v32 = vadd.f32 %v2664_v2, %v8142_v42  ;;  %v8277_v27 = vpop.f32.mrf.mxu1  ;;  %v3227_v42 = vadd.f32 %v3226_v34, %v2951_v47  ;;  %v2953_v2 = vmul.f32 %v8166_v57, %v8166_v57 }
 0x2e2   : > { %v6829_v45 = vpop.f32.mrf.mxu0 }
 0x2e3   : > { %6339 = vst [vmem:[%s7508_s15 + $0x1f0] sm:$0xff] %v5901_v55   ;;  %v2666_v16 = vadd.f32 %v2665_v32, %v8149_v35  ;;  %v2952_v45 = vmul.f32 %v8159_v10, %v8159_v10  ;;  %v7036_v56 = vpop.f32.mrf.mxu1 }
 0x2e4   : > { %v8279_v17 = vpop.f32.mrf.mxu0 }
 0x2e5   : > { %v2667_v22 = vadd.f32 %v2666_v16, %v8159_v10  ;;  %v8288_v55 = vpop.f32.mrf.mxu1  ;;  %v3228_v49 = vadd.f32 %v3227_v42, %v2952_v45  ;;  %v2955_v16 = vmul.f32 %v8183_v38, %v8183_v38 }
 0x2e6   : > { %v6832_v4 = vpop.f32.mrf.mxu0  ;;  %v6161_v10 = vpack.c.bf16 %v8288_v55, %v8277_v27 }
 0x2e7   : > { %v2668_v35 = vadd.f32 %v2667_v22, %v8166_v57  ;;  %v7037_v28 = vpop.f32.mrf.mxu1  ;;  %v3229_v47 = vadd.f32 %v3228_v49, %v2953_v2  ;;  %v2956_v22 = vmul.f32 %v8193_v46, %v8193_v46  ;;  %v2957_v49 = vmul.f32 %v8200_v20, %v8200_v20 }
 0x2e8   : > { %v8290_v60 = vpop.f32.mrf.mxu0  ;;  %6391 = vst [vmem:[%s7508_s15 + $0x390] sm:$0xff] %v6161_v10   ;;  %v2958_v10 = vmul.f32 %v8210_v8, %v8210_v8 }
 0x2e9   : > { %v5906_v56 = vpack.c.bf16 %v8290_v60, %v8279_v17  ;;  %v2669_v34 = vadd.f32 %v2668_v35, %v8176_v30  ;;  %v8303_v45 = vpop.f32.mrf.mxu1  ;;  %v3230_v4 = vadd.f32 %v3229_v47, %v2954_v59 }
 0x2ea   : > { %v6833_v32 = vpop.f32.mrf.mxu0 }
 0x2eb   : > { %6340 = vst [vmem:[%s7508_s15 + $0x1f8] sm:$0xff] %v5906_v56   ;;  %v2670_v42 = vadd.f32 %v2669_v34, %v8183_v38  ;;  %v7040_v28 = vpop.f32.mrf.mxu1  ;;  %v3231_v2 = vadd.f32 %v3230_v4, %v2955_v16 }
 0x2ec   : > { %v8305_v57 = vpop.f32.mrf.mxu0  ;;  %v2959_v28 = vmul.f32 %v8217_v1, %v8217_v1 }
 0x2ed   : > { %v2671_v30 = vadd.f32 %v2670_v42, %v8193_v46  ;;  %v8314_v35 = vpop.f32.mrf.mxu1  ;;  %v3232_v59 = vadd.f32 %v3231_v2, %v2956_v22 }
 0x2ee   : > { %v6836_v32 = vpop.f32.mrf.mxu0  ;;  %9125 = vst [vmem:[#allocation56_spill] sm:$0xff] %v8314_v35  ;;  %v6166_v46 = vpack.c.bf16 %v8314_v35, %v8303_v45 }
 0x2ef   : > { %v2672_v38 = vadd.f32 %v2671_v30, %v8200_v20  ;;  %v7041_v34 = vpop.f32.mrf.mxu1  ;;  %v3233_v4 = vadd.f32 %v3232_v59, %v2957_v49  ;;  %v2960_v30 = vmul.f32 %v8227_v25, %v8227_v25  ;;  %v2961_v59 = vmul.f32 %v8234_v11, %v8234_v11 }
 0x2f0   : > { %v8316_v56 = vpop.f32.mrf.mxu0  ;;  %6392 = vst [vmem:[%s7508_s15 + $0x398] sm:$0xff] %v6166_v46  }
 0x2f1   : > { %v5911_v47 = vpack.c.bf16 %v8316_v56, %v8305_v57  ;;  %v2673_v42 = vadd.f32 %v2672_v38, %v8210_v8  ;;  %v8329_v22 = vpop.f32.mrf.mxu1  ;;  %v3234_v32 = vadd.f32 %v3233_v4, %v2958_v10 }
 0x2f2   : > { %v6837_v16 = vpop.f32.mrf.mxu0  ;;  %9126 = vst [vmem:[#allocation57_spill] sm:$0xff] %v8329_v22 }
 0x2f3   : > { %6341 = vst [vmem:[%s7508_s15 + $0x200] sm:$0xff] %v5911_v47   ;;  %v2674_v2 = vadd.f32 %v2673_v42, %v8217_v1  ;;  %v7044_v34 = vpop.f32.mrf.mxu1  ;;  %v3235_v49 = vadd.f32 %v3234_v32, %v2959_v28  ;;  %v2962_v1 = vmul.f32 %v8248_v14, %v8248_v14 }
 0x2f4   : > { %v1964_v20 = vpop.f32.mrf.mxu0 }
 0x2f5   : > { %v2675_v8 = vadd.f32 %v2674_v2, %v8227_v25  ;;  %v8338_v38 = vpop.f32.mrf.mxu1  ;;  %v3236_v46 = vadd.f32 %v3235_v49, %v2960_v30  ;;  %v2963_v2 = vmul.f32 %v8263_v62, %v8263_v62 }
 0x2f6   : > { %v6840_v16 = vpop.f32.mrf.mxu0  ;;  %9127 = vst [vmem:[#allocation58_spill] sm:$0xff] %v8338_v38  ;;  %v6171_v28 = vpack.c.bf16 %v8338_v38, %v8329_v22 }
 0x2f7   : > { %v2676_v10 = vadd.f32 %v2675_v8, %v8234_v11  ;;  %v7045_v42 = vpop.f32.mrf.mxu1  ;;  %v3237_v25 = vadd.f32 %v3236_v46, %v2961_v59  ;;  %v2964_v8 = vmul.f32 %v8279_v17, %v8279_v17  ;;  %v2965_v46 = vmul.f32 %v8290_v60, %v8290_v60 }
 0x2f8   : > { %v1967_v47 = vpop.f32.mrf.mxu0  ;;  %6393 = vst [vmem:[%s7508_s15 + $0x3a0] sm:$0xff] %v6171_v28  }
 0x2f9   : > { %v5916_v4 = vpack.c.bf16 %v1967_v47, %v1964_v20  ;;  %v2677_v32 = vadd.f32 %v2676_v10, %v8248_v14  ;;  %v8349_v16 = vpop.f32.mrf.mxu1  ;;  %v3238_v11 = vadd.f32 %v3237_v25, %v2962_v1 }
 0x2fa   : > { %v6841_v34 = vpop.f32.mrf.mxu0  ;;  %9128 = vst [vmem:[#allocation59_spill] sm:$0xff] %v8349_v16 }
 0x2fb   : > { %6342 = vst [vmem:[%s7508_s15 + $0x208] sm:$0xff] %v5916_v4   ;;  %v2678_v49 = vadd.f32 %v2677_v32, %v8263_v62  ;;  %v7048_v42 = vpop.f32.mrf.mxu1  ;;  %v3239_v59 = vadd.f32 %v3238_v11, %v2963_v2  ;;  %v2966_v62 = vmul.f32 %v8305_v57, %v8305_v57 }
 0x2fc   : > { %v1972_v30 = vpop.f32.mrf.mxu0 }
 0x2fd   : > { %v2679_v14 = vadd.f32 %v2678_v49, %v8279_v17  ;;  %v8358_v10 = vpop.f32.mrf.mxu1  ;;  %v3240_v28 = vadd.f32 %v3239_v59, %v2964_v8  ;;  %v2967_v49 = vmul.f32 %v8316_v56, %v8316_v56 }
 0x2fe   : > { %v6844_v34 = vpop.f32.mrf.mxu0  ;;  %9129 = vst [vmem:[#allocation60_spill] sm:$0xff] %v8358_v10  ;;  %v6176_v2 = vpack.c.bf16 %v8358_v10, %v8349_v16  ;;  %v2970_v16 = vmul.f32 %v1972_v30, %v1972_v30 }
 0x2ff   : > { %v2680_v1 = vadd.f32 %v2679_v14, %v8290_v60  ;;  %v7049_v32 = vpop.f32.mrf.mxu1  ;;  %v3241_v17 = vadd.f32 %v3240_v28, %v2965_v46  ;;  %v2968_v14 = vmul.f32 %v1964_v20, %v1964_v20  ;;  %v2969_v46 = vmul.f32 %v1967_v47, %v1967_v47 }
 0x300   : > { %v1975_v4 = vpop.f32.mrf.mxu0  ;;  %6394 = vst [vmem:[%s7508_s15 + $0x3a8] sm:$0xff] %v6176_v2  }
 0x301   : > { %v5921_v25 = vpack.c.bf16 %v1975_v4, %v1972_v30  ;;  %v2681_v11 = vadd.f32 %v2680_v1, %v8305_v57  ;;  %v8369_v34 = vpop.f32.mrf.mxu1  ;;  %v3242_v60 = vadd.f32 %v3241_v17, %v2966_v62 }
 0x302   : > { %v6845_v42 = vpop.f32.mrf.mxu0 }
 0x303   : > { %6343 = vst [vmem:[%s7508_s15 + $0x210] sm:$0xff] %v5921_v25   ;;  %v2682_v59 = vadd.f32 %v2681_v11, %v8316_v56  ;;  %v7052_v32 = vpop.f32.mrf.mxu1  ;;  %v3243_v38 = vadd.f32 %v3242_v60, %v2967_v49  ;;  %v2971_v11 = vmul.f32 %v1975_v4, %v1975_v4 }
 0x304   : > { %v1980_v8 = vpop.f32.mrf.mxu0 }
 0x305   : > { %v2683_v10 = vadd.f32 %v2682_v59, %v1964_v20  ;;  %v8373_v57 = vpop.f32.mrf.mxu1  ;;  %v3244_v1 = vadd.f32 %v3243_v38, %v2968_v14  ;;  %v2972_v32 = vmul.f32 %v1980_v8, %v1980_v8 }
 0x306   : > { %v6848_v42 = vpop.f32.mrf.mxu0  ;;  %9130 = vst [vmem:[#allocation61_spill] sm:$0xff] %v8373_v57  ;;  %v6181_v56 = vpack.c.bf16 %v8373_v57, %v8369_v34 }
 0x307   : > { %v2684_v25 = vadd.f32 %v2683_v10, %v1967_v47  ;;  %v7053_v35 = vpop.f32.mrf.mxu1  ;;  %v3245_v62 = vadd.f32 %v3244_v1, %v2969_v46 }
 0x308   : > { %v1983_v28 = vpop.f32.mrf.mxu0  ;;  %6395 = vst [vmem:[%s7508_s15 + $0x3b0] sm:$0xff] %v6181_v56  }
 0x309   : > { %v5926_v22 = vpack.c.bf16 %v1983_v28, %v1980_v8  ;;  %v2685_v17 = vadd.f32 %v2684_v25, %v1972_v30  ;;  %v8378_v49 = vpop.f32.mrf.mxu1  ;;  %v3246_v60 = vadd.f32 %v3245_v62, %v2970_v16  ;;  %v2973_v14 = vmul.f32 %v1983_v28, %v1983_v28 }
 0x30a   : > { %v6849_v2 = vpop.f32.mrf.mxu0 }
 0x30b   : > { %6344 = vst [vmem:[%s7508_s15 + $0x218] sm:$0xff] %v5926_v22   ;;  %v2686_v59 = vadd.f32 %v2685_v17, %v1975_v4  ;;  %v7056_v38 = vpop.f32.mrf.mxu1  ;;  %v3247_v10 = vadd.f32 %v3246_v60, %v2971_v11 }
 0x30c   : > { %v1988_v20 = vpop.f32.mrf.mxu0 }
 0x30d   : > { %v2687_v35 = vadd.f32 %v2686_v59, %v1980_v8  ;;  %v8381_v42 = vpop.f32.mrf.mxu1  ;;  %v3248_v30 = vadd.f32 %v3247_v10, %v2972_v32  ;;  %v2974_v22 = vmul.f32 %v1988_v20, %v1988_v20 }
 0x30e   : > { %v6852_v47 = vpop.f32.mrf.mxu0  ;;  %v6186_v16 = vpack.c.bf16 %v8381_v42, %v8378_v49 }
 0x30f   : > { %v2688_v1 = vadd.f32 %v2687_v35, %v1983_v28  ;;  %v7057_v2 = vpop.f32.mrf.mxu1  ;;  %v3249_v4 = vadd.f32 %v3248_v30, %v2973_v14 }
 0x310   : > { %v1991_v46 = vpop.f32.mrf.mxu0  ;;  %6396 = vst [vmem:[%s7508_s15 + $0x3b8] sm:$0xff] %v6186_v16  }
 0x311   : > { %v5931_v25 = vpack.c.bf16 %v1991_v46, %v1988_v20  ;;  %v2689_v56 = vadd.f32 %v2688_v1, %v1988_v20  ;;  %v2975_v62 = vmul.f32 %v1991_v46, %v1991_v46  ;;  %v8386_v17 = vpop.f32.mrf.mxu1  ;;  %v3250_v11 = vadd.f32 %v3249_v4, %v2974_v22 }
 0x312   : > { %v6853_v57 = vpop.f32.mrf.mxu0 }
 0x313   : > { %6345 = vst [vmem:[%s7508_s15 + $0x220] sm:$0xff] %v5931_v25   ;;  %v2690_v60 = vadd.f32 %v2689_v56, %v1991_v46  ;;  %v7060_v32 = vpop.f32.mrf.mxu1  ;;  %v3251_v38 = vadd.f32 %v3250_v11, %v2975_v62  ;;  %v2978_v46 = vmul.f32 %v7639_v33, %v7639_v33  ;;  %v2979_v56 = vmul.f32 %v7645_v40, %v7645_v40 }
 0x314   : > { %v1996_v8 = vpop.f32.mrf.mxu0 }
 0x315   : > { %v2976_v59 = vmul.f32 %v1996_v8, %v1996_v8  ;;  %v2691_v57 = vadd.f32 %v2690_v60, %v1996_v8  ;;  %v8389_v47 = vpop.f32.mrf.mxu1  ;;  %v2980_v60 = vmul.f32 %v7653_v51, %v7653_v51 }
 0x316   : > { %v6856_v28 = vpop.f32.mrf.mxu0  ;;  %v6191_v22 = vpack.c.bf16 %v8389_v47, %v8386_v17 }
 0x317   : > { %v3252_v35 = vadd.f32 %v3251_v38, %v2976_v59  ;;  %v7061_v1 = vpop.f32.mrf.mxu1  ;;  %v2981_v28 = vmul.f32 %v7659_v58, %v7659_v58 }
 0x318   : > { %v1999_v10 = vpop.f32.mrf.mxu0  ;;  %6397 = vst [vmem:[%s7508_s15 + $0x3c0] sm:$0xff] %v6191_v22   ;;  %v2984_v22 = vmul.f32 %v7681_v24, %v7681_v24 }
 0x319   : > { %v2692_v20 = vadd.f32 %v2691_v57, %v1999_v10  ;;  %v2977_v14 = vmul.f32 %v1999_v10, %v1999_v10  ;;  %v5936_v30 = vpack.c.bf16 %v1999_v10, %v1996_v8  ;;  %v8397_v4 = vpop.f32.mrf.mxu1 }
 0x31a   : > { %v6857_v25 = vpop.f32.mrf.mxu0 }
 0x31b   : > { %v2693_v2 = vadd.f32 %v2692_v20, %v7639_v33  ;;  %v3253_v16 = vadd.f32 %v3252_v35, %v2977_v14  ;;  %6346 = vst [vmem:[%s7508_s15 + $0x228] sm:$0xff] %v5936_v30   ;;  %v7064_v11 = vpop.f32.mrf.mxu1  ;;  %v2982_v35 = vmul.f32 %v7667_v6, %v7667_v6  ;;  %v2983_v30 = vmul.f32 %v7673_v13, %v7673_v13 }
 0x31c   : > { %v2986_v11 = vmul.f32 %v7695_v44, %v7695_v44 }
 0x31d   : > { %v2694_v62 = vadd.f32 %v2693_v2, %v7645_v40  ;;  %v3254_v8 = vadd.f32 %v3253_v16, %v2978_v46  ;;  %v8406_v33 = vpop.f32.mrf.mxu1 }
 0x31e   : > { %v6196_v40 = vpack.c.bf16 %v8406_v33, %v8397_v4 }
 0x31f   : > { %v2695_v59 = vadd.f32 %v2694_v62, %v7653_v51  ;;  %v3255_v32 = vadd.f32 %v3254_v8, %v2979_v56  ;;  %v7065_v10 = vpop.f32.mrf.mxu1 }
 0x320   : > { %6398 = vst [vmem:[%s7508_s15 + $0x3c8] sm:$0xff] %v6196_v40  }
 0x321   : > { %v2696_v38 = vadd.f32 %v2695_v59, %v7659_v58  ;;  %v3256_v57 = vadd.f32 %v3255_v32, %v2980_v60  ;;  %v8416_v51 = vpop.f32.mrf.mxu1  ;;  %v2987_v32 = vmul.f32 %v7701_v52, %v7701_v52 }
 0x323   : > { %v2697_v20 = vadd.f32 %v2696_v38, %v7667_v6  ;;  %v3257_v14 = vadd.f32 %v3256_v57, %v2981_v28  ;;  %v7068_v25 = vpop.f32.mrf.mxu1  ;;  %v2985_v6 = vmul.f32 %v7687_v31, %v7687_v31  ;;  %v2988_v57 = vmul.f32 %v7709_v0, %v7709_v0 }
 0x325   : > { %v2698_v1 = vadd.f32 %v2697_v20, %v7673_v13  ;;  %v3258_v58 = vadd.f32 %v3257_v14, %v2982_v35  ;;  %v8425_v16 = vpop.f32.mrf.mxu1 }
 0x326   : > { %v6201_v13 = vpack.c.bf16 %v8425_v16, %v8416_v51 }
 0x327   : > { %v2699_v46 = vadd.f32 %v2698_v1, %v7681_v24  ;;  %v3259_v2 = vadd.f32 %v3258_v58, %v2983_v30  ;;  %v7069_v8 = vpop.f32.mrf.mxu1  ;;  %v2990_v1 = vmul.f32 %v7723_v21, %v7723_v21 }
 0x328   : > { %6399 = vst [vmem:[%s7508_s15 + $0x3d0] sm:$0xff] %v6201_v13  }
 0x329   : > { %v2700_v56 = vadd.f32 %v2699_v46, %v7687_v31  ;;  %v3260_v62 = vadd.f32 %v3259_v2, %v2984_v22  ;;  %v8435_v24 = vpop.f32.mrf.mxu1  ;;  %v2991_v22 = vmul.f32 %v7729_v29, %v7729_v29 }
 0x32b   : > { %v2701_v60 = vadd.f32 %v2700_v56, %v7695_v44  ;;  %v3261_v59 = vadd.f32 %v3260_v62, %v2985_v6  ;;  %v7072_v38 = vpop.f32.mrf.mxu1  ;;  %v2989_v44 = vmul.f32 %v7715_v9, %v7715_v9  ;;  %v2992_v6 = vmul.f32 %v7737_v43, %v7737_v43 }
 0x32d   : > { %v2702_v28 = vadd.f32 %v2701_v60, %v7701_v52  ;;  %v3262_v31 = vadd.f32 %v3261_v59, %v2986_v11  ;;  %v8444_v35 = vpop.f32.mrf.mxu1  ;;  %v2994_v59 = vmul.f32 %v7751_v3, %v7751_v3 }
 0x32e   : > { %v6206_v52 = vpack.c.bf16 %v8444_v35, %v8435_v24 }
 0x32f   : > { %v2703_v10 = vadd.f32 %v2702_v28, %v7709_v0  ;;  %v3263_v40 = vadd.f32 %v3262_v31, %v2987_v32  ;;  %v7073_v30 = vpop.f32.mrf.mxu1  ;;  %v2995_v31 = vmul.f32 %v7757_v12, %v7757_v12 }
 0x330   : > { %6400 = vst [vmem:[%s7508_s15 + $0x3d8] sm:$0xff] %v6206_v52  }
 0x331   : > { %v2704_v20 = vadd.f32 %v2703_v10, %v7715_v9  ;;  %v3264_v14 = vadd.f32 %v3263_v40, %v2988_v57  ;;  %v8454_v0 = vpop.f32.mrf.mxu1  ;;  %v2996_v10 = vmul.f32 %v7765_v26, %v7765_v26 }
 0x333   : > { %v2705_v58 = vadd.f32 %v2704_v20, %v7723_v21  ;;  %v3265_v25 = vadd.f32 %v3264_v14, %v2989_v44  ;;  %v7076_v2 = vpop.f32.mrf.mxu1  ;;  %v2993_v21 = vmul.f32 %v7743_v53, %v7743_v53 }
 0x334   : > { %v3000_v2 = vmul.f32 %v7793_v15, %v7793_v15 }
 0x335   : > { %v2706_v46 = vadd.f32 %v2705_v58, %v7729_v29  ;;  %v3266_v9 = vadd.f32 %v3265_v25, %v2990_v1  ;;  %v8463_v8 = vpop.f32.mrf.mxu1  ;;  %v2998_v1 = vmul.f32 %v7779_v50, %v7779_v50 }
 0x336   : > { %v6211_v29 = vpack.c.bf16 %v8463_v8, %v8454_v0 }
 0x337   : > { %v2707_v56 = vadd.f32 %v2706_v46, %v7737_v43  ;;  %v3267_v62 = vadd.f32 %v3266_v9, %v2991_v22  ;;  %v7077_v60 = vpop.f32.mrf.mxu1  ;;  %v2999_v22 = vmul.f32 %v7785_v61, %v7785_v61 }
 0x338   : > { %6401 = vst [vmem:[%s7508_s15 + $0x3e0] sm:$0xff] %v6211_v29   ;;  %v3002_v60 = vmul.f32 %v7807_v41, %v7807_v41 }
 0x339   : > { %v2708_v13 = vadd.f32 %v2707_v56, %v7743_v53  ;;  %v3268_v11 = vadd.f32 %v3267_v62, %v2992_v6  ;;  %v8473_v43 = vpop.f32.mrf.mxu1 }
 0x33b   : > { %v2709_v32 = vadd.f32 %v2708_v13, %v7751_v3  ;;  %v3269_v28 = vadd.f32 %v3268_v11, %v2993_v21  ;;  %v7080_v57 = vpop.f32.mrf.mxu1  ;;  %v2997_v3 = vmul.f32 %v7771_v36, %v7771_v36 }
 0x33d   : > { %v2710_v38 = vadd.f32 %v2709_v32, %v7757_v12  ;;  %v3270_v53 = vadd.f32 %v3269_v28, %v2994_v59  ;;  %v8482_v20 = vpop.f32.mrf.mxu1  ;;  %v3003_v32 = vmul.f32 %v7813_v54, %v7813_v54 }
 0x33e   : > { %v6216_v12 = vpack.c.bf16 %v8482_v20, %v8473_v43 }
 0x33f   : > { %v2711_v40 = vadd.f32 %v2710_v38, %v7765_v26  ;;  %v3271_v44 = vadd.f32 %v3270_v53, %v2995_v31  ;;  %v7081_v52 = vpop.f32.mrf.mxu1  ;;  %v3004_v38 = vmul.f32 %v7821_v7, %v7821_v7 }
 0x340   : > { %6402 = vst [vmem:[%s7508_s15 + $0x3e8] sm:$0xff] %v6216_v12   ;;  %v3007_v12 = vmul.f32 %v7841_v48, %v7841_v48 }
 0x341   : > { %v2712_v14 = vadd.f32 %v2711_v40, %v7771_v36  ;;  %v3272_v30 = vadd.f32 %v3271_v44, %v2996_v10  ;;  %v8492_v26 = vpop.f32.mrf.mxu1 }
 0x343   : > { %v2713_v58 = vadd.f32 %v2712_v14, %v7779_v50  ;;  %v3273_v25 = vadd.f32 %v3272_v30, %v2997_v3  ;;  %v7084_v9 = vpop.f32.mrf.mxu1  ;;  %v3001_v50 = vmul.f32 %v7799_v23, %v7799_v23  ;;  %v3006_v14 = vmul.f32 %v7835_v37, %v7835_v37 }
 0x345   : > { %v2714_v46 = vadd.f32 %v2713_v58, %v7785_v61  ;;  %v3274_v36 = vadd.f32 %v3273_v25, %v2998_v1  ;;  %v8501_v62 = vpop.f32.mrf.mxu1  ;;  %v3008_v25 = vmul.f32 %v7849_v5, %v7849_v5 }
 0x346   : > { %v6221_v61 = vpack.c.bf16 %v8501_v62, %v8492_v26 }
 0x347   : > { %v2715_v6 = vadd.f32 %v2714_v46, %v7793_v15  ;;  %v3275_v56 = vadd.f32 %v3274_v36, %v2999_v22  ;;  %v7085_v11 = vpop.f32.mrf.mxu1 }
 0x348   : > { %6403 = vst [vmem:[%s7508_s15 + $0x3f0] sm:$0xff] %v6221_v61  }
 0x349   : > { %v2716_v21 = vadd.f32 %v2715_v6, %v7799_v23  ;;  %v3276_v13 = vadd.f32 %v3275_v56, %v3000_v2  ;;  %v8511_v15 = vpop.f32.mrf.mxu1  ;;  %v3010_v56 = vmul.f32 %v7863_v39, %v7863_v39 }
 0x34b   : > { %v2717_v29 = vadd.f32 %v2716_v21, %v7807_v41  ;;  %v3277_v59 = vadd.f32 %v3276_v13, %v3001_v50  ;;  %v7088_v31 = vpop.f32.mrf.mxu1  ;;  %v3005_v41 = vmul.f32 %v7827_v18, %v7827_v18  ;;  %v9131_v13 = vld [vmem:[#allocation2_spill] sm:$0xff] }
 0x34c   : > { %v3011_v11 = vmul.f32 %v9131_v13, %v9131_v13 }
 0x34d   : > { %v2718_v28 = vadd.f32 %v2717_v29, %v7813_v54  ;;  %v3278_v23 = vadd.f32 %v3277_v59, %v3002_v60  ;;  %v8520_v10 = vpop.f32.mrf.mxu1  ;;  %v9132_v29 = vld [vmem:[#allocation3_spill] sm:$0xff] }
 0x34e   : > { %v6226_v54 = vpack.c.bf16 %v8520_v10, %v8511_v15  ;;  %v3012_v59 = vmul.f32 %v9132_v29, %v9132_v29 }
 0x34f   : > { %v2719_v53 = vadd.f32 %v2718_v28, %v7821_v7  ;;  %v3279_v57 = vadd.f32 %v3278_v23, %v3003_v32  ;;  %v7089_v3 = vpop.f32.mrf.mxu1 }
 0x350   : > { %6404 = vst [vmem:[%s7508_s15 + $0x3f8] sm:$0xff] %v6226_v54  }
 0x351   : > { %v2720_v40 = vadd.f32 %v2719_v53, %v7827_v18  ;;  %v3280_v44 = vadd.f32 %v3279_v57, %v3004_v38  ;;  %v8530_v7 = vpop.f32.mrf.mxu1 }
 0x353   : > { %v2721_v30 = vadd.f32 %v2720_v40, %v7835_v37  ;;  %v3281_v52 = vadd.f32 %v3280_v44, %v3005_v41  ;;  %v7092_v58 = vpop.f32.mrf.mxu1  ;;  %v3009_v37 = vmul.f32 %v7855_v19, %v7855_v19  ;;  %v9134_v40 = vld [vmem:[#allocation5_spill] sm:$0xff] }
 0x354   : > { %v3014_v44 = vmul.f32 %v9134_v40, %v9134_v40  ;;  %v9136_v58 = vld [vmem:[#allocation7_spill] sm:$0xff] }
 0x355   : > { %v2722_v1 = vadd.f32 %v2721_v30, %v7841_v48  ;;  %v3282_v18 = vadd.f32 %v3281_v52, %v3006_v14  ;;  %v8539_v36 = vpop.f32.mrf.mxu1  ;;  %v9135_v30 = vld [vmem:[#allocation6_spill] sm:$0xff] }
 0x356   : > { %v6231_v48 = vpack.c.bf16 %v8539_v36, %v8530_v7  ;;  %v3015_v52 = vmul.f32 %v9135_v30, %v9135_v30 }
 0x357   : > { %v2723_v22 = vadd.f32 %v2722_v1, %v7849_v5  ;;  %v3283_v46 = vadd.f32 %v3282_v18, %v3007_v12  ;;  %v7093_v6 = vpop.f32.mrf.mxu1 }
 0x358   : > { %6405 = vst [vmem:[%s7508_s15 + $0x400] sm:$0xff] %v6231_v48  }
 0x359   : > { %v2724_v9 = vadd.f32 %v2723_v22, %v7855_v19  ;;  %v3284_v2 = vadd.f32 %v3283_v46, %v3008_v25  ;;  %v8549_v5 = vpop.f32.mrf.mxu1  ;;  %v3016_v25 = vmul.f32 %v9136_v58, %v9136_v58 }
 0x35b   : > { %v2725_v50 = vadd.f32 %v2724_v9, %v7863_v39  ;;  %v3285_v21 = vadd.f32 %v3284_v2, %v3009_v37  ;;  %v7096_v60 = vpop.f32.mrf.mxu1  ;;  %v9133_v39 = vld [vmem:[#allocation4_spill] sm:$0xff] }
 0x35c   : > { %v3013_v31 = vmul.f32 %v9133_v39, %v9133_v39  ;;  %v9137_v9 = vld [vmem:[#allocation8_spill] sm:$0xff]  ;;  %v9139_v60 = vld [vmem:[#allocation10_spill] sm:$0xff] }
 0x35d   : > { %v2726_v61 = vadd.f32 %v2725_v50, %v9131_v13  ;;  %v3286_v19 = vadd.f32 %v3285_v21, %v3010_v56  ;;  %v8558_v23 = vpop.f32.mrf.mxu1  ;;  %v3017_v2 = vmul.f32 %v9137_v9, %v9137_v9  ;;  %v9138_v21 = vld [vmem:[#allocation9_spill] sm:$0xff] }
 0x35e   : > { %v6236_v41 = vpack.c.bf16 %v8558_v23, %v8549_v5  ;;  %v3018_v13 = vmul.f32 %v9138_v21, %v9138_v21 }
 0x35f   : > { %v2727_v32 = vadd.f32 %v2726_v61, %v9132_v29  ;;  %v3287_v28 = vadd.f32 %v3286_v19, %v3011_v11  ;;  %v7097_v57 = vpop.f32.mrf.mxu1  ;;  %v3019_v29 = vmul.f32 %v9139_v60, %v9139_v60 }
 0x360   : > { %6406 = vst [vmem:[%s7508_s15 + $0x408] sm:$0xff] %v6236_v41   ;;  %v9141_v41 = vld [vmem:[#allocation12_spill] sm:$0xff] }
 0x361   : > { %v2728_v38 = vadd.f32 %v2727_v32, %v9133_v39  ;;  %v3288_v53 = vadd.f32 %v3287_v28, %v3012_v59  ;;  %v8568_v14 = vpop.f32.mrf.mxu1  ;;  %v9140_v39 = vld [vmem:[#allocation11_spill] sm:$0xff] }
 0x363   : > { %v2729_v3 = vadd.f32 %v2728_v38, %v9134_v40  ;;  %v3289_v54 = vadd.f32 %v3288_v53, %v3013_v31  ;;  %v7100_v18 = vpop.f32.mrf.mxu1  ;;  %v3020_v31 = vmul.f32 %v9140_v39, %v9140_v39  ;;  %v3021_v40 = vmul.f32 %v9141_v41, %v9141_v41 }
 0x365   : > { %v2730_v12 = vadd.f32 %v2729_v3, %v9135_v30  ;;  %v3290_v1 = vadd.f32 %v3289_v54, %v3014_v44  ;;  %v8577_v37 = vpop.f32.mrf.mxu1 }
 0x366   : > { %v6241_v50 = vpack.c.bf16 %v8577_v37, %v8568_v14 }
 0x367   : > { %v2731_v22 = vadd.f32 %v2730_v12, %v9136_v58  ;;  %v3291_v46 = vadd.f32 %v3290_v1, %v3015_v52  ;;  %v7101_v56 = vpop.f32.mrf.mxu1  ;;  %v9142_v52 = vld [vmem:[#allocation13_spill] sm:$0xff] }
 0x368   : > { %6407 = vst [vmem:[%s7508_s15 + $0x410] sm:$0xff] %v6241_v50   ;;  %v3022_v12 = vmul.f32 %v9142_v52, %v9142_v52 }
 0x369   : > { %v2732_v6 = vadd.f32 %v2731_v22, %v9137_v9  ;;  %v3292_v48 = vadd.f32 %v3291_v46, %v3016_v25  ;;  %v8587_v19 = vpop.f32.mrf.mxu1  ;;  %v9143_v25 = vld [vmem:[#allocation14_spill] sm:$0xff] }
 0x36a   : > { %v3023_v22 = vmul.f32 %v9143_v25, %v9143_v25 }
 0x36b   : > { %v2733_v11 = vadd.f32 %v2732_v6, %v9138_v21  ;;  %v3293_v61 = vadd.f32 %v3292_v48, %v3017_v2  ;;  %v7104_v28 = vpop.f32.mrf.mxu1  ;;  %v9144_v6 = vld [vmem:[#allocation15_spill] sm:$0xff] }
 0x36c   : > { %v3024_v48 = vmul.f32 %v9144_v6, %v9144_v6 }
 0x36d   : > { %v2734_v59 = vadd.f32 %v2733_v11, %v9139_v60  ;;  %v3294_v32 = vadd.f32 %v3293_v61, %v3018_v13  ;;  %v8596_v57 = vpop.f32.mrf.mxu1  ;;  %v9145_v13 = vld [vmem:[#allocation16_spill] sm:$0xff] }
 0x36e   : > { %v6246_v30 = vpack.c.bf16 %v8596_v57, %v8587_v19  ;;  %v3025_v11 = vmul.f32 %v9145_v13, %v9145_v13 }
 0x36f   : > { %v2735_v38 = vadd.f32 %v2734_v59, %v9140_v39  ;;  %v3295_v53 = vadd.f32 %v3294_v32, %v3019_v29  ;;  %v7105_v54 = vpop.f32.mrf.mxu1  ;;  %v9146_v32 = vld [vmem:[#allocation17_spill] sm:$0xff] }
 0x370   : > { %6408 = vst [vmem:[%s7508_s15 + $0x418] sm:$0xff] %v6246_v30   ;;  %v3026_v28 = vmul.f32 %v9146_v32, %v9146_v32  ;;  %v9148_v54 = vld [vmem:[#allocation19_spill] sm:$0xff] }
 0x371   : > { %v2736_v44 = vadd.f32 %v2735_v38, %v9141_v41  ;;  %v3296_v3 = vadd.f32 %v3295_v53, %v3020_v31  ;;  %v8606_v58 = vpop.f32.mrf.mxu1  ;;  %v9147_v53 = vld [vmem:[#allocation18_spill] sm:$0xff]  ;;  %v3028_v30 = vmul.f32 %v9148_v54, %v9148_v54 }
 0x372   : > { %v3027_v41 = vmul.f32 %v9147_v53, %v9147_v53 }
 0x373   : > { %v2737_v1 = vadd.f32 %v2736_v44, %v9142_v52  ;;  %v3297_v18 = vadd.f32 %v3296_v3, %v3021_v40  ;;  %v7108_v2 = vpop.f32.mrf.mxu1 }
 0x375   : > { %v2738_v46 = vadd.f32 %v2737_v1, %v9143_v25  ;;  %v3298_v9 = vadd.f32 %v3297_v18, %v3022_v12  ;;  %v8615_v21 = vpop.f32.mrf.mxu1  ;;  %v9149_v18 = vld [vmem:[#allocation20_spill] sm:$0xff] }
 0x376   : > { %v6251_v59 = vpack.c.bf16 %v8615_v21, %v8606_v58  ;;  %v3029_v25 = vmul.f32 %v9149_v18, %v9149_v18 }
 0x377   : > { %v2739_v56 = vadd.f32 %v2738_v46, %v9144_v6  ;;  %v3299_v50 = vadd.f32 %v3298_v9, %v3023_v22  ;;  %v7109_v29 = vpop.f32.mrf.mxu1  ;;  %v9150_v6 = vld [vmem:[#allocation21_spill] sm:$0xff] }
 0x378   : > { %6409 = vst [vmem:[%s7508_s15 + $0x420] sm:$0xff] %v6251_v59  }
 0x379   : > { %v2740_v61 = vadd.f32 %v2739_v56, %v9145_v13  ;;  %v3300_v60 = vadd.f32 %v3299_v50, %v3024_v48  ;;  %v8625_v38 = vpop.f32.mrf.mxu1  ;;  %v3030_v48 = vmul.f32 %v9150_v6, %v9150_v6 }
 0x37b   : > { %v2741_v39 = vadd.f32 %v2740_v61, %v9146_v32  ;;  %v3301_v31 = vadd.f32 %v3300_v60, %v3025_v11  ;;  %v7112_v3 = vpop.f32.mrf.mxu1  ;;  %v9151_v11 = vld [vmem:[#allocation22_spill] sm:$0xff]  ;;  %v9152_v32 = vld [vmem:[#allocation23_spill] sm:$0xff] }
 0x37c   : > { %v3031_v61 = vmul.f32 %v9151_v11, %v9151_v11 }
 0x37d   : > { %v2742_v40 = vadd.f32 %v2741_v39, %v9147_v53  ;;  %v3302_v44 = vadd.f32 %v3301_v31, %v3026_v28  ;;  %v8634_v1 = vpop.f32.mrf.mxu1  ;;  %v3032_v28 = vmul.f32 %v9152_v32, %v9152_v32 }
 0x37e   : > { %v6256_v2 = vpack.c.bf16 %v8634_v1, %v8625_v38 }
 0x37f   : > { %v2743_v52 = vadd.f32 %v2742_v40, %v9148_v54  ;;  %v3303_v12 = vadd.f32 %v3302_v44, %v3027_v41  ;;  %v7113_v9 = vpop.f32.mrf.mxu1  ;;  %v9153_v41 = vld [vmem:[#allocation24_spill] sm:$0xff] }
 0x380   : > { %6410 = vst [vmem:[%s7508_s15 + $0x428] sm:$0xff] %v6256_v2   ;;  %v3033_v40 = vmul.f32 %v9153_v41, %v9153_v41 }
 0x381   : > { %v2744_v22 = vadd.f32 %v2743_v52, %v9149_v18  ;;  %v3304_v46 = vadd.f32 %v3303_v12, %v3028_v30  ;;  %v8644_v13 = vpop.f32.mrf.mxu1  ;;  %v9154_v52 = vld [vmem:[#allocation25_spill] sm:$0xff] }
 0x382   : > { %v3034_v12 = vmul.f32 %v9154_v52, %v9154_v52 }
 0x383   : > { %v2745_v56 = vadd.f32 %v2744_v22, %v9150_v6  ;;  %v3305_v50 = vadd.f32 %v3304_v46, %v3029_v25  ;;  %v7116_v59 = vpop.f32.mrf.mxu1  ;;  %v9155_v46 = vld [vmem:[#allocation26_spill] sm:$0xff] }
 0x384   : > { %v3035_v9 = vmul.f32 %v9155_v46, %v9155_v46 }
 0x385   : > { %v3306_v60 = vadd.f32 %v3305_v50, %v3030_v48  ;;  %v2746_v29 = vadd.f32 %v2745_v56, %v9151_v11  ;;  %v8653_v53 = vpop.f32.mrf.mxu1  ;;  %v9156_v56 = vld [vmem:[#allocation27_spill] sm:$0xff] }
 0x386   : > { %v6261_v30 = vpack.c.bf16 %v8653_v53, %v8644_v13  ;;  %v3036_v50 = vmul.f32 %v9156_v56, %v9156_v56 }
 0x387   : > { %v2747_v39 = vadd.f32 %v2746_v29, %v9152_v32  ;;  %v3307_v31 = vadd.f32 %v3306_v60, %v3031_v61  ;;  %v7117_v54 = vpop.f32.mrf.mxu1  ;;  %v9157_v29 = vld [vmem:[#allocation28_spill] sm:$0xff] }
 0x388   : > { %6411 = vst [vmem:[%s7508_s15 + $0x430] sm:$0xff] %v6261_v30   ;;  %v3037_v59 = vmul.f32 %v9157_v29, %v9157_v29  ;;  %v9159_v30 = vld [vmem:[#allocation30_spill] sm:$0xff] }
 0x389   : > { %v2748_v44 = vadd.f32 %v2747_v39, %v9153_v41  ;;  %v3308_v3 = vadd.f32 %v3307_v31, %v3032_v28  ;;  %v8663_v22 = vpop.f32.mrf.mxu1  ;;  %v9158_v41 = vld [vmem:[#allocation29_spill] sm:$0xff] }
 0x38b   : > { %v2749_v18 = vadd.f32 %v2748_v44, %v9154_v52  ;;  %v3309_v25 = vadd.f32 %v3308_v3, %v3033_v40  ;;  %v7120_v48 = vpop.f32.mrf.mxu1  ;;  %v3038_v40 = vmul.f32 %v9158_v41, %v9158_v41  ;;  %v3039_v52 = vmul.f32 %v9159_v30, %v9159_v30 }
 0x38d   : > { %v2750_v2 = vadd.f32 %v2749_v18, %v9155_v46  ;;  %v3310_v6 = vadd.f32 %v3309_v25, %v3034_v12  ;;  %v8672_v60 = vpop.f32.mrf.mxu1  ;;  %v9160_v46 = vld [vmem:[#allocation31_spill] sm:$0xff] }
 0x38e   : > { %v6266_v31 = vpack.c.bf16 %v8672_v60, %v8663_v22 }
 0x38f   : > { %v2751_v11 = vadd.f32 %v2750_v2, %v9156_v56  ;;  %v3311_v61 = vadd.f32 %v3310_v6, %v3035_v9  ;;  %v7121_v39 = vpop.f32.mrf.mxu1  ;;  %v3040_v9 = vmul.f32 %v9160_v46, %v9160_v46  ;;  %v9161_v56 = vld [vmem:[#allocation32_spill] sm:$0xff] }
 0x390   : > { %6412 = vst [vmem:[%s7508_s15 + $0x438] sm:$0xff] %v6266_v31  }
 0x391   : > { %v2752_v32 = vadd.f32 %v2751_v11, %v9157_v29  ;;  %v3312_v28 = vadd.f32 %v3311_v61, %v3036_v50  ;;  %v8682_v54 = vpop.f32.mrf.mxu1  ;;  %v3041_v50 = vmul.f32 %v9161_v56, %v9161_v56 }
 0x393   : > { %v2753_v44 = vadd.f32 %v2752_v32, %v9158_v41  ;;  %v3313_v3 = vadd.f32 %v3312_v28, %v3037_v59  ;;  %v7124_v25 = vpop.f32.mrf.mxu1  ;;  %v9162_v32 = vld [vmem:[#allocation33_spill] sm:$0xff] }
 0x394   : > { %v3042_v28 = vmul.f32 %v9162_v32, %v9162_v32 }
 0x395   : > { %v2754_v12 = vadd.f32 %v2753_v44, %v9159_v30  ;;  %v3314_v18 = vadd.f32 %v3313_v3, %v3038_v40  ;;  %v8691_v48 = vpop.f32.mrf.mxu1  ;;  %v9163_v40 = vld [vmem:[#allocation34_spill] sm:$0xff] }
 0x396   : > { %v6271_v59 = vpack.c.bf16 %v8691_v48, %v8682_v54  ;;  %v3043_v44 = vmul.f32 %v9163_v40, %v9163_v40 }
 0x397   : > { %v2755_v2 = vadd.f32 %v2754_v12, %v9160_v46  ;;  %v3315_v6 = vadd.f32 %v3314_v18, %v3039_v52  ;;  %v7125_v29 = vpop.f32.mrf.mxu1  ;;  %v9164_v12 = vld [vmem:[#allocation35_spill] sm:$0xff] }
 0x398   : > { %6413 = vst [vmem:[%s7508_s15 + $0x440] sm:$0xff] %v6271_v59   ;;  %v3044_v18 = vmul.f32 %v9164_v12, %v9164_v12  ;;  %v9166_v29 = vld [vmem:[#allocation37_spill] sm:$0xff] }
 0x399   : > { %v2756_v11 = vadd.f32 %v2755_v2, %v9161_v56  ;;  %v3316_v61 = vadd.f32 %v3315_v6, %v3040_v9  ;;  %v8701_v41 = vpop.f32.mrf.mxu1  ;;  %v9165_v2 = vld [vmem:[#allocation36_spill] sm:$0xff]  ;;  %v3046_v59 = vmul.f32 %v9166_v29, %v9166_v29 }
 0x39a   : > { %v3045_v6 = vmul.f32 %v9165_v2, %v9165_v2 }
 0x39b   : > { %v2757_v39 = vadd.f32 %v2756_v11, %v9162_v32  ;;  %v3317_v31 = vadd.f32 %v3316_v61, %v3041_v50  ;;  %v7128_v52 = vpop.f32.mrf.mxu1 }
 0x39c   : > { %v9168_v52 = vld [vmem:[#allocation39_spill] sm:$0xff] }
 0x39d   : > { %v2758_v3 = vadd.f32 %v2757_v39, %v9163_v40  ;;  %v3318_v30 = vadd.f32 %v3317_v31, %v3042_v28  ;;  %v8710_v9 = vpop.f32.mrf.mxu1  ;;  %v9167_v31 = vld [vmem:[#allocation38_spill] sm:$0xff] }
 0x39e   : > { %v6276_v61 = vpack.c.bf16 %v8710_v9, %v8701_v41  ;;  %v3047_v40 = vmul.f32 %v9167_v31, %v9167_v31 }
 0x39f   : > { %v2759_v25 = vadd.f32 %v2758_v3, %v9164_v12  ;;  %v3319_v46 = vadd.f32 %v3318_v30, %v3043_v44  ;;  %v7129_v11 = vpop.f32.mrf.mxu1 }
 0x3a0   : > { %6414 = vst [vmem:[%s7508_s15 + $0x448] sm:$0xff] %v6276_v61  }
 0x3a1   : > { %v2760_v56 = vadd.f32 %v2759_v25, %v9165_v2  ;;  %v3320_v50 = vadd.f32 %v3319_v46, %v3044_v18  ;;  %v8720_v39 = vpop.f32.mrf.mxu1  ;;  %v3048_v18 = vmul.f32 %v9168_v52, %v9168_v52 }
 0x3a2   : > { %v5587_v61 = vpack.c.bf16 %v8720_v39, %v8720_v39 }
 0x3a3   : > { %v2761_v32 = vadd.f32 %v2760_v56, %v9166_v29  ;;  %v3321_v28 = vadd.f32 %v3320_v50, %v3045_v6  ;;  %v7132_v30 = vpop.f32.mrf.mxu1  ;;  %v9169_v6 = vld [vmem:[#allocation40_spill] sm:$0xff] }
 0x3a4   : > { %v3049_v50 = vmul.f32 %v9169_v6, %v9169_v6 }
 0x3a5   : > { %v2762_v44 = vadd.f32 %v2761_v32, %v9167_v31  ;;  %v3322_v3 = vadd.f32 %v3321_v28, %v3046_v59  ;;  %v2551_v46 = vpop.f32.mrf.mxu1  ;;  %v9170_v59 = vld [vmem:[#allocation41_spill] sm:$0xff]  ;;  %v4788_v31 = vld [vmem:[%s7508_s15 + $0x450] sm:$0x1] }
 0x3a6   : > { %v3050_v28 = vmul.f32 %v9170_v59, %v9170_v59 }
 0x3a7   : > { %v2763_v12 = vadd.f32 %v2762_v44, %v9168_v52  ;;  %v3323_v25 = vadd.f32 %v3322_v3, %v3047_v40  ;;  %v7133_v11 = vpop.f32.mrf.mxu1  ;;  %v4789_v40 = vsel %vm4787_vm3, %v5587_v61, %v4788_v31  ;;  %v9171_v3 = vld [vmem:[#allocation42_spill] sm:$0xff]  ;;  %v9174_v61 = vld [vmem:[#allocation45_spill] sm:$0xff] }
 0x3a8   : > { %v3051_v52 = vmul.f32 %v9171_v3, %v9171_v3  ;;  %4790 = vst [vmem:[%s7508_s15 + $0x450] sm:$0x1] %v4789_v40 }
 0x3a9   : > { %v3324_v2 = vadd.f32 %v3323_v25, %v3048_v18  ;;  %v2764_v56 = vadd.f32 %v2763_v12, %v9169_v6  ;;  %v9172_v18 = vld [vmem:[#allocation43_spill] sm:$0xff]  ;;  %v9173_v6 = vld [vmem:[#allocation44_spill] sm:$0xff] }
 0x3aa   : > { %v3052_v46 = vmul.f32 %v9172_v18, %v9172_v18 }
 0x3ab   : > { %v3325_v29 = vadd.f32 %v3324_v2, %v3049_v50  ;;  %v2765_v32 = vadd.f32 %v2764_v56, %v9170_v59  ;;  %v3053_v50 = vmul.f32 %v9173_v6, %v9173_v6  ;;  %v3054_v59 = vmul.f32 %v9174_v61, %v9174_v61 }
 0x3ad   : > { %v3326_v44 = vadd.f32 %v3325_v29, %v3050_v28  ;;  %v2766_v30 = vadd.f32 %v2765_v32, %v9171_v3  ;;  %v9175_v28 = vld [vmem:[#allocation46_spill] sm:$0xff]  ;;  %v9176_v3 = vld [vmem:[#allocation47_spill] sm:$0xff] }
 0x3ae   : > { %v3055_v40 = vmul.f32 %v9175_v28, %v9175_v28 }
 0x3af   : > { %v3327_v12 = vadd.f32 %v3326_v44, %v3051_v52  ;;  %v2767_v25 = vadd.f32 %v2766_v30, %v9172_v18  ;;  %v3056_v52 = vmul.f32 %v9176_v3, %v9176_v3  ;;  %v9177_v18 = vld [vmem:[#allocation48_spill] sm:$0xff] }
 0x3b1   : > { %v3328_v2 = vadd.f32 %v3327_v12, %v3052_v46  ;;  %v2768_v56 = vadd.f32 %v2767_v25, %v9173_v6  ;;  %v3057_v46 = vmul.f32 %v9177_v18, %v9177_v18  ;;  %v9178_v6 = vld [vmem:[#allocation49_spill] sm:$0xff] }
 0x3b3   : > { %v3329_v11 = vadd.f32 %v3328_v2, %v3053_v50  ;;  %v2769_v29 = vadd.f32 %v2768_v56, %v9174_v61  ;;  %v3058_v50 = vmul.f32 %v9178_v6, %v9178_v6  ;;  %v9179_v61 = vld [vmem:[#allocation50_spill] sm:$0xff] }
 0x3b5   : > { %v3330_v32 = vadd.f32 %v3329_v11, %v3054_v59  ;;  %v2770_v31 = vadd.f32 %v2769_v29, %v9175_v28  ;;  %v3059_v59 = vmul.f32 %v9179_v61, %v9179_v61  ;;  %v9180_v28 = vld [vmem:[#allocation51_spill] sm:$0xff] }
 0x3b7   : > { %v3331_v44 = vadd.f32 %v3330_v32, %v3055_v40  ;;  %v2771_v30 = vadd.f32 %v2770_v31, %v9176_v3  ;;  %v3060_v40 = vmul.f32 %v9180_v28, %v9180_v28  ;;  %v9181_v3 = vld [vmem:[#allocation52_spill] sm:$0xff] }
 0x3b9   : > { %v3332_v12 = vadd.f32 %v3331_v44, %v3056_v52  ;;  %v2772_v25 = vadd.f32 %v2771_v30, %v9177_v18  ;;  %v3061_v52 = vmul.f32 %v9181_v3, %v9181_v3  ;;  %v9182_v18 = vld [vmem:[#allocation53_spill] sm:$0xff] }
 0x3bb   : > { %v3333_v2 = vadd.f32 %v3332_v12, %v3057_v46  ;;  %v2773_v56 = vadd.f32 %v2772_v25, %v9178_v6  ;;  %v3062_v46 = vmul.f32 %v9182_v18, %v9182_v18  ;;  %v9183_v6 = vld [vmem:[#allocation54_spill] sm:$0xff] }
 0x3bd   : > { %v3334_v11 = vadd.f32 %v3333_v2, %v3058_v50  ;;  %v2774_v29 = vadd.f32 %v2773_v56, %v9179_v61  ;;  %v3063_v50 = vmul.f32 %v9183_v6, %v9183_v6 }
 0x3bf   : > { %v3335_v32 = vadd.f32 %v3334_v11, %v3059_v59  ;;  %v2775_v31 = vadd.f32 %v2774_v29, %v9180_v28  ;;  %v3064_v29 = vmul.f32 %v8246_v63, %v8246_v63 }
 0x3c1   : > { %v3336_v44 = vadd.f32 %v3335_v32, %v3060_v40  ;;  %v2776_v30 = vadd.f32 %v2775_v31, %v9181_v3  ;;  %v9184_v32 = vld [vmem:[#allocation55_spill] sm:$0xff]  ;;  %v3066_v3 = vmul.f32 %v8277_v27, %v8277_v27 }
 0x3c2   : > { %v3065_v31 = vmul.f32 %v9184_v32, %v9184_v32 }
 0x3c3   : > { %v3337_v12 = vadd.f32 %v3336_v44, %v3061_v52  ;;  %v2777_v25 = vadd.f32 %v2776_v30, %v9182_v18 }
 0x3c5   : > { %v3338_v2 = vadd.f32 %v3337_v12, %v3062_v46  ;;  %v2778_v56 = vadd.f32 %v2777_v25, %v9183_v6  ;;  %v3067_v12 = vmul.f32 %v8288_v55, %v8288_v55  ;;  %v3068_v25 = vmul.f32 %v8303_v45, %v8303_v45 }
 0x3c7   : > { %v3339_v11 = vadd.f32 %v3338_v2, %v3063_v50  ;;  %v2779_v61 = vadd.f32 %v2778_v56, %v8246_v63  ;;  %v9185_v2 = vld [vmem:[#allocation56_spill] sm:$0xff] }
 0x3c8   : > { %v3069_v56 = vmul.f32 %v9185_v2, %v9185_v2 }
 0x3c9   : > { %v3340_v59 = vadd.f32 %v3339_v11, %v3064_v29  ;;  %v2780_v28 = vadd.f32 %v2779_v61, %v9184_v32 }
 0x3cb   : > { %v3341_v40 = vadd.f32 %v3340_v59, %v3065_v31  ;;  %v2781_v44 = vadd.f32 %v2780_v28, %v8277_v27  ;;  %v9186_v27 = vld [vmem:[#allocation57_spill] sm:$0xff] }
 0x3cc   : > { %v3070_v61 = vmul.f32 %v9186_v27, %v9186_v27 }
 0x3cd   : > { %v3342_v30 = vadd.f32 %v3341_v40, %v3066_v3  ;;  %v2782_v52 = vadd.f32 %v2781_v44, %v8288_v55  ;;  %v9187_v55 = vld [vmem:[#allocation58_spill] sm:$0xff]  ;;  %v9189_v3 = vld [vmem:[#allocation60_spill] sm:$0xff] }
 0x3ce   : > { %v3071_v32 = vmul.f32 %v9187_v55, %v9187_v55 }
 0x3cf   : > { %v3343_v18 = vadd.f32 %v3342_v30, %v3067_v12  ;;  %v2783_v63 = vadd.f32 %v2782_v52, %v8303_v45  ;;  %v9188_v45 = vld [vmem:[#allocation59_spill] sm:$0xff]  ;;  %v3073_v52 = vmul.f32 %v9189_v3, %v9189_v3 }
 0x3d0   : > { %v3072_v40 = vmul.f32 %v9188_v45, %v9188_v45 }
 0x3d1   : > { %v3344_v46 = vadd.f32 %v3343_v18, %v3068_v25  ;;  %v2784_v6 = vadd.f32 %v2783_v63, %v9185_v2  ;;  %v3074_v63 = vmul.f32 %v8369_v34, %v8369_v34 }
 0x3d3   : > { %v3345_v50 = vadd.f32 %v3344_v46, %v3069_v56  ;;  %v2785_v11 = vadd.f32 %v2784_v6, %v9186_v27  ;;  %v9190_v46 = vld [vmem:[#allocation61_spill] sm:$0xff]  ;;  %v3076_v27 = vmul.f32 %v8378_v49, %v8378_v49 }
 0x3d4   : > { %v3075_v6 = vmul.f32 %v9190_v46, %v9190_v46 }
 0x3d5   : > { %v3346_v29 = vadd.f32 %v3345_v50, %v3070_v61  ;;  %v2786_v59 = vadd.f32 %v2785_v11, %v9187_v55 }
 0x3d7   : > { %v3347_v28 = vadd.f32 %v3346_v29, %v3071_v32  ;;  %v2787_v31 = vadd.f32 %v2786_v59, %v9188_v45  ;;  %v3077_v29 = vmul.f32 %v8381_v42, %v8381_v42  ;;  %v3078_v59 = vmul.f32 %v8386_v17, %v8386_v17 }
 0x3d8   : > { %v3079_v45 = vmul.f32 %v8389_v47, %v8389_v47 }
 0x3d9   : > { %v3348_v44 = vadd.f32 %v3347_v28, %v3072_v40  ;;  %v2788_v30 = vadd.f32 %v2787_v31, %v9189_v3  ;;  %v3080_v40 = vmul.f32 %v8397_v4, %v8397_v4  ;;  %v3081_v3 = vmul.f32 %v8406_v33, %v8406_v33 }
 0x3db   : > { %v3349_v12 = vadd.f32 %v3348_v44, %v3073_v52  ;;  %v2789_v18 = vadd.f32 %v2788_v30, %v8369_v34  ;;  %v3082_v52 = vmul.f32 %v8416_v51, %v8416_v51 }
 0x3dd   : > { %v3350_v25 = vadd.f32 %v3349_v12, %v3074_v63  ;;  %v2790_v2 = vadd.f32 %v2789_v18, %v9190_v46  ;;  %v3083_v18 = vmul.f32 %v8425_v16, %v8425_v16 }
 0x3df   : > { %v3351_v56 = vadd.f32 %v3350_v25, %v3075_v6  ;;  %v2791_v50 = vadd.f32 %v2790_v2, %v8378_v49  ;;  %v3084_v25 = vmul.f32 %v8435_v24, %v8435_v24  ;;  %v3085_v2 = vmul.f32 %v8444_v35, %v8444_v35 }
 0x3e1   : > { %v3352_v11 = vadd.f32 %v3351_v56, %v3076_v27  ;;  %v2792_v61 = vadd.f32 %v2791_v50, %v8381_v42  ;;  %v3086_v56 = vmul.f32 %v8454_v0, %v8454_v0  ;;  %v3087_v27 = vmul.f32 %v8463_v8, %v8463_v8 }
 0x3e3   : > { %v3353_v55 = vadd.f32 %v3352_v11, %v3077_v29  ;;  %v2793_v34 = vadd.f32 %v2792_v61, %v8386_v17  ;;  %v3088_v61 = vmul.f32 %v8473_v43, %v8473_v43 }
 0x3e5   : > { %v3354_v32 = vadd.f32 %v3353_v55, %v3078_v59  ;;  %v2794_v28 = vadd.f32 %v2793_v34, %v8389_v47  ;;  %v3089_v55 = vmul.f32 %v8482_v20, %v8482_v20  ;;  %v3090_v59 = vmul.f32 %v8492_v26, %v8492_v26 }
 0x3e7   : > { %v3355_v31 = vadd.f32 %v3354_v32, %v3079_v45  ;;  %v2795_v49 = vadd.f32 %v2794_v28, %v8397_v4  ;;  %v3091_v28 = vmul.f32 %v8501_v62, %v8501_v62 }
 0x3e9   : > { %v3356_v44 = vadd.f32 %v3355_v31, %v3080_v40  ;;  %v2796_v42 = vadd.f32 %v2795_v49, %v8406_v33  ;;  %v3092_v31 = vmul.f32 %v8511_v15, %v8511_v15  ;;  %v3093_v40 = vmul.f32 %v8520_v10, %v8520_v10 }
 0x3eb   : > { %v3357_v30 = vadd.f32 %v3356_v44, %v3081_v3  ;;  %v2797_v17 = vadd.f32 %v2796_v42, %v8416_v51  ;;  %v3094_v42 = vmul.f32 %v8530_v7, %v8530_v7 }
 0x3ed   : > { %v3358_v12 = vadd.f32 %v3357_v30, %v3082_v52  ;;  %v2798_v47 = vadd.f32 %v2797_v17, %v8425_v16  ;;  %v3095_v30 = vmul.f32 %v8539_v36, %v8539_v36  ;;  %v3096_v52 = vmul.f32 %v8549_v5, %v8549_v5 }
 0x3ef   : > { %v3359_v63 = vadd.f32 %v3358_v12, %v3083_v18  ;;  %v2799_v4 = vadd.f32 %v2798_v47, %v8435_v24  ;;  %v3097_v47 = vmul.f32 %v8558_v23, %v8558_v23 }
 0x3f1   : > { %v3360_v46 = vadd.f32 %v3359_v63, %v3084_v25  ;;  %v2800_v33 = vadd.f32 %v2799_v4, %v8444_v35  ;;  %v3098_v63 = vmul.f32 %v8568_v14, %v8568_v14  ;;  %v3099_v25 = vmul.f32 %v8577_v37, %v8577_v37 }
 0x3f3   : > { %v3361_v6 = vadd.f32 %v3360_v46, %v3085_v2  ;;  %v2801_v51 = vadd.f32 %v2800_v33, %v8454_v0  ;;  %v3100_v33 = vmul.f32 %v8587_v19, %v8587_v19 }
 0x3f5   : > { %v3362_v50 = vadd.f32 %v3361_v6, %v3086_v56  ;;  %v2802_v16 = vadd.f32 %v2801_v51, %v8463_v8  ;;  %v3101_v6 = vmul.f32 %v8596_v57, %v8596_v57  ;;  %v3102_v56 = vmul.f32 %v8606_v58, %v8606_v58 }
 0x3f7   : > { %v3363_v11 = vadd.f32 %v3362_v50, %v3087_v27  ;;  %v2803_v24 = vadd.f32 %v2802_v16, %v8473_v43  ;;  %v3103_v16 = vmul.f32 %v8615_v21, %v8615_v21 }
 0x3f9   : > { %v3364_v29 = vadd.f32 %v3363_v11, %v3088_v61  ;;  %v2804_v35 = vadd.f32 %v2803_v24, %v8482_v20  ;;  %v3104_v11 = vmul.f32 %v8625_v38, %v8625_v38  ;;  %v3105_v61 = vmul.f32 %v8634_v1, %v8634_v1 }
 0x3fb   : > { %v3365_v34 = vadd.f32 %v3364_v29, %v3089_v55  ;;  %v2805_v0 = vadd.f32 %v2804_v35, %v8492_v26  ;;  %v3106_v35 = vmul.f32 %v8644_v13, %v8644_v13 }
 0x3fd   : > { %v3366_v32 = vadd.f32 %v3365_v34, %v3090_v59  ;;  %v2806_v8 = vadd.f32 %v2805_v0, %v8501_v62  ;;  %v3107_v34 = vmul.f32 %v8653_v53, %v8653_v53  ;;  %v3108_v59 = vmul.f32 %v8663_v22, %v8663_v22 }
 0x3ff   : > { %v3367_v45 = vadd.f32 %v3366_v32, %v3091_v28  ;;  %v2807_v43 = vadd.f32 %v2806_v8, %v8511_v15  ;;  %v3109_v8 = vmul.f32 %v8672_v60, %v8672_v60 }
 0x401   : > { %v3368_v49 = vadd.f32 %v3367_v45, %v3092_v31  ;;  %v2808_v20 = vadd.f32 %v2807_v43, %v8520_v10  ;;  %v3110_v45 = vmul.f32 %v8682_v54, %v8682_v54  ;;  %v3111_v31 = vmul.f32 %v8691_v48, %v8691_v48 }
 0x403   : > { %v3369_v44 = vadd.f32 %v3368_v49, %v3093_v40  ;;  %v2809_v26 = vadd.f32 %v2808_v20, %v8530_v7  ;;  %v2830_v40 = vsel %vm2829_vm1, %v8720_v39, 0.0 }
 0x405   : > { %v3370_v3 = vadd.f32 %v3369_v44, %v3094_v42  ;;  %v2810_v62 = vadd.f32 %v2809_v26, %v8539_v36  ;;  %v3113_v26 = vmul.f32 %v8710_v9, %v8710_v9 }
 0x407   : > { %v3371_v17 = vadd.f32 %v3370_v3, %v3095_v30  ;;  %v2811_v15 = vadd.f32 %v2810_v62, %v8549_v5 }
 0x409   : > { %v3372_v12 = vadd.f32 %v3371_v17, %v3096_v52  ;;  %v2812_v10 = vadd.f32 %v2811_v15, %v8558_v23 }
 0x40b   : > { %v3373_v18 = vadd.f32 %v3372_v12, %v3097_v47  ;;  %v2813_v7 = vadd.f32 %v2812_v10, %v8568_v14 }
 0x40d   : > { %v3374_v4 = vadd.f32 %v3373_v18, %v3098_v63  ;;  %v2814_v36 = vadd.f32 %v2813_v7, %v8577_v37 }
 0x40f   : > { %v3375_v46 = vadd.f32 %v3374_v4, %v3099_v25  ;;  %v2815_v5 = vadd.f32 %v2814_v36, %v8587_v19 }
 0x411   : > { %v3376_v2 = vadd.f32 %v3375_v46, %v3100_v33  ;;  %v2816_v23 = vadd.f32 %v2815_v5, %v8596_v57 }
 0x413   : > { %v3377_v51 = vadd.f32 %v3376_v2, %v3101_v6  ;;  %v2817_v14 = vadd.f32 %v2816_v23, %v8606_v58 }
 0x415   : > { %v3378_v50 = vadd.f32 %v3377_v51, %v3102_v56  ;;  %v2818_v37 = vadd.f32 %v2817_v14, %v8615_v21 }
 0x417   : > { %v3379_v27 = vadd.f32 %v3378_v50, %v3103_v16  ;;  %v2819_v19 = vadd.f32 %v2818_v37, %v8625_v38 }
 0x419   : > { %v3380_v24 = vadd.f32 %v3379_v27, %v3104_v11  ;;  %v2820_v57 = vadd.f32 %v2819_v19, %v8634_v1 }
 0x41b   : > { %v3381_v29 = vadd.f32 %v3380_v24, %v3105_v61  ;;  %v2821_v58 = vadd.f32 %v2820_v57, %v8644_v13 }
 0x41d   : > { %v3382_v55 = vadd.f32 %v3381_v29, %v3106_v35  ;;  %v2822_v21 = vadd.f32 %v2821_v58, %v8653_v53 }
 0x41f   : > { %v3383_v0 = vadd.f32 %v3382_v55, %v3107_v34  ;;  %v2823_v38 = vadd.f32 %v2822_v21, %v8663_v22  ;;  %v3114_v22 = vmul.f32 %v8720_v39, %v8720_v39 }
 0x421   : > { %v3384_v32 = vadd.f32 %v3383_v0, %v3108_v59  ;;  %v2824_v1 = vadd.f32 %v2823_v38, %v8672_v60  ;;  %v3112_v60 = vmul.f32 %v8701_v41, %v8701_v41 }
 0x423   : > { %v3385_v28 = vadd.f32 %v3384_v32, %v3109_v8  ;;  %v2825_v13 = vadd.f32 %v2824_v1, %v8682_v54 }
 0x425   : > { %v3386_v43 = vadd.f32 %v3385_v28, %v3110_v45  ;;  %v2826_v53 = vadd.f32 %v2825_v13, %v8691_v48  ;;  %v3390_v48 = vsel %vm2829_vm1, %v3114_v22, 0.0 }
 0x427   : > { %v3387_v49 = vadd.f32 %v3386_v43, %v3111_v31  ;;  %v2827_v20 = vadd.f32 %v2826_v53, %v8701_v41 }
 0x429   : > { %v3388_v44 = vadd.f32 %v3387_v49, %v3112_v60  ;;  %v2828_v54 = vadd.f32 %v2827_v20, %v8710_v9 }
 0x42b   : > { %v3389_v42 = vadd.f32 %v3388_v44, %v3113_v26  ;;  %v2831_v3 = vadd.f32 %v2830_v40, %v2828_v54 }
 0x42d   : > { %v2832_v62 = vrot.slane %v2831_v3, 4  ;;  %v3391_v30 = vadd.f32 %v3390_v48, %v3389_v42 }
 0x42f   : > { %v2833_v17 = vadd.f32 %v2832_v62, %v2831_v3  ;;  %v3392_v15 = vrot.slane %v3391_v30, 4 }
 0x431   : > { %v2834_v52 = vrot.slane %v2833_v17, 2  ;;  %v3393_v41 = vadd.f32 %v3392_v15, %v3391_v30 }
 0x433   : > { %v2835_v12 = vadd.f32 %v2834_v52, %v2833_v17  ;;  %v3394_v10 = vrot.slane %v3393_v41, 2 }
 0x435   : > { %v2836_v39 = vrot.slane %v2835_v12, 1  ;;  %v3395_v47 = vadd.f32 %v3394_v10, %v3393_v41 }
 0x437   : > { %v3396_v18 = vrot.slane %v3395_v47, 1  ;;  %v2837_v9 = vadd.f32 %v2836_v39, %v2835_v12 }
 0x439   : > { %v3397_v7 = vadd.f32 %v3396_v18, %v3395_v47 }
 0x43b   : > { %v3398_v63 = vsel %vm2829_vm1, %v2837_v9, %v3397_v7 }
 0x43c   : > { %3399 = vst [vmem:[%s235_s19] sm:$0x3] %v3398_v63 }
 0x43d PF: > { %s16_s18 = sadd.s32 1, %s7314_s18  }
 0x43e   : > { %p13_p4 = scmp.ge.s32.totalorder %s16_s18, 4  }
 0x440   :  { %15 = sbr.rel (!%p13_p4) target bundleno = 1 (0x1), region = 78 }

// kernel: tile.43
= control target key start
LH: loop header
LB: loop body
LE: loop exit
PB: predicated region body
PF: predicated region fallthrough
CT: control target
= control target key end

     0   :  { %s40_s0 = inlined_call_operand.vmem [shape: f32[8], index: 0, kind: input, shape index: {}]   ;;  %s41_s1 = inlined_call_operand.vmem [shape: f32[25,8], index: 1, kind: output, shape index: {}]  }
   0x1   :  { %v4_v0 = vld [vmem:[%s40_s0] ss:$0 sm:$0xff] }
   0x2   :  { %5 = vst [vmem:[%s41_s1] sm:$0xff] %v4_v0  ;;  %12 = vst [vmem:[%s41_s1 + $0x8] sm:$0xff] %v4_v0 }
   0x3   :  { %13 = vst [vmem:[%s41_s1 + $0x10] sm:$0xff] %v4_v0  ;;  %14 = vst [vmem:[%s41_s1 + $0x18] sm:$0xff] %v4_v0 }

// kernel: tile.44
= control target key start
LH: loop header
LB: loop body
LE: loop exit
PB: predicated region body
PF: predicated region fallthrough
CT: control target
= control target key end

     0   :  { %s142_s10 = smov 120   ;;  %s143_s11 = smov 104   ;;  %vm4_vm0 = vcmask 64512   ;;  %vm10_vm1 = vcmask 1048512   ;;  %vm16_vm2 = vcmask 982912   ;;  %vm22_vm3 = vcmask 917312   ;;  %s218_s0 = inlined_call_operand.vmem [shape: f32[25,8], index: 0, kind: input, shape index: {}]   ;;  %s219_s1 = inlined_call_operand.vmem [shape: f32[200], index: 1, kind: output, shape index: {}]  }
   0x1   :  { %v112_v0 = vld [vmem:[%s218_s0 + $0xf] sm:$0x1]   ;;  %v114_v1 = vld [vmem:[%s218_s0 + $0xd] sm:$0x1]   ;;  %v113_v2 = vld [vmem:[%s218_s0 + $0xe] sm:$0x1]  }
   0x2   :  { %8 = vrot.lane.b32.xlu0 %v112_v0, %s142_s10  ;;  %20 = vrot.lane.b32.xlu1 %v114_v1, %s143_s11  ;;  %v115_v3 = vld [vmem:[%s218_s0 + $0xc] sm:$0x1]   ;;  %s144_s16 = smov 112   ;;  %s145_s17 = smov 96   ;;  %v116_v4 = vld [vmem:[%s218_s0 + $0xb] sm:$0x1]  }
   0x3   :  { %v117_v5 = vld [vmem:[%s218_s0 + $0xa] sm:$0x1]   ;;  %s49_s22 = smov 3  ;;  %s146_s23 = smov 88   ;;  %v118_v6 = vld [vmem:[%s218_s0 + $0x9] sm:$0x1]  }
   0x4   :  { %s147_s24 = smov 80   ;;  %v119_v7 = vld [vmem:[%s218_s0 + $0x8] ss:$16 sm:%s49_s22]   ;;  %s56_s29 = smov 3  ;;  %vm28_vm4 = vcmask 851712   ;;  %vm34_vm5 = vcmask 786112  }
   0x5   :  { %s63_s30 = smov 3  ;;  %s2_s2 = smov 3  ;;  %v120_v9 = vld [vmem:[%s218_s0 + $0x7] ss:$16 sm:%s56_s29]   ;;  %vm40_vm6 = vcmask 720512   ;;  %vm46_vm7 = vcmask 654912  }
   0x6   :  { %14 = vrot.lane.b32.xlu0 %v113_v2, %s144_s16  ;;  %26 = vrot.lane.b32.xlu1 %v115_v3, %s145_s17  ;;  %v3_v8 = vld [vmem:[%s218_s0] ss:$16 sm:%s2_s2]   ;;  %s148_s5 = smov 72   ;;  %s149_s6 = smov 64   ;;  %vm53_vm8 = vcmask 589312   ;;  %vm60_vm9 = vcmask 523712  }
   0x7   :  { %5 = vst.msk [vmem:[#allocation0] sm:$0x3] %vm4_vm0, %v3_v8   ;;  %v121_v10 = vld [vmem:[%s218_s0 + $0x6] ss:$16 sm:%s63_s30]   ;;  %s70_s11 = smov 3  ;;  %s77_s12 = smov 3 }
   0x8   :  { %s150_s13 = smov 56   ;;  %s151_s14 = smov 48   ;;  %v122_v11 = vld [vmem:[%s218_s0 + $0x5] ss:$16 sm:%s70_s11]   ;;  %v123_v12 = vld [vmem:[%s218_s0 + $0x4] ss:$16 sm:%s77_s12]  }
   0x9   :  { %s84_s19 = smov 3  ;;  %s91_s20 = smov 3  ;;  %vm67_vm10 = vcmask 458112   ;;  %vm74_vm11 = vcmask 392512   ;;  %vm81_vm12 = vcmask 326912   ;;  %vm88_vm13 = vcmask 261312  }
   0xa   :  { %32 = vrot.lane.b32.xlu0 %v116_v4, %s146_s23  ;;  %38 = vrot.lane.b32.xlu1 %v117_v5, %s147_s24  ;;  %s152_s21 = smov 40   ;;  %s153_s22 = smov 32   ;;  %v124_v13 = vld [vmem:[%s218_s0 + $0x3] ss:$16 sm:%s84_s19]   ;;  %vm95_vm14 = vcmask 195712   ;;  %vm102_vm15 = vcmask 130112  }
   0xb   :  { %v125_v14 = vld [vmem:[%s218_s0 + $0x2] ss:$16 sm:%s91_s20]   ;;  %s98_s27 = smov 3  ;;  %s154_s28 = smov 24  }
   0xc   :  { %s155_s29 = smov 16   ;;  %v126_v15 = vld [vmem:[%s218_s0 + $0x1] ss:$16 sm:%s98_s27]   ;;  %s156_s0 = smov 8  }
   0xe   :  { %44 = vrot.lane.b32.xlu0 %v118_v6, %s148_s5  ;;  %51 = vrot.lane.b32.xlu1 %v119_v7, %s149_s6 }
  0x12   :  { %58 = vrot.lane.b32.xlu0 %v120_v9, %s150_s13  ;;  %65 = vrot.lane.b32.xlu1 %v121_v10, %s151_s14 }
  0x16   :  { %72 = vrot.lane.b32.xlu0 %v122_v11, %s152_s21  ;;  %79 = vrot.lane.b32.xlu1 %v123_v12, %s153_s22 }
  0x1a   :  { %86 = vrot.lane.b32.xlu0 %v124_v13, %s154_s28  ;;  %93 = vrot.lane.b32.xlu1 %v125_v14, %s155_s29 }
  0x1e   :  { %100 = vrot.lane.b32.xlu0 %v126_v15, %s156_s0 }
  0x74   :  { %v9_v16 = vpop.permute.xlu0 %8   ;;  %v21_v17 = vpop.permute.xlu1 %20  }
  0x75   :  { %11 = vst.msk [vmem:[#allocation0] sm:$0x1] %vm10_vm1, %v9_v16  }
  0x78   :  { %v15_v18 = vpop.permute.xlu0 %14   ;;  %v27_v19 = vpop.permute.xlu1 %26  }
  0x79   :  { %17 = vst.msk [vmem:[#allocation0] sm:$0x1] %vm16_vm2, %v15_v18  }
  0x7a   :  { %23 = vst.msk [vmem:[#allocation0] sm:$0x1] %vm22_vm3, %v21_v17  }
  0x7b   :  { %29 = vst.msk [vmem:[#allocation0] sm:$0x1] %vm28_vm4, %v27_v19  }
  0x7c   :  { %v33_v20 = vpop.permute.xlu0 %32   ;;  %v39_v21 = vpop.permute.xlu1 %38  }
  0x7d   :  { %35 = vst.msk [vmem:[#allocation0] sm:$0x1] %vm34_vm5, %v33_v20  }
  0x7e   :  { %41 = vst.msk [vmem:[#allocation0] sm:$0x1] %vm40_vm6, %v39_v21  }
  0x80   :  { %v45_v22 = vpop.permute.xlu0 %44   ;;  %v52_v23 = vpop.permute.xlu1 %51  }
  0x81   :  { %47 = vst.msk [vmem:[#allocation0] sm:$0x1] %vm46_vm7, %v45_v22  }
  0x82   :  { %54 = vst.msk [vmem:[#allocation0] sm:$0x3] %vm53_vm8, %v52_v23  }
  0x84   :  { %v59_v24 = vpop.permute.xlu0 %58   ;;  %v66_v25 = vpop.permute.xlu1 %65  }
  0x85   :  { %61 = vst.msk [vmem:[#allocation0] sm:$0x3] %vm60_vm9, %v59_v24  }
  0x86   :  { %68 = vst.msk [vmem:[#allocation0] sm:$0x3] %vm67_vm10, %v66_v25  }
  0x88   :  { %v73_v26 = vpop.permute.xlu0 %72   ;;  %v80_v27 = vpop.permute.xlu1 %79  }
  0x89   :  { %75 = vst.msk [vmem:[#allocation0] sm:$0x3] %vm74_vm11, %v73_v26  }
  0x8a   :  { %82 = vst.msk [vmem:[#allocation0] sm:$0x3] %vm81_vm12, %v80_v27  }
  0x8c   :  { %v87_v28 = vpop.permute.xlu0 %86   ;;  %v94_v29 = vpop.permute.xlu1 %93  }
  0x8d   :  { %89 = vst.msk [vmem:[#allocation0] sm:$0x3] %vm88_vm13, %v87_v28  }
  0x8e   :  { %96 = vst.msk [vmem:[#allocation0] sm:$0x3] %vm95_vm14, %v94_v29  }
  0x90   :  { %v101_v30 = vpop.permute.xlu0 %100  }
  0x91   :  { %103 = vst.msk [vmem:[#allocation0] sm:$0x3] %vm102_vm15, %v101_v30  }
  0x98   :  { %v108_v31 = vld [vmem:[#allocation0] sm:$0x3] }
  0x99   :  { %111 = vst [vmem:[%s219_s1] sm:$0x3] %v108_v31 }

// kernel: discriminator_forward.6
= control target key start
LH: loop header
LB: loop body
LE: loop exit
PB: predicated region body
PF: predicated region fallthrough
CT: control target
= control target key end

     0   :  { %s2730_s18 = smov 0   ;;  %s3816_s0 = inlined_call_operand.vmem [shape: bf16[2,529,256], index: 0, kind: input, shape index: {}]   ;;  %s3817_s1 = inlined_call_operand.vmem [shape: bf16[256,128], index: 1, kind: input, shape index: {}]   ;;  %s3818_s2 = inlined_call_operand.vmem [shape: f32[1,256], index: 2, kind: input, shape index: {}]   ;;  %s3819_s3 = inlined_call_operand.vmem [shape: f32[1,256], index: 3, kind: input, shape index: {}]   ;;  %s3820_s4 = inlined_call_operand.vmem [shape: bf16[2,529,128], index: 4, kind: output, shape index: {0}]   ;;  %s3821_s5 = inlined_call_operand.vmem [shape: f32[2,2,128], index: 5, kind: output, shape index: {1}]  }
   0x1 LB: > { %s2275_s19 = sadd.s32 4294967295, %s2697_s18   ;;  %p2279_p0 = scmp.ge.s32.totalorder %s2697_s18, 1  ;;  %s2697_s18 = sphi %s2730_s18, %s16_s18  }
   0x2   : > { %p190_p1 = scmp.lt.s32.totalorder %s2697_s18, 3 }
   0x4   : > { %p191_p2 = pnand %p2279_p0, %p190_p1 }
   0x5   : > { %p222_p3 = scmp.lt.s32.totalorder (!%p191_p2), %s2275_s19, 1 }
   0x6   : > { %194 = sbr.rel (%p191_p2) target bundleno = 485 (0x1e5), region = 36 }
   0xb   : > { %v2675_v0 = vld [vmem:[%s3817_s1 + $0x38] sm:$0xff]   ;;  %v2699_v1 = vmov 0   ;;  %v2676_v2 = vld [vmem:[%s3817_s1 + $0x30] sm:$0xff]   ;;  %s3823_s19 = smov (!%p222_p3, %s2275_s19), 1  ;;  %v2677_v3 = vld [vmem:[%s3817_s1 + $0x28] sm:$0xff]   ;;  %v440_v4 = vlaneseq }
   0xc   : > { %1328 = vmatprep.subr.bf16.mxu0 %v2699_v1  ;;  %2632 = vmatprep.subr.bf16.mxu1 %v2699_v1  ;;  %s2664_s26 = smul.u32 536, %s3823_s19  ;;  %v2678_v5 = vld [vmem:[%s3817_s1 + $0x20] sm:$0xff]   ;;  %v2679_v7 = vld [vmem:[%s3817_s1 + $0x18] sm:$0xff]   ;;  %v2680_v20 = vld [vmem:[%s3817_s1 + $0x10] sm:$0xff]   ;;  %s2282_s16 = sshll.u32 %s3823_s19, 1 }
   0xd   : > { %1329 = vmatpush1.bf16.msra.mxu0 %v2675_v0  ;;  %2648 = vmatpush1.bf16.msra.mxu1 %v2675_v0  ;;  %v441_v6 = vshrl.u32 %v440_v4, 7  ;;  %v438_v12 = vld [vmem:[%s3818_s2] sm:$0x3]  ;;  %v2681_v37 = vld [vmem:[%s3817_s1 + $0x8] sm:$0xff]   ;;  %s235_s21 = scalar_lea.vmem %s3821_s5, %s2282_s16 }
   0xe   : > { %1330 = vmatprep.subr.bf16.mxu0 %v2699_v1  ;;  %2633 = vmatprep.subr.bf16.mxu1 %v2699_v1  ;;  %s2767_s8 = scalar_lea.vmem %s3816_s0, %s2664_s26  ;;  %v584_v17 = vld [vmem:[%s3819_s3] sm:$0x3] }
   0xf   : > { %v442_v8 = vsub.s32 0, %v441_v6  ;;  %v446_v9 = vsub.s32 1, %v441_v6  ;;  %v237_v10 = vld [vmem:[%s2767_s8] sm:$0xff]  ;;  %v238_v11 = vld [vmem:[%s2767_s8 + $0x8] sm:$0xff]  ;;  %v239_v18 = vld [vmem:[%s2767_s8 + $0x10] sm:$0xff] }
  0x10   : > { %v304_v13 = vunpack.c.l.bf16 %v237_v10  ;;  %v305_v14 = vunpack.c.h.bf16 %v237_v10  ;;  %v306_v15 = vunpack.c.l.bf16 %v238_v11  ;;  %v307_v16 = vunpack.c.h.bf16 %v238_v11  ;;  %v240_v19 = vld [vmem:[%s2767_s8 + $0x18] sm:$0xff]  ;;  %v2682_v50 = vld [vmem:[%s3817_s1] sm:$0xff]   ;;  %v242_v58 = vld [vmem:[%s2767_s8 + $0x28] sm:$0xff] }
  0x11   : > { %1331 = vmatpush1.bf16.msra.mxu0 %v2676_v2  ;;  %2649 = vmatpush1.bf16.msra.mxu1 %v2676_v2  ;;  %v2784_v21 = vrot.slane %v438_v12, %v442_v8  ;;  %v2786_v22 = vrot.slane %v438_v12, %v446_v9  ;;  %v2788_v23 = vrot.slane %v584_v17, %v442_v8  ;;  %v309_v25 = vunpack.c.h.bf16 %v239_v18  ;;  %v241_v53 = vld [vmem:[%s2767_s8 + $0x20] sm:$0xff]  ;;  %v2683_v2 = vld [vmem:[%s3817_s1 + $0x78] sm:$0xff]  }
  0x12   : > { %1332 = vmatprep.subr.bf16.mxu0 %v2699_v1  ;;  %2634 = vmatprep.subr.bf16.mxu1 %v2699_v1  ;;  %v2790_v24 = vrot.slane %v584_v17, %v446_v9  ;;  %v311_v26 = vunpack.c.h.bf16 %v240_v19  ;;  %v308_v27 = vunpack.c.l.bf16 %v239_v18  ;;  %v310_v28 = vunpack.c.l.bf16 %v240_v19  ;;  %v244_v8 = vld [vmem:[%s2767_s8 + $0x38] sm:$0xff] }
  0x13   : > { %v451_v29 = vmul.f32 %v2786_v22, %v305_v14  ;;  %v453_v30 = vmul.f32 %v2786_v22, %v307_v16  ;;  %v450_v31 = vmul.f32 %v2784_v21, %v304_v13  ;;  %v452_v32 = vmul.f32 %v2784_v21, %v306_v15 }
  0x14   : > { %v455_v33 = vmul.f32 %v2786_v22, %v309_v25  ;;  %v457_v34 = vmul.f32 %v2786_v22, %v311_v26  ;;  %v454_v35 = vmul.f32 %v2784_v21, %v308_v27  ;;  %v456_v36 = vmul.f32 %v2784_v21, %v310_v28  ;;  %v2684_v25 = vld [vmem:[%s3817_s1 + $0x70] sm:$0xff]  }
  0x15   : > { %1333 = vmatpush1.bf16.msra.mxu0 %v2677_v3  ;;  %2650 = vmatpush1.bf16.msra.mxu1 %v2677_v3  ;;  %v597_v38 = vadd.f32 %v2790_v24, %v451_v29  ;;  %v599_v39 = vadd.f32 %v2790_v24, %v453_v30  ;;  %v596_v40 = vadd.f32 %v2788_v23, %v450_v31  ;;  %v313_v0 = vunpack.c.h.bf16 %v241_v53 }
  0x16   : > { %1334 = vmatprep.subr.bf16.mxu0 %v2699_v1  ;;  %2635 = vmatprep.subr.bf16.mxu1 %v2699_v1  ;;  %v598_v41 = vadd.f32 %v2788_v23, %v452_v32  ;;  %v601_v42 = vadd.f32 %v2790_v24, %v455_v33  ;;  %v603_v43 = vadd.f32 %v2790_v24, %v457_v34  ;;  %v315_v4 = vunpack.c.h.bf16 %v242_v58 }
  0x17   : > { %v600_v44 = vadd.f32 %v2788_v23, %v454_v35  ;;  %v602_v45 = vadd.f32 %v2788_v23, %v456_v36  ;;  %vm731_vm0 = vcmp.ge.f32.partialorder %v597_v38, 0.0  ;;  %vm733_vm1 = vcmp.ge.f32.partialorder %v599_v39, 0.0 }
  0x18   : > { %v865_v46 = vmul.f32 0.2, %v597_v38  ;;  %v867_v47 = vmul.f32 0.2, %v599_v39  ;;  %vm730_vm2 = vcmp.ge.f32.partialorder %v596_v40, 0.0  ;;  %vm732_vm3 = vcmp.ge.f32.partialorder %v598_v41, 0.0 }
  0x19   : > { %1335 = vmatpush1.bf16.msra.mxu0 %v2678_v5  ;;  %2651 = vmatpush1.bf16.msra.mxu1 %v2678_v5  ;;  %v864_v48 = vmul.f32 0.2, %v596_v40  ;;  %v866_v49 = vmul.f32 0.2, %v598_v41  ;;  %vm735_vm4 = vcmp.ge.f32.partialorder %v601_v42, 0.0  ;;  %vm737_vm5 = vcmp.ge.f32.partialorder %v603_v43, 0.0 }
  0x1a   : > { %1336 = vmatprep.subr.bf16.mxu0 %v2699_v1  ;;  %2636 = vmatprep.subr.bf16.mxu1 %v2699_v1  ;;  %v999_v51 = vsel %vm731_vm0, %v597_v38, %v865_v46  ;;  %v1001_v52 = vsel %vm733_vm1, %v599_v39, %v867_v47  ;;  %v869_v57 = vmul.f32 0.2, %v601_v42  ;;  %v871_v60 = vmul.f32 0.2, %v603_v43  ;;  %v2685_v38 = vld [vmem:[%s3817_s1 + $0x68] sm:$0xff]  }
  0x1b   : > { %v1133_v54 = vpack.c.bf16 %v1001_v52, %v999_v51  ;;  %v2820_v55 = vsel %vm730_vm2, %v596_v40, %v864_v48  ;;  %v2822_v56 = vsel %vm732_vm3, %v598_v41, %v866_v49  ;;  %vm734_vm6 = vcmp.ge.f32.partialorder %v600_v44, 0.0 }
  0x1c   : > { %v1132_v59 = vpack.c.bf16 %v2822_v56, %v2820_v55  ;;  %vm736_vm7 = vcmp.ge.f32.partialorder %v602_v45, 0.0  ;;  %v2827_v61 = vsel %vm735_vm4, %v601_v42, %v869_v57  ;;  %v868_v62 = vmul.f32 0.2, %v600_v44  ;;  %v2686_v57 = vld [vmem:[%s3817_s1 + $0x60] sm:$0xff]  }
  0x1d   : > { %1337 = vmatpush1.bf16.msra.mxu0 %v2679_v7  ;;  %2652 = vmatpush1.bf16.msra.mxu1 %v2679_v7  ;;  %v870_v63 = vmul.f32 0.2, %v602_v45  ;;  %v2834_v3 = vsel %vm737_vm5, %v603_v43, %v871_v60  ;;  %v312_v5 = vunpack.c.l.bf16 %v241_v53  ;;  %v314_v6 = vunpack.c.l.bf16 %v242_v58  ;;  %v243_v7 = vld [vmem:[%s2767_s8 + $0x30] sm:$0xff]  ;;  %v245_v43 = vld [vmem:[%s2767_s8 + $0x40] sm:$0xff] }
  0x1e   : > { %1338 = vmatprep.subr.bf16.mxu0 %v2699_v1  ;;  %2637 = vmatprep.subr.bf16.mxu1 %v2699_v1  ;;  %v1135_v9 = vpack.c.bf16 %v2834_v3, %v2827_v61  ;;  %v2842_v10 = vsel %vm734_vm6, %v600_v44, %v868_v62  ;;  %v459_v12 = vmul.f32 %v2786_v22, %v313_v0  ;;  %v317_v18 = vunpack.c.h.bf16 %v243_v7  ;;  %v246_v44 = vld [vmem:[%s2767_s8 + $0x48] sm:$0xff]  ;;  %v247_v0 = vld [vmem:[%s2767_s8 + $0x50] sm:$0xff] }
  0x1f   : > { %1360 = vmatprep.mubr.bf16.mxu0 %v1133_v54  ;;  %v2845_v11 = vsel %vm736_vm7, %v602_v45, %v870_v63  ;;  %v461_v14 = vmul.f32 %v2786_v22, %v315_v4  ;;  %v458_v15 = vmul.f32 %v2784_v21, %v312_v5  ;;  %v460_v16 = vmul.f32 %v2784_v21, %v314_v6 }
  0x20   : > { %v1134_v13 = vpack.c.bf16 %v2845_v11, %v2842_v10  ;;  %v605_v17 = vadd.f32 %v2790_v24, %v459_v12  ;;  %v319_v19 = vunpack.c.h.bf16 %v244_v8  ;;  %v318_v29 = vunpack.c.l.bf16 %v244_v8 }
  0x21   : > { %1339 = vmatpush1.bf16.msra.mxu0 %v2680_v20  ;;  %2653 = vmatpush1.bf16.msra.mxu1 %v2680_v20  ;;  %v316_v20 = vunpack.c.l.bf16 %v243_v7  ;;  %v607_v26 = vadd.f32 %v2790_v24, %v461_v14  ;;  %v604_v27 = vadd.f32 %v2788_v23, %v458_v15  ;;  %v606_v28 = vadd.f32 %v2788_v23, %v460_v16 }
  0x22   : > { %1340 = vmatprep.subr.bf16.mxu0 %v2699_v1  ;;  %2638 = vmatprep.subr.bf16.mxu1 %v2699_v1  ;;  %vm739_vm8 = vcmp.ge.f32.partialorder %v605_v17, 0.0  ;;  %v873_v30 = vmul.f32 0.2, %v605_v17  ;;  %v463_v31 = vmul.f32 %v2786_v22, %v317_v18  ;;  %v465_v32 = vmul.f32 %v2786_v22, %v319_v19  ;;  %v2687_v18 = vld [vmem:[%s3817_s1 + $0x58] sm:$0xff]  }
  0x23   : > { %vm741_vm9 = vcmp.ge.f32.partialorder %v607_v26, 0.0  ;;  %v875_v33 = vmul.f32 0.2, %v607_v26  ;;  %vm738_vm10 = vcmp.ge.f32.partialorder %v604_v27, 0.0  ;;  %vm740_vm11 = vcmp.ge.f32.partialorder %v606_v28, 0.0 }
  0x24   : > { %v2864_v34 = vsel %vm739_vm8, %v605_v17, %v873_v30  ;;  %v872_v35 = vmul.f32 0.2, %v604_v27  ;;  %v874_v36 = vmul.f32 0.2, %v606_v28  ;;  %v611_v40 = vadd.f32 %v2790_v24, %v465_v32 }
  0x25   : > { %1341 = vmatpush1.bf16.msra.mxu0 %v2681_v37  ;;  %2654 = vmatpush1.bf16.msra.mxu1 %v2681_v37  ;;  %v609_v37 = vadd.f32 %v2790_v24, %v463_v31  ;;  %v2871_v39 = vsel %vm741_vm9, %v607_v26, %v875_v33  ;;  %v462_v41 = vmul.f32 %v2784_v21, %v316_v20  ;;  %v321_v53 = vunpack.c.h.bf16 %v245_v43 }
  0x26   : > { %1342 = vmatprep.subr.bf16.mxu0 %v2699_v1  ;;  %2639 = vmatprep.subr.bf16.mxu1 %v2699_v1  ;;  %v464_v42 = vmul.f32 %v2784_v21, %v318_v29  ;;  %v1137_v45 = vpack.c.bf16 %v2871_v39, %v2864_v34  ;;  %v2882_v46 = vsel %vm738_vm10, %v604_v27, %v872_v35  ;;  %vm745_vm13 = vcmp.ge.f32.partialorder %v611_v40, 0.0 }
  0x27   : > { %v2885_v47 = vsel %vm740_vm11, %v606_v28, %v874_v36  ;;  %vm743_vm12 = vcmp.ge.f32.partialorder %v609_v37, 0.0  ;;  %v877_v49 = vmul.f32 0.2, %v609_v37  ;;  %v608_v51 = vadd.f32 %v2788_v23, %v462_v41  ;;  %v2688_v36 = vld [vmem:[%s3817_s1 + $0x50] sm:$0xff]  }
  0x28   : > { %v1136_v48 = vpack.c.bf16 %v2885_v47, %v2882_v46  ;;  %v610_v52 = vadd.f32 %v2788_v23, %v464_v42  ;;  %v323_v54 = vunpack.c.h.bf16 %v246_v44  ;;  %v320_v62 = vunpack.c.l.bf16 %v245_v43  ;;  %v249_v42 = vld [vmem:[%s2767_s8 + $0x60] sm:$0xff] }
  0x29   : > { %1343 = vmatpush1.bf16.msra.mxu0 %v2682_v50  ;;  %2655 = vmatpush1.bf16.msra.mxu1 %v2682_v50  ;;  %v879_v50 = vmul.f32 0.2, %v611_v40  ;;  %v2895_v58 = vsel %vm743_vm12, %v609_v37, %v877_v49  ;;  %v322_v63 = vunpack.c.l.bf16 %v246_v44  ;;  %vm742_vm14 = vcmp.ge.f32.partialorder %v608_v51, 0.0 }
  0x2a   : > { %1344 = vmatprep.subr.bf16.mxu0 %v2699_v1  ;;  %2640 = vmatprep.subr.bf16.mxu1 %v2699_v1  ;;  %vm744_vm15 = vcmp.ge.f32.partialorder %v610_v52, 0.0  ;;  %v876_v5 = vmul.f32 0.2, %v608_v51  ;;  %v878_v6 = vmul.f32 0.2, %v610_v52  ;;  %v467_v7 = vmul.f32 %v2786_v22, %v321_v53 }
  0x2b   : > { %v2897_v60 = vsel %vm745_vm13, %v611_v40, %v879_v50  ;;  %v469_v8 = vmul.f32 %v2786_v22, %v323_v54  ;;  %v466_v12 = vmul.f32 %v2784_v21, %v320_v62  ;;  %v468_v15 = vmul.f32 %v2784_v21, %v322_v63 }
  0x2c   : > { %v1139_v4 = vpack.c.bf16 %v2897_v60, %v2895_v58  ;;  %v2909_v14 = vsel %vm742_vm14, %v608_v51, %v876_v5  ;;  %v325_v16 = vunpack.c.h.bf16 %v247_v0  ;;  %v2917_v19 = vsel %vm744_vm15, %v610_v52, %v878_v6  ;;  %v250_v51 = vld [vmem:[%s2767_s8 + $0x68] sm:$0xff] }
  0x2d   : > { %1345 = vmatpush2.bf16.msra.mxu0 %v2683_v2  ;;  %2656 = vmatpush2.bf16.msra.mxu1 %v2683_v2  ;;  %v2901_v2 = vld [vmem:[%s2767_s8 + $0x58] sm:$0xff]  ;;  %v613_v20 = vadd.f32 %v2790_v24, %v467_v7  ;;  %v612_v26 = vadd.f32 %v2788_v23, %v466_v12  ;;  %v1138_v27 = vpack.c.bf16 %v2917_v19, %v2909_v14  ;;  %v324_v50 = vunpack.c.l.bf16 %v247_v0  ;;  %v2689_v0 = vld [vmem:[%s3817_s1 + $0x48] sm:$0xff]   ;;  %v3109_v19 = vld [vmem:[%s2767_s8 + $0xa0] sm:$0xff] }
  0x2e   : > { %1346 = vmatprep.subr.bf16.mxu0 %v2699_v1  ;;  %2641 = vmatprep.subr.bf16.mxu1 %v2699_v1  ;;  %v327_v17 = vunpack.c.h.bf16 %v2901_v2  ;;  %v614_v28 = vadd.f32 %v2788_v23, %v468_v15  ;;  %v471_v29 = vmul.f32 %v2786_v22, %v325_v16  ;;  %v329_v63 = vunpack.c.h.bf16 %v249_v42 }
  0x2f   : > { %vm747_vm0 = vcmp.ge.f32.partialorder %v613_v20, 0.0  ;;  %v881_v31 = vmul.f32 0.2, %v613_v20  ;;  %vm746_vm2 = vcmp.ge.f32.partialorder %v612_v26, 0.0  ;;  %v880_v33 = vmul.f32 0.2, %v612_v26 }
  0x30   : > { %v473_v30 = vmul.f32 %v2786_v22, %v327_v17  ;;  %vm748_vm3 = vcmp.ge.f32.partialorder %v614_v28, 0.0  ;;  %v882_v35 = vmul.f32 0.2, %v614_v28  ;;  %v617_v40 = vadd.f32 %v2790_v24, %v471_v29  ;;  %v251_v17 = vld [vmem:[%s2767_s8 + $0x70] sm:$0xff] }
  0x31   : > { %1347 = vmatpush2.bf16.msra.mxu0 %v2684_v25  ;;  %2657 = vmatpush2.bf16.msra.mxu1 %v2684_v25  ;;  %v615_v25 = vadd.f32 %v2790_v24, %v469_v8  ;;  %v2932_v37 = vsel %vm747_vm0, %v613_v20, %v881_v31  ;;  %v2942_v44 = vsel %vm746_vm2, %v612_v26, %v880_v33  ;;  %v331_v6 = vunpack.c.h.bf16 %v250_v51  ;;  %v2690_v31 = vld [vmem:[%s3817_s1 + $0x40] sm:$0xff]  }
  0x32   : > { %1348 = vmatprep.subr.bf16.mxu0 %v2699_v1  ;;  %2642 = vmatprep.subr.bf16.mxu1 %v2699_v1  ;;  %v619_v41 = vadd.f32 %v2790_v24, %v473_v30  ;;  %v2944_v49 = vsel %vm748_vm3, %v614_v28, %v882_v35  ;;  %vm751_vm4 = vcmp.ge.f32.partialorder %v617_v40, 0.0  ;;  %v885_v53 = vmul.f32 0.2, %v617_v40 }
  0x33   : > { %vm749_vm1 = vcmp.ge.f32.partialorder %v615_v25, 0.0  ;;  %v883_v32 = vmul.f32 0.2, %v615_v25  ;;  %v1140_v52 = vpack.c.bf16 %v2944_v49, %v2942_v44  ;;  %v470_v62 = vmul.f32 %v2784_v21, %v324_v50 }
  0x34   : > { %vm753_vm5 = vcmp.ge.f32.partialorder %v619_v41, 0.0  ;;  %v887_v54 = vmul.f32 0.2, %v619_v41  ;;  %v2955_v5 = vsel %vm751_vm4, %v617_v40, %v885_v53  ;;  %v328_v7 = vunpack.c.l.bf16 %v249_v42  ;;  %v252_v42 = vld [vmem:[%s2767_s8 + $0x78] sm:$0xff] }
  0x35   : > { %1349 = vmatpush2.bf16.msra.mxu0 %v2685_v38  ;;  %2658 = vmatpush2.bf16.msra.mxu1 %v2685_v38  ;;  %v2934_v38 = vsel %vm749_vm1, %v615_v25, %v883_v32  ;;  %v330_v8 = vunpack.c.l.bf16 %v250_v51  ;;  %v616_v15 = vadd.f32 %v2788_v23, %v470_v62  ;;  %v475_v16 = vmul.f32 %v2786_v22, %v329_v63 }
  0x36   : > { %1350 = vmatprep.subr.bf16.mxu0 %v2699_v1  ;;  %2643 = vmatprep.subr.bf16.mxu1 %v2699_v1  ;;  %v1141_v43 = vpack.c.bf16 %v2934_v38, %v2932_v37  ;;  %v2958_v12 = vsel %vm753_vm5, %v619_v41, %v887_v54  ;;  %v477_v20 = vmul.f32 %v2786_v22, %v331_v6 }
  0x37   : > { %v474_v25 = vmul.f32 %v2784_v21, %v328_v7  ;;  %v476_v26 = vmul.f32 %v2784_v21, %v330_v8  ;;  %vm750_vm6 = vcmp.ge.f32.partialorder %v616_v15, 0.0  ;;  %v884_v29 = vmul.f32 0.2, %v616_v15  ;;  %v271_v8 = vld [vmem:[%s2767_s8 + $0x110] sm:$0xff] }
  0x38   : > { %v621_v30 = vadd.f32 %v2790_v24, %v475_v16  ;;  %v623_v32 = vadd.f32 %v2790_v24, %v477_v20  ;;  %v335_v7 = vunpack.c.h.bf16 %v252_v42 }
  0x39   : > { %1351 = vmatpush2.bf16.msra.mxu0 %v2686_v57  ;;  %2659 = vmatpush2.bf16.msra.mxu1 %v2686_v57  ;;  %v326_v57 = vunpack.c.l.bf16 %v2901_v2  ;;  %v620_v33 = vadd.f32 %v2788_v23, %v474_v25  ;;  %v622_v35 = vadd.f32 %v2788_v23, %v476_v26  ;;  %v2979_v41 = vsel %vm750_vm6, %v616_v15, %v884_v29  ;;  %v3004_v29 = vld [vmem:[%s2767_s8 + $0x80] sm:$0xff] }
  0x3a   : > { %1352 = vmatprep.subr.bf16.mxu0 %v2699_v1  ;;  %2644 = vmatprep.subr.bf16.mxu1 %v2699_v1  ;;  %vm755_vm8 = vcmp.ge.f32.partialorder %v621_v30, 0.0  ;;  %vm757_vm9 = vcmp.ge.f32.partialorder %v623_v32, 0.0  ;;  %v889_v50 = vmul.f32 0.2, %v621_v30  ;;  %v891_v51 = vmul.f32 0.2, %v623_v32 }
  0x3b   : > { %v472_v2 = vmul.f32 %v2784_v21, %v326_v57  ;;  %vm754_vm10 = vcmp.ge.f32.partialorder %v620_v33, 0.0  ;;  %vm756_vm11 = vcmp.ge.f32.partialorder %v622_v35, 0.0  ;;  %v888_v54 = vmul.f32 0.2, %v620_v33 }
  0x3c   : > { %v890_v57 = vmul.f32 0.2, %v622_v35  ;;  %v2987_v63 = vsel %vm755_vm8, %v621_v30, %v889_v50  ;;  %v2989_v6 = vsel %vm757_vm9, %v623_v32, %v891_v51  ;;  %v481_v25 = vmul.f32 %v2786_v22, %v335_v7 }
  0x3d   : > { %1353 = vmatpush2.bf16.msra.mxu0 %v2687_v18  ;;  %2660 = vmatpush2.bf16.msra.mxu1 %v2687_v18  ;;  %v1143_v18 = vpack.c.bf16 %v2958_v12, %v2955_v5  ;;  %v618_v28 = vadd.f32 %v2788_v23, %v472_v2  ;;  %v272_v2 = vld [vmem:[%s2767_s8 + $0x118] sm:$0xff]  ;;  %v2995_v15 = vsel %vm754_vm10, %v620_v33, %v888_v54  ;;  %v332_v26 = vunpack.c.l.bf16 %v251_v17 }
  0x3e   : > { %1354 = vmatprep.subr.bf16.mxu0 %v2699_v1  ;;  %2645 = vmatprep.subr.bf16.mxu1 %v2699_v1  ;;  %v2997_v16 = vsel %vm756_vm11, %v622_v35, %v890_v57  ;;  %v372_v32 = vunpack.c.l.bf16 %v271_v8  ;;  %v373_v33 = vunpack.c.h.bf16 %v271_v8  ;;  %v374_v35 = vunpack.c.l.bf16 %v272_v2 }
  0x3f   : > { %vm752_vm7 = vcmp.ge.f32.partialorder %v618_v28, 0.0  ;;  %v886_v40 = vmul.f32 0.2, %v618_v28  ;;  %v1144_v20 = vpack.c.bf16 %v2997_v16, %v2995_v15 }
  0x40   : > { %v519_v56 = vmul.f32 %v2786_v22, %v373_v33 }
  0x41   : > { %1355 = vmatpush2.bf16.msra.mxu0 %v2688_v36  ;;  %2661 = vmatpush2.bf16.msra.mxu1 %v2688_v36  ;;  %v333_v36 = vunpack.c.h.bf16 %v251_v17  ;;  %v2982_v53 = vsel %vm752_vm7, %v618_v28, %v886_v40  ;;  %v334_v28 = vunpack.c.l.bf16 %v252_v42  ;;  %v478_v17 = vmul.f32 %v2784_v21, %v332_v26  ;;  %v254_v42 = vld [vmem:[%s2767_s8 + $0x88] sm:$0xff] }
  0x42   : > { %1356 = vmatprep.subr.bf16.mxu0 %v2699_v1  ;;  %2646 = vmatprep.subr.bf16.mxu1 %v2699_v1  ;;  %v1142_v62 = vpack.c.bf16 %v2982_v53, %v2979_v41  ;;  %v375_v40 = vunpack.c.h.bf16 %v272_v2  ;;  %v665_v54 = vadd.f32 %v2790_v24, %v519_v56  ;;  %v339_v57 = vunpack.c.h.bf16 %v254_v42 }
  0x43   : > { %v624_v51 = vadd.f32 %v2788_v23, %v478_v17 }
  0x44   : > { %vm799_vm0 = vcmp.ge.f32.partialorder %v665_v54, 0.0  ;;  %v485_v33 = vmul.f32 %v2786_v22, %v339_v57 }
  0x45   : > { %1357 = vmatpush2.bf16.msra.mxu0 %v2689_v0  ;;  %2662 = vmatpush2.bf16.msra.mxu1 %v2689_v0  ;;  %v1145_v0 = vpack.c.bf16 %v2989_v6, %v2987_v63  ;;  %vm758_vm14 = vcmp.ge.f32.partialorder %v624_v51, 0.0  ;;  %v892_v8 = vmul.f32 0.2, %v624_v51 }
  0x46   : > { %1358 = vmatprep.subr.bf16.mxu0 %v2699_v1  ;;  %2647 = vmatprep.subr.bf16.mxu1 %v2699_v1  ;;  %v479_v1 = vmul.f32 %v2786_v22, %v333_v36  ;;  %v627_v36 = vadd.f32 %v2790_v24, %v481_v25  ;;  %v631_v10 = vadd.f32 %v2790_v24, %v485_v33 }
  0x47   : > { %v3030_v26 = vsel %vm758_vm14, %v624_v51, %v892_v8  ;;  %v3057_v8 = vld [vmem:[%s2767_s8 + $0x90] sm:$0xff] }
  0x48   : > { %v625_v30 = vadd.f32 %v2790_v24, %v479_v1  ;;  %vm761_vm13 = vcmp.ge.f32.partialorder %v627_v36, 0.0  ;;  %v895_v50 = vmul.f32 0.2, %v627_v36  ;;  %vm765_vm3 = vcmp.ge.f32.partialorder %v631_v10, 0.0 }
  0x49   : > { %1359 = vmatpush2.bf16.msra.mxu0 %v2690_v31  ;;  %2663 = vmatpush2.bf16.msra.mxu1 %v2690_v31  ;;  %v480_v31 = vmul.f32 %v2784_v21, %v334_v28  ;;  %v933_v28 = vmul.f32 0.2, %v665_v54 }
  0x4a   : > { %vm759_vm12 = vcmp.ge.f32.partialorder %v625_v30, 0.0  ;;  %v893_v55 = vmul.f32 0.2, %v625_v30  ;;  %v3025_v7 = vsel %vm761_vm13, %v627_v36, %v895_v50  ;;  %v273_v50 = vld [vmem:[%s2767_s8 + $0x120] sm:$0xff] }
  0x4b   : > { %v626_v61 = vadd.f32 %v2788_v23, %v480_v31  ;;  %v518_v31 = vmul.f32 %v2784_v21, %v372_v32  ;;  %v336_v32 = vunpack.c.l.bf16 %v3004_v29  ;;  %v376_v58 = vunpack.c.l.bf16 %v273_v50 }
  0x4c   : > { %1361 = vmatmul.mubr.bf16.vlgmr.msra.gmra.mxu0 %v1132_v59  ;;  %v337_v59 = vunpack.c.h.bf16 %v3004_v29  ;;  %v3021_v3 = vsel %vm759_vm12, %v625_v30, %v893_v55  ;;  %v1067_v55 = vsel %vm799_vm0, %v665_v54, %v933_v28  ;;  %v377_v29 = vunpack.c.h.bf16 %v273_v50 }
  0x4d   : > { %1368 = vmatprep.mubr.bf16.mxu0 %v1135_v9  ;;  %v521_v9 = vmul.f32 %v2786_v22, %v375_v40  ;;  %vm760_vm15 = vcmp.ge.f32.partialorder %v626_v61, 0.0  ;;  %v1147_v2 = vpack.c.bf16 %v3025_v7, %v3021_v3  ;;  %v894_v1 = vmul.f32 0.2, %v626_v61 }
  0x4e   : > { %v483_v30 = vmul.f32 %v2786_v22, %v337_v59  ;;  %v664_v59 = vadd.f32 %v2788_v23, %v518_v31  ;;  %v482_v57 = vmul.f32 %v2784_v21, %v336_v32 }
  0x4f   : > { %v667_v25 = vadd.f32 %v2790_v24, %v521_v9  ;;  %v3037_v36 = vsel %vm760_vm15, %v626_v61, %v894_v1  ;;  %v274_v9 = vld [vmem:[%s2767_s8 + $0x128] sm:$0xff]  ;;  %v3060_v1 = vld [vmem:[%s2767_s8 + $0x98] sm:$0xff] }
  0x50   : > { %v1146_v40 = vpack.c.bf16 %v3037_v36, %v3030_v26  ;;  %v629_v56 = vadd.f32 %v2790_v24, %v483_v30  ;;  %vm798_vm4 = vcmp.ge.f32.partialorder %v664_v59, 0.0  ;;  %v932_v61 = vmul.f32 0.2, %v664_v59 }
  0x51   : > { %vm801_vm1 = vcmp.ge.f32.partialorder %v667_v25, 0.0  ;;  %v935_v17 = vmul.f32 0.2, %v667_v25  ;;  %v628_v31 = vadd.f32 %v2788_v23, %v482_v57  ;;  %v378_v57 = vunpack.c.l.bf16 %v274_v9 }
  0x52   : > { %vm763_vm2 = vcmp.ge.f32.partialorder %v629_v56, 0.0  ;;  %v897_v39 = vmul.f32 0.2, %v629_v56  ;;  %v1066_v30 = vsel %vm798_vm4, %v664_v59, %v932_v61  ;;  %v342_v14 = vunpack.c.l.bf16 %v3060_v1 }
  0x53   : > { %v1069_v11 = vsel %vm801_vm1, %v667_v25, %v935_v17  ;;  %vm762_vm6 = vcmp.ge.f32.partialorder %v628_v31, 0.0  ;;  %v896_v32 = vmul.f32 0.2, %v628_v31 }
  0x54   : > { %1369 = vmatmul.mubr.bf16.gmra.mxu0 %v1134_v13  ;;  %v520_v13 = vmul.f32 %v2784_v21, %v374_v35  ;;  %v1167_v34 = vpack.c.bf16 %v1069_v11, %v1067_v55  ;;  %v3053_v54 = vsel %vm763_vm2, %v629_v56, %v897_v39  ;;  %v338_v35 = vunpack.c.l.bf16 %v254_v42 }
  0x55   : > { %1376 = vmatprep.mubr.bf16.mxu0 %v1137_v45  ;;  %v899_v45 = vmul.f32 0.2, %v631_v10  ;;  %v379_v42 = vunpack.c.h.bf16 %v274_v9  ;;  %v523_v56 = vmul.f32 %v2786_v22, %v377_v29  ;;  %v343_v11 = vunpack.c.h.bf16 %v3060_v1 }
  0x56   : > { %v666_v51 = vadd.f32 %v2788_v23, %v520_v13  ;;  %1496 = vmatprep.mubr.bf16.mxu1 %v1167_v34  ;;  %v484_v17 = vmul.f32 %v2784_v21, %v338_v35  ;;  %v522_v29 = vmul.f32 %v2784_v21, %v376_v58  ;;  %v524_v9 = vmul.f32 %v2784_v21, %v378_v57 }
  0x57   : > { %v3062_v25 = vsel %vm765_vm3, %v631_v10, %v899_v45  ;;  %v341_v10 = vunpack.c.h.bf16 %v3057_v8  ;;  %v525_v34 = vmul.f32 %v2786_v22, %v379_v42  ;;  %v669_v46 = vadd.f32 %v2790_v24, %v523_v56 }
  0x58   : > { %vm800_vm5 = vcmp.ge.f32.partialorder %v666_v51, 0.0  ;;  %v934_v28 = vmul.f32 0.2, %v666_v51  ;;  %v1149_v33 = vpack.c.bf16 %v3062_v25, %v3053_v54  ;;  %v630_v59 = vadd.f32 %v2788_v23, %v484_v17 }
  0x59   : > { %v487_v47 = vmul.f32 %v2786_v22, %v341_v10  ;;  %v3082_v45 = vsel %vm762_vm6, %v628_v31, %v896_v32  ;;  %v671_v60 = vadd.f32 %v2790_v24, %v525_v34  ;;  %vm803_vm8 = vcmp.ge.f32.partialorder %v669_v46, 0.0  ;;  %v275_v10 = vld [vmem:[%s2767_s8 + $0x130] sm:$0xff] }
  0x5a   : > { %v1068_v55 = vsel %vm800_vm5, %v666_v51, %v934_v28  ;;  %vm764_vm7 = vcmp.ge.f32.partialorder %v630_v59, 0.0  ;;  %v898_v39 = vmul.f32 0.2, %v630_v59  ;;  %v340_v56 = vunpack.c.l.bf16 %v3057_v8 }
  0x5b   : > { %v1166_v13 = vpack.c.bf16 %v1068_v55, %v1066_v30  ;;  %v633_v51 = vadd.f32 %v2790_v24, %v487_v47  ;;  %vm805_vm9 = vcmp.ge.f32.partialorder %v671_v60, 0.0  ;;  %v939_v50 = vmul.f32 0.2, %v671_v60  ;;  %v3117_v47 = vld [vmem:[%s2767_s8 + $0xa8] sm:$0xff] }
  0x5c   : > { %1377 = vmatmul.mubr.bf16.gmra.mxu0 %v1136_v48  ;;  %v489_v48 = vmul.f32 %v2786_v22, %v343_v11  ;;  %v3086_v61 = vsel %vm764_vm7, %v630_v59, %v898_v39  ;;  %v668_v55 = vadd.f32 %v2788_v23, %v522_v29  ;;  %v276_v11 = vld [vmem:[%s2767_s8 + $0x138] sm:$0xff]  ;;  %v670_v8 = vadd.f32 %v2788_v23, %v524_v9 }
  0x5d   : > { %1384 = vmatprep.mubr.bf16.mxu0 %v1139_v4  ;;  %1497 = vmatmul.mubr.bf16.vlgmr.msra.gmra.mxu1 %v1166_v13  ;;  %v937_v4 = vmul.f32 0.2, %v669_v46  ;;  %v1148_v28 = vpack.c.bf16 %v3086_v61, %v3082_v45  ;;  %vm767_vm10 = vcmp.ge.f32.partialorder %v633_v51, 0.0  ;;  %v901_v17 = vmul.f32 0.2, %v633_v51  ;;  %v3261_v45 = vld [vmem:[%s2767_s8 + $0xd0] sm:$0xff] }
  0x5e   : > { %v635_v35 = vadd.f32 %v2790_v24, %v489_v48  ;;  %v1073_v42 = vsel %vm805_vm9, %v671_v60, %v939_v50  ;;  %vm802_vm12 = vcmp.ge.f32.partialorder %v668_v55, 0.0  ;;  %v936_v34 = vmul.f32 0.2, %v668_v55  ;;  %v3264_v61 = vld [vmem:[%s2767_s8 + $0xd8] sm:$0xff] }
  0x5f   : > { %v1071_v30 = vsel %vm803_vm8, %v669_v46, %v937_v4  ;;  %v3103_v59 = vsel %vm767_vm10, %v633_v51, %v901_v17  ;;  %v486_v37 = vmul.f32 %v2784_v21, %v340_v56  ;;  %v488_v38 = vmul.f32 %v2784_v21, %v342_v14 }
  0x60   : > { %vm769_vm11 = vcmp.ge.f32.partialorder %v635_v35, 0.0  ;;  %v903_v31 = vmul.f32 0.2, %v635_v35  ;;  %v1169_v13 = vpack.c.bf16 %v1073_v42, %v1071_v30  ;;  %v383_v46 = vunpack.c.h.bf16 %v276_v11 }
  0x61   : > { %vm804_vm13 = vcmp.ge.f32.partialorder %v670_v8, 0.0  ;;  %v938_v1 = vmul.f32 0.2, %v670_v8  ;;  %v1070_v48 = vsel %vm802_vm12, %v668_v55, %v936_v34  ;;  %v345_v39 = vunpack.c.h.bf16 %v3109_v19 }
  0x62   : > { %v3105_v32 = vsel %vm769_vm11, %v635_v35, %v903_v31  ;;  %1504 = vmatprep.mubr.bf16.mxu1 %v1169_v13  ;;  %v632_v58 = vadd.f32 %v2788_v23, %v486_v37  ;;  %v634_v60 = vadd.f32 %v2788_v23, %v488_v38  ;;  %v529_v51 = vmul.f32 %v2786_v22, %v383_v46  ;;  %v277_v46 = vld [vmem:[%s2767_s8 + $0x140] sm:$0xff] }
  0x63   : > { %v1072_v35 = vsel %vm804_vm13, %v670_v8, %v938_v1  ;;  %v347_v57 = vunpack.c.h.bf16 %v3117_v47  ;;  %v491_v29 = vmul.f32 %v2786_v22, %v345_v39  ;;  %v380_v50 = vunpack.c.l.bf16 %v275_v10 }
  0x64   : > { %1385 = vmatmul.mubr.bf16.gmra.mxu0 %v1138_v27  ;;  %v1151_v27 = vpack.c.bf16 %v3105_v32, %v3103_v59  ;;  %v1168_v30 = vpack.c.bf16 %v1072_v35, %v1070_v48  ;;  %vm766_vm14 = vcmp.ge.f32.partialorder %v632_v58, 0.0  ;;  %vm768_vm15 = vcmp.ge.f32.partialorder %v634_v60, 0.0 }
  0x65   : > { %1392 = vmatprep.mubr.bf16.mxu0 %v1141_v43  ;;  %v381_v43 = vunpack.c.h.bf16 %v275_v10  ;;  %v900_v17 = vmul.f32 0.2, %v632_v58  ;;  %v902_v31 = vmul.f32 0.2, %v634_v60  ;;  %v675_v9 = vadd.f32 %v2790_v24, %v529_v51 }
  0x66   : > { %v493_v55 = vmul.f32 %v2786_v22, %v347_v57  ;;  %1505 = vmatmul.mubr.bf16.gmra.mxu1 %v1168_v30  ;;  %v637_v10 = vadd.f32 %v2790_v24, %v491_v29  ;;  %v382_v13 = vunpack.c.l.bf16 %v276_v11  ;;  %v526_v44 = vmul.f32 %v2784_v21, %v380_v50  ;;  %v3157_v57 = vld [vmem:[%s2767_s8 + $0xb0] sm:$0xff]  ;;  %v3160_v29 = vld [vmem:[%s2767_s8 + $0xb8] sm:$0xff] }
  0x67   : > { %v527_v4 = vmul.f32 %v2786_v22, %v381_v43  ;;  %v3135_v56 = vsel %vm766_vm14, %v632_v58, %v900_v17  ;;  %v3139_v49 = vsel %vm768_vm15, %v634_v60, %v902_v31  ;;  %vm809_vm1 = vcmp.ge.f32.partialorder %v675_v9, 0.0  ;;  %v278_v58 = vld [vmem:[%s2767_s8 + $0x148] sm:$0xff] }
  0x68   : > { %v1150_v14 = vpack.c.bf16 %v3139_v49, %v3135_v56  ;;  %v943_v8 = vmul.f32 0.2, %v675_v9  ;;  %v639_v5 = vadd.f32 %v2790_v24, %v493_v55  ;;  %vm771_vm2 = vcmp.ge.f32.partialorder %v637_v10, 0.0 }
  0x69   : > { %v673_v42 = vadd.f32 %v2790_v24, %v527_v4  ;;  %v528_v11 = vmul.f32 %v2784_v21, %v382_v13  ;;  %v672_v34 = vadd.f32 %v2788_v23, %v526_v44  ;;  %v344_v43 = vunpack.c.l.bf16 %v3109_v19 }
  0x6a   : > { %v1077_v37 = vsel %vm809_vm1, %v675_v9, %v943_v8  ;;  %vm773_vm3 = vcmp.ge.f32.partialorder %v639_v5, 0.0  ;;  %v907_v38 = vmul.f32 0.2, %v639_v5  ;;  %v346_v51 = vunpack.c.l.bf16 %v3117_v47 }
  0x6b   : > { %vm807_vm0 = vcmp.ge.f32.partialorder %v673_v42, 0.0  ;;  %v674_v39 = vadd.f32 %v2788_v23, %v528_v11  ;;  %vm806_vm4 = vcmp.ge.f32.partialorder %v672_v34, 0.0  ;;  %v940_v4 = vmul.f32 0.2, %v672_v34 }
  0x6c   : > { %1393 = vmatmul.mubr.bf16.gmra.mxu0 %v1140_v52  ;;  %v941_v52 = vmul.f32 0.2, %v673_v42  ;;  %v3152_v60 = vsel %vm773_vm3, %v639_v5, %v907_v38  ;;  %v490_v35 = vmul.f32 %v2784_v21, %v344_v43  ;;  %v385_v30 = vunpack.c.h.bf16 %v277_v46 }
  0x6d   : > { %1400 = vmatprep.mubr.bf16.mxu0 %v1143_v18  ;;  %v905_v18 = vmul.f32 0.2, %v637_v10  ;;  %vm808_vm5 = vcmp.ge.f32.partialorder %v674_v39, 0.0  ;;  %v942_v50 = vmul.f32 0.2, %v674_v39  ;;  %v1074_v47 = vsel %vm806_vm4, %v672_v34, %v940_v4 }
  0x6e   : > { %v1075_v12 = vsel %vm807_vm0, %v673_v42, %v941_v52  ;;  %v492_v17 = vmul.f32 %v2784_v21, %v346_v51  ;;  %v636_v31 = vadd.f32 %v2788_v23, %v490_v35  ;;  %v387_v42 = vunpack.c.h.bf16 %v278_v58  ;;  %v279_v35 = vld [vmem:[%s2767_s8 + $0x150] sm:$0xff] }
  0x6f   : > { %v1171_v1 = vpack.c.bf16 %v1077_v37, %v1075_v12  ;;  %v3148_v48 = vsel %vm771_vm2, %v637_v10, %v905_v18  ;;  %v1076_v9 = vsel %vm808_vm5, %v674_v39, %v942_v50  ;;  %v531_v41 = vmul.f32 %v2786_v22, %v385_v30  ;;  %v280_v50 = vld [vmem:[%s2767_s8 + $0x158] sm:$0xff] }
  0x70   : > { %v1153_v19 = vpack.c.bf16 %v3152_v60, %v3148_v48  ;;  %v349_v53 = vunpack.c.h.bf16 %v3157_v57  ;;  %v1170_v55 = vpack.c.bf16 %v1076_v9, %v1074_v47  ;;  %v638_v10 = vadd.f32 %v2788_v23, %v492_v17 }
  0x71   : > { %1512 = vmatprep.mubr.bf16.mxu1 %v1171_v1  ;;  %vm770_vm6 = vcmp.ge.f32.partialorder %v636_v31, 0.0  ;;  %v904_v13 = vmul.f32 0.2, %v636_v31  ;;  %v533_v63 = vmul.f32 %v2786_v22, %v387_v42  ;;  %v677_v6 = vadd.f32 %v2790_v24, %v531_v41 }
  0x72   : > { %1513 = vmatmul.mubr.bf16.gmra.mxu1 %v1170_v55  ;;  %vm772_vm7 = vcmp.ge.f32.partialorder %v638_v10, 0.0  ;;  %v906_v52 = vmul.f32 0.2, %v638_v10  ;;  %v384_v5 = vunpack.c.l.bf16 %v277_v46  ;;  %v386_v38 = vunpack.c.l.bf16 %v278_v58 }
  0x73   : > { %v3180_v8 = vsel %vm770_vm6, %v636_v31, %v904_v13  ;;  %v679_v12 = vadd.f32 %v2790_v24, %v533_v63  ;;  %vm811_vm8 = vcmp.ge.f32.partialorder %v677_v6, 0.0  ;;  %v945_v18 = vmul.f32 0.2, %v677_v6 }
  0x74   : > { %1401 = vmatmul.mubr.bf16.gmra.mxu0 %v1142_v62  ;;  %v351_v62 = vunpack.c.h.bf16 %v3160_v29  ;;  %v3184_v34 = vsel %vm772_vm7, %v638_v10, %v906_v52  ;;  %v530_v43 = vmul.f32 %v2784_v21, %v384_v5  ;;  %v532_v15 = vmul.f32 %v2784_v21, %v386_v38 }
  0x75   : > { %1408 = vmatprep.mubr.bf16.mxu0 %v1145_v0  ;;  %v495_v0 = vmul.f32 %v2786_v22, %v349_v53  ;;  %v1152_v46 = vpack.c.bf16 %v3184_v34, %v3180_v8  ;;  %vm813_vm9 = vcmp.ge.f32.partialorder %v679_v12, 0.0  ;;  %v947_v1 = vmul.f32 0.2, %v679_v12 }
  0x76   : > { %v497_v44 = vmul.f32 %v2786_v22, %v351_v62  ;;  %v1079_v39 = vsel %vm811_vm8, %v677_v6, %v945_v18  ;;  %v676_v16 = vadd.f32 %v2788_v23, %v530_v43  ;;  %v350_v7 = vunpack.c.l.bf16 %v3160_v29  ;;  %v3215_v62 = vld [vmem:[%s2767_s8 + $0xc8] sm:$0xff] }
  0x77   : > { %v641_v11 = vadd.f32 %v2790_v24, %v495_v0  ;;  %v1081_v51 = vsel %vm813_vm9, %v679_v12, %v947_v1  ;;  %v678_v31 = vadd.f32 %v2788_v23, %v532_v15  ;;  %v389_v41 = vunpack.c.h.bf16 %v279_v35 }
  0x78   : > { %v643_v37 = vadd.f32 %v2790_v24, %v497_v44  ;;  %v1173_v30 = vpack.c.bf16 %v1081_v51, %v1079_v39  ;;  %vm810_vm12 = vcmp.ge.f32.partialorder %v676_v16, 0.0  ;;  %v944_v42 = vmul.f32 0.2, %v676_v16 }
  0x79   : > { %vm775_vm10 = vcmp.ge.f32.partialorder %v641_v11, 0.0  ;;  %v909_v58 = vmul.f32 0.2, %v641_v11  ;;  %v496_v9 = vmul.f32 %v2784_v21, %v350_v7  ;;  %v391_v53 = vunpack.c.h.bf16 %v280_v50  ;;  %v281_v7 = vld [vmem:[%s2767_s8 + $0x160] sm:$0xff] }
  0x7a   : > { %vm777_vm11 = vcmp.ge.f32.partialorder %v643_v37, 0.0  ;;  %v911_v4 = vmul.f32 0.2, %v643_v37  ;;  %1520 = vmatprep.mubr.bf16.mxu1 %v1173_v30  ;;  %vm812_vm13 = vcmp.ge.f32.partialorder %v678_v31, 0.0  ;;  %v946_v29 = vmul.f32 0.2, %v678_v31 }
  0x7b   : > { %v3201_v47 = vsel %vm775_vm10, %v641_v11, %v909_v58  ;;  %v1078_v55 = vsel %vm810_vm12, %v676_v16, %v944_v42  ;;  %v642_v63 = vadd.f32 %v2788_v23, %v496_v9  ;;  %v535_v6 = vmul.f32 %v2786_v22, %v389_v41  ;;  %v282_v9 = vld [vmem:[%s2767_s8 + $0x168] sm:$0xff] }
  0x7c   : > { %1409 = vmatmul.mubr.bf16.gmra.mxu0 %v1144_v20  ;;  %v348_v20 = vunpack.c.l.bf16 %v3157_v57  ;;  %v3203_v3 = vsel %vm777_vm11, %v643_v37, %v911_v4  ;;  %v537_v0 = vmul.f32 %v2786_v22, %v391_v53  ;;  %v1080_v44 = vsel %vm812_vm13, %v678_v31, %v946_v29 }
  0x7d   : > { %1416 = vmatprep.mubr.bf16.mxu0 %v1147_v2  ;;  %v3207_v2 = vld [vmem:[%s2767_s8 + $0xc0] sm:$0xff]  ;;  %v1155_v17 = vpack.c.bf16 %v3203_v3, %v3201_v47  ;;  %v355_v52 = vunpack.c.h.bf16 %v3215_v62  ;;  %v388_v12 = vunpack.c.l.bf16 %v279_v35  ;;  %v1172_v18 = vpack.c.bf16 %v1080_v44, %v1078_v55 }
  0x7e   : > { %v494_v57 = vmul.f32 %v2784_v21, %v348_v20  ;;  %v353_v10 = vunpack.c.h.bf16 %v3207_v2  ;;  %vm776_vm15 = vcmp.ge.f32.partialorder %v642_v63, 0.0  ;;  %v910_v37 = vmul.f32 0.2, %v642_v63 }
  0x7f   : > { %v681_v38 = vadd.f32 %v2790_v24, %v535_v6  ;;  %v683_v26 = vadd.f32 %v2790_v24, %v537_v0  ;;  %v501_v36 = vmul.f32 %v2786_v22, %v355_v52  ;;  %1521 = vmatmul.mubr.bf16.gmra.mxu1 %v1172_v18  ;;  %v390_v1 = vunpack.c.l.bf16 %v280_v50 }
  0x80   : > { %v640_v13 = vadd.f32 %v2788_v23, %v494_v57  ;;  %v499_v5 = vmul.f32 %v2786_v22, %v353_v10  ;;  %v534_v54 = vmul.f32 %v2784_v21, %v388_v12  ;;  %v3237_v25 = vsel %vm776_vm15, %v642_v63, %v910_v37 }
  0x81   : > { %vm815_vm0 = vcmp.ge.f32.partialorder %v681_v38, 0.0  ;;  %vm817_vm1 = vcmp.ge.f32.partialorder %v683_v26, 0.0  ;;  %v951_v58 = vmul.f32 0.2, %v683_v26  ;;  %v647_v4 = vadd.f32 %v2790_v24, %v501_v36 }
  0x82   : > { %vm774_vm14 = vcmp.ge.f32.partialorder %v640_v13, 0.0  ;;  %v908_v11 = vmul.f32 0.2, %v640_v13  ;;  %v645_v43 = vadd.f32 %v2790_v24, %v499_v5  ;;  %v536_v16 = vmul.f32 %v2784_v21, %v390_v1 }
  0x83   : > { %v680_v20 = vadd.f32 %v2788_v23, %v534_v54  ;;  %v1085_v35 = vsel %vm817_vm1, %v683_v26, %v951_v58  ;;  %vm781_vm3 = vcmp.ge.f32.partialorder %v647_v4, 0.0  ;;  %v915_v50 = vmul.f32 0.2, %v647_v4 }
  0x84   : > { %1417 = vmatmul.mubr.bf16.gmra.mxu0 %v1146_v40  ;;  %v3233_v40 = vsel %vm774_vm14, %v640_v13, %v908_v11  ;;  %vm779_vm2 = vcmp.ge.f32.partialorder %v645_v43, 0.0  ;;  %v913_v15 = vmul.f32 0.2, %v645_v43  ;;  %v352_v30 = vunpack.c.l.bf16 %v3207_v2 }
  0x85   : > { %1424 = vmatprep.mubr.bf16.mxu0 %v1149_v33  ;;  %v949_v33 = vmul.f32 0.2, %v681_v38  ;;  %v1154_v39 = vpack.c.bf16 %v3237_v25, %v3233_v40  ;;  %v682_v57 = vadd.f32 %v2788_v23, %v536_v16  ;;  %vm814_vm4 = vcmp.ge.f32.partialorder %v680_v20, 0.0  ;;  %v285_v40 = vld [vmem:[%s2767_s8 + $0x180] sm:$0xff] }
  0x86   : > { %v3249_v42 = vsel %vm779_vm2, %v645_v43, %v913_v15  ;;  %v3256_v41 = vsel %vm781_vm3, %v647_v4, %v915_v50  ;;  %v948_v53 = vmul.f32 0.2, %v680_v20  ;;  %v354_v2 = vunpack.c.l.bf16 %v3215_v62  ;;  %v284_v50 = vld [vmem:[%s2767_s8 + $0x178] sm:$0xff] }
  0x87   : > { %v1083_v51 = vsel %vm815_vm0, %v681_v38, %v949_v33  ;;  %v498_v29 = vmul.f32 %v2784_v21, %v352_v30  ;;  %vm816_vm5 = vcmp.ge.f32.partialorder %v682_v57, 0.0  ;;  %v950_v55 = vmul.f32 0.2, %v682_v57 }
  0x88   : > { %v1175_v31 = vpack.c.bf16 %v1085_v35, %v1083_v51  ;;  %v393_v10 = vunpack.c.h.bf16 %v281_v7  ;;  %v1082_v59 = vsel %vm814_vm4, %v680_v20, %v948_v53  ;;  %v500_v32 = vmul.f32 %v2784_v21, %v354_v2  ;;  %v283_v35 = vld [vmem:[%s2767_s8 + $0x170] sm:$0xff] }
  0x89   : > { %v395_v13 = vunpack.c.h.bf16 %v282_v9  ;;  %v1084_v62 = vsel %vm816_vm5, %v682_v57, %v950_v55  ;;  %v357_v6 = vunpack.c.h.bf16 %v3261_v45  ;;  %v359_v0 = vunpack.c.h.bf16 %v3264_v61 }
  0x8a   : > { %1528 = vmatprep.mubr.bf16.mxu1 %v1175_v31  ;;  %v539_v63 = vmul.f32 %v2786_v22, %v393_v10  ;;  %v1174_v44 = vpack.c.bf16 %v1084_v62, %v1082_v59  ;;  %v646_v52 = vadd.f32 %v2788_v23, %v500_v32  ;;  %v392_v36 = vunpack.c.l.bf16 %v281_v7  ;;  %v3313_v32 = vld [vmem:[%s2767_s8 + $0xe8] sm:$0xff] }
  0x8b   : > { %v541_v12 = vmul.f32 %v2786_v22, %v395_v13  ;;  %v503_v11 = vmul.f32 %v2786_v22, %v357_v6  ;;  %v505_v37 = vmul.f32 %v2786_v22, %v359_v0  ;;  %v394_v4 = vunpack.c.l.bf16 %v282_v9  ;;  %v3305_v9 = vld [vmem:[%s2767_s8 + $0xe0] sm:$0xff] }
  0x8c   : > { %1425 = vmatmul.mubr.bf16.gmra.mxu0 %v1148_v28  ;;  %v1157_v28 = vpack.c.bf16 %v3256_v41, %v3249_v42  ;;  %v685_v18 = vadd.f32 %v2790_v24, %v539_v63  ;;  %1529 = vmatmul.mubr.bf16.gmra.mxu1 %v1174_v44  ;;  %vm780_vm7 = vcmp.ge.f32.partialorder %v646_v52, 0.0  ;;  %v914_v38 = vmul.f32 0.2, %v646_v52 }
  0x8d   : > { %1432 = vmatprep.mubr.bf16.mxu0 %v1151_v27  ;;  %v644_v27 = vadd.f32 %v2788_v23, %v498_v29  ;;  %v687_v43 = vadd.f32 %v2790_v24, %v541_v12  ;;  %v649_v54 = vadd.f32 %v2790_v24, %v503_v11  ;;  %v651_v58 = vadd.f32 %v2790_v24, %v505_v37 }
  0x8e   : > { %vm819_vm8 = vcmp.ge.f32.partialorder %v685_v18, 0.0  ;;  %v953_v1 = vmul.f32 0.2, %v685_v18  ;;  %v3288_v33 = vsel %vm780_vm7, %v646_v52, %v914_v38  ;;  %v538_v56 = vmul.f32 %v2784_v21, %v392_v36 }
  0x8f   : > { %vm778_vm6 = vcmp.ge.f32.partialorder %v644_v27, 0.0  ;;  %v912_v5 = vmul.f32 0.2, %v644_v27  ;;  %vm821_vm9 = vcmp.ge.f32.partialorder %v687_v43, 0.0  ;;  %vm783_vm10 = vcmp.ge.f32.partialorder %v649_v54, 0.0 }
  0x90   : > { %v1087_v51 = vsel %vm819_vm8, %v685_v18, %v953_v1  ;;  %vm785_vm11 = vcmp.ge.f32.partialorder %v651_v58, 0.0  ;;  %v917_v48 = vmul.f32 0.2, %v649_v54  ;;  %v919_v60 = vmul.f32 0.2, %v651_v58 }
  0x91   : > { %v3278_v26 = vsel %vm778_vm6, %v644_v27, %v912_v5  ;;  %v540_v15 = vmul.f32 %v2784_v21, %v394_v4  ;;  %v684_v16 = vadd.f32 %v2788_v23, %v538_v56  ;;  %v356_v20 = vunpack.c.l.bf16 %v3261_v45 }
  0x92   : > { %v1156_v49 = vpack.c.bf16 %v3288_v33, %v3278_v26  ;;  %v3299_v7 = vsel %vm783_vm10, %v649_v54, %v917_v48  ;;  %v3301_v31 = vsel %vm785_vm11, %v651_v58, %v919_v60  ;;  %v358_v57 = vunpack.c.l.bf16 %v3264_v61 }
  0x93   : > { %v1159_v53 = vpack.c.bf16 %v3301_v31, %v3299_v7  ;;  %v686_v2 = vadd.f32 %v2788_v23, %v540_v15  ;;  %vm818_vm12 = vcmp.ge.f32.partialorder %v684_v16, 0.0  ;;  %v952_v29 = vmul.f32 0.2, %v684_v16 }
  0x94   : > { %1433 = vmatmul.mubr.bf16.gmra.mxu0 %v1150_v14  ;;  %v955_v14 = vmul.f32 0.2, %v687_v43  ;;  %v502_v45 = vmul.f32 %v2784_v21, %v356_v20  ;;  %v504_v55 = vmul.f32 %v2784_v21, %v358_v57  ;;  %v397_v10 = vunpack.c.h.bf16 %v283_v35 }
  0x95   : > { %1440 = vmatprep.mubr.bf16.mxu0 %v1153_v19  ;;  %v399_v59 = vunpack.c.h.bf16 %v284_v50  ;;  %vm820_vm13 = vcmp.ge.f32.partialorder %v686_v2, 0.0  ;;  %v954_v61 = vmul.f32 0.2, %v686_v2  ;;  %v1086_v27 = vsel %vm818_vm12, %v684_v16, %v952_v29  ;;  %v286_v16 = vld [vmem:[%s2767_s8 + $0x188] sm:$0xff] }
  0x96   : > { %v1089_v19 = vsel %vm821_vm9, %v687_v43, %v955_v14  ;;  %v361_v13 = vunpack.c.h.bf16 %v3305_v9  ;;  %v648_v62 = vadd.f32 %v2788_v23, %v502_v45  ;;  %v650_v63 = vadd.f32 %v2788_v23, %v504_v55 }
  0x97   : > { %v1177_v30 = vpack.c.bf16 %v1089_v19, %v1087_v51  ;;  %v543_v6 = vmul.f32 %v2786_v22, %v397_v10  ;;  %v545_v0 = vmul.f32 %v2786_v22, %v399_v59  ;;  %v1088_v44 = vsel %vm820_vm13, %v686_v2, %v954_v61 }
  0x98   : > { %v363_v8 = vunpack.c.h.bf16 %v3313_v32  ;;  %v507_v34 = vmul.f32 %v2786_v22, %v361_v13  ;;  %v1176_v52 = vpack.c.bf16 %v1088_v44, %v1086_v27  ;;  %vm782_vm14 = vcmp.ge.f32.partialorder %v648_v62, 0.0 }
  0x99   : > { %1536 = vmatprep.mubr.bf16.mxu1 %v1177_v30  ;;  %vm784_vm15 = vcmp.ge.f32.partialorder %v650_v63, 0.0  ;;  %v916_v5 = vmul.f32 0.2, %v648_v62  ;;  %v918_v47 = vmul.f32 0.2, %v650_v63  ;;  %v689_v3 = vadd.f32 %v2790_v24, %v543_v6 }
  0x9a   : > { %v509_v12 = vmul.f32 %v2786_v22, %v363_v8  ;;  %1537 = vmatmul.mubr.bf16.gmra.mxu1 %v1176_v52  ;;  %v653_v11 = vadd.f32 %v2790_v24, %v507_v34  ;;  %v398_v37 = vunpack.c.l.bf16 %v284_v50  ;;  %v360_v19 = vunpack.c.l.bf16 %v3305_v9  ;;  %v3362_v50 = vld [vmem:[%s2767_s8 + $0xf8] sm:$0xff] }
  0x9b   : > { %v3331_v18 = vsel %vm782_vm14, %v648_v62, %v916_v5  ;;  %v3335_v36 = vsel %vm784_vm15, %v650_v63, %v918_v47  ;;  %vm823_vm0 = vcmp.ge.f32.partialorder %v689_v3, 0.0  ;;  %v957_v43 = vmul.f32 0.2, %v689_v3 }
  0x9c   : > { %1441 = vmatmul.mubr.bf16.gmra.mxu0 %v1152_v46  ;;  %v396_v46 = vunpack.c.l.bf16 %v283_v35  ;;  %v1158_v1 = vpack.c.bf16 %v3335_v36, %v3331_v18  ;;  %v655_v58 = vadd.f32 %v2790_v24, %v509_v12  ;;  %vm787_vm2 = vcmp.ge.f32.partialorder %v653_v11, 0.0 }
  0x9d   : > { %1448 = vmatprep.mubr.bf16.mxu0 %v1155_v17  ;;  %v691_v17 = vadd.f32 %v2790_v24, %v545_v0  ;;  %v1091_v4 = vsel %vm823_vm0, %v689_v3, %v957_v43  ;;  %v921_v56 = vmul.f32 0.2, %v653_v11  ;;  %v544_v14 = vmul.f32 %v2784_v21, %v398_v37 }
  0x9e   : > { %v542_v38 = vmul.f32 %v2784_v21, %v396_v46  ;;  %vm789_vm3 = vcmp.ge.f32.partialorder %v655_v58, 0.0  ;;  %v923_v60 = vmul.f32 0.2, %v655_v58  ;;  %v362_v42 = vunpack.c.l.bf16 %v3313_v32 }
  0x9f   : > { %vm825_vm1 = vcmp.ge.f32.partialorder %v691_v17, 0.0  ;;  %v959_v54 = vmul.f32 0.2, %v691_v17  ;;  %v690_v15 = vadd.f32 %v2788_v23, %v544_v14  ;;  %v506_v41 = vmul.f32 %v2784_v21, %v360_v19 }
  0xa0   : > { %v688_v51 = vadd.f32 %v2788_v23, %v542_v38  ;;  %v3354_v20 = vsel %vm789_vm3, %v655_v58, %v923_v60  ;;  %v401_v9 = vunpack.c.h.bf16 %v285_v40  ;;  %v508_v29 = vmul.f32 %v2784_v21, %v362_v42  ;;  %v288_v58 = vld [vmem:[%s2767_s8 + $0x198] sm:$0xff] }
  0xa1   : > { %v1093_v48 = vsel %vm825_vm1, %v691_v17, %v959_v54  ;;  %vm824_vm5 = vcmp.ge.f32.partialorder %v690_v15, 0.0  ;;  %v958_v57 = vmul.f32 0.2, %v690_v15  ;;  %v652_v45 = vadd.f32 %v2788_v23, %v506_v41  ;;  %v287_v54 = vld [vmem:[%s2767_s8 + $0x190] sm:$0xff] }
  0xa2   : > { %v1179_v25 = vpack.c.bf16 %v1093_v48, %v1091_v4  ;;  %vm822_vm4 = vcmp.ge.f32.partialorder %v688_v51, 0.0  ;;  %v956_v35 = vmul.f32 0.2, %v688_v51  ;;  %v403_v55 = vunpack.c.h.bf16 %v286_v16  ;;  %v3396_v48 = vld [vmem:[%s2767_s8 + $0x100] sm:$0xff] }
  0xa3   : > { %v1092_v10 = vsel %vm824_vm5, %v690_v15, %v958_v57  ;;  %v547_v59 = vmul.f32 %v2786_v22, %v401_v9  ;;  %v367_v61 = vunpack.c.h.bf16 %v3362_v50  ;;  %v654_v13 = vadd.f32 %v2788_v23, %v508_v29 }
  0xa4   : > { %1449 = vmatmul.mubr.bf16.gmra.mxu0 %v1154_v39  ;;  %v3350_v39 = vsel %vm787_vm2, %v653_v11, %v921_v56  ;;  %1544 = vmatprep.mubr.bf16.mxu1 %v1179_v25  ;;  %v1090_v2 = vsel %vm822_vm4, %v688_v51, %v956_v35  ;;  %vm786_vm6 = vcmp.ge.f32.partialorder %v652_v45, 0.0  ;;  %v920_v62 = vmul.f32 0.2, %v652_v45 }
  0xa5   : > { %1456 = vmatprep.mubr.bf16.mxu0 %v1157_v28  ;;  %v3359_v28 = vld [vmem:[%s2767_s8 + $0xf0] sm:$0xff]  ;;  %v1161_v30 = vpack.c.bf16 %v3354_v20, %v3350_v39  ;;  %v1178_v27 = vpack.c.bf16 %v1092_v10, %v1090_v2  ;;  %v549_v63 = vmul.f32 %v2786_v22, %v403_v55  ;;  %v693_v6 = vadd.f32 %v2790_v24, %v547_v59  ;;  %v270_v20 = vld [vmem:[%s2767_s8 + $0x108] sm:$0xff] }
  0xa6   : > { %v365_v32 = vunpack.c.h.bf16 %v3359_v28  ;;  %v513_v44 = vmul.f32 %v2786_v22, %v367_v61  ;;  %vm788_vm7 = vcmp.ge.f32.partialorder %v654_v13, 0.0  ;;  %v922_v8 = vmul.f32 0.2, %v654_v13 }
  0xa7   : > { %1545 = vmatmul.mubr.bf16.gmra.mxu1 %v1178_v27  ;;  %v3382_v34 = vsel %vm786_vm6, %v652_v45, %v920_v62  ;;  %v400_v46 = vunpack.c.l.bf16 %v285_v40  ;;  %v695_v26 = vadd.f32 %v2790_v24, %v549_v63  ;;  %vm827_vm8 = vcmp.ge.f32.partialorder %v693_v6, 0.0 }
  0xa8   : > { %v511_v0 = vmul.f32 %v2786_v22, %v365_v32  ;;  %v961_v33 = vmul.f32 0.2, %v693_v6  ;;  %v1056_v52 = vsel %vm788_vm7, %v654_v13, %v922_v8  ;;  %v659_v5 = vadd.f32 %v2790_v24, %v513_v44 }
  0xa9   : > { %v402_v47 = vunpack.c.l.bf16 %v286_v16  ;;  %v546_v7 = vmul.f32 %v2784_v21, %v400_v46  ;;  %v1160_v31 = vpack.c.bf16 %v1056_v52, %v3382_v34  ;;  %vm829_vm9 = vcmp.ge.f32.partialorder %v695_v26, 0.0 }
  0xaa   : > { %v1095_v3 = vsel %vm827_vm8, %v693_v6, %v961_v33  ;;  %vm793_vm11 = vcmp.ge.f32.partialorder %v659_v5, 0.0  ;;  %v927_v12 = vmul.f32 0.2, %v659_v5  ;;  %v364_v43 = vunpack.c.l.bf16 %v3359_v28 }
  0xab   : > { %v548_v37 = vmul.f32 %v2784_v21, %v402_v47  ;;  %v692_v38 = vadd.f32 %v2788_v23, %v546_v7  ;;  %v366_v51 = vunpack.c.l.bf16 %v3362_v50  ;;  %v405_v15 = vunpack.c.h.bf16 %v287_v54 }
  0xac   : > { %1457 = vmatmul.mubr.bf16.gmra.mxu0 %v1156_v49  ;;  %v657_v49 = vadd.f32 %v2790_v24, %v511_v0  ;;  %v1061_v14 = vsel %vm793_vm11, %v659_v5, %v927_v12  ;;  %v510_v25 = vmul.f32 %v2784_v21, %v364_v43  ;;  %v407_v16 = vunpack.c.h.bf16 %v288_v58  ;;  %v289_v5 = vld [vmem:[%s2767_s8 + $0x1a0] sm:$0xff] }
  0xad   : > { %1464 = vmatprep.mubr.bf16.mxu0 %v1159_v53  ;;  %v963_v53 = vmul.f32 0.2, %v695_v26  ;;  %v694_v19 = vadd.f32 %v2788_v23, %v548_v37  ;;  %vm826_vm12 = vcmp.ge.f32.partialorder %v692_v38, 0.0  ;;  %v960_v40 = vmul.f32 0.2, %v692_v38 }
  0xae   : > { %vm791_vm10 = vcmp.ge.f32.partialorder %v657_v49, 0.0  ;;  %v925_v17 = vmul.f32 0.2, %v657_v49  ;;  %v512_v39 = vmul.f32 %v2784_v21, %v366_v51  ;;  %v369_v18 = vunpack.c.h.bf16 %v3396_v48 }
  0xaf   : > { %v1097_v11 = vsel %vm829_vm9, %v695_v26, %v963_v53  ;;  %vm828_vm13 = vcmp.ge.f32.partialorder %v694_v19, 0.0  ;;  %v962_v35 = vmul.f32 0.2, %v694_v19  ;;  %v1094_v42 = vsel %vm826_vm12, %v692_v38, %v960_v40  ;;  %v290_v53 = vld [vmem:[%s2767_s8 + $0x1a8] sm:$0xff] }
  0xb0   : > { %v1181_v4 = vpack.c.bf16 %v1097_v11, %v1095_v3  ;;  %v1059_v56 = vsel %vm791_vm10, %v657_v49, %v925_v17  ;;  %v656_v36 = vadd.f32 %v2788_v23, %v510_v25  ;;  %v551_v41 = vmul.f32 %v2786_v22, %v405_v15 }
  0xb1   : > { %v1163_v60 = vpack.c.bf16 %v1061_v14, %v1059_v56  ;;  %v553_v28 = vmul.f32 %v2786_v22, %v407_v16  ;;  %v1096_v50 = vsel %vm828_vm13, %v694_v19, %v962_v35  ;;  %v515_v57 = vmul.f32 %v2786_v22, %v369_v18  ;;  %v291_v19 = vld [vmem:[%s2767_s8 + $0x1b0] sm:$0xff] }
  0xb2   : > { %1552 = vmatprep.mubr.bf16.mxu1 %v1181_v4  ;;  %v404_v9 = vunpack.c.l.bf16 %v287_v54  ;;  %v1180_v2 = vpack.c.bf16 %v1096_v50, %v1094_v42  ;;  %vm790_vm14 = vcmp.ge.f32.partialorder %v656_v36, 0.0  ;;  %v924_v29 = vmul.f32 0.2, %v656_v36  ;;  %v292_v42 = vld [vmem:[%s2767_s8 + $0x1b8] sm:$0xff] }
  0xb3   : > { %v697_v55 = vadd.f32 %v2790_v24, %v551_v41  ;;  %v699_v10 = vadd.f32 %v2790_v24, %v553_v28  ;;  %v661_v61 = vadd.f32 %v2790_v24, %v515_v57  ;;  %v406_v27 = vunpack.c.l.bf16 %v288_v58 }
  0xb4   : > { %1465 = vmatmul.mubr.bf16.gmra.mxu0 %v1158_v1  ;;  %v658_v1 = vadd.f32 %v2788_v23, %v512_v39  ;;  %1553 = vmatmul.mubr.bf16.gmra.mxu1 %v1180_v2  ;;  %v1058_v32 = vsel %vm790_vm14, %v656_v36, %v924_v29  ;;  %v550_v13 = vmul.f32 %v2784_v21, %v404_v9  ;;  %v368_v52 = vunpack.c.l.bf16 %v3396_v48 }
  0xb5   : > { %1472 = vmatprep.mubr.bf16.mxu0 %v1161_v30  ;;  %v371_v30 = vunpack.c.h.bf16 %v270_v20  ;;  %vm831_vm0 = vcmp.ge.f32.partialorder %v697_v55, 0.0  ;;  %vm833_vm1 = vcmp.ge.f32.partialorder %v699_v10, 0.0  ;;  %v965_v63 = vmul.f32 0.2, %v697_v55 }
  0xb6   : > { %vm792_vm15 = vcmp.ge.f32.partialorder %v658_v1, 0.0  ;;  %v926_v45 = vmul.f32 0.2, %v658_v1  ;;  %v967_v0 = vmul.f32 0.2, %v699_v10  ;;  %vm795_vm2 = vcmp.ge.f32.partialorder %v661_v61, 0.0 }
  0xb7   : > { %v517_v59 = vmul.f32 %v2786_v22, %v371_v30  ;;  %v1099_v8 = vsel %vm831_vm0, %v697_v55, %v965_v63  ;;  %v929_v34 = vmul.f32 0.2, %v661_v61  ;;  %v552_v46 = vmul.f32 %v2784_v21, %v406_v27  ;;  %v294_v63 = vld [vmem:[%s2767_s8 + $0x1c8] sm:$0xff] }
  0xb8   : > { %v1060_v62 = vsel %vm792_vm15, %v658_v1, %v926_v45  ;;  %v696_v26 = vadd.f32 %v2788_v23, %v550_v13  ;;  %v1101_v33 = vsel %vm833_vm1, %v699_v10, %v967_v0  ;;  %v370_v12 = vunpack.c.l.bf16 %v270_v20 }
  0xb9   : > { %v1162_v6 = vpack.c.bf16 %v1060_v62, %v1058_v32  ;;  %v663_v44 = vadd.f32 %v2790_v24, %v517_v59  ;;  %v1183_v47 = vpack.c.bf16 %v1101_v33, %v1099_v8  ;;  %v1063_v7 = vsel %vm795_vm2, %v661_v61, %v929_v34  ;;  %v293_v62 = vld [vmem:[%s2767_s8 + $0x1c0] sm:$0xff] }
  0xba   : > { %vm830_vm4 = vcmp.ge.f32.partialorder %v696_v26, 0.0  ;;  %v964_v17 = vmul.f32 0.2, %v696_v26  ;;  %v514_v11 = vmul.f32 %v2784_v21, %v368_v52  ;;  %v409_v43 = vunpack.c.h.bf16 %v289_v5 }
  0xbb   : > { %vm797_vm3 = vcmp.ge.f32.partialorder %v663_v44, 0.0  ;;  %v931_v49 = vmul.f32 0.2, %v663_v44  ;;  %1560 = vmatprep.mubr.bf16.mxu1 %v1183_v47  ;;  %v516_v58 = vmul.f32 %v2784_v21, %v370_v12  ;;  %v411_v56 = vunpack.c.h.bf16 %v290_v53  ;;  %v295_v47 = vld [vmem:[%s2767_s8 + $0x1d0] sm:$0xff] }
  0xbc   : > { %1473 = vmatmul.mubr.bf16.gmra.mxu0 %v1160_v31  ;;  %v698_v31 = vadd.f32 %v2788_v23, %v552_v46  ;;  %v1098_v54 = vsel %vm830_vm4, %v696_v26, %v964_v17  ;;  %v660_v4 = vadd.f32 %v2788_v23, %v514_v11  ;;  %v555_v51 = vmul.f32 %v2786_v22, %v409_v43 }
  0xbd   : > { %1480 = vmatprep.mubr.bf16.mxu0 %v1163_v60  ;;  %v1065_v3 = vsel %vm797_vm3, %v663_v44, %v931_v49  ;;  %v408_v48 = vunpack.c.l.bf16 %v289_v5  ;;  %v410_v60 = vunpack.c.l.bf16 %v290_v53  ;;  %v662_v25 = vadd.f32 %v2788_v23, %v516_v58 }
  0xbe   : > { %v1165_v37 = vpack.c.bf16 %v1065_v3, %v1063_v7  ;;  %vm832_vm5 = vcmp.ge.f32.partialorder %v698_v31, 0.0  ;;  %v966_v38 = vmul.f32 0.2, %v698_v31  ;;  %vm794_vm6 = vcmp.ge.f32.partialorder %v660_v4, 0.0 }
  0xbf   : > { %v928_v39 = vmul.f32 0.2, %v660_v4  ;;  %v557_v15 = vmul.f32 %v2786_v22, %v411_v56  ;;  %v701_v16 = vadd.f32 %v2790_v24, %v555_v51  ;;  %v554_v20 = vmul.f32 %v2784_v21, %v408_v48 }
  0xc0   : > { %v1100_v14 = vsel %vm832_vm5, %v698_v31, %v966_v38  ;;  %v556_v35 = vmul.f32 %v2784_v21, %v410_v60  ;;  %vm796_vm7 = vcmp.ge.f32.partialorder %v662_v25, 0.0  ;;  %v930_v18 = vmul.f32 0.2, %v662_v25 }
  0xc1   : > { %v1182_v40 = vpack.c.bf16 %v1100_v14, %v1098_v54  ;;  %v1062_v36 = vsel %vm794_vm6, %v660_v4, %v928_v39  ;;  %v413_v1 = vunpack.c.h.bf16 %v291_v19  ;;  %v703_v41 = vadd.f32 %v2790_v24, %v557_v15  ;;  %v296_v54 = vld [vmem:[%s2767_s8 + $0x1d8] sm:$0xff] }
  0xc2   : > { %vm835_vm8 = vcmp.ge.f32.partialorder %v701_v16, 0.0  ;;  %v969_v28 = vmul.f32 0.2, %v701_v16  ;;  %v700_v50 = vadd.f32 %v2788_v23, %v554_v20  ;;  %v1064_v30 = vsel %vm796_vm7, %v662_v25, %v930_v18 }
  0xc3   : > { %1561 = vmatmul.mubr.bf16.gmra.mxu1 %v1182_v40  ;;  %v702_v57 = vadd.f32 %v2788_v23, %v556_v35  ;;  %v415_v9 = vunpack.c.h.bf16 %v292_v42  ;;  %v559_v2 = vmul.f32 %v2786_v22, %v413_v1  ;;  %v1164_v29 = vpack.c.bf16 %v1064_v30, %v1062_v36 }
  0xc4   : > { %1481 = vmatmul.mubr.bf16.gmra.mxu0 %v1162_v6  ;;  %vm837_vm9 = vcmp.ge.f32.partialorder %v703_v41, 0.0  ;;  %v971_v45 = vmul.f32 0.2, %v703_v41  ;;  %v1103_v55 = vsel %vm835_vm8, %v701_v16, %v969_v28  ;;  %vm834_vm10 = vcmp.ge.f32.partialorder %v700_v50, 0.0 }
  0xc5   : > { %1488 = vmatprep.mubr.bf16.mxu0 %v1165_v37  ;;  %vm836_vm11 = vcmp.ge.f32.partialorder %v702_v57, 0.0  ;;  %v968_v10 = vmul.f32 0.2, %v700_v50  ;;  %v970_v59 = vmul.f32 0.2, %v702_v57  ;;  %v561_v61 = vmul.f32 %v2786_v22, %v415_v9 }
  0xc6   : > { %v1105_v32 = vsel %vm837_vm9, %v703_v41, %v971_v45  ;;  %v705_v27 = vadd.f32 %v2790_v24, %v559_v2  ;;  %v412_v13 = vunpack.c.l.bf16 %v291_v19  ;;  %v414_v8 = vunpack.c.l.bf16 %v292_v42  ;;  %v298_v45 = vld [vmem:[%s2767_s8 + $0x1e8] sm:$0xff] }
  0xc7   : > { %v1185_v6 = vpack.c.bf16 %v1105_v32, %v1103_v55  ;;  %v1102_v0 = vsel %vm834_vm10, %v700_v50, %v968_v10  ;;  %v1104_v44 = vsel %vm836_vm11, %v702_v57, %v970_v59  ;;  %v707_v46 = vadd.f32 %v2790_v24, %v561_v61  ;;  %v297_v57 = vld [vmem:[%s2767_s8 + $0x1e0] sm:$0xff] }
  0xc8   : > { %v1184_v34 = vpack.c.bf16 %v1104_v44, %v1102_v0  ;;  %vm839_vm12 = vcmp.ge.f32.partialorder %v705_v27, 0.0  ;;  %v973_v26 = vmul.f32 0.2, %v705_v27  ;;  %v558_v33 = vmul.f32 %v2784_v21, %v412_v13 }
  0xc9   : > { %1568 = vmatprep.mubr.bf16.mxu1 %v1185_v6  ;;  %v560_v49 = vmul.f32 %v2784_v21, %v414_v8  ;;  %v417_v52 = vunpack.c.h.bf16 %v293_v62  ;;  %v419_v5 = vunpack.c.h.bf16 %v294_v63  ;;  %vm841_vm13 = vcmp.ge.f32.partialorder %v707_v46, 0.0 }
  0xca   : > { %v975_v7 = vmul.f32 0.2, %v707_v46  ;;  %v1107_v31 = vsel %vm839_vm12, %v705_v27, %v973_v26  ;;  %v416_v53 = vunpack.c.l.bf16 %v293_v62  ;;  %v704_v3 = vadd.f32 %v2788_v23, %v558_v33  ;;  %v299_v26 = vld [vmem:[%s2767_s8 + $0x1f0] sm:$0xff] }
  0xcb   : > { %1569 = vmatmul.mubr.bf16.gmra.mxu1 %v1184_v34  ;;  %v706_v17 = vadd.f32 %v2788_v23, %v560_v49  ;;  %v563_v12 = vmul.f32 %v2786_v22, %v417_v52  ;;  %v565_v11 = vmul.f32 %v2786_v22, %v419_v5  ;;  %v418_v38 = vunpack.c.l.bf16 %v294_v63 }
  0xcc   : > { %1489 = vmatmul.mubr.bf16.gmra.mxu0 %v1164_v29  ;;  %v1109_v37 = vsel %vm841_vm13, %v707_v46, %v975_v7  ;;  %v562_v43 = vmul.f32 %v2784_v21, %v416_v53  ;;  %v421_v58 = vunpack.c.h.bf16 %v295_v47  ;;  %vm838_vm14 = vcmp.ge.f32.partialorder %v704_v3, 0.0  ;;  %v300_v53 = vld [vmem:[%s2767_s8 + $0x1f8] sm:$0xff] }
  0xcd   : > { %v1187_v4 = vpack.c.bf16 %v1109_v37, %v1107_v31  ;;  %vm840_vm15 = vcmp.ge.f32.partialorder %v706_v17, 0.0  ;;  %v972_v56 = vmul.f32 0.2, %v704_v3  ;;  %v974_v14 = vmul.f32 0.2, %v706_v17 }
  0xce   : > { %v709_v51 = vadd.f32 %v2790_v24, %v563_v12  ;;  %v711_v48 = vadd.f32 %v2790_v24, %v565_v11  ;;  %v564_v60 = vmul.f32 %v2784_v21, %v418_v38  ;;  %v708_v40 = vadd.f32 %v2788_v23, %v562_v43 }
  0xcf   : > { %1576 = vmatprep.mubr.bf16.mxu1 %v1187_v4  ;;  %v1106_v19 = vsel %vm838_vm14, %v704_v3, %v972_v56  ;;  %v423_v25 = vunpack.c.h.bf16 %v296_v54  ;;  %v567_v39 = vmul.f32 %v2786_v22, %v421_v58  ;;  %v1108_v15 = vsel %vm840_vm15, %v706_v17, %v974_v14 }
  0xd0   : > { %vm843_vm0 = vcmp.ge.f32.partialorder %v709_v51, 0.0  ;;  %vm845_vm1 = vcmp.ge.f32.partialorder %v711_v48, 0.0  ;;  %v977_v16 = vmul.f32 0.2, %v709_v51  ;;  %v1186_v20 = vpack.c.bf16 %v1108_v15, %v1106_v19  ;;  %v301_v15 = vld [vmem:[%s2767_s8 + $0x200] sm:$0xff] }
  0xd1   : > { %v979_v35 = vmul.f32 0.2, %v711_v48  ;;  %v710_v42 = vadd.f32 %v2788_v23, %v564_v60  ;;  %vm842_vm2 = vcmp.ge.f32.partialorder %v708_v40, 0.0  ;;  %v976_v36 = vmul.f32 0.2, %v708_v40 }
  0xd2   : > { %v1111_v18 = vsel %vm843_vm0, %v709_v51, %v977_v16  ;;  %v569_v1 = vmul.f32 %v2786_v22, %v423_v25  ;;  %v713_v41 = vadd.f32 %v2790_v24, %v567_v39  ;;  %v420_v30 = vunpack.c.l.bf16 %v295_v47  ;;  %v302_v16 = vld [vmem:[%s2767_s8 + $0x208] sm:$0xff] }
  0xd3   : > { %1577 = vmatmul.mubr.bf16.gmra.mxu1 %v1186_v20  ;;  %v1113_v28 = vsel %vm845_vm1, %v711_v48, %v979_v35  ;;  %vm844_vm3 = vcmp.ge.f32.partialorder %v710_v42, 0.0  ;;  %v978_v50 = vmul.f32 0.2, %v710_v42  ;;  %v1110_v2 = vsel %vm842_vm2, %v708_v40, %v976_v36 }
  0xd4   : > { %v1189_v9 = vpack.c.bf16 %v1113_v28, %v1111_v18  ;;  %v715_v29 = vadd.f32 %v2790_v24, %v569_v1  ;;  %vm847_vm4 = vcmp.ge.f32.partialorder %v713_v41, 0.0  ;;  %v981_v10 = vmul.f32 0.2, %v713_v41 }
  0xd5   : > { %v1112_v55 = vsel %vm844_vm3, %v710_v42, %v978_v50  ;;  %v422_v59 = vunpack.c.l.bf16 %v296_v54  ;;  %v566_v32 = vmul.f32 %v2784_v21, %v420_v30  ;;  %v425_v13 = vunpack.c.h.bf16 %v297_v57 }
  0xd6   : > { %1584 = vmatprep.mubr.bf16.mxu1 %v1189_v9  ;;  %v1188_v61 = vpack.c.bf16 %v1112_v55, %v1110_v2  ;;  %vm849_vm5 = vcmp.ge.f32.partialorder %v715_v29, 0.0  ;;  %v983_v27 = vmul.f32 0.2, %v715_v29  ;;  %v1115_v62 = vsel %vm847_vm4, %v713_v41, %v981_v10 }
  0xd7   : > { %v568_v63 = vmul.f32 %v2784_v21, %v422_v59  ;;  %v712_v6 = vadd.f32 %v2788_v23, %v566_v32  ;;  %v427_v0 = vunpack.c.h.bf16 %v298_v45  ;;  %v571_v8 = vmul.f32 %v2786_v22, %v425_v13 }
  0xd8   : > { %v1117_v44 = vsel %vm849_vm5, %v715_v29, %v983_v27  ;;  %v424_v34 = vunpack.c.l.bf16 %v297_v57  ;;  %v426_v46 = vunpack.c.l.bf16 %v298_v45  ;;  %v429_v12 = vunpack.c.h.bf16 %v299_v26  ;;  %v303_v57 = vld [vmem:[%s2767_s8 + $0x210] sm:$0x11]  ;;  %s2665_s8 = smul.u32 268, %s3823_s19 }
  0xd9   : > { %v1191_v33 = vpack.c.bf16 %v1117_v44, %v1115_v62  ;;  %v714_v49 = vadd.f32 %v2788_v23, %v568_v63  ;;  %vm846_vm6 = vcmp.ge.f32.partialorder %v712_v6, 0.0  ;;  %v980_v52 = vmul.f32 0.2, %v712_v6 }
  0xda   : > { %v573_v5 = vmul.f32 %v2786_v22, %v427_v0  ;;  %v717_v47 = vadd.f32 %v2790_v24, %v571_v8  ;;  %v570_v7 = vmul.f32 %v2784_v21, %v424_v34  ;;  %v572_v31 = vmul.f32 %v2784_v21, %v426_v46  ;;  %s3504_s15 = scalar_lea.vmem %s3820_s4, %s2665_s8 }
  0xdb   : > { %1585 = vmatmul.mubr.bf16.gmra.mxu1 %v1188_v61  ;;  %vm848_vm7 = vcmp.ge.f32.partialorder %v714_v49, 0.0  ;;  %v982_v3 = vmul.f32 0.2, %v714_v49  ;;  %v1114_v17 = vsel %vm846_vm6, %v712_v6, %v980_v52  ;;  %v431_v58 = vunpack.c.h.bf16 %v300_v53 }
  0xdc   : > { %1592 = vmatprep.mubr.bf16.mxu1 %v1191_v33  ;;  %v719_v11 = vadd.f32 %v2790_v24, %v573_v5  ;;  %vm851_vm8 = vcmp.ge.f32.partialorder %v717_v47, 0.0  ;;  %v985_v37 = vmul.f32 0.2, %v717_v47  ;;  %v716_v38 = vadd.f32 %v2788_v23, %v570_v7 }
  0xdd   : > { %v1116_v43 = vsel %vm848_vm7, %v714_v49, %v982_v3  ;;  %v718_v54 = vadd.f32 %v2788_v23, %v572_v31  ;;  %v575_v4 = vmul.f32 %v2786_v22, %v429_v12  ;;  %v577_v40 = vmul.f32 %v2786_v22, %v431_v58 }
  0xde   : > { %v1190_v56 = vpack.c.bf16 %v1116_v43, %v1114_v17  ;;  %vm853_vm9 = vcmp.ge.f32.partialorder %v719_v11, 0.0  ;;  %v987_v14 = vmul.f32 0.2, %v719_v11  ;;  %v1119_v51 = vsel %vm851_vm8, %v717_v47, %v985_v37 }
  0xdf   : > { %vm850_vm10 = vcmp.ge.f32.partialorder %v716_v38, 0.0  ;;  %vm852_vm11 = vcmp.ge.f32.partialorder %v718_v54, 0.0  ;;  %v984_v48 = vmul.f32 0.2, %v716_v38  ;;  %v986_v60 = vmul.f32 0.2, %v718_v54 }
  0xe0   : > { %v1121_v19 = vsel %vm853_vm9, %v719_v11, %v987_v14  ;;  %v721_v25 = vadd.f32 %v2790_v24, %v575_v4  ;;  %v428_v39 = vunpack.c.l.bf16 %v299_v26  ;;  %v430_v42 = vunpack.c.l.bf16 %v300_v53 }
  0xe1   : > { %v1193_v20 = vpack.c.bf16 %v1121_v19, %v1119_v51  ;;  %v1118_v35 = vsel %vm850_vm10, %v716_v38, %v984_v48  ;;  %v1120_v18 = vsel %vm852_vm11, %v718_v54, %v986_v60  ;;  %v723_v36 = vadd.f32 %v2790_v24, %v577_v40 }
  0xe2   : > { %vm855_vm12 = vcmp.ge.f32.partialorder %v721_v25, 0.0  ;;  %v989_v1 = vmul.f32 0.2, %v721_v25  ;;  %v574_v41 = vmul.f32 %v2784_v21, %v428_v39  ;;  %v576_v28 = vmul.f32 %v2784_v21, %v430_v42 }
  0xe3   : > { %1593 = vmatmul.mubr.bf16.gmra.mxu1 %v1190_v56  ;;  %v433_v50 = vunpack.c.h.bf16 %v301_v15  ;;  %v435_v30 = vunpack.c.h.bf16 %v302_v16  ;;  %vm857_vm13 = vcmp.ge.f32.partialorder %v723_v36, 0.0  ;;  %v991_v9 = vmul.f32 0.2, %v723_v36 }
  0xe4   : > { %1600 = vmatprep.mubr.bf16.mxu1 %v1193_v20  ;;  %v1123_v2 = vsel %vm855_vm12, %v721_v25, %v989_v1  ;;  %v432_v29 = vunpack.c.l.bf16 %v301_v15  ;;  %v720_v45 = vadd.f32 %v2788_v23, %v574_v41  ;;  %v722_v55 = vadd.f32 %v2788_v23, %v576_v28 }
  0xe5   : > { %v579_v10 = vmul.f32 %v2786_v22, %v433_v50  ;;  %v581_v59 = vmul.f32 %v2786_v22, %v435_v30  ;;  %v1192_v32 = vpack.c.bf16 %v1120_v18, %v1118_v35  ;;  %v1125_v61 = vsel %vm857_vm13, %v723_v36, %v991_v9 }
  0xe6   : > { %v434_v27 = vunpack.c.l.bf16 %v302_v16  ;;  %v437_v13 = vunpack.c.h.bf16 %v303_v57  ;;  %v1195_v62 = vpack.c.bf16 %v1125_v61, %v1123_v2  ;;  %vm854_vm14 = vcmp.ge.f32.partialorder %v720_v45, 0.0 }
  0xe7   : > { %v988_v63 = vmul.f32 0.2, %v720_v45  ;;  %v578_v6 = vmul.f32 %v2784_v21, %v432_v29  ;;  %v990_v0 = vmul.f32 0.2, %v722_v55  ;;  %v725_v44 = vadd.f32 %v2790_v24, %v579_v10 }
  0xe8   : > { %v727_v8 = vadd.f32 %v2790_v24, %v581_v59  ;;  %v580_v34 = vmul.f32 %v2784_v21, %v434_v27  ;;  %vm856_vm15 = vcmp.ge.f32.partialorder %v722_v55, 0.0  ;;  %v583_v46 = vmul.f32 %v2786_v22, %v437_v13 }
  0xe9   : > { %vm859_vm0 = vcmp.ge.f32.partialorder %v725_v44, 0.0  ;;  %v993_v26 = vmul.f32 0.2, %v725_v44  ;;  %v1122_v33 = vsel %vm854_vm14, %v720_v45, %v988_v63  ;;  %v1124_v52 = vsel %vm856_vm15, %v722_v55, %v990_v0 }
  0xea   : > { %vm861_vm1 = vcmp.ge.f32.partialorder %v727_v8, 0.0  ;;  %v995_v49 = vmul.f32 0.2, %v727_v8  ;;  %v724_v5 = vadd.f32 %v2788_v23, %v578_v6  ;;  %v726_v47 = vadd.f32 %v2788_v23, %v580_v34 }
  0xeb   : > { %1601 = vmatmul.mubr.bf16.gmra.mxu1 %v1192_v32  ;;  %v436_v7 = vunpack.c.l.bf16 %v303_v57  ;;  %v1127_v31 = vsel %vm859_vm0, %v725_v44, %v993_v26  ;;  %v729_v3 = vadd.f32 %v2790_v24, %v583_v46  ;;  %v1194_v17 = vpack.c.bf16 %v1124_v52, %v1122_v33 }
  0xec   : > { %1608 = vmatprep.mubr.bf16.mxu1 %v1195_v62  ;;  %v1129_v53 = vsel %vm861_vm1, %v727_v8, %v995_v49  ;;  %v992_v22 = vmul.f32 0.2, %v724_v5  ;;  %v994_v11 = vmul.f32 0.2, %v726_v47  ;;  %vm858_vm2 = vcmp.ge.f32.partialorder %v724_v5, 0.0 }
  0xed   : > { %v1197_v12 = vpack.c.bf16 %v1129_v53, %v1127_v31  ;;  %v582_v37 = vmul.f32 %v2784_v21, %v436_v7  ;;  %vm860_vm3 = vcmp.ge.f32.partialorder %v726_v47, 0.0  ;;  %v997_v38 = vmul.f32 0.2, %v729_v3 }
  0xee   : > { %vm863_vm4 = vcmp.ge.f32.partialorder %v729_v3, 0.0  ;;  %v1126_v43 = vsel %vm858_vm2, %v724_v5, %v992_v22  ;;  %v1128_v54 = vsel %vm860_vm3, %v726_v47, %v994_v11  ;;  %vm1697_vm6 = vcmask 1040384  }
  0xef   : > { %v728_v58 = vadd.f32 %v2788_v23, %v582_v37  ;;  %v1131_v4 = vsel %vm863_vm4, %v729_v3, %v997_v38  ;;  %v1196_v56 = vpack.c.bf16 %v1128_v54, %v1126_v43  ;;  %vm2184_vm7 = vsmask.f32 256 }
  0xf0   : > { %v1199_v24 = vpack.c.bf16 %v1131_v4, %v1131_v4  ;;  %vm2185_vm8 = vmand %vm1697_vm6, %vm2184_vm7 }
  0xf1   : > { %v996_v14 = vmul.f32 0.2, %v728_v58  ;;  %vm862_vm5 = vcmp.ge.f32.partialorder %v728_v58, 0.0 }
  0xf3   : > { %1609 = vmatmul.mubr.bf16.gmra.mxu1 %v1194_v17  ;;  %v1130_v51 = vsel %vm862_vm5, %v728_v58, %v996_v14 }
  0xf4   : > { %1616 = vmatprep.mubr.bf16.mxu1 %v1197_v12  ;;  %v1198_v21 = vpack.c.bf16 %v1130_v51, %v1130_v51 }
  0xfb   : > { %1617 = vmatmul.mubr.bf16.gmra.mxu1 %v1196_v56 }
  0xfc   : > { %1624 = vmatprep.mubr.bf16.mxu1 %v1199_v24 }
 0x103   : > { %1625 = vmatmul.mubr.bf16.gmra.mxu1 %v1198_v21 }
 0x10c   : > { %v1362_v48 = vpop.f32.mrf.mxu0 }
 0x10d   : > { %v1706_v19 = vmul.f32 %v1362_v48, %v1362_v48 }
 0x10e   : > { %v1364_v60 = vpop.f32.mrf.mxu0 }
 0x110   : > { %v1365_v23 = vpop.f32.mrf.mxu0 }
 0x111   : > { %v1632_v40 = vadd.f32 %v1365_v23, %v1362_v48  ;;  %v1707_v25 = vmul.f32 %v1365_v23, %v1365_v23  ;;  %v2438_v39 = vpack.c.bf16 %v1365_v23, %v1362_v48 }
 0x112   : > { %v1367_v15 = vpop.f32.mrf.mxu0 }
 0x113   : > { %v3506_v16 = vadd.f32 %v1707_v25, %v1706_v19  ;;  %2439 = vst [vmem:[%s3504_s15] sm:$0xff] %v2438_v39  }
 0x114   : > { %v3509_v20 = vpop.f32.mrf.mxu0 }
 0x115   : > { %v3512_v35 = vadd.f32 %v1632_v40, %v3509_v20  ;;  %v1708_v40 = vmul.f32 %v3509_v20, %v3509_v20 }
 0x116   : > { %v1372_v42 = vpop.f32.mrf.mxu0 }
 0x118   : > { %v3514_v18 = vpop.f32.mrf.mxu0 }
 0x119   : > { %v2443_v36 = vpack.c.bf16 %v3514_v18, %v3509_v20  ;;  %v1709_v15 = vmul.f32 %v3514_v18, %v3514_v18 }
 0x11a   : > { %v1375_v1 = vpop.f32.mrf.mxu0 }
 0x11b   : > { %2600 = vst [vmem:[%s3504_s15 + $0x8] sm:$0xff] %v2443_v36   ;;  %v1774_v1 = vadd.f32 %v3506_v16, %v1708_v40 }
 0x11c   : > { %v3519_v41 = vpop.f32.mrf.mxu0 }
 0x11d   : > { %v3521_v50 = vpop.f32.mrf.mxu1  ;;  %v1710_v20 = vmul.f32 %v3519_v41, %v3519_v41 }
 0x11e   : > { %v1380_v28 = vpop.f32.mrf.mxu0 }
 0x11f   : > { %v1500_v9 = vpop.f32.mrf.mxu1  ;;  %v1634_v28 = vadd.f32 %v3512_v35, %v3514_v18 }
 0x120   : > { %v3523_v30 = vpop.f32.mrf.mxu0 }
 0x121   : > { %v2448_v57 = vpack.c.bf16 %v3523_v30, %v3519_v41  ;;  %v3528_v29 = vpop.f32.mrf.mxu1 }
 0x122   : > { %v1383_v2 = vpop.f32.mrf.mxu0  ;;  %v2523_v55 = vpack.c.bf16 %v3528_v29, %v3521_v50 }
 0x123   : > { %2601 = vst [vmem:[%s3504_s15 + $0x10] sm:$0xff] %v2448_v57   ;;  %v1503_v10 = vpop.f32.mrf.mxu1  ;;  %v1775_v2 = vadd.f32 %v1774_v1, %v1709_v15 }
 0x124   : > { %v3530_v45 = vpop.f32.mrf.mxu0  ;;  %2616 = vst [vmem:[%s3504_s15 + $0x88] sm:$0xff] %v2523_v55   ;;  %v1635_v55 = vadd.f32 %v1634_v28, %v3519_v41  ;;  %v1711_v10 = vmul.f32 %v3523_v30, %v3523_v30 }
 0x125   : > { %v1776_v35 = vadd.f32 %v1775_v2, %v1710_v20 }
 0x126   : > { %v1388_v59 = vpop.f32.mrf.mxu0  ;;  %v3542_v62 = vpop.f32.mrf.mxu1  ;;  %v1636_v18 = vadd.f32 %v1635_v55, %v3523_v30 }
 0x128   : > { %v3535_v32 = vpop.f32.mrf.mxu0  ;;  %v1508_v6 = vpop.f32.mrf.mxu1 }
 0x129   : > { %v2453_v61 = vpack.c.bf16 %v3535_v32, %v3530_v45 }
 0x12a   : > { %v1391_v27 = vpop.f32.mrf.mxu0  ;;  %v3548_v8 = vpop.f32.mrf.mxu1 }
 0x12b   : > { %2602 = vst [vmem:[%s3504_s15 + $0x18] sm:$0xff] %v2453_v61   ;;  %v2528_v46 = vpack.c.bf16 %v3548_v8, %v3542_v62  ;;  %v1712_v27 = vmul.f32 %v3530_v45, %v3530_v45 }
 0x12c   : > { %v3540_v13 = vpop.f32.mrf.mxu0  ;;  %v1511_v26 = vpop.f32.mrf.mxu1 }
 0x12d   : > { %2617 = vst [vmem:[%s3504_s15 + $0x90] sm:$0xff] %v2528_v46   ;;  %v1713_v46 = vmul.f32 %v3535_v32, %v3535_v32 }
 0x12e   : > { %v1396_v63 = vpop.f32.mrf.mxu0 }
 0x130   : > { %v3544_v0 = vpop.f32.mrf.mxu0 }
 0x131   : > { %v2458_v44 = vpack.c.bf16 %v3544_v0, %v3540_v13 }
 0x132   : > { %v1399_v34 = vpop.f32.mrf.mxu0  ;;  %v3560_v47 = vpop.f32.mrf.mxu1 }
 0x133   : > { %2603 = vst [vmem:[%s3504_s15 + $0x20] sm:$0xff] %v2458_v44   ;;  %v1777_v44 = vadd.f32 %v1776_v35, %v1711_v10  ;;  %v1637_v34 = vadd.f32 %v1636_v18, %v3530_v45  ;;  %v1715_v45 = vmul.f32 %v3544_v0, %v3544_v0 }
 0x134   : > { %v3553_v33 = vpop.f32.mrf.mxu0  ;;  %v1516_v31 = vpop.f32.mrf.mxu1 }
 0x135   : > { %v1638_v30 = vadd.f32 %v1637_v34, %v3535_v32 }
 0x136   : > { %v1404_v49 = vpop.f32.mrf.mxu0  ;;  %v3565_v3 = vpop.f32.mrf.mxu1 }
 0x137   : > { %v2533_v12 = vpack.c.bf16 %v3565_v3, %v3560_v47  ;;  %v1778_v49 = vadd.f32 %v1777_v44, %v1712_v27 }
 0x138   : > { %v3556_v52 = vpop.f32.mrf.mxu0  ;;  %v1519_v22 = vpop.f32.mrf.mxu1 }
 0x139   : > { %v2463_v5 = vpack.c.bf16 %v3556_v52, %v3553_v33  ;;  %2618 = vst [vmem:[%s3504_s15 + $0x98] sm:$0xff] %v2533_v12   ;;  %v1779_v31 = vadd.f32 %v1778_v49, %v1713_v46 }
 0x13a   : > { %v1407_v7 = vpop.f32.mrf.mxu0 }
 0x13b   : > { %2604 = vst [vmem:[%s3504_s15 + $0x28] sm:$0xff] %v2463_v5   ;;  %v1714_v5 = vmul.f32 %v3540_v13, %v3540_v13 }
 0x13c   : > { %v3563_v53 = vpop.f32.mrf.mxu0 }
 0x13d   : > { %v1780_v22 = vadd.f32 %v1779_v31, %v1714_v5  ;;  %v1718_v40 = vmul.f32 %v3563_v53, %v3563_v53 }
 0x13e   : > { %v1412_v17 = vpop.f32.mrf.mxu0 }
 0x13f   : > { %v3577_v58 = vpop.f32.mrf.mxu1  ;;  %v1639_v17 = vadd.f32 %v1638_v30, %v3540_v13 }
 0x140   : > { %v3569_v11 = vpop.f32.mrf.mxu0 }
 0x141   : > { %v2468_v37 = vpack.c.bf16 %v3569_v11, %v3563_v53  ;;  %v1524_v24 = vpop.f32.mrf.mxu1  ;;  %v1719_v28 = vmul.f32 %v3569_v11, %v3569_v11 }
 0x142   : > { %v1415_v38 = vpop.f32.mrf.mxu0  ;;  %v1781_v24 = vadd.f32 %v1780_v22, %v1715_v45 }
 0x143   : > { %2605 = vst [vmem:[%s3504_s15 + $0x30] sm:$0xff] %v2468_v37   ;;  %v3584_v51 = vpop.f32.mrf.mxu1  ;;  %v1640_v37 = vadd.f32 %v1639_v17, %v3544_v0  ;;  %v1716_v38 = vmul.f32 %v3553_v33, %v3553_v33 }
 0x144   : > { %v3575_v43 = vpop.f32.mrf.mxu0  ;;  %v2538_v48 = vpack.c.bf16 %v3584_v51, %v3577_v58 }
 0x145   : > { %v1527_v60 = vpop.f32.mrf.mxu1  ;;  %v1641_v13 = vadd.f32 %v1640_v37, %v3553_v33  ;;  %v1782_v0 = vadd.f32 %v1781_v24, %v1716_v38  ;;  %v1720_v2 = vmul.f32 %v3575_v43, %v3575_v43 }
 0x146   : > { %v1420_v54 = vpop.f32.mrf.mxu0  ;;  %2619 = vst [vmem:[%s3504_s15 + $0xa0] sm:$0xff] %v2538_v48  }
 0x148   : > { %v3579_v4 = vpop.f32.mrf.mxu0 }
 0x149   : > { %v2473_v56 = vpack.c.bf16 %v3579_v4, %v3575_v43 }
 0x14a   : > { %v1423_v14 = vpop.f32.mrf.mxu0 }
 0x14b   : > { %2606 = vst [vmem:[%s3504_s15 + $0x38] sm:$0xff] %v2473_v56   ;;  %v1717_v14 = vmul.f32 %v3556_v52, %v3556_v52 }
 0x14c   : > { %v3586_v21 = vpop.f32.mrf.mxu0  ;;  %v3600_v42 = vpop.f32.mrf.mxu1 }
 0x14d   : > { %v1783_v15 = vadd.f32 %v1782_v0, %v1717_v14 }
 0x14e   : > { %v1428_v23 = vpop.f32.mrf.mxu0  ;;  %v1532_v57 = vpop.f32.mrf.mxu1 }
 0x14f   : > { %v1642_v23 = vadd.f32 %v1641_v13, %v3556_v52  ;;  %v1784_v52 = vadd.f32 %v1783_v15, %v1718_v40 }
 0x150   : > { %v3591_v19 = vpop.f32.mrf.mxu0  ;;  %v3612_v59 = vpop.f32.mrf.mxu1 }
 0x151   : > { %v2478_v25 = vpack.c.bf16 %v3591_v19, %v3586_v21  ;;  %v2543_v16 = vpack.c.bf16 %v3612_v59, %v3600_v42  ;;  %v1643_v1 = vadd.f32 %v1642_v23, %v3563_v53  ;;  %v1721_v53 = vmul.f32 %v3579_v4, %v3579_v4 }
 0x152   : > { %v1431_v39 = vpop.f32.mrf.mxu0  ;;  %v1535_v41 = vpop.f32.mrf.mxu1 }
 0x153   : > { %2607 = vst [vmem:[%s3504_s15 + $0x40] sm:$0xff] %v2478_v25   ;;  %2620 = vst [vmem:[%s3504_s15 + $0xa8] sm:$0xff] %v2543_v16   ;;  %v1785_v16 = vadd.f32 %v1784_v52, %v1719_v28  ;;  %v1722_v41 = vmul.f32 %v3586_v21, %v3586_v21 }
 0x154   : > { %v3602_v36 = vpop.f32.mrf.mxu0 }
 0x155   : > { %v1786_v27 = vadd.f32 %v1785_v16, %v1720_v2 }
 0x156   : > { %v1436_v9 = vpop.f32.mrf.mxu0 }
 0x157   : > { %v1644_v9 = vadd.f32 %v1643_v1, %v3569_v11  ;;  %v1787_v44 = vadd.f32 %v1786_v27, %v1721_v53 }
 0x158   : > { %v3614_v61 = vpop.f32.mrf.mxu0 }
 0x159   : > { %v2483_v63 = vpack.c.bf16 %v3614_v61, %v3602_v36  ;;  %v1645_v35 = vadd.f32 %v1644_v9, %v3575_v43  ;;  %v1723_v43 = vmul.f32 %v3591_v19, %v3591_v19  ;;  %v1788_v30 = vadd.f32 %v1787_v44, %v1722_v41 }
 0x15a   : > { %v1439_v6 = vpop.f32.mrf.mxu0  ;;  %v3643_v54 = vpop.f32.mrf.mxu1  ;;  %v1725_v37 = vmul.f32 %v3614_v61, %v3614_v61 }
 0x15b   : > { %2608 = vst [vmem:[%s3504_s15 + $0x48] sm:$0xff] %v2483_v63   ;;  %v1646_v63 = vadd.f32 %v1645_v35, %v3579_v4  ;;  %v1724_v4 = vmul.f32 %v3602_v36, %v3602_v36 }
 0x15c   : > { %v3628_v26 = vpop.f32.mrf.mxu0  ;;  %v1540_v48 = vpop.f32.mrf.mxu1 }
 0x15d   : > { %v1647_v34 = vadd.f32 %v1646_v63, %v3586_v21  ;;  %v1789_v21 = vadd.f32 %v1788_v30, %v1723_v43  ;;  %v1726_v24 = vmul.f32 %v3628_v26, %v3628_v26 }
 0x15e   : > { %v1444_v7 = vpop.f32.mrf.mxu0  ;;  %v3652_v25 = vpop.f32.mrf.mxu1 }
 0x15f   : > { %v2548_v33 = vpack.c.bf16 %v3652_v25, %v3643_v54  ;;  %v1648_v5 = vadd.f32 %v1647_v34, %v3591_v19  ;;  %v1790_v19 = vadd.f32 %v1789_v21, %v1724_v4 }
 0x160   : > { %v3636_v12 = vpop.f32.mrf.mxu0  ;;  %v1543_v20 = vpop.f32.mrf.mxu1 }
 0x161   : > { %v2488_v32 = vpack.c.bf16 %v3636_v12, %v3628_v26  ;;  %2621 = vst [vmem:[%s3504_s15 + $0xb0] sm:$0xff] %v2548_v33   ;;  %v1649_v22 = vadd.f32 %v1648_v5, %v3602_v36  ;;  %v1791_v14 = vadd.f32 %v1790_v19, %v1725_v37  ;;  %v1727_v36 = vmul.f32 %v3636_v12, %v3636_v12 }
 0x162   : > { %v1447_v56 = vpop.f32.mrf.mxu0 }
 0x163   : > { %2609 = vst [vmem:[%s3504_s15 + $0x50] sm:$0xff] %v2488_v32   ;;  %v1650_v56 = vadd.f32 %v1649_v22, %v3614_v61  ;;  %v1792_v23 = vadd.f32 %v1791_v14, %v1726_v24 }
 0x164   : > { %v1450_v60 = vpop.f32.mrf.mxu0 }
 0x165   : > { %v1651_v48 = vadd.f32 %v1650_v56, %v3628_v26  ;;  %v1793_v1 = vadd.f32 %v1792_v23, %v1727_v36 }
 0x166   : > { %v1452_v39 = vpop.f32.mrf.mxu0 }
 0x167   : > { %v3670_v11 = vpop.f32.mrf.mxu1  ;;  %v1652_v40 = vadd.f32 %v1651_v48, %v3636_v12  ;;  %v1728_v39 = vmul.f32 %v1450_v60, %v1450_v60 }
 0x168   : > { %v1453_v57 = vpop.f32.mrf.mxu0 }
 0x169   : > { %v2493_v55 = vpack.c.bf16 %v1453_v57, %v1450_v60  ;;  %v1548_v46 = vpop.f32.mrf.mxu1  ;;  %v1653_v28 = vadd.f32 %v1652_v40, %v1450_v60  ;;  %v1729_v61 = vmul.f32 %v1453_v57, %v1453_v57  ;;  %v1794_v9 = vadd.f32 %v1793_v1, %v1728_v39 }
 0x16a   : > { %v1455_v10 = vpop.f32.mrf.mxu0 }
 0x16b   : > { %2610 = vst [vmem:[%s3504_s15 + $0x58] sm:$0xff] %v2493_v55   ;;  %v3678_v31 = vpop.f32.mrf.mxu1  ;;  %v1654_v2 = vadd.f32 %v1653_v28, %v1453_v57  ;;  %v1795_v16 = vadd.f32 %v1794_v9, %v1729_v61 }
 0x16c   : > { %v1458_v18 = vpop.f32.mrf.mxu0  ;;  %v2553_v45 = vpack.c.bf16 %v3678_v31, %v3670_v11 }
 0x16d   : > { %v1551_v38 = vpop.f32.mrf.mxu1  ;;  %v1730_v26 = vmul.f32 %v1458_v18, %v1458_v18  ;;  %v1655_v35 = vadd.f32 %v1654_v2, %v1458_v18 }
 0x16e   : > { %v1460_v6 = vpop.f32.mrf.mxu0  ;;  %2622 = vst [vmem:[%s3504_s15 + $0xb8] sm:$0xff] %v2553_v45  }
 0x16f   : > { %v1796_v63 = vadd.f32 %v1795_v16, %v1730_v26 }
 0x170   : > { %v1461_v49 = vpop.f32.mrf.mxu0 }
 0x171   : > { %v2498_v7 = vpack.c.bf16 %v1461_v49, %v1458_v18  ;;  %v1731_v12 = vmul.f32 %v1461_v49, %v1461_v49  ;;  %v1656_v41 = vadd.f32 %v1655_v35, %v1461_v49 }
 0x172   : > { %v1463_v17 = vpop.f32.mrf.mxu0 }
 0x173   : > { %2611 = vst [vmem:[%s3504_s15 + $0x60] sm:$0xff] %v2498_v7   ;;  %v1797_v43 = vadd.f32 %v1796_v63, %v1731_v12 }
 0x174   : > { %v1466_v32 = vpop.f32.mrf.mxu0  ;;  %v3695_v20 = vpop.f32.mrf.mxu1 }
 0x175   : > { %v1732_v6 = vmul.f32 %v1466_v32, %v1466_v32  ;;  %v1657_v46 = vadd.f32 %v1656_v41, %v1466_v32 }
 0x176   : > { %v1468_v13 = vpop.f32.mrf.mxu0  ;;  %v1556_v55 = vpop.f32.mrf.mxu1 }
 0x177   : > { %v1798_v18 = vadd.f32 %v1797_v43, %v1732_v6  ;;  %v1741_v6 = vmul.f32 %v3528_v29, %v3528_v29 }
 0x178   : > { %v1469_v0 = vpop.f32.mrf.mxu0  ;;  %v3697_v53 = vpop.f32.mrf.mxu1 }
 0x179   : > { %v2503_v33 = vpack.c.bf16 %v1469_v0, %v1466_v32  ;;  %v2558_v60 = vpack.c.bf16 %v3697_v53, %v3695_v20  ;;  %v1733_v30 = vmul.f32 %v1469_v0, %v1469_v0  ;;  %v1658_v4 = vadd.f32 %v1657_v46, %v1469_v0 }
 0x17a   : > { %v1471_v15 = vpop.f32.mrf.mxu0  ;;  %v1559_v34 = vpop.f32.mrf.mxu1  ;;  %v1742_v46 = vmul.f32 %v3542_v62, %v3542_v62 }
 0x17b   : > { %2612 = vst [vmem:[%s3504_s15 + $0x68] sm:$0xff] %v2503_v33   ;;  %2623 = vst [vmem:[%s3504_s15 + $0xc0] sm:$0xff] %v2558_v60   ;;  %v1799_v45 = vadd.f32 %v1798_v18, %v1733_v30 }
 0x17c   : > { %v1474_v52 = vpop.f32.mrf.mxu0 }
 0x17d   : > { %v1734_v7 = vmul.f32 %v1474_v52, %v1474_v52  ;;  %v1659_v21 = vadd.f32 %v1658_v4, %v1474_v52 }
 0x17e   : > { %v1476_v10 = vpop.f32.mrf.mxu0 }
 0x17f   : > { %v1800_v38 = vadd.f32 %v1799_v45, %v1734_v7  ;;  %v1744_v7 = vmul.f32 %v3560_v47, %v3560_v47 }
 0x180   : > { %v1477_v27 = vpop.f32.mrf.mxu0 }
 0x181   : > { %v2508_v44 = vpack.c.bf16 %v1477_v27, %v1474_v52  ;;  %v1735_v22 = vmul.f32 %v1477_v27, %v1477_v27  ;;  %v1660_v19 = vadd.f32 %v1659_v21, %v1477_v27  ;;  %v1740_v27 = vmul.f32 %v3521_v50, %v3521_v50 }
 0x182   : > { %v1479_v57 = vpop.f32.mrf.mxu0 }
 0x183   : > { %2613 = vst [vmem:[%s3504_s15 + $0x70] sm:$0xff] %v2508_v44   ;;  %v3703_v37 = vpop.f32.mrf.mxu1  ;;  %v1801_v14 = vadd.f32 %v1800_v38, %v1735_v22 }
 0x184   : > { %v1482_v5 = vpop.f32.mrf.mxu0 }
 0x185   : > { %v1736_v56 = vmul.f32 %v1482_v5, %v1482_v5  ;;  %v1564_v32 = vpop.f32.mrf.mxu1  ;;  %v1661_v48 = vadd.f32 %v1660_v19, %v1482_v5  ;;  %v1746_v19 = vmul.f32 %v3577_v58, %v3577_v58 }
 0x186   : > { %v1484_v17 = vpop.f32.mrf.mxu0  ;;  %v1747_v32 = vmul.f32 %v3584_v51, %v3584_v51 }
 0x187   : > { %v3706_v0 = vpop.f32.mrf.mxu1  ;;  %v1802_v39 = vadd.f32 %v1801_v14, %v1736_v56 }
 0x188   : > { %v1485_v49 = vpop.f32.mrf.mxu0  ;;  %v2563_v40 = vpack.c.bf16 %v3706_v0, %v3703_v37 }
 0x189   : > { %v2513_v24 = vpack.c.bf16 %v1485_v49, %v1482_v5  ;;  %v1737_v36 = vmul.f32 %v1485_v49, %v1485_v49  ;;  %v1662_v33 = vadd.f32 %v1661_v48, %v1485_v49  ;;  %v1567_v1 = vpop.f32.mrf.mxu1  ;;  %v1743_v5 = vmul.f32 %v3548_v8, %v3548_v8 }
 0x18a   : > { %v1487_v13 = vpop.f32.mrf.mxu0  ;;  %2624 = vst [vmem:[%s3504_s15 + $0xc8] sm:$0xff] %v2563_v40   ;;  %v1748_v48 = vmul.f32 %v3600_v42, %v3600_v42  ;;  %v1750_v1 = vmul.f32 %v3643_v54, %v3643_v54 }
 0x18b   : > { %2614 = vst [vmem:[%s3504_s15 + $0x78] sm:$0xff] %v2513_v24   ;;  %v1803_v61 = vadd.f32 %v1802_v39, %v1737_v36  ;;  %v3711_v2 = vpop.f32.mrf.mxu1 }
 0x18c   : > { %v1490_v23 = vpop.f32.mrf.mxu0 }
 0x18d   : > { %v1738_v15 = vmul.f32 %v1490_v23, %v1490_v23  ;;  %v1663_v52 = vadd.f32 %v1662_v33, %v1490_v23  ;;  %v1572_v12 = vpop.f32.mrf.mxu1 }
 0x18e   : > { %v1492_v28 = vpop.f32.mrf.mxu0 }
 0x18f   : > { %v1804_v26 = vadd.f32 %v1803_v61, %v1738_v15  ;;  %v3717_v41 = vpop.f32.mrf.mxu1 }
 0x190   : > { %v1493_v9 = vpop.f32.mrf.mxu0  ;;  %v2568_v57 = vpack.c.bf16 %v3717_v41, %v3711_v2 }
 0x191   : > { %v1664_v55 = vadd.f32 %v1663_v52, %v1493_v9  ;;  %v1739_v10 = vmul.f32 %v1493_v9, %v1493_v9  ;;  %v2518_v16 = vpack.c.bf16 %v1493_v9, %v1490_v23  ;;  %v1575_v43 = vpop.f32.mrf.mxu1 }
 0x192   : > { %v1495_v35 = vpop.f32.mrf.mxu0  ;;  %2625 = vst [vmem:[%s3504_s15 + $0xd0] sm:$0xff] %v2568_v57  }
 0x193   : > { %v1665_v60 = vadd.f32 %v1664_v55, %v3521_v50  ;;  %v1805_v63 = vadd.f32 %v1804_v26, %v1739_v10  ;;  %2615 = vst [vmem:[%s3504_s15 + $0x80] sm:$0xff] %v2518_v16  }
 0x195   : > { %v1666_v44 = vadd.f32 %v1665_v60, %v3528_v29  ;;  %v1806_v34 = vadd.f32 %v1805_v63, %v1740_v27  ;;  %v3731_v29 = vpop.f32.mrf.mxu1 }
 0x197   : > { %v1667_v30 = vadd.f32 %v1666_v44, %v3542_v62  ;;  %v1807_v50 = vadd.f32 %v1806_v34, %v1741_v6  ;;  %v1580_v21 = vpop.f32.mrf.mxu1  ;;  %v1745_v62 = vmul.f32 %v3565_v3, %v3565_v3 }
 0x199   : > { %v1668_v18 = vadd.f32 %v1667_v30, %v3548_v8  ;;  %v1808_v4 = vadd.f32 %v1807_v50, %v1742_v46  ;;  %v3739_v38 = vpop.f32.mrf.mxu1 }
 0x19a   : > { %v2573_v8 = vpack.c.bf16 %v3739_v38, %v3731_v29 }
 0x19b   : > { %v1669_v17 = vadd.f32 %v1668_v18, %v3560_v47  ;;  %v1809_v45 = vadd.f32 %v1808_v4, %v1743_v5  ;;  %v1583_v47 = vpop.f32.mrf.mxu1 }
 0x19c   : > { %2626 = vst [vmem:[%s3504_s15 + $0xd8] sm:$0xff] %v2573_v8  }
 0x19d   : > { %v1670_v22 = vadd.f32 %v1669_v17, %v3565_v3  ;;  %v1810_v49 = vadd.f32 %v1809_v45, %v1744_v7  ;;  %v3750_v14 = vpop.f32.mrf.mxu1  ;;  %v1758_v45 = vmul.f32 %v3711_v2, %v3711_v2 }
 0x19f   : > { %v1671_v56 = vadd.f32 %v1670_v22, %v3577_v58  ;;  %v1811_v24 = vadd.f32 %v1810_v49, %v1745_v62  ;;  %v1588_v40 = vpop.f32.mrf.mxu1  ;;  %v1749_v58 = vmul.f32 %v3612_v59, %v3612_v59  ;;  %v1759_v49 = vmul.f32 %v3717_v41, %v3717_v41 }
 0x1a1   : > { %v1672_v13 = vadd.f32 %v1671_v56, %v3584_v51  ;;  %v1812_v3 = vadd.f32 %v1811_v24, %v1746_v19  ;;  %v1589_v15 = vpop.f32.mrf.mxu1  ;;  %v1760_v56 = vmul.f32 %v3731_v29, %v3731_v29 }
 0x1a2   : > { %v2578_v51 = vpack.c.bf16 %v1589_v15, %v3750_v14 }
 0x1a3   : > { %v1673_v36 = vadd.f32 %v1672_v13, %v3600_v42  ;;  %v1813_v23 = vadd.f32 %v1812_v3, %v1747_v32  ;;  %v1591_v52 = vpop.f32.mrf.mxu1  ;;  %v1751_v42 = vmul.f32 %v3652_v25, %v3652_v25  ;;  %v1761_v32 = vmul.f32 %v3739_v38, %v3739_v38 }
 0x1a4   : > { %2627 = vst [vmem:[%s3504_s15 + $0xe0] sm:$0xff] %v2578_v51  }
 0x1a5   : > { %v1814_v39 = vadd.f32 %v1813_v23, %v1748_v48  ;;  %v1674_v33 = vadd.f32 %v1673_v36, %v3612_v59  ;;  %v1594_v55 = vpop.f32.mrf.mxu1  ;;  %v1752_v59 = vmul.f32 %v3670_v11, %v3670_v11 }
 0x1a7   : > { %v1675_v28 = vadd.f32 %v1674_v33, %v3643_v54  ;;  %v1815_v61 = vadd.f32 %v1814_v39, %v1749_v58  ;;  %v1596_v35 = vpop.f32.mrf.mxu1  ;;  %v1753_v54 = vmul.f32 %v3678_v31, %v3678_v31 }
 0x1a9   : > { %v1676_v9 = vadd.f32 %v1675_v28, %v3652_v25  ;;  %v1816_v26 = vadd.f32 %v1815_v61, %v1750_v1  ;;  %v1597_v60 = vpop.f32.mrf.mxu1  ;;  %v1754_v25 = vmul.f32 %v3695_v20, %v3695_v20  ;;  %v1764_v1 = vmul.f32 %v1594_v55, %v1594_v55 }
 0x1aa   : > { %v2583_v63 = vpack.c.bf16 %v1597_v60, %v1594_v55  ;;  %v1765_v52 = vmul.f32 %v1597_v60, %v1597_v60 }
 0x1ab   : > { %v1677_v10 = vadd.f32 %v1676_v9, %v3670_v11  ;;  %v1817_v16 = vadd.f32 %v1816_v26, %v1751_v42  ;;  %v1599_v34 = vpop.f32.mrf.mxu1  ;;  %v1755_v11 = vmul.f32 %v3697_v53, %v3697_v53 }
 0x1ac   : > { %2628 = vst [vmem:[%s3504_s15 + $0xe8] sm:$0xff] %v2583_v63  }
 0x1ad   : > { %v1678_v12 = vadd.f32 %v1677_v10, %v3678_v31  ;;  %v1818_v27 = vadd.f32 %v1817_v16, %v1752_v59  ;;  %v1602_v46 = vpop.f32.mrf.mxu1  ;;  %v1756_v31 = vmul.f32 %v3703_v37, %v3703_v37 }
 0x1ae   : > { %v1766_v59 = vmul.f32 %v1602_v46, %v1602_v46 }
 0x1af   : > { %v1679_v6 = vadd.f32 %v1678_v12, %v3695_v20  ;;  %v1819_v44 = vadd.f32 %v1818_v27, %v1753_v54  ;;  %v1604_v5 = vpop.f32.mrf.mxu1  ;;  %v1757_v20 = vmul.f32 %v3706_v0, %v3706_v0 }
 0x1b1   : > { %v1680_v57 = vadd.f32 %v1679_v6, %v3697_v53  ;;  %v1820_v43 = vadd.f32 %v1819_v44, %v1754_v25  ;;  %v1605_v7 = vpop.f32.mrf.mxu1 }
 0x1b2   : > { %v2588_v17 = vpack.c.bf16 %v1605_v7, %v1602_v46  ;;  %v1767_v35 = vmul.f32 %v1605_v7, %v1605_v7 }
 0x1b3   : > { %v1681_v30 = vadd.f32 %v1680_v57, %v3703_v37  ;;  %v1821_v50 = vadd.f32 %v1820_v43, %v1755_v11  ;;  %v1607_v62 = vpop.f32.mrf.mxu1 }
 0x1b4   : > { %2629 = vst [vmem:[%s3504_s15 + $0xf0] sm:$0xff] %v2588_v17  }
 0x1b5   : > { %v1682_v18 = vadd.f32 %v1681_v30, %v3706_v0  ;;  %v1822_v4 = vadd.f32 %v1821_v50, %v1756_v31  ;;  %v1610_v8 = vpop.f32.mrf.mxu1 }
 0x1b6   : > { %v1768_v63 = vmul.f32 %v1610_v8, %v1610_v8 }
 0x1b7   : > { %v1683_v53 = vadd.f32 %v1682_v18, %v3711_v2  ;;  %v1823_v21 = vadd.f32 %v1822_v4, %v1757_v20  ;;  %v1612_v24 = vpop.f32.mrf.mxu1 }
 0x1b9   : > { %v1824_v22 = vadd.f32 %v1823_v21, %v1758_v45  ;;  %v1684_v37 = vadd.f32 %v1683_v53, %v3717_v41  ;;  %v1613_v13 = vpop.f32.mrf.mxu1  ;;  %v1762_v41 = vmul.f32 %v3750_v14, %v3750_v14 }
 0x1ba   : > { %v2593_v3 = vpack.c.bf16 %v1613_v13, %v1610_v8  ;;  %v1769_v11 = vmul.f32 %v1613_v13, %v1613_v13 }
 0x1bb   : > { %v1825_v0 = vadd.f32 %v1824_v22, %v1759_v49  ;;  %v1685_v19 = vadd.f32 %v1684_v37, %v3731_v29  ;;  %v1615_v23 = vpop.f32.mrf.mxu1  ;;  %v1763_v29 = vmul.f32 %v1589_v15, %v1589_v15 }
 0x1bc   : > { %2630 = vst [vmem:[%s3504_s15 + $0xf8] sm:$0xff] %v2593_v3  }
 0x1bd   : > { %v1826_v47 = vadd.f32 %v1825_v0, %v1760_v56  ;;  %v1686_v2 = vadd.f32 %v1685_v19, %v3739_v38  ;;  %v1618_v39 = vpop.f32.mrf.mxu1 }
 0x1be   : > { %v1770_v30 = vmul.f32 %v1618_v39, %v1618_v39 }
 0x1bf   : > { %v1827_v48 = vadd.f32 %v1826_v47, %v1761_v32  ;;  %v1687_v36 = vadd.f32 %v1686_v2, %v3750_v14  ;;  %v1620_v28 = vpop.f32.mrf.mxu1 }
 0x1c1   : > { %v1828_v40 = vadd.f32 %v1827_v48, %v1762_v41  ;;  %v1688_v58 = vadd.f32 %v1687_v36, %v1589_v15  ;;  %v1621_v42 = vpop.f32.mrf.mxu1 }
 0x1c2   : > { %v2598_v9 = vpack.c.bf16 %v1621_v42, %v1618_v39  ;;  %v1771_v4 = vmul.f32 %v1621_v42, %v1621_v42 }
 0x1c3   : > { %v1829_v33 = vadd.f32 %v1828_v40, %v1763_v29  ;;  %v1689_v51 = vadd.f32 %v1688_v58, %v1594_v55  ;;  %v1623_v10 = vpop.f32.mrf.mxu1  ;;  %v2186_v55 = vld [vmem:[%s3504_s15 + $0x108] sm:$0x1] }
 0x1c4   : > { %2631 = vst [vmem:[%s3504_s15 + $0x100] sm:$0xff] %v2598_v9  }
 0x1c5   : > { %v1830_v38 = vadd.f32 %v1829_v33, %v1764_v1  ;;  %v1690_v61 = vadd.f32 %v1689_v51, %v1597_v60  ;;  %v1626_v54 = vpop.f32.mrf.mxu1 }
 0x1c6   : > { %v2434_v12 = vpack.c.bf16 %v1626_v54, %v1626_v54  ;;  %v1772_v43 = vmul.f32 %v1626_v54, %v1626_v54  ;;  %v1698_v5 = vsel %vm1697_vm6, %v1626_v54, 0.0 }
 0x1c7   : > { %v1831_v14 = vadd.f32 %v1830_v38, %v1765_v52  ;;  %v1691_v26 = vadd.f32 %v1690_v61, %v1602_v46  ;;  %v1628_v25 = vpop.f32.mrf.mxu1 }
 0x1c8   : > { %v2187_v6 = vsel %vm2185_vm8, %v2434_v12, %v2186_v55 }
 0x1c9   : > { %v1832_v15 = vadd.f32 %v1831_v14, %v1766_v59  ;;  %v1692_v16 = vadd.f32 %v1691_v26, %v1605_v7  ;;  %2188 = vst [vmem:[%s3504_s15 + $0x108] sm:$0x1] %v2187_v6  ;;  %v1629_v57 = vpop.f32.mrf.mxu1  ;;  %v1838_v7 = vsel %vm1697_vm6, %v1772_v43, 0.0 }
 0x1cb   : > { %v1833_v27 = vadd.f32 %v1832_v15, %v1767_v35  ;;  %v1693_v60 = vadd.f32 %v1692_v16, %v1610_v8  ;;  %v1630_v50 = vpop.f32.mrf.mxu1 }
 0x1cd   : > { %v1834_v44 = vadd.f32 %v1833_v27, %v1768_v63  ;;  %v1694_v34 = vadd.f32 %v1693_v60, %v1613_v13 }
 0x1cf   : > { %v1835_v46 = vadd.f32 %v1834_v44, %v1769_v11  ;;  %v1695_v31 = vadd.f32 %v1694_v34, %v1618_v39 }
 0x1d1   : > { %v1836_v20 = vadd.f32 %v1835_v46, %v1770_v30  ;;  %v1696_v18 = vadd.f32 %v1695_v31, %v1621_v42 }
 0x1d3   : > { %v1837_v17 = vadd.f32 %v1836_v20, %v1771_v4  ;;  %v1699_v53 = vadd.f32 %v1698_v5, %v1696_v18 }
 0x1d5   : > { %v1700_v45 = vrot.slane %v1699_v53, 4  ;;  %v1839_v21 = vadd.f32 %v1838_v7, %v1837_v17 }
 0x1d7   : > { %v1701_v62 = vadd.f32 %v1700_v45, %v1699_v53  ;;  %v1840_v22 = vrot.slane %v1839_v21, 4 }
 0x1d9   : > { %v1702_v37 = vrot.slane %v1701_v62, 2  ;;  %v1841_v49 = vadd.f32 %v1840_v22, %v1839_v21 }
 0x1db   : > { %v1703_v8 = vadd.f32 %v1702_v37, %v1701_v62  ;;  %v1842_v0 = vrot.slane %v1841_v49, 2 }
 0x1dd   : > { %v1704_v19 = vrot.slane %v1703_v8, 1  ;;  %v1843_v56 = vadd.f32 %v1842_v0, %v1841_v49 }
 0x1df   : > { %v1844_v24 = vrot.slane %v1843_v56, 1  ;;  %v1705_v47 = vadd.f32 %v1704_v19, %v1703_v8 }
 0x1e1   : > { %v1845_v2 = vadd.f32 %v1844_v24, %v1843_v56 }
 0x1e3   : > { %v1846_v32 = vsel %vm1697_vm6, %v1705_v47, %v1845_v2 }
 0x1e4   : > { %1847 = vst [vmem:[%s235_s21] sm:$0x3] %v1846_v32 }
 0x1e5 PF: > { %s16_s18 = sadd.s32 1, %s2697_s18  }
 0x1e6   : > { %p13_p4 = scmp.ge.s32.totalorder %s16_s18, 4  }
 0x1e8   :  { %15 = sbr.rel (!%p13_p4) target bundleno = 1 (0x1), region = 78 }

// kernel: tile.53
= control target key start
LH: loop header
LB: loop body
LE: loop exit
PB: predicated region body
PF: predicated region fallthrough
CT: control target
= control target key end

     0   :  { %s40_s0 = inlined_call_operand.vmem [shape: f32[16], index: 0, kind: input, shape index: {}]   ;;  %s41_s1 = inlined_call_operand.vmem [shape: f32[25,16], index: 1, kind: output, shape index: {}]  }
   0x1   :  { %v4_v0 = vld [vmem:[%s40_s0] ss:$0 sm:$0xff] }
   0x2   :  { %5 = vst [vmem:[%s41_s1] sm:$0xff] %v4_v0  ;;  %12 = vst [vmem:[%s41_s1 + $0x8] sm:$0xff] %v4_v0 }
   0x3   :  { %13 = vst [vmem:[%s41_s1 + $0x10] sm:$0xff] %v4_v0  ;;  %14 = vst [vmem:[%s41_s1 + $0x18] sm:$0xff] %v4_v0 }

// kernel: tile.54
= control target key start
LH: loop header
LB: loop body
LE: loop exit
PB: predicated region body
PF: predicated region fallthrough
CT: control target
= control target key end

     0   :  { %s69_s8 = smov 112   ;;  %s70_s11 = smov 80   ;;  %vm3_vm0 = vcmask 130048   ;;  %vm9_vm1 = vcmask 1048448   ;;  %vm15_vm2 = vcmask 917248   ;;  %vm21_vm3 = vcmask 786048   ;;  %s113_s0 = inlined_call_operand.vmem [shape: f32[25,16], index: 0, kind: input, shape index: {}]   ;;  %s114_s1 = inlined_call_operand.vmem [shape: f32[400], index: 1, kind: output, shape index: {}]  }
   0x1   :  { %v55_v0 = vld [vmem:[%s113_s0 + $0x7] ss:$8 sm:$0x7]   ;;  %v57_v1 = vld [vmem:[%s113_s0 + $0x5] ss:$8 sm:$0x7]  }
   0x2   :  { %7 = vrot.lane.b32.xlu0 %v55_v0, %s69_s8  ;;  %19 = vrot.lane.b32.xlu1 %v57_v1, %s70_s11  ;;  %v56_v2 = vld [vmem:[%s113_s0 + $0x6] ss:$8 sm:$0x7]   ;;  %v58_v3 = vld [vmem:[%s113_s0 + $0x4] ss:$8 sm:$0x7]  }
   0x3   :  { %s71_s16 = smov 96   ;;  %v2_v4 = vld [vmem:[%s113_s0] ss:$8 sm:$0xf]   ;;  %s72_s19 = smov 64   ;;  %vm27_vm4 = vcmask 654848  }
   0x4   :  { %v59_v5 = vld [vmem:[%s113_s0 + $0x3] ss:$8 sm:$0x7]   ;;  %4 = vst.msk [vmem:[#allocation0] sm:$0xf] %vm3_vm0, %v2_v4   ;;  %s73_s24 = smov 48  }
   0x5   :  { %v60_v6 = vld [vmem:[%s113_s0 + $0x2] ss:$8 sm:$0x7]   ;;  %s74_s25 = smov 32   ;;  %vm33_vm5 = vcmask 523648   ;;  %vm39_vm6 = vcmask 392448  }
   0x6   :  { %13 = vrot.lane.b32.xlu0 %v56_v2, %s71_s16  ;;  %25 = vrot.lane.b32.xlu1 %v58_v3, %s72_s19  ;;  %v61_v7 = vld [vmem:[%s113_s0 + $0x1] ss:$8 sm:$0x7]   ;;  %s75_s0 = smov 16   ;;  %vm45_vm7 = vcmask 261248  }
   0xa   :  { %31 = vrot.lane.b32.xlu0 %v59_v5, %s73_s24  ;;  %37 = vrot.lane.b32.xlu1 %v60_v6, %s74_s25 }
   0xe   :  { %43 = vrot.lane.b32.xlu0 %v61_v7, %s75_s0 }
  0x74   :  { %v8_v8 = vpop.permute.xlu0 %7   ;;  %v20_v9 = vpop.permute.xlu1 %19  }
  0x75   :  { %10 = vst.msk [vmem:[#allocation0] sm:$0x7] %vm9_vm1, %v8_v8  }
  0x78   :  { %v14_v10 = vpop.permute.xlu0 %13   ;;  %v26_v11 = vpop.permute.xlu1 %25  }
  0x79   :  { %16 = vst.msk [vmem:[#allocation0] sm:$0x7] %vm15_vm2, %v14_v10  }
  0x7a   :  { %22 = vst.msk [vmem:[#allocation0] sm:$0x7] %vm21_vm3, %v20_v9  }
  0x7b   :  { %28 = vst.msk [vmem:[#allocation0] sm:$0x7] %vm27_vm4, %v26_v11  }
  0x7c   :  { %v32_v12 = vpop.permute.xlu0 %31   ;;  %v38_v13 = vpop.permute.xlu1 %37  }
  0x7d   :  { %34 = vst.msk [vmem:[#allocation0] sm:$0x7] %vm33_vm5, %v32_v12  }
  0x7e   :  { %40 = vst.msk [vmem:[#allocation0] sm:$0x7] %vm39_vm6, %v38_v13  }
  0x80   :  { %v44_v14 = vpop.permute.xlu0 %43  }
  0x81   :  { %46 = vst.msk [vmem:[#allocation0] sm:$0x7] %vm45_vm7, %v44_v14  }
  0x88   :  { %v51_v15 = vld [vmem:[#allocation0] sm:$0xf] }
  0x89   :  { %54 = vst [vmem:[%s114_s1] sm:$0xf] %v51_v15 }

// kernel: discriminator_forward.7
= control target key start
LH: loop header
LB: loop body
LE: loop exit
PB: predicated region body
PF: predicated region fallthrough
CT: control target
= control target key end

     0   :  { %v208_v23 = vlaneseq  ;;  %s2919_s1 = inlined_call_operand.vmem [shape: bf16[512,128], index: 1, kind: input, shape index: {}]   ;;  %s2920_s0 = inlined_call_operand.vmem [shape: bf16[1,242,512], index: 0, kind: input, shape index: {}]   ;;  %s2921_s2 = inlined_call_operand.vmem [shape: f32[1,512], index: 2, kind: input, shape index: {}]   ;;  %s2922_s3 = inlined_call_operand.vmem [shape: f32[1,512], index: 3, kind: input, shape index: {}]   ;;  %s2923_s4 = inlined_call_operand.vmem [shape: bf16[1,242,128], index: 4, kind: output, shape index: {0}]   ;;  %s2924_s5 = inlined_call_operand.vmem [shape: f32[1,2,128], index: 5, kind: output, shape index: {1}]  }
   0x1   :  { %v2190_v0 = vld [vmem:[%s2919_s1 + $0x78] sm:$0xff]   ;;  %v2194_v4 = vld [vmem:[%s2919_s1 + $0x70] sm:$0xff]   ;;  %v2198_v8 = vld [vmem:[%s2919_s1 + $0x68] sm:$0xff]  }
   0x2   :  { %v2191_v1 = vld [vmem:[%s2919_s1 + $0xf8] sm:$0xff]   ;;  %1966 = vmatprep.subr.bf16.mxu0 %v2190_v0  ;;  %v2195_v5 = vld [vmem:[%s2919_s1 + $0xf0] sm:$0xff]   ;;  %v2199_v9 = vld [vmem:[%s2919_s1 + $0xe8] sm:$0xff]   ;;  %v209_v28 = vshrl.u32 %v208_v23, 7 }
   0x3   :  { %v2192_v2 = vld [vmem:[%s2919_s1 + $0x38] sm:$0xff]   ;;  %2078 = vmatprep.subr.bf16.mxu1 %v2191_v1  ;;  %v2196_v6 = vld [vmem:[%s2919_s1 + $0x30] sm:$0xff]   ;;  %v2200_v10 = vld [vmem:[%s2919_s1 + $0x28] sm:$0xff]  }
   0x4   :  { %v2193_v3 = vld [vmem:[%s2919_s1 + $0xb8] sm:$0xff]   ;;  %1967 = vmatpush3.bf16.msra.mxu0 %v2192_v2  ;;  %v2197_v7 = vld [vmem:[%s2919_s1 + $0xb0] sm:$0xff]   ;;  %v2201_v11 = vld [vmem:[%s2919_s1 + $0xa8] sm:$0xff]   ;;  %v214_v33 = vsub.s32 1, %v209_v28  ;;  %v222_v35 = vsub.s32 3, %v209_v28  ;;  %v210_v39 = vsub.s32 0, %v209_v28 }
   0x5   :  { %2079 = vmatpush3.bf16.msra.mxu1 %v2193_v3  ;;  %1968 = vmatprep.subr.bf16.mxu0 %v2194_v4  ;;  %v2202_v12 = vld [vmem:[%s2919_s1 + $0x60] sm:$0xff]   ;;  %v2206_v16 = vld [vmem:[%s2919_s1 + $0x58] sm:$0xff]   ;;  %v2210_v20 = vld [vmem:[%s2919_s1 + $0x50] sm:$0xff]   ;;  %v218_v40 = vsub.s32 2, %v209_v28 }
   0x6   :  { %2080 = vmatprep.subr.bf16.mxu1 %v2195_v5  ;;  %v2203_v13 = vld [vmem:[%s2919_s1 + $0xe0] sm:$0xff]   ;;  %v2207_v17 = vld [vmem:[%s2919_s1 + $0xd8] sm:$0xff]   ;;  %v2211_v21 = vld [vmem:[%s2919_s1 + $0xd0] sm:$0xff]  }
   0x7   :  { %v2204_v14 = vld [vmem:[%s2919_s1 + $0x20] sm:$0xff]   ;;  %v2208_v18 = vld [vmem:[%s2919_s1 + $0x18] sm:$0xff]   ;;  %v2212_v22 = vld [vmem:[%s2919_s1 + $0x10] sm:$0xff]  }
   0x8   :  { %1969 = vmatpush3.bf16.msra.mxu0 %v2196_v6  ;;  %v2205_v15 = vld [vmem:[%s2919_s1 + $0xa0] sm:$0xff]   ;;  %v2209_v19 = vld [vmem:[%s2919_s1 + $0x98] sm:$0xff]   ;;  %v2213_v24 = vld [vmem:[%s2919_s1 + $0x90] sm:$0xff]  }
   0x9   :  { %2081 = vmatpush3.bf16.msra.mxu1 %v2197_v7  ;;  %1970 = vmatprep.subr.bf16.mxu0 %v2198_v8  ;;  %v2214_v25 = vld [vmem:[%s2919_s1 + $0x48] sm:$0xff]   ;;  %v2218_v30 = vld [vmem:[%s2919_s1 + $0x40] sm:$0xff]   ;;  %v22_v37 = vld [vmem:[%s2920_s0 + $0x10] sm:$0xff] }
   0xa   :  { %2082 = vmatprep.subr.bf16.mxu1 %v2199_v9  ;;  %v2215_v26 = vld [vmem:[%s2919_s1 + $0xc8] sm:$0xff]   ;;  %v2219_v31 = vld [vmem:[%s2919_s1 + $0xc0] sm:$0xff]   ;;  %v86_v43 = vunpack.c.l.bf16 %v22_v37  ;;  %v87_v44 = vunpack.c.h.bf16 %v22_v37  ;;  %v23_v47 = vld [vmem:[%s2920_s0 + $0x18] sm:$0xff] }
   0xb   :  { %v2216_v27 = vld [vmem:[%s2919_s1 + $0x8] sm:$0xff]   ;;  %v2220_v32 = vld [vmem:[%s2919_s1] sm:$0xff]   ;;  %v88_v52 = vunpack.c.l.bf16 %v23_v47  ;;  %v89_v53 = vunpack.c.h.bf16 %v23_v47  ;;  %v27_v28 = vld [vmem:[%s2920_s0 + $0x38] sm:$0xff] }
   0xc   :  { %1971 = vmatpush3.bf16.msra.mxu0 %v2200_v10  ;;  %v2217_v29 = vld [vmem:[%s2919_s1 + $0x88] sm:$0xff]   ;;  %v2221_v34 = vld [vmem:[%s2919_s1 + $0x80] sm:$0xff]  }
   0xd   :  { %2083 = vmatpush3.bf16.msra.mxu1 %v2201_v11  ;;  %1972 = vmatprep.subr.bf16.mxu0 %v2202_v12  ;;  %v20_v36 = vld [vmem:[%s2920_s0] sm:$0xff]  ;;  %v21_v46 = vld [vmem:[%s2920_s0 + $0x8] sm:$0xff] }
   0xe   :  { %2084 = vmatprep.subr.bf16.mxu1 %v2203_v13  ;;  %v206_v38 = vld [vmem:[%s2921_s2] sm:$0xf]  ;;  %v82_v41 = vunpack.c.l.bf16 %v20_v36  ;;  %v83_v42 = vunpack.c.h.bf16 %v20_v36  ;;  %v84_v50 = vunpack.c.l.bf16 %v21_v46  ;;  %v85_v51 = vunpack.c.h.bf16 %v21_v46 }
   0xf   :  { %v352_v45 = vld [vmem:[%s2922_s3] sm:$0xf]  ;;  %v2366_v48 = vrot.slane %v206_v38, %v214_v33  ;;  %v2370_v54 = vrot.slane %v206_v38, %v222_v35  ;;  %v2376_v58 = vrot.slane %v206_v38, %v210_v39  ;;  %v2382_v62 = vrot.slane %v206_v38, %v218_v40 }
  0x10   :  { %1973 = vmatpush3.bf16.msra.mxu0 %v2204_v14  ;;  %v2368_v49 = vrot.slane %v352_v45, %v214_v33  ;;  %v2372_v55 = vrot.slane %v352_v45, %v222_v35  ;;  %v2378_v59 = vrot.slane %v352_v45, %v210_v39  ;;  %v2384_v63 = vrot.slane %v352_v45, %v218_v40 }
  0x11   :  { %2085 = vmatpush3.bf16.msra.mxu1 %v2205_v15  ;;  %1974 = vmatprep.subr.bf16.mxu0 %v2206_v16  ;;  %v229_v56 = vmul.f32 %v2366_v48, %v83_v42  ;;  %v233_v57 = vmul.f32 %v2366_v48, %v87_v44  ;;  %v231_v60 = vmul.f32 %v2370_v54, %v85_v51  ;;  %v97_v39 = vunpack.c.h.bf16 %v27_v28 }
  0x12   :  { %2086 = vmatprep.subr.bf16.mxu1 %v2207_v17  ;;  %v235_v61 = vmul.f32 %v2370_v54, %v89_v53  ;;  %v228_v2 = vmul.f32 %v2376_v58, %v82_v41  ;;  %v232_v3 = vmul.f32 %v2376_v58, %v86_v43  ;;  %v230_v6 = vmul.f32 %v2382_v62, %v84_v50 }
  0x13   :  { %v375_v0 = vadd.f32 %v2368_v49, %v229_v56  ;;  %v379_v1 = vadd.f32 %v2368_v49, %v233_v57  ;;  %v377_v4 = vadd.f32 %v2372_v55, %v231_v60  ;;  %v234_v7 = vmul.f32 %v2382_v62, %v88_v52 }
  0x14   :  { %1975 = vmatpush3.bf16.msra.mxu0 %v2208_v18  ;;  %v381_v5 = vadd.f32 %v2372_v55, %v235_v61  ;;  %v374_v14 = vadd.f32 %v2378_v59, %v228_v2  ;;  %v378_v15 = vadd.f32 %v2378_v59, %v232_v3  ;;  %v243_v47 = vmul.f32 %v2370_v54, %v97_v39 }
  0x15   :  { %2087 = vmatpush3.bf16.msra.mxu1 %v2209_v19  ;;  %1976 = vmatprep.subr.bf16.mxu0 %v2210_v20  ;;  %vm499_vm0 = vcmp.ge.f32.partialorder %v375_v0, 0.0  ;;  %vm503_vm1 = vcmp.ge.f32.partialorder %v379_v1, 0.0  ;;  %v623_v8 = vmul.f32 0.2, %v375_v0  ;;  %v627_v9 = vmul.f32 0.2, %v379_v1 }
  0x16   :  { %2088 = vmatprep.subr.bf16.mxu1 %v2211_v21  ;;  %vm501_vm2 = vcmp.ge.f32.partialorder %v377_v4, 0.0  ;;  %vm505_vm3 = vcmp.ge.f32.partialorder %v381_v5, 0.0  ;;  %v625_v10 = vmul.f32 0.2, %v377_v4  ;;  %v629_v11 = vmul.f32 0.2, %v381_v5 }
  0x17   :  { %v747_v12 = vsel %vm499_vm0, %v375_v0, %v623_v8  ;;  %v751_v13 = vsel %vm503_vm1, %v379_v1, %v627_v9  ;;  %v376_v19 = vadd.f32 %v2384_v63, %v230_v6  ;;  %v24_v20 = vld [vmem:[%s2920_s0 + $0x20] sm:$0xff]  ;;  %v26_v21 = vld [vmem:[%s2920_s0 + $0x30] sm:$0xff]  ;;  %vm498_vm4 = vcmp.ge.f32.partialorder %v374_v14, 0.0 }
  0x18   :  { %1977 = vmatpush3.bf16.msra.mxu0 %v2212_v22  ;;  %v871_v16 = vpack.c.bf16 %v751_v13, %v747_v12  ;;  %v749_v17 = vsel %vm501_vm2, %v377_v4, %v625_v10  ;;  %v753_v18 = vsel %vm505_vm3, %v381_v5, %v629_v11  ;;  %v2406_v22 = vld [vmem:[%s2920_s0 + $0x28] sm:$0xff]  ;;  %vm502_vm5 = vcmp.ge.f32.partialorder %v378_v15, 0.0  ;;  %v28_v5 = vld [vmem:[%s2920_s0 + $0x40] sm:$0xff]  ;;  %v30_v9 = vld [vmem:[%s2920_s0 + $0x50] sm:$0xff] }
  0x19   :  { %2089 = vmatpush3.bf16.msra.mxu1 %v2213_v24  ;;  %1978 = vmatprep.subr.bf16.mxu0 %v2214_v25  ;;  %v873_v23 = vpack.c.bf16 %v753_v18, %v749_v17  ;;  %v622_v24 = vmul.f32 0.2, %v374_v14  ;;  %v626_v25 = vmul.f32 0.2, %v378_v15  ;;  %vm500_vm6 = vcmp.ge.f32.partialorder %v376_v19, 0.0  ;;  %v31_v17 = vld [vmem:[%s2920_s0 + $0x58] sm:$0xff] }
  0x1a   :  { %2090 = vmatprep.subr.bf16.mxu1 %v2215_v26  ;;  %1222 = vmatprep.mubr.bf16.mxu0 %v871_v16  ;;  %v380_v26 = vadd.f32 %v2384_v63, %v234_v7  ;;  %v90_v42 = vunpack.c.l.bf16 %v24_v20  ;;  %v94_v43 = vunpack.c.l.bf16 %v26_v21  ;;  %v92_v53 = vunpack.c.l.bf16 %v2406_v22  ;;  %v29_v16 = vld [vmem:[%s2920_s0 + $0x48] sm:$0xff] }
  0x1b   :  { %1382 = vmatprep.mubr.bf16.mxu1 %v873_v23  ;;  %v750_v33 = vsel %vm502_vm5, %v378_v15, %v626_v25  ;;  %v389_v60 = vadd.f32 %v2372_v55, %v243_v47  ;;  %v96_v4 = vunpack.c.l.bf16 %v27_v28  ;;  %v99_v15 = vunpack.c.h.bf16 %v28_v5 }
  0x1c   :  { %1979 = vmatpush3.bf16.msra.mxu0 %v2216_v27  ;;  %v624_v27 = vmul.f32 0.2, %v376_v19  ;;  %vm504_vm7 = vcmp.ge.f32.partialorder %v380_v26, 0.0  ;;  %v236_v51 = vmul.f32 %v2376_v58, %v90_v42  ;;  %v240_v52 = vmul.f32 %v2376_v58, %v94_v43 }
  0x1d   :  { %2091 = vmatpush3.bf16.msra.mxu1 %v2217_v29  ;;  %1980 = vmatprep.subr.bf16.mxu0 %v2218_v30  ;;  %v746_v29 = vsel %vm498_vm4, %v374_v14, %v622_v24  ;;  %v91_v30 = vunpack.c.h.bf16 %v24_v20  ;;  %vm513_vm11 = vcmp.ge.f32.partialorder %v389_v60, 0.0  ;;  %v637_v7 = vmul.f32 0.2, %v389_v60 }
  0x1e   :  { %2092 = vmatprep.subr.bf16.mxu1 %v2219_v31  ;;  %v95_v31 = vunpack.c.h.bf16 %v26_v21  ;;  %v748_v35 = vsel %vm500_vm6, %v376_v19, %v624_v27  ;;  %v870_v36 = vpack.c.bf16 %v750_v33, %v746_v29  ;;  %v382_v0 = vadd.f32 %v2378_v59, %v236_v51 }
  0x1f   :  { %v237_v37 = vmul.f32 %v2366_v48, %v91_v30  ;;  %v386_v3 = vadd.f32 %v2378_v59, %v240_v52  ;;  %v761_v12 = vsel %vm513_vm11, %v389_v60, %v637_v7  ;;  %v238_v13 = vmul.f32 %v2382_v62, %v92_v53 }
  0x20   :  { %1981 = vmatpush3.bf16.msra.mxu0 %v2220_v32  ;;  %v93_v32 = vunpack.c.h.bf16 %v2406_v22  ;;  %v241_v38 = vmul.f32 %v2366_v48, %v95_v31  ;;  %vm506_vm12 = vcmp.ge.f32.partialorder %v382_v0, 0.0  ;;  %v630_v10 = vmul.f32 0.2, %v382_v0 }
  0x21   :  { %2093 = vmatpush3.bf16.msra.mxu1 %v2221_v34  ;;  %v628_v34 = vmul.f32 0.2, %v380_v26  ;;  %v383_v45 = vadd.f32 %v2368_v49, %v237_v37  ;;  %vm510_vm13 = vcmp.ge.f32.partialorder %v386_v3, 0.0  ;;  %v634_v11 = vmul.f32 0.2, %v386_v3 }
  0x22   :  { %v239_v41 = vmul.f32 %v2370_v54, %v93_v32  ;;  %v387_v46 = vadd.f32 %v2368_v49, %v241_v38  ;;  %v242_v14 = vmul.f32 %v2382_v62, %v96_v4  ;;  %v754_v19 = vsel %vm506_vm12, %v382_v0, %v630_v10  ;;  %v34_v4 = vld [vmem:[%s2920_s0 + $0x70] sm:$0xff] }
  0x23   :  { %v752_v40 = vsel %vm504_vm7, %v380_v26, %v628_v34  ;;  %1223 = vmatmul.mubr.bf16.vlgmr.msra.gmra.mxu0 %v870_v36  ;;  %vm507_vm8 = vcmp.ge.f32.partialorder %v383_v45, 0.0  ;;  %v631_v56 = vmul.f32 0.2, %v383_v45  ;;  %v758_v20 = vsel %vm510_vm13, %v386_v3, %v634_v11 }
  0x24   :  { %v872_v44 = vpack.c.bf16 %v752_v40, %v748_v35  ;;  %v385_v50 = vadd.f32 %v2372_v55, %v239_v41  ;;  %vm511_vm9 = vcmp.ge.f32.partialorder %v387_v46, 0.0  ;;  %v635_v57 = vmul.f32 0.2, %v387_v46 }
  0x25   :  { %v755_v1 = vsel %vm507_vm8, %v383_v45, %v631_v56  ;;  %v103_v21 = vunpack.c.h.bf16 %v30_v9  ;;  %v874_v22 = vpack.c.bf16 %v758_v20, %v754_v19  ;;  %v384_v23 = vadd.f32 %v2384_v63, %v238_v13  ;;  %v32_v56 = vld [vmem:[%s2920_s0 + $0x60] sm:$0xff]  ;;  %v35_v13 = vld [vmem:[%s2920_s0 + $0x78] sm:$0xff] }
  0x26   :  { %1383 = vmatmul.mubr.bf16.vlgmr.msra.gmra.mxu1 %v872_v44  ;;  %vm509_vm10 = vcmp.ge.f32.partialorder %v385_v50, 0.0  ;;  %v633_v61 = vmul.f32 0.2, %v385_v50  ;;  %v759_v2 = vsel %vm511_vm9, %v387_v46, %v635_v57  ;;  %v388_v24 = vadd.f32 %v2384_v63, %v242_v14 }
  0x27   :  { %v875_v6 = vpack.c.bf16 %v759_v2, %v755_v1  ;;  %v245_v25 = vmul.f32 %v2366_v48, %v99_v15  ;;  %v249_v26 = vmul.f32 %v2366_v48, %v103_v21  ;;  %v101_v27 = vunpack.c.h.bf16 %v29_v16 }
  0x28   :  { %v757_v8 = vsel %vm509_vm10, %v385_v50, %v633_v61  ;;  %v105_v28 = vunpack.c.h.bf16 %v31_v17  ;;  %v98_v29 = vunpack.c.l.bf16 %v28_v5  ;;  %vm508_vm14 = vcmp.ge.f32.partialorder %v384_v23, 0.0  ;;  %v2465_v5 = vld [vmem:[%s2920_s0 + $0x68] sm:$0xff] }
  0x29   :  { %1230 = vmatprep.mubr.bf16.mxu0 %v875_v6  ;;  %v877_v18 = vpack.c.bf16 %v761_v12, %v757_v8  ;;  %vm512_vm15 = vcmp.ge.f32.partialorder %v388_v24, 0.0  ;;  %v632_v30 = vmul.f32 0.2, %v384_v23  ;;  %v636_v31 = vmul.f32 0.2, %v388_v24 }
  0x2a   :  { %v391_v32 = vadd.f32 %v2368_v49, %v245_v25  ;;  %v395_v33 = vadd.f32 %v2368_v49, %v249_v26  ;;  %v247_v34 = vmul.f32 %v2370_v54, %v101_v27  ;;  %v251_v35 = vmul.f32 %v2370_v54, %v105_v28 }
  0x2b   :  { %1390 = vmatprep.mubr.bf16.mxu1 %v877_v18  ;;  %1231 = vmatmul.mubr.bf16.gmra.mxu0 %v874_v22  ;;  %v756_v36 = vsel %vm508_vm14, %v384_v23, %v632_v30  ;;  %v760_v37 = vsel %vm512_vm15, %v388_v24, %v636_v31  ;;  %v102_v38 = vunpack.c.l.bf16 %v30_v9  ;;  %v244_v39 = vmul.f32 %v2376_v58, %v98_v29 }
  0x2c   :  { %v876_v40 = vpack.c.bf16 %v760_v37, %v756_v36  ;;  %vm515_vm0 = vcmp.ge.f32.partialorder %v391_v32, 0.0  ;;  %vm519_vm1 = vcmp.ge.f32.partialorder %v395_v33, 0.0  ;;  %v639_v41 = vmul.f32 0.2, %v391_v32 }
  0x2d   :  { %v643_v42 = vmul.f32 0.2, %v395_v33  ;;  %v393_v43 = vadd.f32 %v2372_v55, %v247_v34  ;;  %v397_v44 = vadd.f32 %v2372_v55, %v251_v35  ;;  %v248_v45 = vmul.f32 %v2376_v58, %v102_v38 }
  0x2e   :  { %1391 = vmatmul.mubr.bf16.gmra.mxu1 %v876_v40  ;;  %v763_v46 = vsel %vm515_vm0, %v391_v32, %v639_v41  ;;  %v390_v47 = vadd.f32 %v2378_v59, %v244_v39  ;;  %v100_v50 = vunpack.c.l.bf16 %v29_v16  ;;  %v104_v51 = vunpack.c.l.bf16 %v31_v17 }
  0x2f   :  { %v767_v52 = vsel %vm519_vm1, %v395_v33, %v643_v42  ;;  %vm517_vm2 = vcmp.ge.f32.partialorder %v393_v43, 0.0  ;;  %vm521_vm3 = vcmp.ge.f32.partialorder %v397_v44, 0.0  ;;  %v641_v53 = vmul.f32 0.2, %v393_v43 }
  0x30   :  { %v879_v57 = vpack.c.bf16 %v767_v52, %v763_v46  ;;  %v645_v60 = vmul.f32 0.2, %v397_v44  ;;  %v394_v61 = vadd.f32 %v2378_v59, %v248_v45  ;;  %vm514_vm4 = vcmp.ge.f32.partialorder %v390_v47, 0.0  ;;  %v36_v45 = vld [vmem:[%s2920_s0 + $0x80] sm:$0xff] }
  0x31   :  { %v765_v0 = vsel %vm517_vm2, %v393_v43, %v641_v53  ;;  %v638_v1 = vmul.f32 0.2, %v390_v47  ;;  %v246_v2 = vmul.f32 %v2382_v62, %v100_v50  ;;  %v250_v3 = vmul.f32 %v2382_v62, %v104_v51  ;;  %v38_v51 = vld [vmem:[%s2920_s0 + $0x90] sm:$0xff] }
  0x32   :  { %1238 = vmatprep.mubr.bf16.mxu0 %v879_v57  ;;  %v769_v6 = vsel %vm521_vm3, %v397_v44, %v645_v60  ;;  %vm518_vm5 = vcmp.ge.f32.partialorder %v394_v61, 0.0  ;;  %v642_v7 = vmul.f32 0.2, %v394_v61  ;;  %v107_v8 = vunpack.c.h.bf16 %v32_v56 }
  0x33   :  { %v881_v9 = vpack.c.bf16 %v769_v6, %v765_v0  ;;  %v762_v10 = vsel %vm514_vm4, %v390_v47, %v638_v1  ;;  %v392_v11 = vadd.f32 %v2384_v63, %v246_v2  ;;  %v396_v12 = vadd.f32 %v2384_v63, %v250_v3  ;;  %v37_v0 = vld [vmem:[%s2920_s0 + $0x88] sm:$0xff]  ;;  %v39_v1 = vld [vmem:[%s2920_s0 + $0x98] sm:$0xff] }
  0x34   :  { %v766_v14 = vsel %vm518_vm5, %v394_v61, %v642_v7  ;;  %v111_v15 = vunpack.c.h.bf16 %v34_v4  ;;  %v253_v16 = vmul.f32 %v2366_v48, %v107_v8  ;;  %v109_v17 = vunpack.c.h.bf16 %v2465_v5 }
  0x35   :  { %1398 = vmatprep.mubr.bf16.mxu1 %v881_v9  ;;  %v878_v18 = vpack.c.bf16 %v766_v14, %v762_v10  ;;  %vm516_vm6 = vcmp.ge.f32.partialorder %v392_v11, 0.0  ;;  %vm520_vm7 = vcmp.ge.f32.partialorder %v396_v12, 0.0  ;;  %v640_v19 = vmul.f32 0.2, %v392_v11 }
  0x36   :  { %v644_v20 = vmul.f32 0.2, %v396_v12  ;;  %v257_v21 = vmul.f32 %v2366_v48, %v111_v15  ;;  %v399_v22 = vadd.f32 %v2368_v49, %v253_v16  ;;  %v113_v23 = vunpack.c.h.bf16 %v35_v13 }
  0x37   :  { %1239 = vmatmul.mubr.bf16.gmra.mxu0 %v878_v18  ;;  %v764_v24 = vsel %vm516_vm6, %v392_v11, %v640_v19  ;;  %v255_v25 = vmul.f32 %v2370_v54, %v109_v17  ;;  %v106_v26 = vunpack.c.l.bf16 %v32_v56  ;;  %v110_v27 = vunpack.c.l.bf16 %v34_v4 }
  0x38   :  { %v768_v28 = vsel %vm520_vm7, %v396_v12, %v644_v20  ;;  %v403_v29 = vadd.f32 %v2368_v49, %v257_v21  ;;  %vm523_vm8 = vcmp.ge.f32.partialorder %v399_v22, 0.0  ;;  %v647_v30 = vmul.f32 0.2, %v399_v22 }
  0x39   :  { %v880_v31 = vpack.c.bf16 %v768_v28, %v764_v24  ;;  %v259_v32 = vmul.f32 %v2370_v54, %v113_v23  ;;  %v401_v33 = vadd.f32 %v2372_v55, %v255_v25  ;;  %v252_v34 = vmul.f32 %v2376_v58, %v106_v26 }
  0x3a   :  { %vm527_vm9 = vcmp.ge.f32.partialorder %v403_v29, 0.0  ;;  %v651_v35 = vmul.f32 0.2, %v403_v29  ;;  %v771_v36 = vsel %vm523_vm8, %v399_v22, %v647_v30  ;;  %v256_v37 = vmul.f32 %v2376_v58, %v110_v27 }
  0x3b   :  { %1399 = vmatmul.mubr.bf16.gmra.mxu1 %v880_v31  ;;  %v405_v38 = vadd.f32 %v2372_v55, %v259_v32  ;;  %vm525_vm10 = vcmp.ge.f32.partialorder %v401_v33, 0.0  ;;  %v649_v39 = vmul.f32 0.2, %v401_v33  ;;  %v398_v40 = vadd.f32 %v2378_v59, %v252_v34 }
  0x3c   :  { %v775_v41 = vsel %vm527_vm9, %v403_v29, %v651_v35  ;;  %v402_v42 = vadd.f32 %v2378_v59, %v256_v37  ;;  %v108_v43 = vunpack.c.l.bf16 %v2465_v5  ;;  %v112_v44 = vunpack.c.l.bf16 %v35_v13 }
  0x3d   :  { %v883_v46 = vpack.c.bf16 %v775_v41, %v771_v36  ;;  %vm529_vm11 = vcmp.ge.f32.partialorder %v405_v38, 0.0  ;;  %v653_v47 = vmul.f32 0.2, %v405_v38  ;;  %v773_v50 = vsel %vm525_vm10, %v401_v33, %v649_v39  ;;  %v40_v36 = vld [vmem:[%s2920_s0 + $0xa0] sm:$0xff] }
  0x3e   :  { %vm522_vm12 = vcmp.ge.f32.partialorder %v398_v40, 0.0  ;;  %vm526_vm13 = vcmp.ge.f32.partialorder %v402_v42, 0.0  ;;  %v646_v52 = vmul.f32 0.2, %v398_v40  ;;  %v650_v53 = vmul.f32 0.2, %v402_v42 }
  0x3f   :  { %1246 = vmatprep.mubr.bf16.mxu0 %v883_v46  ;;  %v777_v56 = vsel %vm529_vm11, %v405_v38, %v653_v47  ;;  %v254_v57 = vmul.f32 %v2382_v62, %v108_v43  ;;  %v258_v60 = vmul.f32 %v2382_v62, %v112_v44  ;;  %v115_v61 = vunpack.c.h.bf16 %v36_v45  ;;  %v42_v44 = vld [vmem:[%s2920_s0 + $0xb0] sm:$0xff] }
  0x40   :  { %v885_v2 = vpack.c.bf16 %v777_v56, %v773_v50  ;;  %v770_v3 = vsel %vm522_vm12, %v398_v40, %v646_v52  ;;  %v774_v4 = vsel %vm526_vm13, %v402_v42, %v650_v53  ;;  %v119_v5 = vunpack.c.h.bf16 %v38_v51 }
  0x41   :  { %v882_v6 = vpack.c.bf16 %v774_v4, %v770_v3  ;;  %v400_v7 = vadd.f32 %v2384_v63, %v254_v57  ;;  %v404_v8 = vadd.f32 %v2384_v63, %v258_v60  ;;  %v261_v9 = vmul.f32 %v2366_v48, %v115_v61  ;;  %v43_v57 = vld [vmem:[%s2920_s0 + $0xb8] sm:$0xff] }
  0x42   :  { %1406 = vmatprep.mubr.bf16.mxu1 %v885_v2  ;;  %v265_v10 = vmul.f32 %v2366_v48, %v119_v5  ;;  %v117_v11 = vunpack.c.h.bf16 %v37_v0  ;;  %v121_v12 = vunpack.c.h.bf16 %v39_v1  ;;  %v114_v13 = vunpack.c.l.bf16 %v36_v45  ;;  %v2525_v45 = vld [vmem:[%s2920_s0 + $0xa8] sm:$0xff] }
  0x43   :  { %1247 = vmatmul.mubr.bf16.gmra.mxu0 %v882_v6  ;;  %vm524_vm14 = vcmp.ge.f32.partialorder %v400_v7, 0.0  ;;  %vm528_vm15 = vcmp.ge.f32.partialorder %v404_v8, 0.0  ;;  %v648_v14 = vmul.f32 0.2, %v400_v7  ;;  %v652_v15 = vmul.f32 0.2, %v404_v8 }
  0x44   :  { %v407_v16 = vadd.f32 %v2368_v49, %v261_v9  ;;  %v411_v17 = vadd.f32 %v2368_v49, %v265_v10  ;;  %v263_v18 = vmul.f32 %v2370_v54, %v117_v11  ;;  %v267_v19 = vmul.f32 %v2370_v54, %v121_v12 }
  0x45   :  { %v772_v20 = vsel %vm524_vm14, %v400_v7, %v648_v14  ;;  %v776_v21 = vsel %vm528_vm15, %v404_v8, %v652_v15  ;;  %v118_v22 = vunpack.c.l.bf16 %v38_v51  ;;  %v260_v23 = vmul.f32 %v2376_v58, %v114_v13 }
  0x46   :  { %v884_v24 = vpack.c.bf16 %v776_v21, %v772_v20  ;;  %vm531_vm0 = vcmp.ge.f32.partialorder %v407_v16, 0.0  ;;  %vm535_vm1 = vcmp.ge.f32.partialorder %v411_v17, 0.0  ;;  %v655_v25 = vmul.f32 0.2, %v407_v16 }
  0x47   :  { %v659_v26 = vmul.f32 0.2, %v411_v17  ;;  %v409_v27 = vadd.f32 %v2372_v55, %v263_v18  ;;  %v413_v28 = vadd.f32 %v2372_v55, %v267_v19  ;;  %v264_v29 = vmul.f32 %v2376_v58, %v118_v22 }
  0x48   :  { %1407 = vmatmul.mubr.bf16.gmra.mxu1 %v884_v24  ;;  %v779_v30 = vsel %vm531_vm0, %v407_v16, %v655_v25  ;;  %v406_v31 = vadd.f32 %v2378_v59, %v260_v23  ;;  %v116_v32 = vunpack.c.l.bf16 %v37_v0  ;;  %v120_v33 = vunpack.c.l.bf16 %v39_v1 }
  0x49   :  { %v783_v34 = vsel %vm535_vm1, %v411_v17, %v659_v26  ;;  %vm533_vm2 = vcmp.ge.f32.partialorder %v409_v27, 0.0  ;;  %vm537_vm3 = vcmp.ge.f32.partialorder %v413_v28, 0.0  ;;  %v657_v35 = vmul.f32 0.2, %v409_v27 }
  0x4a   :  { %v887_v37 = vpack.c.bf16 %v783_v34, %v779_v30  ;;  %v661_v38 = vmul.f32 0.2, %v413_v28  ;;  %v410_v39 = vadd.f32 %v2378_v59, %v264_v29  ;;  %vm530_vm4 = vcmp.ge.f32.partialorder %v406_v31, 0.0  ;;  %v44_v29 = vld [vmem:[%s2920_s0 + $0xc0] sm:$0xff] }
  0x4b   :  { %v781_v40 = vsel %vm533_vm2, %v409_v27, %v657_v35  ;;  %v654_v41 = vmul.f32 0.2, %v406_v31  ;;  %v262_v42 = vmul.f32 %v2382_v62, %v116_v32  ;;  %v266_v43 = vmul.f32 %v2382_v62, %v120_v33  ;;  %v46_v33 = vld [vmem:[%s2920_s0 + $0xd0] sm:$0xff] }
  0x4c   :  { %1254 = vmatprep.mubr.bf16.mxu0 %v887_v37  ;;  %v785_v46 = vsel %vm537_vm3, %v413_v28, %v661_v38  ;;  %vm534_vm5 = vcmp.ge.f32.partialorder %v410_v39, 0.0  ;;  %v658_v47 = vmul.f32 0.2, %v410_v39  ;;  %v123_v50 = vunpack.c.h.bf16 %v40_v36 }
  0x4d   :  { %v889_v51 = vpack.c.bf16 %v785_v46, %v781_v40  ;;  %v778_v52 = vsel %vm530_vm4, %v406_v31, %v654_v41  ;;  %v408_v53 = vadd.f32 %v2384_v63, %v262_v42  ;;  %v412_v56 = vadd.f32 %v2384_v63, %v266_v43  ;;  %v45_v40 = vld [vmem:[%s2920_s0 + $0xc8] sm:$0xff]  ;;  %v47_v41 = vld [vmem:[%s2920_s0 + $0xd8] sm:$0xff] }
  0x4e   :  { %v782_v60 = vsel %vm534_vm5, %v410_v39, %v658_v47  ;;  %v127_v61 = vunpack.c.h.bf16 %v42_v44  ;;  %v269_v0 = vmul.f32 %v2366_v48, %v123_v50  ;;  %v125_v1 = vunpack.c.h.bf16 %v2525_v45 }
  0x4f   :  { %1414 = vmatprep.mubr.bf16.mxu1 %v889_v51  ;;  %v886_v2 = vpack.c.bf16 %v782_v60, %v778_v52  ;;  %vm532_vm6 = vcmp.ge.f32.partialorder %v408_v53, 0.0  ;;  %vm536_vm7 = vcmp.ge.f32.partialorder %v412_v56, 0.0  ;;  %v656_v3 = vmul.f32 0.2, %v408_v53 }
  0x50   :  { %v660_v4 = vmul.f32 0.2, %v412_v56  ;;  %v273_v5 = vmul.f32 %v2366_v48, %v127_v61  ;;  %v415_v6 = vadd.f32 %v2368_v49, %v269_v0  ;;  %v129_v7 = vunpack.c.h.bf16 %v43_v57 }
  0x51   :  { %1255 = vmatmul.mubr.bf16.gmra.mxu0 %v886_v2  ;;  %v780_v8 = vsel %vm532_vm6, %v408_v53, %v656_v3  ;;  %v271_v9 = vmul.f32 %v2370_v54, %v125_v1  ;;  %v122_v10 = vunpack.c.l.bf16 %v40_v36  ;;  %v126_v11 = vunpack.c.l.bf16 %v42_v44 }
  0x52   :  { %v784_v12 = vsel %vm536_vm7, %v412_v56, %v660_v4  ;;  %v419_v13 = vadd.f32 %v2368_v49, %v273_v5  ;;  %vm539_vm8 = vcmp.ge.f32.partialorder %v415_v6, 0.0  ;;  %v663_v14 = vmul.f32 0.2, %v415_v6 }
  0x53   :  { %v888_v15 = vpack.c.bf16 %v784_v12, %v780_v8  ;;  %v275_v16 = vmul.f32 %v2370_v54, %v129_v7  ;;  %v417_v17 = vadd.f32 %v2372_v55, %v271_v9  ;;  %v268_v18 = vmul.f32 %v2376_v58, %v122_v10 }
  0x54   :  { %vm543_vm9 = vcmp.ge.f32.partialorder %v419_v13, 0.0  ;;  %v667_v19 = vmul.f32 0.2, %v419_v13  ;;  %v787_v20 = vsel %vm539_vm8, %v415_v6, %v663_v14  ;;  %v272_v21 = vmul.f32 %v2376_v58, %v126_v11 }
  0x55   :  { %1415 = vmatmul.mubr.bf16.gmra.mxu1 %v888_v15  ;;  %v421_v22 = vadd.f32 %v2372_v55, %v275_v16  ;;  %vm541_vm10 = vcmp.ge.f32.partialorder %v417_v17, 0.0  ;;  %v665_v23 = vmul.f32 0.2, %v417_v17  ;;  %v414_v24 = vadd.f32 %v2378_v59, %v268_v18 }
  0x56   :  { %v791_v25 = vsel %vm543_vm9, %v419_v13, %v667_v19  ;;  %v418_v26 = vadd.f32 %v2378_v59, %v272_v21  ;;  %v124_v27 = vunpack.c.l.bf16 %v2525_v45  ;;  %v128_v28 = vunpack.c.l.bf16 %v43_v57 }
  0x57   :  { %v891_v30 = vpack.c.bf16 %v791_v25, %v787_v20  ;;  %vm545_vm11 = vcmp.ge.f32.partialorder %v421_v22, 0.0  ;;  %v669_v31 = vmul.f32 0.2, %v421_v22  ;;  %v789_v32 = vsel %vm541_vm10, %v417_v17, %v665_v23  ;;  %v48_v20 = vld [vmem:[%s2920_s0 + $0xe0] sm:$0xff] }
  0x58   :  { %vm538_vm12 = vcmp.ge.f32.partialorder %v414_v24, 0.0  ;;  %vm542_vm13 = vcmp.ge.f32.partialorder %v418_v26, 0.0  ;;  %v662_v34 = vmul.f32 0.2, %v414_v24  ;;  %v666_v35 = vmul.f32 0.2, %v418_v26 }
  0x59   :  { %1262 = vmatprep.mubr.bf16.mxu0 %v891_v30  ;;  %v793_v36 = vsel %vm545_vm11, %v421_v22, %v669_v31  ;;  %v270_v37 = vmul.f32 %v2382_v62, %v124_v27  ;;  %v274_v38 = vmul.f32 %v2382_v62, %v128_v28  ;;  %v131_v39 = vunpack.c.h.bf16 %v44_v29  ;;  %v50_v28 = vld [vmem:[%s2920_s0 + $0xf0] sm:$0xff] }
  0x5a   :  { %v893_v42 = vpack.c.bf16 %v793_v36, %v789_v32  ;;  %v786_v43 = vsel %vm538_vm12, %v414_v24, %v662_v34  ;;  %v790_v44 = vsel %vm542_vm13, %v418_v26, %v666_v35  ;;  %v135_v45 = vunpack.c.h.bf16 %v46_v33 }
  0x5b   :  { %v890_v46 = vpack.c.bf16 %v790_v44, %v786_v43  ;;  %v416_v47 = vadd.f32 %v2384_v63, %v270_v37  ;;  %v420_v50 = vadd.f32 %v2384_v63, %v274_v38  ;;  %v277_v51 = vmul.f32 %v2366_v48, %v131_v39  ;;  %v51_v37 = vld [vmem:[%s2920_s0 + $0xf8] sm:$0xff] }
  0x5c   :  { %1422 = vmatprep.mubr.bf16.mxu1 %v893_v42  ;;  %v281_v52 = vmul.f32 %v2366_v48, %v135_v45  ;;  %v133_v53 = vunpack.c.h.bf16 %v45_v40  ;;  %v137_v56 = vunpack.c.h.bf16 %v47_v41  ;;  %v130_v57 = vunpack.c.l.bf16 %v44_v29  ;;  %v2585_v29 = vld [vmem:[%s2920_s0 + $0xe8] sm:$0xff] }
  0x5d   :  { %1263 = vmatmul.mubr.bf16.gmra.mxu0 %v890_v46  ;;  %vm540_vm14 = vcmp.ge.f32.partialorder %v416_v47, 0.0  ;;  %vm544_vm15 = vcmp.ge.f32.partialorder %v420_v50, 0.0  ;;  %v664_v60 = vmul.f32 0.2, %v416_v47  ;;  %v668_v61 = vmul.f32 0.2, %v420_v50 }
  0x5e   :  { %v423_v0 = vadd.f32 %v2368_v49, %v277_v51  ;;  %v427_v1 = vadd.f32 %v2368_v49, %v281_v52  ;;  %v279_v2 = vmul.f32 %v2370_v54, %v133_v53  ;;  %v283_v3 = vmul.f32 %v2370_v54, %v137_v56 }
  0x5f   :  { %v788_v4 = vsel %vm540_vm14, %v416_v47, %v664_v60  ;;  %v792_v5 = vsel %vm544_vm15, %v420_v50, %v668_v61  ;;  %v134_v6 = vunpack.c.l.bf16 %v46_v33  ;;  %v276_v7 = vmul.f32 %v2376_v58, %v130_v57 }
  0x60   :  { %v892_v8 = vpack.c.bf16 %v792_v5, %v788_v4  ;;  %vm547_vm0 = vcmp.ge.f32.partialorder %v423_v0, 0.0  ;;  %vm551_vm1 = vcmp.ge.f32.partialorder %v427_v1, 0.0  ;;  %v671_v9 = vmul.f32 0.2, %v423_v0 }
  0x61   :  { %v675_v10 = vmul.f32 0.2, %v427_v1  ;;  %v425_v11 = vadd.f32 %v2372_v55, %v279_v2  ;;  %v429_v12 = vadd.f32 %v2372_v55, %v283_v3  ;;  %v280_v13 = vmul.f32 %v2376_v58, %v134_v6 }
  0x62   :  { %1423 = vmatmul.mubr.bf16.gmra.mxu1 %v892_v8  ;;  %v795_v14 = vsel %vm547_vm0, %v423_v0, %v671_v9  ;;  %v422_v15 = vadd.f32 %v2378_v59, %v276_v7  ;;  %v132_v16 = vunpack.c.l.bf16 %v45_v40  ;;  %v136_v17 = vunpack.c.l.bf16 %v47_v41 }
  0x63   :  { %v799_v18 = vsel %vm551_vm1, %v427_v1, %v675_v10  ;;  %vm549_vm2 = vcmp.ge.f32.partialorder %v425_v11, 0.0  ;;  %vm553_vm3 = vcmp.ge.f32.partialorder %v429_v12, 0.0  ;;  %v673_v19 = vmul.f32 0.2, %v425_v11 }
  0x64   :  { %v895_v21 = vpack.c.bf16 %v799_v18, %v795_v14  ;;  %v677_v22 = vmul.f32 0.2, %v429_v12  ;;  %v426_v23 = vadd.f32 %v2378_v59, %v280_v13  ;;  %vm546_vm4 = vcmp.ge.f32.partialorder %v422_v15, 0.0  ;;  %v52_v13 = vld [vmem:[%s2920_s0 + $0x100] sm:$0xff] }
  0x65   :  { %v797_v24 = vsel %vm549_vm2, %v425_v11, %v673_v19  ;;  %v670_v25 = vmul.f32 0.2, %v422_v15  ;;  %v278_v26 = vmul.f32 %v2382_v62, %v132_v16  ;;  %v282_v27 = vmul.f32 %v2382_v62, %v136_v17  ;;  %v54_v17 = vld [vmem:[%s2920_s0 + $0x110] sm:$0xff] }
  0x66   :  { %1270 = vmatprep.mubr.bf16.mxu0 %v895_v21  ;;  %v801_v30 = vsel %vm553_vm3, %v429_v12, %v677_v22  ;;  %vm550_vm5 = vcmp.ge.f32.partialorder %v426_v23, 0.0  ;;  %v674_v31 = vmul.f32 0.2, %v426_v23  ;;  %v139_v32 = vunpack.c.h.bf16 %v48_v20 }
  0x67   :  { %v897_v33 = vpack.c.bf16 %v801_v30, %v797_v24  ;;  %v794_v34 = vsel %vm546_vm4, %v422_v15, %v670_v25  ;;  %v424_v35 = vadd.f32 %v2384_v63, %v278_v26  ;;  %v428_v36 = vadd.f32 %v2384_v63, %v282_v27  ;;  %v53_v24 = vld [vmem:[%s2920_s0 + $0x108] sm:$0xff]  ;;  %v55_v25 = vld [vmem:[%s2920_s0 + $0x118] sm:$0xff] }
  0x68   :  { %v798_v38 = vsel %vm550_vm5, %v426_v23, %v674_v31  ;;  %v143_v39 = vunpack.c.h.bf16 %v50_v28  ;;  %v285_v40 = vmul.f32 %v2366_v48, %v139_v32  ;;  %v141_v41 = vunpack.c.h.bf16 %v2585_v29 }
  0x69   :  { %1430 = vmatprep.mubr.bf16.mxu1 %v897_v33  ;;  %v894_v42 = vpack.c.bf16 %v798_v38, %v794_v34  ;;  %vm548_vm6 = vcmp.ge.f32.partialorder %v424_v35, 0.0  ;;  %vm552_vm7 = vcmp.ge.f32.partialorder %v428_v36, 0.0  ;;  %v672_v43 = vmul.f32 0.2, %v424_v35 }
  0x6a   :  { %v676_v44 = vmul.f32 0.2, %v428_v36  ;;  %v289_v45 = vmul.f32 %v2366_v48, %v143_v39  ;;  %v431_v46 = vadd.f32 %v2368_v49, %v285_v40  ;;  %v145_v47 = vunpack.c.h.bf16 %v51_v37 }
  0x6b   :  { %1271 = vmatmul.mubr.bf16.gmra.mxu0 %v894_v42  ;;  %v796_v50 = vsel %vm548_vm6, %v424_v35, %v672_v43  ;;  %v287_v51 = vmul.f32 %v2370_v54, %v141_v41  ;;  %v138_v52 = vunpack.c.l.bf16 %v48_v20  ;;  %v142_v53 = vunpack.c.l.bf16 %v50_v28 }
  0x6c   :  { %v800_v56 = vsel %vm552_vm7, %v428_v36, %v676_v44  ;;  %v435_v57 = vadd.f32 %v2368_v49, %v289_v45  ;;  %vm555_vm8 = vcmp.ge.f32.partialorder %v431_v46, 0.0  ;;  %v679_v60 = vmul.f32 0.2, %v431_v46 }
  0x6d   :  { %v896_v61 = vpack.c.bf16 %v800_v56, %v796_v50  ;;  %v291_v0 = vmul.f32 %v2370_v54, %v145_v47  ;;  %v433_v1 = vadd.f32 %v2372_v55, %v287_v51  ;;  %v284_v2 = vmul.f32 %v2376_v58, %v138_v52 }
  0x6e   :  { %vm559_vm9 = vcmp.ge.f32.partialorder %v435_v57, 0.0  ;;  %v683_v3 = vmul.f32 0.2, %v435_v57  ;;  %v803_v4 = vsel %vm555_vm8, %v431_v46, %v679_v60  ;;  %v288_v5 = vmul.f32 %v2376_v58, %v142_v53 }
  0x6f   :  { %1431 = vmatmul.mubr.bf16.gmra.mxu1 %v896_v61  ;;  %v437_v6 = vadd.f32 %v2372_v55, %v291_v0  ;;  %vm557_vm10 = vcmp.ge.f32.partialorder %v433_v1, 0.0  ;;  %v681_v7 = vmul.f32 0.2, %v433_v1  ;;  %v430_v8 = vadd.f32 %v2378_v59, %v284_v2 }
  0x70   :  { %v807_v9 = vsel %vm559_vm9, %v435_v57, %v683_v3  ;;  %v434_v10 = vadd.f32 %v2378_v59, %v288_v5  ;;  %v140_v11 = vunpack.c.l.bf16 %v2585_v29  ;;  %v144_v12 = vunpack.c.l.bf16 %v51_v37 }
  0x71   :  { %v899_v14 = vpack.c.bf16 %v807_v9, %v803_v4  ;;  %vm561_vm11 = vcmp.ge.f32.partialorder %v437_v6, 0.0  ;;  %v685_v15 = vmul.f32 0.2, %v437_v6  ;;  %v805_v16 = vsel %vm557_vm10, %v433_v1, %v681_v7  ;;  %v56_v4 = vld [vmem:[%s2920_s0 + $0x120] sm:$0xff] }
  0x72   :  { %vm554_vm12 = vcmp.ge.f32.partialorder %v430_v8, 0.0  ;;  %vm558_vm13 = vcmp.ge.f32.partialorder %v434_v10, 0.0  ;;  %v678_v18 = vmul.f32 0.2, %v430_v8  ;;  %v682_v19 = vmul.f32 0.2, %v434_v10 }
  0x73   :  { %1278 = vmatprep.mubr.bf16.mxu0 %v899_v14  ;;  %v809_v20 = vsel %vm561_vm11, %v437_v6, %v685_v15  ;;  %v286_v21 = vmul.f32 %v2382_v62, %v140_v11  ;;  %v290_v22 = vmul.f32 %v2382_v62, %v144_v12  ;;  %v147_v23 = vunpack.c.h.bf16 %v52_v13  ;;  %v58_v12 = vld [vmem:[%s2920_s0 + $0x130] sm:$0xff] }
  0x74   :  { %v901_v26 = vpack.c.bf16 %v809_v20, %v805_v16  ;;  %v802_v27 = vsel %vm554_vm12, %v430_v8, %v678_v18  ;;  %v806_v28 = vsel %vm558_vm13, %v434_v10, %v682_v19  ;;  %v151_v29 = vunpack.c.h.bf16 %v54_v17 }
  0x75   :  { %v898_v30 = vpack.c.bf16 %v806_v28, %v802_v27  ;;  %v432_v31 = vadd.f32 %v2384_v63, %v286_v21  ;;  %v436_v32 = vadd.f32 %v2384_v63, %v290_v22  ;;  %v293_v33 = vmul.f32 %v2366_v48, %v147_v23  ;;  %v59_v21 = vld [vmem:[%s2920_s0 + $0x138] sm:$0xff] }
  0x76   :  { %1438 = vmatprep.mubr.bf16.mxu1 %v901_v26  ;;  %v297_v34 = vmul.f32 %v2366_v48, %v151_v29  ;;  %v149_v35 = vunpack.c.h.bf16 %v53_v24  ;;  %v153_v36 = vunpack.c.h.bf16 %v55_v25  ;;  %v146_v37 = vunpack.c.l.bf16 %v52_v13  ;;  %v2645_v13 = vld [vmem:[%s2920_s0 + $0x128] sm:$0xff] }
  0x77   :  { %1279 = vmatmul.mubr.bf16.gmra.mxu0 %v898_v30  ;;  %vm556_vm14 = vcmp.ge.f32.partialorder %v432_v31, 0.0  ;;  %vm560_vm15 = vcmp.ge.f32.partialorder %v436_v32, 0.0  ;;  %v680_v38 = vmul.f32 0.2, %v432_v31  ;;  %v684_v39 = vmul.f32 0.2, %v436_v32 }
  0x78   :  { %v439_v40 = vadd.f32 %v2368_v49, %v293_v33  ;;  %v443_v41 = vadd.f32 %v2368_v49, %v297_v34  ;;  %v295_v42 = vmul.f32 %v2370_v54, %v149_v35  ;;  %v299_v43 = vmul.f32 %v2370_v54, %v153_v36 }
  0x79   :  { %v804_v44 = vsel %vm556_vm14, %v432_v31, %v680_v38  ;;  %v808_v45 = vsel %vm560_vm15, %v436_v32, %v684_v39  ;;  %v150_v46 = vunpack.c.l.bf16 %v54_v17  ;;  %v292_v47 = vmul.f32 %v2376_v58, %v146_v37 }
  0x7a   :  { %v900_v50 = vpack.c.bf16 %v808_v45, %v804_v44  ;;  %vm563_vm0 = vcmp.ge.f32.partialorder %v439_v40, 0.0  ;;  %vm567_vm1 = vcmp.ge.f32.partialorder %v443_v41, 0.0  ;;  %v687_v51 = vmul.f32 0.2, %v439_v40 }
  0x7b   :  { %v691_v52 = vmul.f32 0.2, %v443_v41  ;;  %v441_v53 = vadd.f32 %v2372_v55, %v295_v42  ;;  %v445_v56 = vadd.f32 %v2372_v55, %v299_v43  ;;  %v296_v57 = vmul.f32 %v2376_v58, %v150_v46 }
  0x7c   :  { %1439 = vmatmul.mubr.bf16.gmra.mxu1 %v900_v50  ;;  %v811_v60 = vsel %vm563_vm0, %v439_v40, %v687_v51  ;;  %v438_v61 = vadd.f32 %v2378_v59, %v292_v47  ;;  %v148_v0 = vunpack.c.l.bf16 %v53_v24  ;;  %v152_v1 = vunpack.c.l.bf16 %v55_v25 }
  0x7d   :  { %v815_v2 = vsel %vm567_vm1, %v443_v41, %v691_v52  ;;  %vm565_vm2 = vcmp.ge.f32.partialorder %v441_v53, 0.0  ;;  %vm569_vm3 = vcmp.ge.f32.partialorder %v445_v56, 0.0  ;;  %v689_v3 = vmul.f32 0.2, %v441_v53 }
  0x7e   :  { %v903_v5 = vpack.c.bf16 %v815_v2, %v811_v60  ;;  %v693_v6 = vmul.f32 0.2, %v445_v56  ;;  %v442_v7 = vadd.f32 %v2378_v59, %v296_v57  ;;  %vm562_vm4 = vcmp.ge.f32.partialorder %v438_v61, 0.0  ;;  %v60_v57 = vld [vmem:[%s2920_s0 + $0x140] sm:$0xff] }
  0x7f   :  { %v813_v8 = vsel %vm565_vm2, %v441_v53, %v689_v3  ;;  %v686_v9 = vmul.f32 0.2, %v438_v61  ;;  %v294_v10 = vmul.f32 %v2382_v62, %v148_v0  ;;  %v298_v11 = vmul.f32 %v2382_v62, %v152_v1  ;;  %v62_v1 = vld [vmem:[%s2920_s0 + $0x150] sm:$0xff] }
  0x80   :  { %1286 = vmatprep.mubr.bf16.mxu0 %v903_v5  ;;  %v817_v14 = vsel %vm569_vm3, %v445_v56, %v693_v6  ;;  %vm566_vm5 = vcmp.ge.f32.partialorder %v442_v7, 0.0  ;;  %v690_v15 = vmul.f32 0.2, %v442_v7  ;;  %v155_v16 = vunpack.c.h.bf16 %v56_v4 }
  0x81   :  { %v905_v17 = vpack.c.bf16 %v817_v14, %v813_v8  ;;  %v810_v18 = vsel %vm562_vm4, %v438_v61, %v686_v9  ;;  %v440_v19 = vadd.f32 %v2384_v63, %v294_v10  ;;  %v444_v20 = vadd.f32 %v2384_v63, %v298_v11  ;;  %v61_v8 = vld [vmem:[%s2920_s0 + $0x148] sm:$0xff]  ;;  %v63_v9 = vld [vmem:[%s2920_s0 + $0x158] sm:$0xff] }
  0x82   :  { %v814_v22 = vsel %vm566_vm5, %v442_v7, %v690_v15  ;;  %v159_v23 = vunpack.c.h.bf16 %v58_v12  ;;  %v301_v24 = vmul.f32 %v2366_v48, %v155_v16  ;;  %v157_v25 = vunpack.c.h.bf16 %v2645_v13 }
  0x83   :  { %1446 = vmatprep.mubr.bf16.mxu1 %v905_v17  ;;  %v902_v26 = vpack.c.bf16 %v814_v22, %v810_v18  ;;  %vm564_vm6 = vcmp.ge.f32.partialorder %v440_v19, 0.0  ;;  %vm568_vm7 = vcmp.ge.f32.partialorder %v444_v20, 0.0  ;;  %v688_v27 = vmul.f32 0.2, %v440_v19 }
  0x84   :  { %v692_v28 = vmul.f32 0.2, %v444_v20  ;;  %v305_v29 = vmul.f32 %v2366_v48, %v159_v23  ;;  %v447_v30 = vadd.f32 %v2368_v49, %v301_v24  ;;  %v161_v31 = vunpack.c.h.bf16 %v59_v21 }
  0x85   :  { %1287 = vmatmul.mubr.bf16.gmra.mxu0 %v902_v26  ;;  %v812_v32 = vsel %vm564_vm6, %v440_v19, %v688_v27  ;;  %v303_v33 = vmul.f32 %v2370_v54, %v157_v25  ;;  %v154_v34 = vunpack.c.l.bf16 %v56_v4  ;;  %v158_v35 = vunpack.c.l.bf16 %v58_v12 }
  0x86   :  { %v816_v36 = vsel %vm568_vm7, %v444_v20, %v692_v28  ;;  %v451_v37 = vadd.f32 %v2368_v49, %v305_v29  ;;  %vm571_vm8 = vcmp.ge.f32.partialorder %v447_v30, 0.0  ;;  %v695_v38 = vmul.f32 0.2, %v447_v30 }
  0x87   :  { %v904_v39 = vpack.c.bf16 %v816_v36, %v812_v32  ;;  %v307_v40 = vmul.f32 %v2370_v54, %v161_v31  ;;  %v449_v41 = vadd.f32 %v2372_v55, %v303_v33  ;;  %v300_v42 = vmul.f32 %v2376_v58, %v154_v34 }
  0x88   :  { %vm575_vm9 = vcmp.ge.f32.partialorder %v451_v37, 0.0  ;;  %v699_v43 = vmul.f32 0.2, %v451_v37  ;;  %v819_v44 = vsel %vm571_vm8, %v447_v30, %v695_v38  ;;  %v304_v45 = vmul.f32 %v2376_v58, %v158_v35 }
  0x89   :  { %1447 = vmatmul.mubr.bf16.gmra.mxu1 %v904_v39  ;;  %v453_v46 = vadd.f32 %v2372_v55, %v307_v40  ;;  %vm573_vm10 = vcmp.ge.f32.partialorder %v449_v41, 0.0  ;;  %v697_v47 = vmul.f32 0.2, %v449_v41  ;;  %v446_v50 = vadd.f32 %v2378_v59, %v300_v42 }
  0x8a   :  { %v823_v51 = vsel %vm575_vm9, %v451_v37, %v699_v43  ;;  %v450_v52 = vadd.f32 %v2378_v59, %v304_v45  ;;  %v156_v53 = vunpack.c.l.bf16 %v2645_v13  ;;  %v160_v56 = vunpack.c.l.bf16 %v59_v21 }
  0x8b   :  { %v907_v60 = vpack.c.bf16 %v823_v51, %v819_v44  ;;  %vm577_vm11 = vcmp.ge.f32.partialorder %v453_v46, 0.0  ;;  %v701_v61 = vmul.f32 0.2, %v453_v46  ;;  %v821_v0 = vsel %vm573_vm10, %v449_v41, %v697_v47  ;;  %v64_v44 = vld [vmem:[%s2920_s0 + $0x160] sm:$0xff] }
  0x8c   :  { %vm570_vm12 = vcmp.ge.f32.partialorder %v446_v50, 0.0  ;;  %vm574_vm13 = vcmp.ge.f32.partialorder %v450_v52, 0.0  ;;  %v694_v2 = vmul.f32 0.2, %v446_v50  ;;  %v698_v3 = vmul.f32 0.2, %v450_v52 }
  0x8d   :  { %1294 = vmatprep.mubr.bf16.mxu0 %v907_v60  ;;  %v825_v4 = vsel %vm577_vm11, %v453_v46, %v701_v61  ;;  %v302_v5 = vmul.f32 %v2382_v62, %v156_v53  ;;  %v306_v6 = vmul.f32 %v2382_v62, %v160_v56  ;;  %v163_v7 = vunpack.c.h.bf16 %v60_v57  ;;  %v66_v56 = vld [vmem:[%s2920_s0 + $0x170] sm:$0xff] }
  0x8e   :  { %v909_v10 = vpack.c.bf16 %v825_v4, %v821_v0  ;;  %v818_v11 = vsel %vm570_vm12, %v446_v50, %v694_v2  ;;  %v822_v12 = vsel %vm574_vm13, %v450_v52, %v698_v3  ;;  %v167_v13 = vunpack.c.h.bf16 %v62_v1 }
  0x8f   :  { %v906_v14 = vpack.c.bf16 %v822_v12, %v818_v11  ;;  %v448_v15 = vadd.f32 %v2384_v63, %v302_v5  ;;  %v452_v16 = vadd.f32 %v2384_v63, %v306_v6  ;;  %v309_v17 = vmul.f32 %v2366_v48, %v163_v7  ;;  %v67_v5 = vld [vmem:[%s2920_s0 + $0x178] sm:$0xff] }
  0x90   :  { %1454 = vmatprep.mubr.bf16.mxu1 %v909_v10  ;;  %v313_v18 = vmul.f32 %v2366_v48, %v167_v13  ;;  %v165_v19 = vunpack.c.h.bf16 %v61_v8  ;;  %v169_v20 = vunpack.c.h.bf16 %v63_v9  ;;  %v162_v21 = vunpack.c.l.bf16 %v60_v57  ;;  %v2705_v57 = vld [vmem:[%s2920_s0 + $0x168] sm:$0xff] }
  0x91   :  { %1295 = vmatmul.mubr.bf16.gmra.mxu0 %v906_v14  ;;  %vm572_vm14 = vcmp.ge.f32.partialorder %v448_v15, 0.0  ;;  %vm576_vm15 = vcmp.ge.f32.partialorder %v452_v16, 0.0  ;;  %v696_v22 = vmul.f32 0.2, %v448_v15  ;;  %v700_v23 = vmul.f32 0.2, %v452_v16 }
  0x92   :  { %v455_v24 = vadd.f32 %v2368_v49, %v309_v17  ;;  %v459_v25 = vadd.f32 %v2368_v49, %v313_v18  ;;  %v311_v26 = vmul.f32 %v2370_v54, %v165_v19  ;;  %v315_v27 = vmul.f32 %v2370_v54, %v169_v20 }
  0x93   :  { %v820_v28 = vsel %vm572_vm14, %v448_v15, %v696_v22  ;;  %v824_v29 = vsel %vm576_vm15, %v452_v16, %v700_v23  ;;  %v166_v30 = vunpack.c.l.bf16 %v62_v1  ;;  %v308_v31 = vmul.f32 %v2376_v58, %v162_v21 }
  0x94   :  { %v908_v32 = vpack.c.bf16 %v824_v29, %v820_v28  ;;  %vm579_vm0 = vcmp.ge.f32.partialorder %v455_v24, 0.0  ;;  %vm583_vm1 = vcmp.ge.f32.partialorder %v459_v25, 0.0  ;;  %v703_v33 = vmul.f32 0.2, %v455_v24 }
  0x95   :  { %v707_v34 = vmul.f32 0.2, %v459_v25  ;;  %v457_v35 = vadd.f32 %v2372_v55, %v311_v26  ;;  %v461_v36 = vadd.f32 %v2372_v55, %v315_v27  ;;  %v312_v37 = vmul.f32 %v2376_v58, %v166_v30 }
  0x96   :  { %1455 = vmatmul.mubr.bf16.gmra.mxu1 %v908_v32  ;;  %v827_v38 = vsel %vm579_vm0, %v455_v24, %v703_v33  ;;  %v454_v39 = vadd.f32 %v2378_v59, %v308_v31  ;;  %v164_v40 = vunpack.c.l.bf16 %v61_v8  ;;  %v168_v41 = vunpack.c.l.bf16 %v63_v9 }
  0x97   :  { %v831_v42 = vsel %vm583_vm1, %v459_v25, %v707_v34  ;;  %vm581_vm2 = vcmp.ge.f32.partialorder %v457_v35, 0.0  ;;  %vm585_vm3 = vcmp.ge.f32.partialorder %v461_v36, 0.0  ;;  %v705_v43 = vmul.f32 0.2, %v457_v35 }
  0x98   :  { %v911_v45 = vpack.c.bf16 %v831_v42, %v827_v38  ;;  %v709_v46 = vmul.f32 0.2, %v461_v36  ;;  %v458_v47 = vadd.f32 %v2378_v59, %v312_v37  ;;  %vm578_vm4 = vcmp.ge.f32.partialorder %v454_v39, 0.0  ;;  %v68_v37 = vld [vmem:[%s2920_s0 + $0x180] sm:$0xff] }
  0x99   :  { %v829_v50 = vsel %vm581_vm2, %v457_v35, %v705_v43  ;;  %v702_v51 = vmul.f32 0.2, %v454_v39  ;;  %v310_v52 = vmul.f32 %v2382_v62, %v164_v40  ;;  %v314_v53 = vmul.f32 %v2382_v62, %v168_v41  ;;  %v70_v41 = vld [vmem:[%s2920_s0 + $0x190] sm:$0xff] }
  0x9a   :  { %1302 = vmatprep.mubr.bf16.mxu0 %v911_v45  ;;  %v833_v60 = vsel %vm585_vm3, %v461_v36, %v709_v46  ;;  %vm582_vm5 = vcmp.ge.f32.partialorder %v458_v47, 0.0  ;;  %v706_v61 = vmul.f32 0.2, %v458_v47  ;;  %v171_v0 = vunpack.c.h.bf16 %v64_v44 }
  0x9b   :  { %v913_v1 = vpack.c.bf16 %v833_v60, %v829_v50  ;;  %v826_v2 = vsel %vm578_vm4, %v454_v39, %v702_v51  ;;  %v456_v3 = vadd.f32 %v2384_v63, %v310_v52  ;;  %v460_v4 = vadd.f32 %v2384_v63, %v314_v53  ;;  %v69_v50 = vld [vmem:[%s2920_s0 + $0x188] sm:$0xff]  ;;  %v71_v51 = vld [vmem:[%s2920_s0 + $0x198] sm:$0xff] }
  0x9c   :  { %v830_v6 = vsel %vm582_vm5, %v458_v47, %v706_v61  ;;  %v175_v7 = vunpack.c.h.bf16 %v66_v56  ;;  %v317_v8 = vmul.f32 %v2366_v48, %v171_v0  ;;  %v173_v9 = vunpack.c.h.bf16 %v2705_v57 }
  0x9d   :  { %1462 = vmatprep.mubr.bf16.mxu1 %v913_v1  ;;  %v910_v10 = vpack.c.bf16 %v830_v6, %v826_v2  ;;  %vm580_vm6 = vcmp.ge.f32.partialorder %v456_v3, 0.0  ;;  %vm584_vm7 = vcmp.ge.f32.partialorder %v460_v4, 0.0  ;;  %v704_v11 = vmul.f32 0.2, %v456_v3 }
  0x9e   :  { %v708_v12 = vmul.f32 0.2, %v460_v4  ;;  %v321_v13 = vmul.f32 %v2366_v48, %v175_v7  ;;  %v463_v14 = vadd.f32 %v2368_v49, %v317_v8  ;;  %v177_v15 = vunpack.c.h.bf16 %v67_v5 }
  0x9f   :  { %1303 = vmatmul.mubr.bf16.gmra.mxu0 %v910_v10  ;;  %v828_v16 = vsel %vm580_vm6, %v456_v3, %v704_v11  ;;  %v319_v17 = vmul.f32 %v2370_v54, %v173_v9  ;;  %v170_v18 = vunpack.c.l.bf16 %v64_v44  ;;  %v174_v19 = vunpack.c.l.bf16 %v66_v56 }
  0xa0   :  { %v832_v20 = vsel %vm584_vm7, %v460_v4, %v708_v12  ;;  %v467_v21 = vadd.f32 %v2368_v49, %v321_v13  ;;  %vm587_vm8 = vcmp.ge.f32.partialorder %v463_v14, 0.0  ;;  %v711_v22 = vmul.f32 0.2, %v463_v14 }
  0xa1   :  { %v912_v23 = vpack.c.bf16 %v832_v20, %v828_v16  ;;  %v323_v24 = vmul.f32 %v2370_v54, %v177_v15  ;;  %v465_v25 = vadd.f32 %v2372_v55, %v319_v17  ;;  %v316_v26 = vmul.f32 %v2376_v58, %v170_v18 }
  0xa2   :  { %vm591_vm9 = vcmp.ge.f32.partialorder %v467_v21, 0.0  ;;  %v715_v27 = vmul.f32 0.2, %v467_v21  ;;  %v835_v28 = vsel %vm587_vm8, %v463_v14, %v711_v22  ;;  %v320_v29 = vmul.f32 %v2376_v58, %v174_v19 }
  0xa3   :  { %1463 = vmatmul.mubr.bf16.gmra.mxu1 %v912_v23  ;;  %v469_v30 = vadd.f32 %v2372_v55, %v323_v24  ;;  %vm589_vm10 = vcmp.ge.f32.partialorder %v465_v25, 0.0  ;;  %v713_v31 = vmul.f32 0.2, %v465_v25  ;;  %v462_v32 = vadd.f32 %v2378_v59, %v316_v26 }
  0xa4   :  { %v839_v33 = vsel %vm591_vm9, %v467_v21, %v715_v27  ;;  %v466_v34 = vadd.f32 %v2378_v59, %v320_v29  ;;  %v172_v35 = vunpack.c.l.bf16 %v2705_v57  ;;  %v176_v36 = vunpack.c.l.bf16 %v67_v5 }
  0xa5   :  { %v915_v38 = vpack.c.bf16 %v839_v33, %v835_v28  ;;  %vm593_vm11 = vcmp.ge.f32.partialorder %v469_v30, 0.0  ;;  %v717_v39 = vmul.f32 0.2, %v469_v30  ;;  %v837_v40 = vsel %vm589_vm10, %v465_v25, %v713_v31  ;;  %v72_v28 = vld [vmem:[%s2920_s0 + $0x1a0] sm:$0xff] }
  0xa6   :  { %vm586_vm12 = vcmp.ge.f32.partialorder %v462_v32, 0.0  ;;  %vm590_vm13 = vcmp.ge.f32.partialorder %v466_v34, 0.0  ;;  %v710_v42 = vmul.f32 0.2, %v462_v32  ;;  %v714_v43 = vmul.f32 0.2, %v466_v34 }
  0xa7   :  { %1310 = vmatprep.mubr.bf16.mxu0 %v915_v38  ;;  %v841_v44 = vsel %vm593_vm11, %v469_v30, %v717_v39  ;;  %v318_v45 = vmul.f32 %v2382_v62, %v172_v35  ;;  %v322_v46 = vmul.f32 %v2382_v62, %v176_v36  ;;  %v179_v47 = vunpack.c.h.bf16 %v68_v37  ;;  %v74_v36 = vld [vmem:[%s2920_s0 + $0x1b0] sm:$0xff] }
  0xa8   :  { %v917_v52 = vpack.c.bf16 %v841_v44, %v837_v40  ;;  %v834_v53 = vsel %vm586_vm12, %v462_v32, %v710_v42  ;;  %v838_v56 = vsel %vm590_vm13, %v466_v34, %v714_v43  ;;  %v183_v57 = vunpack.c.h.bf16 %v70_v41 }
  0xa9   :  { %v914_v60 = vpack.c.bf16 %v838_v56, %v834_v53  ;;  %v464_v61 = vadd.f32 %v2384_v63, %v318_v45  ;;  %v468_v0 = vadd.f32 %v2384_v63, %v322_v46  ;;  %v325_v1 = vmul.f32 %v2366_v48, %v179_v47  ;;  %v75_v45 = vld [vmem:[%s2920_s0 + $0x1b8] sm:$0xff] }
  0xaa   :  { %1470 = vmatprep.mubr.bf16.mxu1 %v917_v52  ;;  %v329_v2 = vmul.f32 %v2366_v48, %v183_v57  ;;  %v181_v3 = vunpack.c.h.bf16 %v69_v50  ;;  %v185_v4 = vunpack.c.h.bf16 %v71_v51  ;;  %v178_v5 = vunpack.c.l.bf16 %v68_v37  ;;  %v2765_v37 = vld [vmem:[%s2920_s0 + $0x1a8] sm:$0xff] }
  0xab   :  { %1311 = vmatmul.mubr.bf16.gmra.mxu0 %v914_v60  ;;  %vm588_vm14 = vcmp.ge.f32.partialorder %v464_v61, 0.0  ;;  %vm592_vm15 = vcmp.ge.f32.partialorder %v468_v0, 0.0  ;;  %v712_v6 = vmul.f32 0.2, %v464_v61  ;;  %v716_v7 = vmul.f32 0.2, %v468_v0 }
  0xac   :  { %v471_v8 = vadd.f32 %v2368_v49, %v325_v1  ;;  %v475_v9 = vadd.f32 %v2368_v49, %v329_v2  ;;  %v327_v10 = vmul.f32 %v2370_v54, %v181_v3  ;;  %v331_v11 = vmul.f32 %v2370_v54, %v185_v4 }
  0xad   :  { %v836_v12 = vsel %vm588_vm14, %v464_v61, %v712_v6  ;;  %v840_v13 = vsel %vm592_vm15, %v468_v0, %v716_v7  ;;  %v182_v14 = vunpack.c.l.bf16 %v70_v41  ;;  %v324_v15 = vmul.f32 %v2376_v58, %v178_v5 }
  0xae   :  { %v916_v16 = vpack.c.bf16 %v840_v13, %v836_v12  ;;  %vm595_vm0 = vcmp.ge.f32.partialorder %v471_v8, 0.0  ;;  %vm599_vm1 = vcmp.ge.f32.partialorder %v475_v9, 0.0  ;;  %v719_v17 = vmul.f32 0.2, %v471_v8 }
  0xaf   :  { %v723_v18 = vmul.f32 0.2, %v475_v9  ;;  %v473_v19 = vadd.f32 %v2372_v55, %v327_v10  ;;  %v477_v20 = vadd.f32 %v2372_v55, %v331_v11  ;;  %v328_v21 = vmul.f32 %v2376_v58, %v182_v14 }
  0xb0   :  { %1471 = vmatmul.mubr.bf16.gmra.mxu1 %v916_v16  ;;  %v843_v22 = vsel %vm595_vm0, %v471_v8, %v719_v17  ;;  %v470_v23 = vadd.f32 %v2378_v59, %v324_v15  ;;  %v180_v24 = vunpack.c.l.bf16 %v69_v50  ;;  %v184_v25 = vunpack.c.l.bf16 %v71_v51 }
  0xb1   :  { %v847_v26 = vsel %vm599_vm1, %v475_v9, %v723_v18  ;;  %vm597_vm2 = vcmp.ge.f32.partialorder %v473_v19, 0.0  ;;  %vm601_vm3 = vcmp.ge.f32.partialorder %v477_v20, 0.0  ;;  %v721_v27 = vmul.f32 0.2, %v473_v19 }
  0xb2   :  { %v919_v29 = vpack.c.bf16 %v847_v26, %v843_v22  ;;  %v725_v30 = vmul.f32 0.2, %v477_v20  ;;  %v474_v31 = vadd.f32 %v2378_v59, %v328_v21  ;;  %vm594_vm4 = vcmp.ge.f32.partialorder %v470_v23, 0.0  ;;  %v76_v21 = vld [vmem:[%s2920_s0 + $0x1c0] sm:$0xff] }
  0xb3   :  { %v845_v32 = vsel %vm597_vm2, %v473_v19, %v721_v27  ;;  %v718_v33 = vmul.f32 0.2, %v470_v23  ;;  %v326_v34 = vmul.f32 %v2382_v62, %v180_v24  ;;  %v330_v35 = vmul.f32 %v2382_v62, %v184_v25  ;;  %v78_v25 = vld [vmem:[%s2920_s0 + $0x1d0] sm:$0xff] }
  0xb4   :  { %1318 = vmatprep.mubr.bf16.mxu0 %v919_v29  ;;  %v849_v38 = vsel %vm601_vm3, %v477_v20, %v725_v30  ;;  %vm598_vm5 = vcmp.ge.f32.partialorder %v474_v31, 0.0  ;;  %v722_v39 = vmul.f32 0.2, %v474_v31  ;;  %v187_v40 = vunpack.c.h.bf16 %v72_v28 }
  0xb5   :  { %v921_v41 = vpack.c.bf16 %v849_v38, %v845_v32  ;;  %v842_v42 = vsel %vm594_vm4, %v470_v23, %v718_v33  ;;  %v472_v43 = vadd.f32 %v2384_v63, %v326_v34  ;;  %v476_v44 = vadd.f32 %v2384_v63, %v330_v35  ;;  %v77_v32 = vld [vmem:[%s2920_s0 + $0x1c8] sm:$0xff]  ;;  %v79_v33 = vld [vmem:[%s2920_s0 + $0x1d8] sm:$0xff] }
  0xb6   :  { %v846_v46 = vsel %vm598_vm5, %v474_v31, %v722_v39  ;;  %v191_v47 = vunpack.c.h.bf16 %v74_v36  ;;  %v333_v50 = vmul.f32 %v2366_v48, %v187_v40  ;;  %v189_v51 = vunpack.c.h.bf16 %v2765_v37 }
  0xb7   :  { %1478 = vmatprep.mubr.bf16.mxu1 %v921_v41  ;;  %v918_v52 = vpack.c.bf16 %v846_v46, %v842_v42  ;;  %vm596_vm6 = vcmp.ge.f32.partialorder %v472_v43, 0.0  ;;  %vm600_vm7 = vcmp.ge.f32.partialorder %v476_v44, 0.0  ;;  %v720_v53 = vmul.f32 0.2, %v472_v43 }
  0xb8   :  { %v724_v56 = vmul.f32 0.2, %v476_v44  ;;  %v337_v57 = vmul.f32 %v2366_v48, %v191_v47  ;;  %v479_v60 = vadd.f32 %v2368_v49, %v333_v50  ;;  %v193_v61 = vunpack.c.h.bf16 %v75_v45 }
  0xb9   :  { %1319 = vmatmul.mubr.bf16.gmra.mxu0 %v918_v52  ;;  %v844_v0 = vsel %vm596_vm6, %v472_v43, %v720_v53  ;;  %v335_v1 = vmul.f32 %v2370_v54, %v189_v51  ;;  %v186_v2 = vunpack.c.l.bf16 %v72_v28  ;;  %v190_v3 = vunpack.c.l.bf16 %v74_v36 }
  0xba   :  { %v848_v4 = vsel %vm600_vm7, %v476_v44, %v724_v56  ;;  %v483_v5 = vadd.f32 %v2368_v49, %v337_v57  ;;  %vm603_vm8 = vcmp.ge.f32.partialorder %v479_v60, 0.0  ;;  %v727_v6 = vmul.f32 0.2, %v479_v60 }
  0xbb   :  { %v920_v7 = vpack.c.bf16 %v848_v4, %v844_v0  ;;  %v339_v8 = vmul.f32 %v2370_v54, %v193_v61  ;;  %v481_v9 = vadd.f32 %v2372_v55, %v335_v1  ;;  %v332_v10 = vmul.f32 %v2376_v58, %v186_v2 }
  0xbc   :  { %vm607_vm9 = vcmp.ge.f32.partialorder %v483_v5, 0.0  ;;  %v731_v11 = vmul.f32 0.2, %v483_v5  ;;  %v851_v12 = vsel %vm603_vm8, %v479_v60, %v727_v6  ;;  %v336_v13 = vmul.f32 %v2376_v58, %v190_v3 }
  0xbd   :  { %1479 = vmatmul.mubr.bf16.gmra.mxu1 %v920_v7  ;;  %v485_v14 = vadd.f32 %v2372_v55, %v339_v8  ;;  %vm605_vm10 = vcmp.ge.f32.partialorder %v481_v9, 0.0  ;;  %v729_v15 = vmul.f32 0.2, %v481_v9  ;;  %v478_v16 = vadd.f32 %v2378_v59, %v332_v10 }
  0xbe   :  { %v855_v17 = vsel %vm607_vm9, %v483_v5, %v731_v11  ;;  %v482_v18 = vadd.f32 %v2378_v59, %v336_v13  ;;  %v188_v19 = vunpack.c.l.bf16 %v2765_v37  ;;  %v192_v20 = vunpack.c.l.bf16 %v75_v45 }
  0xbf   :  { %v923_v22 = vpack.c.bf16 %v855_v17, %v851_v12  ;;  %vm609_vm11 = vcmp.ge.f32.partialorder %v485_v14, 0.0  ;;  %v733_v23 = vmul.f32 0.2, %v485_v14  ;;  %v853_v24 = vsel %vm605_vm10, %v481_v9, %v729_v15  ;;  %v80_v12 = vld [vmem:[%s2920_s0 + $0x1e0] sm:$0x11] }
  0xc0   :  { %vm602_vm12 = vcmp.ge.f32.partialorder %v478_v16, 0.0  ;;  %vm606_vm13 = vcmp.ge.f32.partialorder %v482_v18, 0.0  ;;  %v726_v26 = vmul.f32 0.2, %v478_v16  ;;  %v730_v27 = vmul.f32 0.2, %v482_v18 }
  0xc1   :  { %1326 = vmatprep.mubr.bf16.mxu0 %v923_v22  ;;  %v857_v28 = vsel %vm609_vm11, %v485_v14, %v733_v23  ;;  %v334_v29 = vmul.f32 %v2382_v62, %v188_v19  ;;  %v338_v30 = vmul.f32 %v2382_v62, %v192_v20  ;;  %v195_v31 = vunpack.c.h.bf16 %v76_v21  ;;  %v81_v20 = vld [vmem:[%s2920_s0 + $0x1e8] sm:$0x11] }
  0xc2   :  { %v925_v34 = vpack.c.bf16 %v857_v28, %v853_v24  ;;  %v850_v35 = vsel %vm602_vm12, %v478_v16, %v726_v26  ;;  %v854_v36 = vsel %vm606_vm13, %v482_v18, %v730_v27  ;;  %v199_v37 = vunpack.c.h.bf16 %v78_v25 }
  0xc3   :  { %v922_v38 = vpack.c.bf16 %v854_v36, %v850_v35  ;;  %v480_v39 = vadd.f32 %v2384_v63, %v334_v29  ;;  %v484_v40 = vadd.f32 %v2384_v63, %v338_v30  ;;  %v341_v41 = vmul.f32 %v2366_v48, %v195_v31 }
  0xc4   :  { %1486 = vmatprep.mubr.bf16.mxu1 %v925_v34  ;;  %v345_v42 = vmul.f32 %v2366_v48, %v199_v37  ;;  %v197_v43 = vunpack.c.h.bf16 %v77_v32  ;;  %v201_v44 = vunpack.c.h.bf16 %v79_v33  ;;  %v194_v45 = vunpack.c.l.bf16 %v76_v21 }
  0xc5   :  { %1327 = vmatmul.mubr.bf16.gmra.mxu0 %v922_v38  ;;  %vm604_vm14 = vcmp.ge.f32.partialorder %v480_v39, 0.0  ;;  %vm608_vm15 = vcmp.ge.f32.partialorder %v484_v40, 0.0  ;;  %v728_v46 = vmul.f32 0.2, %v480_v39  ;;  %v732_v47 = vmul.f32 0.2, %v484_v40 }
  0xc6   :  { %v487_v50 = vadd.f32 %v2368_v49, %v341_v41  ;;  %v491_v51 = vadd.f32 %v2368_v49, %v345_v42  ;;  %v343_v52 = vmul.f32 %v2370_v54, %v197_v43  ;;  %v347_v53 = vmul.f32 %v2370_v54, %v201_v44 }
  0xc7   :  { %v852_v56 = vsel %vm604_vm14, %v480_v39, %v728_v46  ;;  %v856_v57 = vsel %vm608_vm15, %v484_v40, %v732_v47  ;;  %v198_v60 = vunpack.c.l.bf16 %v78_v25  ;;  %v340_v61 = vmul.f32 %v2376_v58, %v194_v45 }
  0xc8   :  { %v924_v0 = vpack.c.bf16 %v856_v57, %v852_v56  ;;  %vm611_vm0 = vcmp.ge.f32.partialorder %v487_v50, 0.0  ;;  %vm615_vm1 = vcmp.ge.f32.partialorder %v491_v51, 0.0  ;;  %v735_v1 = vmul.f32 0.2, %v487_v50 }
  0xc9   :  { %v739_v2 = vmul.f32 0.2, %v491_v51  ;;  %v489_v3 = vadd.f32 %v2372_v55, %v343_v52  ;;  %v493_v4 = vadd.f32 %v2372_v55, %v347_v53  ;;  %v344_v5 = vmul.f32 %v2376_v58, %v198_v60 }
  0xca   :  { %1487 = vmatmul.mubr.bf16.gmra.mxu1 %v924_v0  ;;  %v859_v6 = vsel %vm611_vm0, %v487_v50, %v735_v1  ;;  %v486_v7 = vadd.f32 %v2378_v59, %v340_v61  ;;  %v196_v8 = vunpack.c.l.bf16 %v77_v32  ;;  %v200_v9 = vunpack.c.l.bf16 %v79_v33 }
  0xcb   :  { %v863_v10 = vsel %vm615_vm1, %v491_v51, %v739_v2  ;;  %vm613_vm2 = vcmp.ge.f32.partialorder %v489_v3, 0.0  ;;  %vm617_vm3 = vcmp.ge.f32.partialorder %v493_v4, 0.0  ;;  %v737_v11 = vmul.f32 0.2, %v489_v3 }
  0xcc   :  { %v927_v13 = vpack.c.bf16 %v863_v10, %v859_v6  ;;  %v741_v14 = vmul.f32 0.2, %v493_v4  ;;  %v490_v15 = vadd.f32 %v2378_v59, %v344_v5  ;;  %vm610_vm4 = vcmp.ge.f32.partialorder %v486_v7, 0.0 }
  0xcd   :  { %v861_v16 = vsel %vm613_vm2, %v489_v3, %v737_v11  ;;  %v734_v17 = vmul.f32 0.2, %v486_v7  ;;  %v342_v18 = vmul.f32 %v2382_v62, %v196_v8  ;;  %v346_v19 = vmul.f32 %v2382_v62, %v200_v9 }
  0xce   :  { %1334 = vmatprep.mubr.bf16.mxu0 %v927_v13  ;;  %v865_v21 = vsel %vm617_vm3, %v493_v4, %v741_v14  ;;  %vm614_vm5 = vcmp.ge.f32.partialorder %v490_v15, 0.0  ;;  %v738_v22 = vmul.f32 0.2, %v490_v15  ;;  %v203_v23 = vunpack.c.h.bf16 %v80_v12 }
  0xcf   :  { %v929_v24 = vpack.c.bf16 %v865_v21, %v861_v16  ;;  %v858_v25 = vsel %vm610_vm4, %v486_v7, %v734_v17  ;;  %v488_v26 = vadd.f32 %v2384_v63, %v342_v18  ;;  %v492_v27 = vadd.f32 %v2384_v63, %v346_v19 }
  0xd0   :  { %v862_v28 = vsel %vm614_vm5, %v490_v15, %v738_v22  ;;  %v349_v29 = vmul.f32 %v2366_v48, %v203_v23  ;;  %v205_v30 = vunpack.c.h.bf16 %v81_v20  ;;  %v202_v31 = vunpack.c.l.bf16 %v80_v12 }
  0xd1   :  { %1494 = vmatprep.mubr.bf16.mxu1 %v929_v24  ;;  %v926_v32 = vpack.c.bf16 %v862_v28, %v858_v25  ;;  %vm612_vm6 = vcmp.ge.f32.partialorder %v488_v26, 0.0  ;;  %vm616_vm7 = vcmp.ge.f32.partialorder %v492_v27, 0.0  ;;  %v736_v33 = vmul.f32 0.2, %v488_v26 }
  0xd2   :  { %v740_v34 = vmul.f32 0.2, %v492_v27  ;;  %v495_v35 = vadd.f32 %v2368_v49, %v349_v29  ;;  %v351_v36 = vmul.f32 %v2370_v54, %v205_v30  ;;  %v348_v37 = vmul.f32 %v2376_v58, %v202_v31 }
  0xd3   :  { %1335 = vmatmul.mubr.bf16.gmra.mxu0 %v926_v32  ;;  %v860_v38 = vsel %vm612_vm6, %v488_v26, %v736_v33  ;;  %v204_v39 = vunpack.c.l.bf16 %v81_v20  ;;  %vm1539_vm12 = vcmask 1041408   ;;  %vm1616_vm13 = vcmask 1040384  }
  0xd4   :  { %v864_v40 = vsel %vm616_vm7, %v492_v27, %v740_v34  ;;  %vm619_vm8 = vcmp.ge.f32.partialorder %v495_v35, 0.0  ;;  %v743_v48 = vmul.f32 0.2, %v495_v35  ;;  %v497_v41 = vadd.f32 %v2372_v55, %v351_v36 }
  0xd5   :  { %v928_v42 = vpack.c.bf16 %v864_v40, %v860_v38  ;;  %v494_v43 = vadd.f32 %v2378_v59, %v348_v37  ;;  %v350_v44 = vmul.f32 %v2382_v62, %v204_v39 }
  0xd6   :  { %v867_v45 = vsel %vm619_vm8, %v495_v35, %v743_v48  ;;  %vm621_vm9 = vcmp.ge.f32.partialorder %v497_v41, 0.0  ;;  %v745_v49 = vmul.f32 0.2, %v497_v41 }
  0xd7   :  { %1495 = vmatmul.mubr.bf16.gmra.mxu1 %v928_v42  ;;  %v931_v54 = vpack.c.bf16 %v867_v45, %v867_v45  ;;  %vm618_vm10 = vcmp.ge.f32.partialorder %v494_v43, 0.0  ;;  %v742_v58 = vmul.f32 0.2, %v494_v43  ;;  %v496_v46 = vadd.f32 %v2384_v63, %v350_v44 }
  0xd8   :  { %v869_v47 = vsel %vm621_vm9, %v497_v41, %v745_v49 }
  0xd9   :  { %1342 = vmatprep.mubr.bf16.mxu0 %v931_v54  ;;  %v933_v50 = vpack.c.bf16 %v869_v47, %v869_v47  ;;  %v866_v51 = vsel %vm618_vm10, %v494_v43, %v742_v58  ;;  %vm620_vm11 = vcmp.ge.f32.partialorder %v496_v46, 0.0  ;;  %v744_v55 = vmul.f32 0.2, %v496_v46 }
  0xda   :  { %v930_v52 = vpack.c.bf16 %v866_v51, %v866_v51 }
  0xdb   :  { %1502 = vmatprep.mubr.bf16.mxu1 %v933_v50  ;;  %v868_v59 = vsel %vm620_vm11, %v496_v46, %v744_v55 }
  0xdc   :  { %1343 = vmatmul.mubr.bf16.gmra.mxu0 %v930_v52  ;;  %v932_v62 = vpack.c.bf16 %v868_v59, %v868_v59 }
  0xdf   :  { %1503 = vmatmul.mubr.bf16.gmra.mxu1 %v932_v62 }
  0xe3   :  { %v1982_v53 = vpop.f32.mrf.mxu0 }
  0xe5   :  { %v1983_v57 = vpop.f32.mrf.mxu0 }
  0xe6   :  { %v2094_v56 = vpop.f32.mrf.mxu1  ;;  %v1984_v0 = vadd.f32 %v1983_v57, %v1982_v53 }
  0xe7   :  { %v1985_v61 = vpop.f32.mrf.mxu0 }
  0xe8   :  { %v2095_v60 = vpop.f32.mrf.mxu1 }
  0xe9   :  { %v2096_v1 = vadd.f32 %v2095_v60, %v2094_v56  ;;  %v1986_v2 = vpop.f32.mrf.mxu0 }
  0xea   :  { %v2097_v63 = vpop.f32.mrf.mxu1  ;;  %v1987_v3 = vadd.f32 %v1986_v2, %v1985_v61 }
  0xeb   :  { %v1385_v5 = vadd.f32 %v2096_v1, %v1984_v0  ;;  %v1988_v8 = vpop.f32.mrf.mxu0 }
  0xec   :  { %v2098_v4 = vpop.f32.mrf.mxu1 }
  0xed   :  { %v2099_v6 = vadd.f32 %v2098_v4, %v2097_v63  ;;  %v1548_v9 = vmul.f32 %v1385_v5, %v1385_v5  ;;  %v1989_v13 = vpop.f32.mrf.mxu0 }
  0xee   :  { %v2100_v16 = vpop.f32.mrf.mxu1  ;;  %v1990_v17 = vadd.f32 %v1989_v13, %v1988_v8 }
  0xef   :  { %v1388_v7 = vadd.f32 %v2099_v6, %v1987_v3  ;;  %v1991_v15 = vpop.f32.mrf.mxu0 }
  0xf0   :  { %v2101_v18 = vpop.f32.mrf.mxu1 }
  0xf1   :  { %v1510_v10 = vadd.f32 %v1388_v7, %v1385_v5  ;;  %v1549_v11 = vmul.f32 %v1388_v7, %v1388_v7  ;;  %v1880_v12 = vpack.c.bf16 %v1388_v7, %v1385_v5  ;;  %v1992_v19 = vpop.f32.mrf.mxu0  ;;  %v2102_v20 = vadd.f32 %v2101_v18, %v2100_v16 }
  0xf2   :  { %v2103_v21 = vpop.f32.mrf.mxu1  ;;  %v1993_v23 = vadd.f32 %v1992_v19, %v1991_v15 }
  0xf3   :  { %v1579_v14 = vadd.f32 %v1549_v11, %v1548_v9  ;;  %1881 = vst [vmem:[%s2923_s4] sm:$0xff] %v1880_v12   ;;  %v1393_v22 = vadd.f32 %v2102_v20, %v1990_v17 }
  0xf4   :  { %v2104_v24 = vpop.f32.mrf.mxu1 }
  0xf5   :  { %v1511_v25 = vadd.f32 %v1510_v10, %v1393_v22  ;;  %v1550_v26 = vmul.f32 %v1393_v22, %v1393_v22  ;;  %v2105_v27 = vadd.f32 %v2104_v24, %v2103_v21 }
  0xf7   :  { %v1580_v28 = vadd.f32 %v1579_v14, %v1550_v26  ;;  %v1396_v29 = vadd.f32 %v2105_v27, %v1993_v23  ;;  %v1994_v30 = vpop.f32.mrf.mxu0 }
  0xf9   :  { %v1512_v31 = vadd.f32 %v1511_v25, %v1396_v29  ;;  %v1551_v32 = vmul.f32 %v1396_v29, %v1396_v29  ;;  %v1885_v33 = vpack.c.bf16 %v1396_v29, %v1393_v22  ;;  %v1995_v34 = vpop.f32.mrf.mxu0 }
  0xfa   :  { %v1996_v38 = vadd.f32 %v1995_v34, %v1994_v30 }
  0xfb   :  { %v1581_v35 = vadd.f32 %v1580_v28, %v1551_v32  ;;  %1952 = vst [vmem:[%s2923_s4 + $0x8] sm:$0xff] %v1885_v33   ;;  %v2106_v36 = vpop.f32.mrf.mxu1  ;;  %v1997_v37 = vpop.f32.mrf.mxu0 }
  0xfd   :  { %v2107_v39 = vpop.f32.mrf.mxu1  ;;  %v1998_v40 = vpop.f32.mrf.mxu0 }
  0xfe   :  { %v2108_v48 = vadd.f32 %v2107_v39, %v2106_v36  ;;  %v1999_v43 = vadd.f32 %v1998_v40, %v1997_v37 }
  0xff   :  { %v2109_v41 = vpop.f32.mrf.mxu1 }
 0x100   :  { %v1401_v42 = vadd.f32 %v2108_v48, %v1996_v38 }
 0x101   :  { %v2110_v44 = vpop.f32.mrf.mxu1 }
 0x102   :  { %v1513_v45 = vadd.f32 %v1512_v31, %v1401_v42  ;;  %v1552_v49 = vmul.f32 %v1401_v42, %v1401_v42  ;;  %v2111_v54 = vadd.f32 %v2110_v44, %v2109_v41 }
 0x103   :  { %v2000_v58 = vpop.f32.mrf.mxu0 }
 0x104   :  { %v1582_v46 = vadd.f32 %v1581_v35, %v1552_v49  ;;  %v1404_v47 = vadd.f32 %v2111_v54, %v1999_v43 }
 0x105   :  { %v2001_v50 = vpop.f32.mrf.mxu0 }
 0x106   :  { %v1514_v51 = vadd.f32 %v1513_v45, %v1404_v47  ;;  %v1553_v55 = vmul.f32 %v1404_v47, %v1404_v47  ;;  %v1890_v52 = vpack.c.bf16 %v1404_v47, %v1401_v42  ;;  %v2002_v56 = vadd.f32 %v2001_v50, %v2000_v58 }
 0x107   :  { %v2003_v59 = vpop.f32.mrf.mxu0 }
 0x108   :  { %v1583_v62 = vadd.f32 %v1582_v46, %v1553_v55  ;;  %1953 = vst [vmem:[%s2923_s4 + $0x10] sm:$0xff] %v1890_v52   ;;  %v2112_v53 = vpop.f32.mrf.mxu1 }
 0x109   :  { %v2004_v60 = vpop.f32.mrf.mxu0 }
 0x10a   :  { %v2113_v57 = vpop.f32.mrf.mxu1  ;;  %v2005_v63 = vadd.f32 %v2004_v60, %v2003_v59 }
 0x10b   :  { %v2114_v61 = vadd.f32 %v2113_v57, %v2112_v53 }
 0x10c   :  { %v2115_v0 = vpop.f32.mrf.mxu1 }
 0x10d   :  { %v1409_v1 = vadd.f32 %v2114_v61, %v2002_v56 }
 0x10e   :  { %v2116_v2 = vpop.f32.mrf.mxu1 }
 0x10f   :  { %v1515_v3 = vadd.f32 %v1514_v51, %v1409_v1  ;;  %v1554_v4 = vmul.f32 %v1409_v1, %v1409_v1  ;;  %v2117_v5 = vadd.f32 %v2116_v2, %v2115_v0 }
 0x111   :  { %v1584_v6 = vadd.f32 %v1583_v62, %v1554_v4  ;;  %v1412_v7 = vadd.f32 %v2117_v5, %v2005_v63  ;;  %v2006_v8 = vpop.f32.mrf.mxu0 }
 0x113   :  { %v1516_v9 = vadd.f32 %v1515_v3, %v1412_v7  ;;  %v1555_v10 = vmul.f32 %v1412_v7, %v1412_v7  ;;  %v1895_v11 = vpack.c.bf16 %v1412_v7, %v1409_v1  ;;  %v2007_v12 = vpop.f32.mrf.mxu0 }
 0x114   :  { %v2008_v16 = vadd.f32 %v2007_v12, %v2006_v8 }
 0x115   :  { %v1585_v13 = vadd.f32 %v1584_v6, %v1555_v10  ;;  %1954 = vst [vmem:[%s2923_s4 + $0x18] sm:$0xff] %v1895_v11   ;;  %v2118_v14 = vpop.f32.mrf.mxu1  ;;  %v2009_v15 = vpop.f32.mrf.mxu0 }
 0x117   :  { %v2119_v17 = vpop.f32.mrf.mxu1  ;;  %v2010_v18 = vpop.f32.mrf.mxu0 }
 0x118   :  { %v2120_v19 = vadd.f32 %v2119_v17, %v2118_v14  ;;  %v2011_v22 = vadd.f32 %v2010_v18, %v2009_v15 }
 0x119   :  { %v2121_v20 = vpop.f32.mrf.mxu1 }
 0x11a   :  { %v1417_v21 = vadd.f32 %v2120_v19, %v2008_v16 }
 0x11b   :  { %v2122_v23 = vpop.f32.mrf.mxu1 }
 0x11c   :  { %v1517_v24 = vadd.f32 %v1516_v9, %v1417_v21  ;;  %v1556_v25 = vmul.f32 %v1417_v21, %v1417_v21  ;;  %v2123_v26 = vadd.f32 %v2122_v23, %v2121_v20 }
 0x11d   :  { %v2012_v27 = vpop.f32.mrf.mxu0 }
 0x11e   :  { %v1586_v28 = vadd.f32 %v1585_v13, %v1556_v25  ;;  %v1420_v29 = vadd.f32 %v2123_v26, %v2011_v22 }
 0x11f   :  { %v2013_v30 = vpop.f32.mrf.mxu0 }
 0x120   :  { %v1518_v31 = vadd.f32 %v1517_v24, %v1420_v29  ;;  %v1557_v32 = vmul.f32 %v1420_v29, %v1420_v29  ;;  %v1900_v33 = vpack.c.bf16 %v1420_v29, %v1417_v21  ;;  %v2014_v37 = vadd.f32 %v2013_v30, %v2012_v27 }
 0x121   :  { %v2015_v34 = vpop.f32.mrf.mxu0 }
 0x122   :  { %v1587_v35 = vadd.f32 %v1586_v28, %v1557_v32  ;;  %1955 = vst [vmem:[%s2923_s4 + $0x20] sm:$0xff] %v1900_v33   ;;  %v2124_v36 = vpop.f32.mrf.mxu1 }
 0x123   :  { %v2016_v39 = vpop.f32.mrf.mxu0 }
 0x124   :  { %v2125_v38 = vpop.f32.mrf.mxu1  ;;  %v2017_v42 = vadd.f32 %v2016_v39, %v2015_v34 }
 0x125   :  { %v2126_v40 = vadd.f32 %v2125_v38, %v2124_v36 }
 0x126   :  { %v2127_v48 = vpop.f32.mrf.mxu1 }
 0x127   :  { %v1425_v41 = vadd.f32 %v2126_v40, %v2014_v37 }
 0x128   :  { %v2128_v43 = vpop.f32.mrf.mxu1 }
 0x129   :  { %v1519_v44 = vadd.f32 %v1518_v31, %v1425_v41  ;;  %v1558_v45 = vmul.f32 %v1425_v41, %v1425_v41  ;;  %v2129_v49 = vadd.f32 %v2128_v43, %v2127_v48 }
 0x12b   :  { %v1588_v54 = vadd.f32 %v1587_v35, %v1558_v45  ;;  %v1428_v58 = vadd.f32 %v2129_v49, %v2017_v42  ;;  %v2018_v46 = vpop.f32.mrf.mxu0 }
 0x12d   :  { %v1520_v47 = vadd.f32 %v1519_v44, %v1428_v58  ;;  %v1559_v50 = vmul.f32 %v1428_v58, %v1428_v58  ;;  %v1905_v51 = vpack.c.bf16 %v1428_v58, %v1425_v41  ;;  %v2019_v55 = vpop.f32.mrf.mxu0 }
 0x12e   :  { %v2020_v53 = vadd.f32 %v2019_v55, %v2018_v46 }
 0x12f   :  { %v1589_v52 = vadd.f32 %v1588_v54, %v1559_v50  ;;  %1956 = vst [vmem:[%s2923_s4 + $0x28] sm:$0xff] %v1905_v51   ;;  %v2130_v59 = vpop.f32.mrf.mxu1  ;;  %v2021_v62 = vpop.f32.mrf.mxu0 }
 0x131   :  { %v2131_v56 = vpop.f32.mrf.mxu1  ;;  %v2022_v57 = vpop.f32.mrf.mxu0 }
 0x132   :  { %v2132_v60 = vadd.f32 %v2131_v56, %v2130_v59  ;;  %v2023_v1 = vadd.f32 %v2022_v57, %v2021_v62 }
 0x133   :  { %v2133_v61 = vpop.f32.mrf.mxu1 }
 0x134   :  { %v1433_v0 = vadd.f32 %v2132_v60, %v2020_v53 }
 0x135   :  { %v2134_v63 = vpop.f32.mrf.mxu1 }
 0x136   :  { %v1521_v2 = vadd.f32 %v1520_v47, %v1433_v0  ;;  %v1560_v3 = vmul.f32 %v1433_v0, %v1433_v0  ;;  %v2135_v4 = vadd.f32 %v2134_v63, %v2133_v61 }
 0x137   :  { %v2024_v5 = vpop.f32.mrf.mxu0 }
 0x138   :  { %v1590_v6 = vadd.f32 %v1589_v52, %v1560_v3  ;;  %v1436_v7 = vadd.f32 %v2135_v4, %v2023_v1 }
 0x139   :  { %v2025_v8 = vpop.f32.mrf.mxu0 }
 0x13a   :  { %v1522_v9 = vadd.f32 %v1521_v2, %v1436_v7  ;;  %v1561_v10 = vmul.f32 %v1436_v7, %v1436_v7  ;;  %v1910_v11 = vpack.c.bf16 %v1436_v7, %v1433_v0  ;;  %v2026_v15 = vadd.f32 %v2025_v8, %v2024_v5 }
 0x13b   :  { %v2027_v12 = vpop.f32.mrf.mxu0 }
 0x13c   :  { %v1591_v13 = vadd.f32 %v1590_v6, %v1561_v10  ;;  %1957 = vst [vmem:[%s2923_s4 + $0x30] sm:$0xff] %v1910_v11   ;;  %v2136_v14 = vpop.f32.mrf.mxu1 }
 0x13d   :  { %v2028_v17 = vpop.f32.mrf.mxu0 }
 0x13e   :  { %v2137_v16 = vpop.f32.mrf.mxu1  ;;  %v2029_v21 = vadd.f32 %v2028_v17, %v2027_v12 }
 0x13f   :  { %v2138_v18 = vadd.f32 %v2137_v16, %v2136_v14 }
 0x140   :  { %v2139_v19 = vpop.f32.mrf.mxu1 }
 0x141   :  { %v1441_v20 = vadd.f32 %v2138_v18, %v2026_v15 }
 0x142   :  { %v2140_v22 = vpop.f32.mrf.mxu1 }
 0x143   :  { %v1523_v23 = vadd.f32 %v1522_v9, %v1441_v20  ;;  %v1562_v24 = vmul.f32 %v1441_v20, %v1441_v20  ;;  %v2141_v25 = vadd.f32 %v2140_v22, %v2139_v19 }
 0x145   :  { %v1592_v26 = vadd.f32 %v1591_v13, %v1562_v24  ;;  %v1444_v27 = vadd.f32 %v2141_v25, %v2029_v21  ;;  %v2030_v28 = vpop.f32.mrf.mxu0 }
 0x147   :  { %v2853_v29 = vadd.f32 %v1523_v23, %v1444_v27  ;;  %v1563_v30 = vmul.f32 %v1444_v27, %v1444_v27  ;;  %v1915_v31 = vpack.c.bf16 %v1444_v27, %v1441_v20  ;;  %v2031_v32 = vpop.f32.mrf.mxu0 }
 0x148   :  { %v2032_v39 = vadd.f32 %v2031_v32, %v2030_v28 }
 0x149   :  { %v2855_v33 = vadd.f32 %v1592_v26, %v1563_v30  ;;  %1958 = vst [vmem:[%s2923_s4 + $0x38] sm:$0xff] %v1915_v31   ;;  %v2142_v34 = vpop.f32.mrf.mxu1  ;;  %v2033_v35 = vpop.f32.mrf.mxu0 }
 0x14b   :  { %v2143_v36 = vpop.f32.mrf.mxu1  ;;  %v2034_v37 = vpop.f32.mrf.mxu0 }
 0x14c   :  { %v2144_v40 = vadd.f32 %v2143_v36, %v2142_v34  ;;  %v2035_v48 = vadd.f32 %v2034_v37, %v2033_v35 }
 0x14d   :  { %v2145_v38 = vpop.f32.mrf.mxu1 }
 0x14e   :  { %v2860_v44 = vadd.f32 %v2144_v40, %v2032_v39 }
 0x14f   :  { %v2146_v41 = vpop.f32.mrf.mxu1 }
 0x150   :  { %v2147_v42 = vadd.f32 %v2146_v41, %v2145_v38 }
 0x151   :  { %v2036_v43 = vpop.f32.mrf.mxu0 }
 0x152   :  { %v2862_v45 = vadd.f32 %v2147_v42, %v2035_v48 }
 0x153   :  { %v2037_v49 = vpop.f32.mrf.mxu0 }
 0x154   :  { %v1920_v54 = vpack.c.bf16 %v2862_v45, %v2860_v44  ;;  %v2038_v55 = vadd.f32 %v2037_v49, %v2036_v43 }
 0x155   :  { %v2039_v58 = vpop.f32.mrf.mxu0 }
 0x156   :  { %1959 = vst [vmem:[%s2923_s4 + $0x40] sm:$0xff] %v1920_v54   ;;  %v2148_v46 = vpop.f32.mrf.mxu1  ;;  %v1564_v54 = vmul.f32 %v2860_v44, %v2860_v44 }
 0x157   :  { %v2040_v50 = vpop.f32.mrf.mxu0 }
 0x158   :  { %v2149_v47 = vpop.f32.mrf.mxu1  ;;  %v2041_v59 = vadd.f32 %v2040_v50, %v2039_v58 }
 0x159   :  { %v2150_v52 = vadd.f32 %v2149_v47, %v2148_v46  ;;  %v1565_v47 = vmul.f32 %v2862_v45, %v2862_v45 }
 0x15a   :  { %v2151_v51 = vpop.f32.mrf.mxu1 }
 0x15b   :  { %v2869_v56 = vadd.f32 %v2150_v52, %v2038_v55  ;;  %v1594_v55 = vadd.f32 %v2855_v33, %v1564_v54 }
 0x15c   :  { %v2152_v62 = vpop.f32.mrf.mxu1 }
 0x15d   :  { %v2153_v53 = vadd.f32 %v2152_v62, %v2151_v51  ;;  %v1525_v51 = vadd.f32 %v2853_v29, %v2860_v44  ;;  %v1566_v52 = vmul.f32 %v2869_v56, %v2869_v56 }
 0x15f   :  { %v2871_v57 = vadd.f32 %v2153_v53, %v2041_v59  ;;  %v2042_v60 = vpop.f32.mrf.mxu0  ;;  %v1526_v53 = vadd.f32 %v1525_v51, %v2862_v45 }
 0x161   :  { %v1925_v61 = vpack.c.bf16 %v2871_v57, %v2869_v56  ;;  %v2043_v0 = vpop.f32.mrf.mxu0 }
 0x162   :  { %v2044_v5 = vadd.f32 %v2043_v0, %v2042_v60  ;;  %v1595_v60 = vadd.f32 %v1594_v55, %v1565_v47 }
 0x163   :  { %1960 = vst [vmem:[%s2923_s4 + $0x48] sm:$0xff] %v1925_v61   ;;  %v2154_v1 = vpop.f32.mrf.mxu1  ;;  %v2045_v63 = vpop.f32.mrf.mxu0  ;;  %v1567_v61 = vmul.f32 %v2871_v57, %v2871_v57 }
 0x164   :  { %v1596_v29 = vadd.f32 %v1595_v60, %v1566_v52 }
 0x165   :  { %v2155_v2 = vpop.f32.mrf.mxu1  ;;  %v2046_v3 = vpop.f32.mrf.mxu0 }
 0x166   :  { %v2156_v6 = vadd.f32 %v2155_v2, %v2154_v1  ;;  %v2047_v7 = vadd.f32 %v2046_v3, %v2045_v63  ;;  %v1527_v1 = vadd.f32 %v1526_v53, %v2869_v56 }
 0x167   :  { %v2157_v4 = vpop.f32.mrf.mxu1 }
 0x168   :  { %v1465_v11 = vadd.f32 %v2156_v6, %v2044_v5  ;;  %v1528_v33 = vadd.f32 %v1527_v1, %v2871_v57  ;;  %v1597_v6 = vadd.f32 %v1596_v29, %v1567_v61 }
 0x169   :  { %v2158_v8 = vpop.f32.mrf.mxu1 }
 0x16a   :  { %v2159_v9 = vadd.f32 %v2158_v8, %v2157_v4  ;;  %v1568_v4 = vmul.f32 %v1465_v11, %v1465_v11 }
 0x16b   :  { %v2048_v10 = vpop.f32.mrf.mxu0 }
 0x16c   :  { %v2878_v12 = vadd.f32 %v2159_v9, %v2047_v7  ;;  %v1529_v7 = vadd.f32 %v1528_v33, %v1465_v11 }
 0x16d   :  { %v2049_v13 = vpop.f32.mrf.mxu0 }
 0x16e   :  { %v1930_v14 = vpack.c.bf16 %v2878_v12, %v1465_v11  ;;  %v2050_v20 = vadd.f32 %v2049_v13, %v2048_v10  ;;  %v1569_v45 = vmul.f32 %v2878_v12, %v2878_v12  ;;  %v1598_v13 = vadd.f32 %v1597_v6, %v1568_v4 }
 0x16f   :  { %v2051_v15 = vpop.f32.mrf.mxu0  ;;  %v1530_v56 = vadd.f32 %v1529_v7, %v2878_v12 }
 0x170   :  { %1961 = vst [vmem:[%s2923_s4 + $0x50] sm:$0xff] %v1930_v14   ;;  %v2160_v16 = vpop.f32.mrf.mxu1 }
 0x171   :  { %v2052_v18 = vpop.f32.mrf.mxu0 }
 0x172   :  { %v2161_v17 = vpop.f32.mrf.mxu1  ;;  %v2053_v22 = vadd.f32 %v2052_v18, %v2051_v15 }
 0x173   :  { %v2162_v21 = vadd.f32 %v2161_v17, %v2160_v16  ;;  %v1599_v17 = vadd.f32 %v1598_v13, %v1569_v45 }
 0x174   :  { %v2163_v19 = vpop.f32.mrf.mxu1 }
 0x175   :  { %v1473_v25 = vadd.f32 %v2162_v21, %v2050_v20 }
 0x176   :  { %v2164_v23 = vpop.f32.mrf.mxu1 }
 0x177   :  { %v2165_v24 = vadd.f32 %v2164_v23, %v2163_v19  ;;  %v1570_v14 = vmul.f32 %v1473_v25, %v1473_v25  ;;  %v1531_v18 = vadd.f32 %v1530_v56, %v1473_v25 }
 0x179   :  { %v1476_v26 = vadd.f32 %v2165_v24, %v2053_v22  ;;  %v2054_v27 = vpop.f32.mrf.mxu0  ;;  %v1600_v20 = vadd.f32 %v1599_v17, %v1570_v14 }
 0x17b   :  { %v1935_v28 = vpack.c.bf16 %v1476_v26, %v1473_v25  ;;  %v2055_v30 = vpop.f32.mrf.mxu0  ;;  %v1571_v19 = vmul.f32 %v1476_v26, %v1476_v26  ;;  %v1532_v21 = vadd.f32 %v1531_v18, %v1476_v26 }
 0x17c   :  { %v2056_v37 = vadd.f32 %v2055_v30, %v2054_v27 }
 0x17d   :  { %1962 = vst [vmem:[%s2923_s4 + $0x58] sm:$0xff] %v1935_v28   ;;  %v2166_v31 = vpop.f32.mrf.mxu1  ;;  %v2057_v32 = vpop.f32.mrf.mxu0  ;;  %v1601_v12 = vadd.f32 %v1600_v20, %v1571_v19 }
 0x17f   :  { %v2167_v34 = vpop.f32.mrf.mxu1  ;;  %v2058_v35 = vpop.f32.mrf.mxu0 }
 0x180   :  { %v2168_v38 = vadd.f32 %v2167_v34, %v2166_v31  ;;  %v2059_v39 = vadd.f32 %v2058_v35, %v2057_v32 }
 0x181   :  { %v2169_v36 = vpop.f32.mrf.mxu1 }
 0x182   :  { %v1481_v42 = vadd.f32 %v2168_v38, %v2056_v37 }
 0x183   :  { %v2170_v40 = vpop.f32.mrf.mxu1 }
 0x184   :  { %v2171_v48 = vadd.f32 %v2170_v40, %v2169_v36  ;;  %v1572_v22 = vmul.f32 %v1481_v42, %v1481_v42  ;;  %v1533_v30 = vadd.f32 %v1532_v21, %v1481_v42 }
 0x185   :  { %v2060_v41 = vpop.f32.mrf.mxu0 }
 0x186   :  { %v1484_v43 = vadd.f32 %v2171_v48, %v2059_v39  ;;  %v1602_v35 = vadd.f32 %v1601_v12, %v1572_v22 }
 0x187   :  { %v2061_v49 = vpop.f32.mrf.mxu0 }
 0x188   :  { %v1940_v58 = vpack.c.bf16 %v1484_v43, %v1481_v42  ;;  %v2062_v63 = vadd.f32 %v2061_v49, %v2060_v41  ;;  %v1573_v31 = vmul.f32 %v1484_v43, %v1484_v43  ;;  %v1534_v36 = vadd.f32 %v1533_v30, %v1484_v43 }
 0x189   :  { %v2063_v46 = vpop.f32.mrf.mxu0 }
 0x18a   :  { %1963 = vst [vmem:[%s2923_s4 + $0x60] sm:$0xff] %v1940_v58   ;;  %v2172_v50 = vpop.f32.mrf.mxu1  ;;  %v1603_v41 = vadd.f32 %v1602_v35, %v1573_v31 }
 0x18b   :  { %v2064_v62 = vpop.f32.mrf.mxu0 }
 0x18c   :  { %v2173_v59 = vpop.f32.mrf.mxu1  ;;  %v2065_v3 = vadd.f32 %v2064_v62, %v2063_v46 }
 0x18d   :  { %v2174_v2 = vadd.f32 %v2173_v59, %v2172_v50 }
 0x18e   :  { %v2175_v0 = vpop.f32.mrf.mxu1 }
 0x18f   :  { %v1489_v8 = vadd.f32 %v2174_v2, %v2062_v63 }
 0x190   :  { %v2176_v44 = vpop.f32.mrf.mxu1 }
 0x191   :  { %v2177_v5 = vadd.f32 %v2176_v44, %v2175_v0  ;;  %v1574_v37 = vmul.f32 %v1489_v8, %v1489_v8  ;;  %v1535_v26 = vadd.f32 %v1534_v36, %v1489_v8 }
 0x193   :  { %v1492_v9 = vadd.f32 %v2177_v5, %v2065_v3  ;;  %v2066_v10 = vpop.f32.mrf.mxu0  ;;  %v1604_v50 = vadd.f32 %v1603_v41, %v1574_v37 }
 0x195   :  { %v1945_v15 = vpack.c.bf16 %v1492_v9, %v1489_v8  ;;  %v2067_v16 = vpop.f32.mrf.mxu0  ;;  %v1575_v49 = vmul.f32 %v1492_v9, %v1492_v9  ;;  %v1536_v42 = vadd.f32 %v1535_v26, %v1492_v9 }
 0x196   :  { %v2068_v23 = vadd.f32 %v2067_v16, %v2066_v10 }
 0x197   :  { %1964 = vst [vmem:[%s2923_s4 + $0x68] sm:$0xff] %v1945_v15   ;;  %v2178_v57 = vpop.f32.mrf.mxu1  ;;  %v2069_v11 = vpop.f32.mrf.mxu0  ;;  %v1605_v43 = vadd.f32 %v1604_v50, %v1575_v49 }
 0x199   :  { %v2179_v24 = vpop.f32.mrf.mxu1  ;;  %v2070_v27 = vpop.f32.mrf.mxu0 }
 0x19a   :  { %v2180_v28 = vadd.f32 %v2179_v24, %v2178_v57  ;;  %v2071_v34 = vadd.f32 %v2070_v27, %v2069_v11 }
 0x19b   :  { %v2181_v32 = vpop.f32.mrf.mxu1 }
 0x19c   :  { %v2072_v25 = vpop.f32.mrf.mxu0  ;;  %v1497_v38 = vadd.f32 %v2180_v28, %v2068_v23 }
 0x19d   :  { %v2182_v39 = vpop.f32.mrf.mxu1 }
 0x19e   :  { %v2183_v40 = vadd.f32 %v2182_v39, %v2181_v32  ;;  %v2073_v48 = vpop.f32.mrf.mxu0  ;;  %v1576_v51 = vmul.f32 %v1497_v38, %v1497_v38  ;;  %v1537_v53 = vadd.f32 %v1536_v42, %v1497_v38 }
 0x19f   :  { %v2184_v54 = vpop.f32.mrf.mxu1  ;;  %v2074_v46 = vadd.f32 %v2073_v48, %v2072_v25 }
 0x1a0   :  { %v1500_v58 = vadd.f32 %v2183_v40, %v2071_v34  ;;  %v2075_v47 = vpop.f32.mrf.mxu0  ;;  %v1606_v1 = vadd.f32 %v1605_v43, %v1576_v51 }
 0x1a1   :  { %v2185_v55 = vpop.f32.mrf.mxu1 }
 0x1a2   :  { %v1950_v52 = vpack.c.bf16 %v1500_v58, %v1497_v38  ;;  %v2186_v59 = vadd.f32 %v2185_v55, %v2184_v54  ;;  %v2076_v62 = vpop.f32.mrf.mxu0  ;;  %v1577_v60 = vmul.f32 %v1500_v58, %v1500_v58  ;;  %v1538_v63 = vadd.f32 %v1537_v53, %v1500_v58 }
 0x1a3   :  { %v2187_v61 = vpop.f32.mrf.mxu1 }
 0x1a4   :  { %1965 = vst [vmem:[%s2923_s4 + $0x70] sm:$0xff] %v1950_v52   ;;  %v1505_v0 = vadd.f32 %v2186_v59, %v2074_v46  ;;  %v1607_v33 = vadd.f32 %v1606_v1, %v1577_v60 }
 0x1a5   :  { %v2188_v2 = vpop.f32.mrf.mxu1 }
 0x1a6   :  { %v1540_v3 = vsel %vm1539_vm12, %v1505_v0, 0.0  ;;  %v1578_v29 = vmul.f32 %v1505_v0, %v1505_v0  ;;  %v1876_v44 = vpack.c.bf16 %v1505_v0, %v1505_v0 }
 0x1a7   :  { %v1541_v4 = vadd.f32 %v1540_v3, %v1538_v63 }
 0x1a8   :  { %v1608_v5 = vsel %vm1539_vm12, %v1578_v29, 0.0  ;;  %1774 = vst [vmem:[%s2923_s4 + $0x78] sm:$0x1] %v1876_v44 }
 0x1a9   :  { %v1542_v6 = vrot.slane %v1541_v4, 4  ;;  %v1609_v7 = vadd.f32 %v1608_v5, %v1607_v33 }
 0x1ab   :  { %v1543_v45 = vadd.f32 %v1542_v6, %v1541_v4  ;;  %v1610_v8 = vrot.slane %v1609_v7, 4 }
 0x1ad   :  { %v1544_v9 = vrot.slane %v1543_v45, 2  ;;  %v1611_v10 = vadd.f32 %v1610_v8, %v1609_v7 }
 0x1af   :  { %v1545_v13 = vadd.f32 %v1544_v9, %v1543_v45  ;;  %v1612_v56 = vrot.slane %v1611_v10, 2 }
 0x1b1   :  { %v1546_v14 = vrot.slane %v1545_v13, 1  ;;  %v1613_v15 = vadd.f32 %v1612_v56, %v1611_v10 }
 0x1b3   :  { %v1614_v16 = vrot.slane %v1613_v15, 1  ;;  %v1547_v17 = vadd.f32 %v1546_v14, %v1545_v13 }
 0x1b5   :  { %v1615_v18 = vadd.f32 %v1614_v16, %v1613_v15 }
 0x1b7   :  { %v1617_v19 = vsel %vm1616_vm13, %v1547_v17, %v1615_v18 }
 0x1b8   :  { %1618 = vst [vmem:[%s2924_s5] sm:$0x3] %v1617_v19 }

// kernel: tile.63
= control target key start
LH: loop header
LB: loop body
LE: loop exit
PB: predicated region body
PF: predicated region fallthrough
CT: control target
= control target key end

     0   :  { %s40_s0 = inlined_call_operand.vmem [shape: f32[32], index: 0, kind: input, shape index: {}]   ;;  %s41_s1 = inlined_call_operand.vmem [shape: f32[25,32], index: 1, kind: output, shape index: {}]  }
   0x1   :  { %v4_v0 = vld [vmem:[%s40_s0] ss:$0 sm:$0xff] }
   0x2   :  { %5 = vst [vmem:[%s41_s1] sm:$0xff] %v4_v0  ;;  %12 = vst [vmem:[%s41_s1 + $0x8] sm:$0xff] %v4_v0 }
   0x3   :  { %13 = vst [vmem:[%s41_s1 + $0x10] sm:$0xff] %v4_v0  ;;  %14 = vst [vmem:[%s41_s1 + $0x18] sm:$0xff] %v4_v0 }

// kernel: tile.64
= control target key start
LH: loop header
LB: loop body
LE: loop exit
PB: predicated region body
PF: predicated region fallthrough
CT: control target
= control target key end

     0   :  { %vm3_vm0 = vcmask 261120   ;;  %s29_s8 = smov 96   ;;  %s30_s13 = smov 32   ;;  %vm9_vm1 = vcmask 1048320   ;;  %vm15_vm2 = vcmask 785920   ;;  %vm21_vm3 = vcmask 523520   ;;  %s66_s0 = inlined_call_operand.vmem [shape: f32[25,32], index: 0, kind: input, shape index: {}]   ;;  %s67_s1 = inlined_call_operand.vmem [shape: f32[800], index: 1, kind: output, shape index: {}]  }
   0x1   :  { %v23_v0 = vld [vmem:[%s66_s0 + $0x3] ss:$4 sm:$0x3f]   ;;  %v25_v1 = vld [vmem:[%s66_s0 + $0x1] ss:$4 sm:$0x3f]  }
   0x2   :  { %7 = vrot.lane.b32.xlu0 %v23_v0, %s29_s8  ;;  %v24_v2 = vld [vmem:[%s66_s0 + $0x2] ss:$4 sm:$0x3f]   ;;  %19 = vrot.lane.b32.xlu1 %v25_v1, %s30_s13  ;;  %v2_v3 = vld [vmem:[%s66_s0] ss:$4 sm:$0x7f]  }
   0x3   :  { %4 = vst.msk [vmem:[%s67_s1] sm:$0x7f] %vm3_vm0, %v2_v3   ;;  %s31_s17 = smov 64  }
   0x6   :  { %13 = vrot.lane.b32.xlu0 %v24_v2, %s31_s17 }
  0x74   :  { %v8_v4 = vpop.permute.xlu0 %7   ;;  %v20_v5 = vpop.permute.xlu1 %19  }
  0x75   :  { %10 = vst.msk [vmem:[%s67_s1] sm:$0x3f] %vm9_vm1, %v8_v4  }
  0x78   :  { %v14_v6 = vpop.permute.xlu0 %13  }
  0x79   :  { %16 = vst.msk [vmem:[%s67_s1] sm:$0x3f] %vm15_vm2, %v14_v6  }
  0x7a   :  { %22 = vst.msk [vmem:[%s67_s1] sm:$0x3f] %vm21_vm3, %v20_v5  }

// kernel: discriminator_forward.8
= control target key start
LH: loop header
LB: loop body
LE: loop exit
PB: predicated region body
PF: predicated region fallthrough
CT: control target
= control target key end

     0   :  { %v99_v21 = vlaneseq  ;;  %s2022_s1 = inlined_call_operand.vmem [shape: bf16[896,128], index: 1, kind: input, shape index: {}]   ;;  %s2023_s0 = inlined_call_operand.vmem [shape: bf16[1,50,896], index: 0, kind: input, shape index: {}]   ;;  %s2024_s2 = inlined_call_operand.vmem [shape: f32[1,896], index: 2, kind: input, shape index: {}]   ;;  %s2025_s3 = inlined_call_operand.vmem [shape: f32[1,896], index: 3, kind: input, shape index: {}]   ;;  %s2026_s4 = inlined_call_operand.vmem [shape: bf16[1,50,128], index: 4, kind: output, shape index: {0}]   ;;  %s2027_s5 = inlined_call_operand.vmem [shape: f32[1,2,128], index: 5, kind: output, shape index: {1}]  }
   0x1   :  { %v1472_v0 = vld [vmem:[%s2022_s1 + $0x78] sm:$0xff]   ;;  %v1476_v4 = vld [vmem:[%s2022_s1 + $0x70] sm:$0xff]   ;;  %v1480_v8 = vld [vmem:[%s2022_s1 + $0x68] sm:$0xff]  }
   0x2   :  { %v1473_v1 = vld [vmem:[%s2022_s1 + $0xf8] sm:$0xff]   ;;  %1316 = vmatprep.subr.bf16.mxu0 %v1472_v0  ;;  %v1477_v5 = vld [vmem:[%s2022_s1 + $0xf0] sm:$0xff]   ;;  %v1481_v9 = vld [vmem:[%s2022_s1 + $0xe8] sm:$0xff]   ;;  %v1633_v26 = vshrl.u32 %v99_v21, 7 }
   0x3   :  { %v1474_v2 = vld [vmem:[%s2022_s1 + $0x38] sm:$0xff]   ;;  %1356 = vmatprep.subr.bf16.mxu1 %v1473_v1  ;;  %v1478_v6 = vld [vmem:[%s2022_s1 + $0x30] sm:$0xff]   ;;  %v1482_v10 = vld [vmem:[%s2022_s1 + $0x28] sm:$0xff]  }
   0x4   :  { %v1475_v3 = vld [vmem:[%s2022_s1 + $0xb8] sm:$0xff]   ;;  %1317 = vmatpush3.bf16.msra.mxu0 %v1474_v2  ;;  %v1479_v7 = vld [vmem:[%s2022_s1 + $0xb0] sm:$0xff]   ;;  %v1483_v11 = vld [vmem:[%s2022_s1 + $0xa8] sm:$0xff]   ;;  %v105_v31 = vsub.s32 1, %v1633_v26  ;;  %v113_v33 = vsub.s32 3, %v1633_v26  ;;  %v101_v35 = vsub.s32 0, %v1633_v26 }
   0x5   :  { %1357 = vmatpush3.bf16.msra.mxu1 %v1475_v3  ;;  %1318 = vmatprep.subr.bf16.mxu0 %v1476_v4  ;;  %v1484_v12 = vld [vmem:[%s2022_s1 + $0x60] sm:$0xff]   ;;  %v1488_v16 = vld [vmem:[%s2022_s1 + $0x58] sm:$0xff]   ;;  %v1492_v20 = vld [vmem:[%s2022_s1 + $0x50] sm:$0xff]   ;;  %v109_v37 = vsub.s32 2, %v1633_v26  ;;  %v117_v41 = vsub.s32 4, %v1633_v26  ;;  %v121_v42 = vsub.s32 5, %v1633_v26 }
   0x6   :  { %1358 = vmatprep.subr.bf16.mxu1 %v1477_v5  ;;  %v1485_v13 = vld [vmem:[%s2022_s1 + $0xe0] sm:$0xff]   ;;  %v1489_v17 = vld [vmem:[%s2022_s1 + $0xd8] sm:$0xff]   ;;  %v1493_v22 = vld [vmem:[%s2022_s1 + $0xd0] sm:$0xff]   ;;  %v125_v43 = vsub.s32 6, %v1633_v26 }
   0x7   :  { %v1486_v14 = vld [vmem:[%s2022_s1 + $0x20] sm:$0xff]   ;;  %v1490_v18 = vld [vmem:[%s2022_s1 + $0x18] sm:$0xff]   ;;  %v1494_v23 = vld [vmem:[%s2022_s1 + $0x10] sm:$0xff]  }
   0x8   :  { %1319 = vmatpush3.bf16.msra.mxu0 %v1478_v6  ;;  %v1487_v15 = vld [vmem:[%s2022_s1 + $0xa0] sm:$0xff]   ;;  %v1491_v19 = vld [vmem:[%s2022_s1 + $0x98] sm:$0xff]   ;;  %v1495_v24 = vld [vmem:[%s2022_s1 + $0x90] sm:$0xff]  }
   0x9   :  { %1359 = vmatpush3.bf16.msra.mxu1 %v1479_v7  ;;  %1320 = vmatprep.subr.bf16.mxu0 %v1480_v8  ;;  %v1496_v25 = vld [vmem:[%s2022_s1 + $0x48] sm:$0xff]   ;;  %v1500_v30 = vld [vmem:[%s2022_s1 + $0x40] sm:$0xff]   ;;  %v1504_v55 = vld [vmem:[%s2022_s1 + $0x178] sm:$0xff]  }
   0xa   :  { %1360 = vmatprep.subr.bf16.mxu1 %v1481_v9  ;;  %v1497_v27 = vld [vmem:[%s2022_s1 + $0xc8] sm:$0xff]   ;;  %v1501_v32 = vld [vmem:[%s2022_s1 + $0xc0] sm:$0xff]   ;;  %v1719_v4 = vld [vmem:[%s2022_s1 + $0x1b8] sm:$0xff]  }
   0xb   :  { %v1498_v28 = vld [vmem:[%s2022_s1 + $0x8] sm:$0xff]   ;;  %v1502_v34 = vld [vmem:[%s2022_s1] sm:$0xff]  }
   0xc   :  { %1321 = vmatpush3.bf16.msra.mxu0 %v1482_v10  ;;  %v1499_v29 = vld [vmem:[%s2022_s1 + $0x88] sm:$0xff]   ;;  %v1503_v36 = vld [vmem:[%s2022_s1 + $0x80] sm:$0xff]  }
   0xd   :  { %1361 = vmatpush3.bf16.msra.mxu1 %v1483_v11  ;;  %1322 = vmatprep.subr.bf16.mxu0 %v1484_v12  ;;  %v20_v38 = vld [vmem:[%s2023_s0] sm:$0xff]  ;;  %v21_v49 = vld [vmem:[%s2023_s0 + $0x8] sm:$0xff] }
   0xe   :  { %1362 = vmatprep.subr.bf16.mxu1 %v1485_v13  ;;  %v24_v39 = vld [vmem:[%s2023_s0 + $0x1c] sm:$0xff]  ;;  %v48_v44 = vunpack.c.l.bf16 %v20_v38  ;;  %v49_v45 = vunpack.c.h.bf16 %v20_v38  ;;  %v25_v50 = vld [vmem:[%s2023_s0 + $0x24] sm:$0xff]  ;;  %v50_v53 = vunpack.c.l.bf16 %v21_v49  ;;  %v51_v54 = vunpack.c.h.bf16 %v21_v49 }
   0xf   :  { %v1669_v40 = vld [vmem:[%s2024_s2] sm:$0xff]  ;;  %v55_v46 = vunpack.c.l.bf16 %v24_v39  ;;  %v56_v47 = vunpack.c.h.bf16 %v24_v39  ;;  %v57_v56 = vunpack.c.l.bf16 %v25_v50  ;;  %v58_v57 = vunpack.c.h.bf16 %v25_v50 }
  0x10   :  { %1323 = vmatpush3.bf16.msra.mxu0 %v1486_v14  ;;  %v1677_v48 = vld [vmem:[%s2025_s3] sm:$0xff]  ;;  %v1686_v51 = vrot.slane %v1669_v40, %v105_v31  ;;  %v1695_v58 = vrot.slane %v1669_v40, %v113_v33  ;;  %v1703_v62 = vrot.slane %v1669_v40, %v101_v35  ;;  %v1711_v2 = vrot.slane %v1669_v40, %v109_v37 }
  0x11   :  { %1363 = vmatpush3.bf16.msra.mxu1 %v1487_v15  ;;  %1324 = vmatprep.subr.bf16.mxu0 %v1488_v16  ;;  %v1689_v52 = vrot.slane %v1677_v48, %v105_v31  ;;  %v1698_v59 = vrot.slane %v1677_v48, %v113_v33  ;;  %v1706_v63 = vrot.slane %v1677_v48, %v101_v35  ;;  %v1751_v35 = vld [vmem:[%s2023_s0 + $0x5c] sm:$0xff] }
  0x12   :  { %1364 = vmatprep.subr.bf16.mxu1 %v1489_v17  ;;  %v135_v60 = vmul.f32 %v1686_v51, %v49_v45  ;;  %v142_v61 = vmul.f32 %v1686_v51, %v56_v47  ;;  %v137_v0 = vmul.f32 %v1695_v58, %v51_v54  ;;  %v144_v1 = vmul.f32 %v1695_v58, %v58_v57  ;;  %v28_v17 = vld [vmem:[%s2023_s0 + $0x38] sm:$0xff]  ;;  %v1506_v47 = vld [vmem:[%s2022_s1 + $0x170] sm:$0xff]  }
  0x13   :  { %v1714_v3 = vrot.slane %v1677_v48, %v109_v37  ;;  %v134_v7 = vmul.f32 %v1703_v62, %v48_v44  ;;  %v141_v8 = vmul.f32 %v1703_v62, %v55_v46  ;;  %v136_v11 = vmul.f32 %v1711_v2, %v50_v53 }
  0x14   :  { %1325 = vmatpush3.bf16.msra.mxu0 %v1490_v18  ;;  %v221_v5 = vadd.f32 %v1689_v52, %v135_v60  ;;  %v228_v6 = vadd.f32 %v1689_v52, %v142_v61  ;;  %v223_v9 = vadd.f32 %v1698_v59, %v137_v0  ;;  %v230_v10 = vadd.f32 %v1698_v59, %v144_v1  ;;  %v1508_v0 = vld [vmem:[%s2022_s1 + $0x130] sm:$0xff]  }
  0x15   :  { %1365 = vmatpush3.bf16.msra.mxu1 %v1491_v19  ;;  %1326 = vmatprep.subr.bf16.mxu0 %v1492_v20  ;;  %v143_v12 = vmul.f32 %v1711_v2, %v57_v56  ;;  %v220_v20 = vadd.f32 %v1706_v63, %v134_v7  ;;  %v227_v21 = vadd.f32 %v1706_v63, %v141_v8  ;;  %v63_v37 = vunpack.c.h.bf16 %v28_v17  ;;  %v1510_v7 = vld [vmem:[%s2022_s1 + $0x1b0] sm:$0xff]  }
  0x16   :  { %1366 = vmatprep.subr.bf16.mxu1 %v1493_v22  ;;  %vm270_vm0 = vcmp.ge.f32.partialorder %v221_v5, 0.0  ;;  %vm277_vm1 = vcmp.ge.f32.partialorder %v228_v6, 0.0  ;;  %v319_v13 = vmul.f32 0.2, %v221_v5  ;;  %v326_v14 = vmul.f32 0.2, %v228_v6 }
  0x17   :  { %vm272_vm2 = vcmp.ge.f32.partialorder %v223_v9, 0.0  ;;  %vm279_vm3 = vcmp.ge.f32.partialorder %v230_v10, 0.0  ;;  %v321_v15 = vmul.f32 0.2, %v223_v9  ;;  %v328_v16 = vmul.f32 0.2, %v230_v10 }
  0x18   :  { %1327 = vmatpush3.bf16.msra.mxu0 %v1494_v23  ;;  %v368_v18 = vsel %vm270_vm0, %v221_v5, %v319_v13  ;;  %v375_v19 = vsel %vm277_vm1, %v228_v6, %v326_v14  ;;  %v32_v22 = vld [vmem:[%s2023_s0 + $0x54] sm:$0xff]  ;;  %vm269_vm4 = vcmp.ge.f32.partialorder %v220_v20, 0.0  ;;  %vm276_vm5 = vcmp.ge.f32.partialorder %v227_v21, 0.0 }
  0x19   :  { %1367 = vmatpush3.bf16.msra.mxu1 %v1495_v24  ;;  %1328 = vmatprep.subr.bf16.mxu0 %v1496_v25  ;;  %v417_v23 = vpack.c.bf16 %v375_v19, %v368_v18  ;;  %v370_v24 = vsel %vm272_vm2, %v223_v9, %v321_v15  ;;  %v377_v25 = vsel %vm279_vm3, %v230_v10, %v328_v16  ;;  %v325_v31 = vmul.f32 0.2, %v227_v21  ;;  %v1513_v15 = vld [vmem:[%s2022_s1 + $0x1a8] sm:$0xff]   ;;  %v1783_v16 = vld [vmem:[%s2023_s0 + $0x70] sm:$0xff] }
  0x1a   :  { %1368 = vmatprep.subr.bf16.mxu1 %v1497_v27  ;;  %v222_v27 = vadd.f32 %v1714_v3, %v136_v11  ;;  %v70_v38 = vunpack.c.h.bf16 %v32_v22  ;;  %v149_v50 = vmul.f32 %v1686_v51, %v63_v37  ;;  %v72_v54 = vunpack.c.h.bf16 %v1751_v35  ;;  %v1812_v37 = vld [vmem:[%s2023_s0 + $0x94] sm:$0xff] }
  0x1b   :  { %924 = vmatprep.mubr.bf16.mxu0 %v417_v23  ;;  %v374_v44 = vsel %vm276_vm5, %v227_v21, %v325_v31  ;;  %v62_v57 = vunpack.c.l.bf16 %v28_v17  ;;  %v69_v60 = vunpack.c.l.bf16 %v32_v22  ;;  %v1794_v21 = vld [vmem:[%s2023_s0 + $0x8c] sm:$0xff] }
  0x1c   :  { %1329 = vmatpush3.bf16.msra.mxu0 %v1498_v28  ;;  %v1742_v28 = vld [vmem:[%s2023_s0 + $0x40] sm:$0xff]  ;;  %vm271_vm6 = vcmp.ge.f32.partialorder %v222_v27, 0.0  ;;  %v320_v33 = vmul.f32 0.2, %v222_v27  ;;  %v156_v53 = vmul.f32 %v1686_v51, %v70_v38  ;;  %v235_v1 = vadd.f32 %v1689_v52, %v149_v50 }
  0x1d   :  { %1369 = vmatpush3.bf16.msra.mxu1 %v1499_v29  ;;  %1330 = vmatprep.subr.bf16.mxu0 %v1500_v30  ;;  %v419_v29 = vpack.c.bf16 %v377_v25, %v370_v24  ;;  %v318_v30 = vmul.f32 0.2, %v220_v20  ;;  %v65_v39 = vunpack.c.h.bf16 %v1742_v28  ;;  %v158_v6 = vmul.f32 %v1695_v58, %v72_v54  ;;  %v1512_v25 = vld [vmem:[%s2022_s1 + $0x160] sm:$0xff]  }
  0x1e   :  { %1370 = vmatprep.subr.bf16.mxu1 %v1501_v32  ;;  %v229_v32 = vadd.f32 %v1714_v3, %v143_v12  ;;  %v369_v46 = vsel %vm271_vm6, %v222_v27, %v320_v33  ;;  %v242_v5 = vadd.f32 %v1689_v52, %v156_v53  ;;  %v148_v9 = vmul.f32 %v1703_v62, %v62_v57  ;;  %v1509_v12 = vld [vmem:[%s2022_s1 + $0x168] sm:$0xff]   ;;  %v1514_v53 = vld [vmem:[%s2022_s1 + $0x120] sm:$0xff]  }
  0x1f   :  { %988 = vmatprep.mubr.bf16.mxu1 %v419_v29  ;;  %v151_v56 = vmul.f32 %v1695_v58, %v65_v39  ;;  %v155_v10 = vmul.f32 %v1703_v62, %v69_v60  ;;  %v64_v11 = vunpack.c.l.bf16 %v1742_v28  ;;  %vm284_vm8 = vcmp.ge.f32.partialorder %v235_v1, 0.0 }
  0x20   :  { %1331 = vmatpush3.bf16.msra.mxu0 %v1502_v34  ;;  %v1505_v34 = vld [vmem:[%s2022_s1 + $0x138] sm:$0xff]   ;;  %vm278_vm7 = vcmp.ge.f32.partialorder %v229_v32, 0.0  ;;  %v327_v45 = vmul.f32 0.2, %v229_v32  ;;  %vm291_vm9 = vcmp.ge.f32.partialorder %v242_v5, 0.0  ;;  %v244_v17 = vadd.f32 %v1698_v59, %v158_v6 }
  0x21   :  { %1371 = vmatpush3.bf16.msra.mxu1 %v1503_v36  ;;  %1396 = vmatprep.subr.bf16.mxu0 %v1504_v55  ;;  %v367_v36 = vsel %vm269_vm4, %v220_v20, %v318_v30  ;;  %v237_v8 = vadd.f32 %v1698_v59, %v151_v56  ;;  %v333_v13 = vmul.f32 0.2, %v235_v1  ;;  %v340_v14 = vmul.f32 0.2, %v242_v5  ;;  %v1511_v20 = vld [vmem:[%s2022_s1 + $0x128] sm:$0xff]   ;;  %v1804_v30 = vld [vmem:[%s2023_s0 + $0x78] sm:$0xff] }
  0x22   :  { %1448 = vmatprep.subr.bf16.mxu1 %v1719_v4  ;;  %v416_v49 = vpack.c.bf16 %v374_v44, %v367_v36  ;;  %v376_v55 = vsel %vm278_vm7, %v229_v32, %v327_v45  ;;  %v234_v19 = vadd.f32 %v1706_v63, %v148_v9  ;;  %v241_v24 = vadd.f32 %v1706_v63, %v155_v10  ;;  %v1519_v9 = vld [vmem:[%s2022_s1 + $0x198] sm:$0xff]  }
  0x23   :  { %v418_v61 = vpack.c.bf16 %v376_v55, %v369_v46  ;;  %vm286_vm10 = vcmp.ge.f32.partialorder %v237_v8, 0.0  ;;  %v335_v18 = vmul.f32 0.2, %v237_v8  ;;  %v382_v22 = vsel %vm284_vm8, %v235_v1, %v333_v13  ;;  %v1516_v46 = vld [vmem:[%s2022_s1 + $0x1a0] sm:$0xff]  }
  0x24   :  { %925 = vmatmul.mubr.bf16.vlgmr.msra.gmra.mxu0 %v416_v49  ;;  %v389_v23 = vsel %vm291_vm9, %v242_v5, %v340_v14  ;;  %vm293_vm11 = vcmp.ge.f32.partialorder %v244_v17, 0.0  ;;  %v342_v28 = vmul.f32 0.2, %v244_v17  ;;  %vm283_vm12 = vcmp.ge.f32.partialorder %v234_v19, 0.0  ;;  %v1517_v14 = vld [vmem:[%s2022_s1 + $0x118] sm:$0xff]  }
  0x25   :  { %1397 = vmatpush3.bf16.msra.mxu0 %v1505_v34  ;;  %989 = vmatmul.mubr.bf16.vlgmr.msra.gmra.mxu1 %v418_v61  ;;  %v424_v27 = vpack.c.bf16 %v389_v23, %v382_v22  ;;  %v384_v29 = vsel %vm286_vm10, %v237_v8, %v335_v18  ;;  %vm290_vm13 = vcmp.ge.f32.partialorder %v241_v24, 0.0  ;;  %v332_v31 = vmul.f32 0.2, %v234_v19  ;;  %v1515_v61 = vld [vmem:[%s2022_s1 + $0x158] sm:$0xff]   ;;  %v1520_v22 = vld [vmem:[%s2022_s1 + $0x110] sm:$0xff]  }
  0x26   :  { %1398 = vmatprep.subr.bf16.mxu0 %v1506_v47  ;;  %1449 = vmatpush3.bf16.msra.mxu1 %v1719_v4  ;;  %v71_v4 = vunpack.c.l.bf16 %v1751_v35  ;;  %v339_v32 = vmul.f32 0.2, %v241_v24  ;;  %v391_v33 = vsel %vm293_vm11, %v244_v17, %v342_v28  ;;  %v150_v34 = vmul.f32 %v1711_v2, %v64_v11  ;;  %v1518_v17 = vld [vmem:[%s2022_s1 + $0x150] sm:$0xff]   ;;  %v44_v23 = vld [vmem:[%s2023_s0 + $0xa8] sm:$0x11] }
  0x27   :  { %1450 = vmatprep.subr.bf16.mxu1 %v1510_v7  ;;  %932 = vmatprep.mubr.bf16.mxu0 %v424_v27  ;;  %v77_v36 = vunpack.c.h.bf16 %v1783_v16  ;;  %v426_v38 = vpack.c.bf16 %v391_v33, %v384_v29  ;;  %v381_v39 = vsel %vm283_vm12, %v234_v19, %v332_v31  ;;  %v84_v45 = vunpack.c.h.bf16 %v1794_v21  ;;  %v1522_v28 = vld [vmem:[%s2022_s1 + $0x190] sm:$0xff]  }
  0x28   :  { %v157_v35 = vmul.f32 %v1711_v2, %v71_v4  ;;  %v388_v44 = vsel %vm290_vm13, %v241_v24, %v339_v32  ;;  %v236_v49 = vadd.f32 %v1714_v3, %v150_v34  ;;  %v79_v56 = vunpack.c.h.bf16 %v1804_v30 }
  0x29   :  { %1399 = vmatpush3.bf16.msra.mxu0 %v1508_v0  ;;  %v423_v47 = vpack.c.bf16 %v388_v44, %v381_v39  ;;  %v163_v54 = vmul.f32 %v1686_v51, %v77_v36  ;;  %996 = vmatprep.mubr.bf16.mxu1 %v426_v38  ;;  %v170_v55 = vmul.f32 %v1686_v51, %v84_v45  ;;  %v86_v57 = vunpack.c.h.bf16 %v1812_v37  ;;  %v45_v39 = vld [vmem:[%s2023_s0 + $0xb0] sm:$0x11] }
  0x2a   :  { %1400 = vmatprep.subr.bf16.mxu0 %v1509_v12  ;;  %1451 = vmatpush3.bf16.msra.mxu1 %v1510_v7  ;;  %v243_v50 = vadd.f32 %v1714_v3, %v157_v35  ;;  %v76_v60 = vunpack.c.l.bf16 %v1783_v16  ;;  %vm285_vm14 = vcmp.ge.f32.partialorder %v236_v49, 0.0  ;;  %v334_v0 = vmul.f32 0.2, %v236_v49 }
  0x2b   :  { %1452 = vmatprep.subr.bf16.mxu1 %v1513_v15  ;;  %v249_v5 = vadd.f32 %v1689_v52, %v163_v54  ;;  %v256_v6 = vadd.f32 %v1689_v52, %v170_v55  ;;  %v165_v7 = vmul.f32 %v1695_v58, %v79_v56  ;;  %v172_v8 = vmul.f32 %v1695_v58, %v86_v57 }
  0x2c   :  { %933 = vmatmul.mubr.bf16.gmra.mxu0 %v423_v47  ;;  %vm292_vm15 = vcmp.ge.f32.partialorder %v243_v50, 0.0  ;;  %v341_v1 = vmul.f32 0.2, %v243_v50  ;;  %v383_v10 = vsel %vm285_vm14, %v236_v49, %v334_v0  ;;  %v83_v12 = vunpack.c.l.bf16 %v1794_v21  ;;  %v1525_v47 = vld [vmem:[%s2022_s1 + $0x188] sm:$0xff]   ;;  %v22_v0 = vld [vmem:[%s2023_s0 + $0x10] sm:$0xff] }
  0x2d   :  { %1401 = vmatpush3.bf16.msra.mxu0 %v1511_v20  ;;  %v162_v13 = vmul.f32 %v1703_v62, %v76_v60  ;;  %vm298_vm0 = vcmp.ge.f32.partialorder %v249_v5, 0.0  ;;  %vm305_vm1 = vcmp.ge.f32.partialorder %v256_v6, 0.0  ;;  %v347_v16 = vmul.f32 0.2, %v249_v5 }
  0x2e   :  { %1402 = vmatprep.subr.bf16.mxu0 %v1512_v25  ;;  %1453 = vmatpush3.bf16.msra.mxu1 %v1513_v15  ;;  %v390_v11 = vsel %vm292_vm15, %v243_v50, %v341_v1  ;;  %v354_v18 = vmul.f32 0.2, %v256_v6  ;;  %v251_v19 = vadd.f32 %v1698_v59, %v165_v7  ;;  %v258_v20 = vadd.f32 %v1698_v59, %v172_v8 }
  0x2f   :  { %1454 = vmatprep.subr.bf16.mxu1 %v1516_v46  ;;  %v425_v15 = vpack.c.bf16 %v390_v11, %v383_v10  ;;  %v169_v21 = vmul.f32 %v1703_v62, %v83_v12  ;;  %v396_v24 = vsel %vm298_vm0, %v249_v5, %v347_v16  ;;  %v248_v4 = vadd.f32 %v1706_v63, %v162_v13  ;;  %v26_v10 = vld [vmem:[%s2023_s0 + $0x2c] sm:$0xff]  ;;  %v1527_v11 = vld [vmem:[%s2022_s1 + $0x180] sm:$0xff]  }
  0x30   :  { %v78_v25 = vunpack.c.l.bf16 %v1804_v30  ;;  %v85_v27 = vunpack.c.l.bf16 %v1812_v37  ;;  %v403_v29 = vsel %vm305_vm1, %v256_v6, %v354_v18  ;;  %vm300_vm2 = vcmp.ge.f32.partialorder %v251_v19, 0.0  ;;  %v1521_v30 = vld [vmem:[%s2022_s1 + $0x148] sm:$0xff]   ;;  %v1526_v16 = vld [vmem:[%s2022_s1 + $0x100] sm:$0xff]  }
  0x31   :  { %1403 = vmatpush3.bf16.msra.mxu0 %v1514_v53  ;;  %997 = vmatmul.mubr.bf16.gmra.mxu1 %v425_v15  ;;  %vm307_vm3 = vcmp.ge.f32.partialorder %v258_v20, 0.0  ;;  %v349_v31 = vmul.f32 0.2, %v251_v19  ;;  %v431_v32 = vpack.c.bf16 %v403_v29, %v396_v24  ;;  %v356_v33 = vmul.f32 0.2, %v258_v20 }
  0x32   :  { %1404 = vmatprep.subr.bf16.mxu0 %v1515_v61  ;;  %1455 = vmatpush3.bf16.msra.mxu1 %v1516_v46  ;;  %v255_v34 = vadd.f32 %v1706_v63, %v169_v21  ;;  %vm297_vm4 = vcmp.ge.f32.partialorder %v248_v4, 0.0  ;;  %v346_v36 = vmul.f32 0.2, %v248_v4  ;;  %v164_v37 = vmul.f32 %v1711_v2, %v78_v25  ;;  %v1523_v61 = vld [vmem:[%s2022_s1 + $0x108] sm:$0xff]  }
  0x33   :  { %1456 = vmatprep.subr.bf16.mxu1 %v1519_v9  ;;  %v398_v35 = vsel %vm300_vm2, %v251_v19, %v349_v31  ;;  %v171_v38 = vmul.f32 %v1711_v2, %v85_v27  ;;  %940 = vmatprep.mubr.bf16.mxu0 %v431_v32  ;;  %v405_v44 = vsel %vm307_vm3, %v258_v20, %v356_v33  ;;  %v91_v46 = vunpack.c.h.bf16 %v44_v23 }
  0x34   :  { %vm304_vm5 = vcmp.ge.f32.partialorder %v255_v34, 0.0  ;;  %v353_v45 = vmul.f32 0.2, %v255_v34  ;;  %v433_v49 = vpack.c.bf16 %v405_v44, %v398_v35  ;;  %v395_v50 = vsel %vm297_vm4, %v248_v4, %v346_v36 }
  0x35   :  { %1405 = vmatpush3.bf16.msra.mxu0 %v1517_v14  ;;  %v250_v53 = vadd.f32 %v1714_v3, %v164_v37  ;;  %v257_v54 = vadd.f32 %v1714_v3, %v171_v38  ;;  %v177_v56 = vmul.f32 %v1686_v51, %v91_v46  ;;  %v93_v57 = vunpack.c.h.bf16 %v45_v39  ;;  %v1524_v51 = vld [vmem:[%s2022_s1 + $0x140] sm:$0xff]  }
  0x36   :  { %1406 = vmatprep.subr.bf16.mxu0 %v1518_v17  ;;  %1457 = vmatpush3.bf16.msra.mxu1 %v1519_v9  ;;  %v402_v55 = vsel %vm304_vm5, %v255_v34, %v353_v45  ;;  %v90_v60 = vunpack.c.l.bf16 %v44_v23  ;;  %v92_v13 = vunpack.c.l.bf16 %v45_v39  ;;  %v52_v14 = vunpack.c.l.bf16 %v22_v0 }
  0x37   :  { %1458 = vmatprep.subr.bf16.mxu1 %v1522_v28  ;;  %1004 = vmatprep.mubr.bf16.mxu1 %v433_v49  ;;  %v430_v1 = vpack.c.bf16 %v402_v55, %v395_v50  ;;  %vm299_vm6 = vcmp.ge.f32.partialorder %v250_v53, 0.0  ;;  %vm306_vm7 = vcmp.ge.f32.partialorder %v257_v54, 0.0  ;;  %v348_v5 = vmul.f32 0.2, %v250_v53 }
  0x38   :  { %v355_v6 = vmul.f32 0.2, %v257_v54  ;;  %v263_v7 = vadd.f32 %v1689_v52, %v177_v56  ;;  %v179_v8 = vmul.f32 %v1695_v58, %v93_v57  ;;  %v176_v9 = vmul.f32 %v1703_v62, %v90_v60 }
  0x39   :  { %1407 = vmatpush3.bf16.msra.mxu0 %v1520_v22  ;;  %v397_v12 = vsel %vm299_vm6, %v250_v53, %v348_v5  ;;  %v53_v15 = vunpack.c.h.bf16 %v22_v0  ;;  %v178_v19 = vmul.f32 %v1711_v2, %v92_v13  ;;  %v59_v20 = vunpack.c.l.bf16 %v26_v10  ;;  %v34_v5 = vld [vmem:[%s2023_s0 + $0x64] sm:$0xff] }
  0x3a   :  { %1408 = vmatprep.subr.bf16.mxu0 %v1521_v30  ;;  %1459 = vmatpush3.bf16.msra.mxu1 %v1522_v28  ;;  %v404_v52 = vsel %vm306_vm7, %v257_v54, %v355_v6  ;;  %vm312_vm8 = vcmp.ge.f32.partialorder %v263_v7, 0.0  ;;  %v361_v58 = vmul.f32 0.2, %v263_v7  ;;  %v265_v62 = vadd.f32 %v1698_v59, %v179_v8 }
  0x3b   :  { %1460 = vmatprep.subr.bf16.mxu1 %v1525_v47  ;;  %941 = vmatmul.mubr.bf16.gmra.mxu0 %v430_v1  ;;  %v432_v17 = vpack.c.bf16 %v404_v52, %v397_v12  ;;  %v262_v18 = vadd.f32 %v1706_v63, %v176_v9  ;;  %v60_v23 = vunpack.c.h.bf16 %v26_v10  ;;  %v264_v4 = vadd.f32 %v1714_v3, %v178_v19  ;;  %v23_v3 = vld [vmem:[%s2023_s0 + $0x18] ss:$28 sps:$4 sm:$0xff]   ;;  %v30_v1 = vld [vmem:[%s2023_s0 + $0x48] sm:$0xff] }
  0x3c   :  { %v410_v21 = vsel %vm312_vm8, %v263_v7, %v361_v58  ;;  %vm314_vm9 = vcmp.ge.f32.partialorder %v265_v62, 0.0  ;;  %v363_v22 = vmul.f32 0.2, %v265_v62  ;;  %v1908_v63 = vrot.slane %v1669_v40, %v117_v41 }
  0x3d   :  { %1409 = vmatpush3.bf16.msra.mxu0 %v1523_v61  ;;  %1005 = vmatmul.mubr.bf16.gmra.mxu1 %v432_v17  ;;  %v438_v59 = vpack.c.bf16 %v410_v21, %v410_v21  ;;  %vm311_vm10 = vcmp.ge.f32.partialorder %v262_v18, 0.0  ;;  %v360_v24 = vmul.f32 0.2, %v262_v18  ;;  %v1913_v2 = vrot.slane %v1669_v40, %v121_v42 }
  0x3e   :  { %1410 = vmatprep.subr.bf16.mxu0 %v1524_v51  ;;  %1461 = vmatpush3.bf16.msra.mxu1 %v1525_v47  ;;  %v412_v25 = vsel %vm314_vm9, %v265_v62, %v363_v22  ;;  %v1918_v27 = vrot.slane %v1677_v48, %v121_v42  ;;  %vm313_vm11 = vcmp.ge.f32.partialorder %v264_v4, 0.0  ;;  %v362_v31 = vmul.f32 0.2, %v264_v4 }
  0x3f   :  { %1462 = vmatprep.subr.bf16.mxu1 %v1527_v11  ;;  %948 = vmatprep.mubr.bf16.mxu0 %v438_v59  ;;  %v440_v28 = vpack.c.bf16 %v412_v25, %v412_v25  ;;  %v409_v29 = vsel %vm311_vm10, %v262_v18, %v360_v24  ;;  %v138_v33 = vmul.f32 %v1908_v63, %v52_v14  ;;  %v54_v37 = vunpack.c.l.bf16 %v23_v3  ;;  %v42_v59 = vld [vmem:[%s2023_s0 + $0x9c] sm:$0xff] }
  0x40   :  { %v437_v32 = vpack.c.bf16 %v409_v29, %v409_v29  ;;  %v139_v34 = vmul.f32 %v1913_v2, %v53_v15  ;;  %v145_v30 = vmul.f32 %v1908_v63, %v59_v20  ;;  %v411_v42 = vsel %vm313_vm11, %v264_v4, %v362_v31  ;;  %v38_v15 = vld [vmem:[%s2023_s0 + $0x80] sm:$0xff] }
  0x41   :  { %1411 = vmatpush3.bf16.msra.mxu0 %v1526_v16  ;;  %1012 = vmatprep.mubr.bf16.mxu1 %v440_v28  ;;  %v146_v35 = vmul.f32 %v1913_v2, %v60_v23  ;;  %v1930_v36 = vrot.slane %v1677_v48, %v117_v41  ;;  %v439_v38 = vpack.c.bf16 %v411_v42, %v411_v42  ;;  %v61_v44 = vunpack.c.h.bf16 %v23_v3 }
  0x42   :  { %1463 = vmatpush3.bf16.msra.mxu1 %v1527_v11  ;;  %v225_v39 = vadd.f32 %v1918_v27, %v139_v34  ;;  %v1936_v45 = vrot.slane %v1669_v40, %v125_v43  ;;  %v1944_v41 = vrot.slane %v1677_v48, %v125_v43  ;;  %v31_v40 = vld [vmem:[%s2023_s0 + $0x50] ss:$28 sps:$4 sm:$0xff]   ;;  %v67_v13 = vunpack.c.h.bf16 %v30_v1 }
  0x43   :  { %949 = vmatmul.mubr.bf16.gmra.mxu0 %v437_v32  ;;  %v232_v46 = vadd.f32 %v1918_v27, %v146_v35  ;;  %v224_v47 = vadd.f32 %v1930_v36, %v138_v33  ;;  %v231_v49 = vadd.f32 %v1930_v36, %v145_v30  ;;  %v68_v61 = vunpack.c.l.bf16 %v31_v40 }
  0x44   :  { %vm274_vm12 = vcmp.ge.f32.partialorder %v225_v39, 0.0  ;;  %v323_v50 = vmul.f32 0.2, %v225_v39  ;;  %v140_v53 = vmul.f32 %v1936_v45, %v54_v37  ;;  %v147_v54 = vmul.f32 %v1936_v45, %v61_v44 }
  0x45   :  { %1013 = vmatmul.mubr.bf16.gmra.mxu1 %v439_v38  ;;  %vm281_vm13 = vcmp.ge.f32.partialorder %v232_v46, 0.0  ;;  %v330_v55 = vmul.f32 0.2, %v232_v46  ;;  %vm273_vm14 = vcmp.ge.f32.partialorder %v224_v47, 0.0  ;;  %vm280_vm15 = vcmp.ge.f32.partialorder %v231_v49, 0.0 }
  0x46   :  { %v372_v56 = vsel %vm274_vm12, %v225_v39, %v323_v50  ;;  %v322_v26 = vmul.f32 0.2, %v224_v47  ;;  %v329_v57 = vmul.f32 0.2, %v231_v49  ;;  %v226_v43 = vadd.f32 %v1944_v41, %v140_v53 }
  0x47   :  { %v379_v48 = vsel %vm281_vm13, %v232_v46, %v330_v55  ;;  %v233_v60 = vadd.f32 %v1944_v41, %v147_v54  ;;  %v75_v0 = vunpack.c.h.bf16 %v31_v40  ;;  %v154_v11 = vmul.f32 %v1936_v45, %v68_v61  ;;  %v39_v40 = vld [vmem:[%s2023_s0 + $0x88] ss:$28 sps:$4 sm:$0xff]  }
  0x48   :  { %v421_v51 = vpack.c.bf16 %v379_v48, %v372_v56  ;;  %v371_v6 = vsel %vm273_vm14, %v224_v47, %v322_v26  ;;  %v378_v7 = vsel %vm280_vm15, %v231_v49, %v329_v57  ;;  %vm275_vm0 = vcmp.ge.f32.partialorder %v226_v43, 0.0  ;;  %v47_v57 = vld [vmem:[%s2023_s0 + $0xc0] sm:$0x1] }
  0x49   :  { %v420_v8 = vpack.c.bf16 %v378_v7, %v371_v6  ;;  %vm282_vm1 = vcmp.ge.f32.partialorder %v233_v60, 0.0  ;;  %v324_v9 = vmul.f32 0.2, %v226_v43  ;;  %v331_v10 = vmul.f32 0.2, %v233_v60 }
  0x4a   :  { %1052 = vmatprep.mubr.bf16.mxu0 %v421_v51  ;;  %v161_v12 = vmul.f32 %v1936_v45, %v75_v0  ;;  %v74_v14 = vunpack.c.h.bf16 %v34_v5  ;;  %v66_v62 = vunpack.c.l.bf16 %v30_v1  ;;  %v73_v16 = vunpack.c.l.bf16 %v34_v5  ;;  %v46_v0 = vld [vmem:[%s2023_s0 + $0xb8] sm:$0x11] }
  0x4b   :  { %1053 = vmatmul.mubr.bf16.vlgmr.msra.gmra.mxu0 %v420_v8  ;;  %v373_v52 = vsel %vm275_vm0, %v226_v43, %v324_v9  ;;  %v380_v58 = vsel %vm282_vm1, %v233_v60, %v331_v10  ;;  %v240_v18 = vadd.f32 %v1944_v41, %v154_v11  ;;  %v153_v20 = vmul.f32 %v1913_v2, %v67_v13 }
  0x4c   :  { %v422_v17 = vpack.c.bf16 %v380_v58, %v373_v52  ;;  %v247_v19 = vadd.f32 %v1944_v41, %v161_v12  ;;  %v160_v21 = vmul.f32 %v1913_v2, %v74_v14  ;;  %v152_v22 = vmul.f32 %v1908_v63, %v66_v62 }
  0x4d   :  { %v159_v23 = vmul.f32 %v1908_v63, %v73_v16  ;;  %v81_v24 = vunpack.c.h.bf16 %v38_v15  ;;  %vm289_vm2 = vcmp.ge.f32.partialorder %v240_v18, 0.0  ;;  %v338_v4 = vmul.f32 0.2, %v240_v18 }
  0x4e   :  { %1464 = vmatprep.mubr.bf16.mxu1 %v422_v17  ;;  %vm296_vm3 = vcmp.ge.f32.partialorder %v247_v19, 0.0  ;;  %v345_v25 = vmul.f32 0.2, %v247_v19  ;;  %v239_v3 = vadd.f32 %v1918_v27, %v153_v20  ;;  %v246_v28 = vadd.f32 %v1918_v27, %v160_v21 }
  0x4f   :  { %v238_v29 = vadd.f32 %v1930_v36, %v152_v22  ;;  %v245_v31 = vadd.f32 %v1930_v36, %v159_v23  ;;  %v387_v32 = vsel %vm289_vm2, %v240_v18, %v338_v4  ;;  %v88_v34 = vunpack.c.h.bf16 %v42_v59 }
  0x50   :  { %v394_v33 = vsel %vm296_vm3, %v247_v19, %v345_v25  ;;  %v167_v30 = vmul.f32 %v1913_v2, %v81_v24  ;;  %vm288_vm4 = vcmp.ge.f32.partialorder %v239_v3, 0.0  ;;  %vm295_vm5 = vcmp.ge.f32.partialorder %v246_v28, 0.0 }
  0x51   :  { %v429_v42 = vpack.c.bf16 %v394_v33, %v387_v32  ;;  %v337_v35 = vmul.f32 0.2, %v239_v3  ;;  %v344_v37 = vmul.f32 0.2, %v246_v28  ;;  %vm287_vm6 = vcmp.ge.f32.partialorder %v238_v29, 0.0 }
  0x52   :  { %vm294_vm7 = vcmp.ge.f32.partialorder %v245_v31, 0.0  ;;  %v336_v38 = vmul.f32 0.2, %v238_v29  ;;  %v343_v44 = vmul.f32 0.2, %v245_v31  ;;  %v174_v46 = vmul.f32 %v1913_v2, %v88_v34 }
  0x53   :  { %1465 = vmatmul.mubr.bf16.vlgmr.msra.gmra.mxu1 %v429_v42  ;;  %v386_v39 = vsel %vm288_vm4, %v239_v3, %v337_v35  ;;  %v253_v47 = vadd.f32 %v1918_v27, %v167_v30  ;;  %v393_v49 = vsel %vm295_vm5, %v246_v28, %v344_v37  ;;  %v80_v53 = vunpack.c.l.bf16 %v38_v15 }
  0x54   :  { %v385_v50 = vsel %vm287_vm6, %v238_v29, %v336_v38  ;;  %v87_v54 = vunpack.c.l.bf16 %v42_v59  ;;  %v428_v55 = vpack.c.bf16 %v393_v49, %v386_v39  ;;  %v392_v56 = vsel %vm294_vm7, %v245_v31, %v343_v44 }
  0x55   :  { %v260_v26 = vadd.f32 %v1918_v27, %v174_v46  ;;  %vm302_vm8 = vcmp.ge.f32.partialorder %v253_v47, 0.0  ;;  %v427_v43 = vpack.c.bf16 %v392_v56, %v385_v50  ;;  %v351_v48 = vmul.f32 0.2, %v253_v47 }
  0x56   :  { %v166_v60 = vmul.f32 %v1908_v63, %v80_v53  ;;  %v173_v61 = vmul.f32 %v1908_v63, %v87_v54  ;;  %1060 = vmatprep.mubr.bf16.mxu0 %v428_v55  ;;  %v82_v5 = vunpack.c.l.bf16 %v39_v40  ;;  %v89_v51 = vunpack.c.h.bf16 %v39_v40 }
  0x57   :  { %vm309_vm9 = vcmp.ge.f32.partialorder %v260_v26, 0.0  ;;  %v358_v1 = vmul.f32 0.2, %v260_v26  ;;  %1061 = vmatmul.mubr.bf16.gmra.mxu0 %v427_v43  ;;  %v400_v6 = vsel %vm302_vm8, %v253_v47, %v351_v48  ;;  %v96_v9 = vunpack.c.l.bf16 %v47_v57 }
  0x58   :  { %v252_v7 = vadd.f32 %v1930_v36, %v166_v60  ;;  %v259_v8 = vadd.f32 %v1930_v36, %v173_v61  ;;  %v168_v11 = vmul.f32 %v1936_v45, %v82_v5  ;;  %v175_v12 = vmul.f32 %v1936_v45, %v89_v51 }
  0x59   :  { %v407_v10 = vsel %vm309_vm9, %v260_v26, %v358_v1  ;;  %v95_v13 = vunpack.c.h.bf16 %v46_v0  ;;  %v182_v16 = vmul.f32 %v1936_v45, %v96_v9  ;;  %v94_v19 = vunpack.c.l.bf16 %v46_v0 }
  0x5a   :  { %v435_v14 = vpack.c.bf16 %v407_v10, %v400_v6  ;;  %vm301_vm10 = vcmp.ge.f32.partialorder %v252_v7, 0.0  ;;  %vm308_vm11 = vcmp.ge.f32.partialorder %v259_v8, 0.0  ;;  %v350_v15 = vmul.f32 0.2, %v252_v7 }
  0x5b   :  { %v357_v52 = vmul.f32 0.2, %v259_v8  ;;  %v254_v58 = vadd.f32 %v1944_v41, %v168_v11  ;;  %v261_v62 = vadd.f32 %v1944_v41, %v175_v12  ;;  %v181_v18 = vmul.f32 %v1913_v2, %v95_v13 }
  0x5c   :  { %1068 = vmatprep.mubr.bf16.mxu0 %v435_v14  ;;  %v399_v17 = vsel %vm301_vm10, %v252_v7, %v350_v15  ;;  %v268_v59 = vadd.f32 %v1944_v41, %v182_v16  ;;  %v180_v25 = vmul.f32 %v1908_v63, %v94_v19  ;;  %vm1153_vm1 = vcmask 1041408  }
  0x5d   :  { %v406_v20 = vsel %vm308_vm11, %v259_v8, %v357_v52  ;;  %vm303_vm12 = vcmp.ge.f32.partialorder %v254_v58, 0.0  ;;  %vm310_vm13 = vcmp.ge.f32.partialorder %v261_v62, 0.0  ;;  %v352_v21 = vmul.f32 0.2, %v254_v58 }
  0x5e   :  { %v434_v22 = vpack.c.bf16 %v406_v20, %v399_v17  ;;  %v359_v23 = vmul.f32 0.2, %v261_v62  ;;  %v267_v24 = vadd.f32 %v1918_v27, %v181_v18  ;;  %vm317_vm14 = vcmp.ge.f32.partialorder %v268_v59, 0.0 }
  0x5f   :  { %v401_v4 = vsel %vm303_vm12, %v254_v58, %v352_v21  ;;  %v366_v3 = vmul.f32 0.2, %v268_v59  ;;  %v266_v29 = vadd.f32 %v1930_v36, %v180_v25  ;;  %vm1182_vm2 = vcmask 1040384  }
  0x60   :  { %1069 = vmatmul.mubr.bf16.gmra.mxu0 %v434_v22  ;;  %v408_v45 = vsel %vm310_vm13, %v261_v62, %v359_v23  ;;  %vm316_vm15 = vcmp.ge.f32.partialorder %v267_v24, 0.0  ;;  %v365_v28 = vmul.f32 0.2, %v267_v24 }
  0x61   :  { %v436_v2 = vpack.c.bf16 %v408_v45, %v401_v4  ;;  %v415_v31 = vsel %vm317_vm14, %v268_v59, %v366_v3  ;;  %vm315_vm0 = vcmp.ge.f32.partialorder %v266_v29, 0.0  ;;  %v364_v41 = vmul.f32 0.2, %v266_v29 }
  0x62   :  { %v443_v32 = vpack.c.bf16 %v415_v31, %v415_v31  ;;  %v414_v33 = vsel %vm316_vm15, %v267_v24, %v365_v28 }
  0x63   :  { %1468 = vmatprep.mubr.bf16.mxu1 %v436_v2  ;;  %v442_v34 = vpack.c.bf16 %v414_v33, %v414_v33  ;;  %v413_v27 = vsel %vm315_vm0, %v266_v29, %v364_v41 }
  0x64   :  { %1469 = vmatmul.mubr.bf16.gmra.mxu1 %v443_v32  ;;  %v441_v63 = vpack.c.bf16 %v413_v27, %v413_v27 }
  0x65   :  { %1076 = vmatprep.mubr.bf16.mxu0 %v442_v34 }
  0x68   :  { %1077 = vmatmul.mubr.bf16.gmra.mxu0 %v441_v63 }
  0xe4   :  { %v1332_v30 = vpop.f32.mrf.mxu0 }
  0xe5   :  { %v1372_v42 = vpop.f32.mrf.mxu1 }
  0xe6   :  { %v1333_v35 = vpop.f32.mrf.mxu0 }
  0xe7   :  { %v1373_v37 = vpop.f32.mrf.mxu1  ;;  %v1334_v14 = vadd.f32 %v1333_v35, %v1332_v30 }
  0xe8   :  { %v1335_v38 = vpop.f32.mrf.mxu0  ;;  %v1374_v15 = vadd.f32 %v1373_v37, %v1372_v42 }
  0xe9   :  { %v1375_v44 = vpop.f32.mrf.mxu1 }
  0xea   :  { %v1336_v39 = vpop.f32.mrf.mxu0  ;;  %v991_v19 = vadd.f32 %v1374_v15, %v1334_v14 }
  0xeb   :  { %v1376_v46 = vpop.f32.mrf.mxu1  ;;  %v1337_v52 = vadd.f32 %v1336_v39, %v1335_v38 }
  0xec   :  { %v1338_v36 = vpop.f32.mrf.mxu0  ;;  %v1377_v58 = vadd.f32 %v1376_v46, %v1375_v44 }
  0xee   :  { %v1339_v47 = vpop.f32.mrf.mxu0  ;;  %v994_v20 = vadd.f32 %v1377_v58, %v1337_v52 }
  0xef   :  { %v1340_v4 = vadd.f32 %v1339_v47, %v1338_v36 }
  0xf0   :  { %v1341_v50 = vpop.f32.mrf.mxu0 }
  0xf1   :  { %v1378_v49 = vpop.f32.mrf.mxu1 }
  0xf2   :  { %v1342_v40 = vpop.f32.mrf.mxu0 }
  0xf3   :  { %v1379_v53 = vpop.f32.mrf.mxu1  ;;  %v1343_v29 = vadd.f32 %v1342_v40, %v1341_v50 }
  0xf4   :  { %v1380_v25 = vadd.f32 %v1379_v53, %v1378_v49 }
  0xf5   :  { %v1381_v54 = vpop.f32.mrf.mxu1 }
  0xf6   :  { %v999_v34 = vadd.f32 %v1380_v25, %v1340_v4 }
  0xf7   :  { %v1382_v55 = vpop.f32.mrf.mxu1 }
  0xf8   :  { %v1383_v31 = vadd.f32 %v1382_v55, %v1381_v54 }
  0xfa   :  { %v1002_v42 = vadd.f32 %v1383_v31, %v1343_v29 }
  0xfb   :  { %v1344_v56 = vpop.f32.mrf.mxu0 }
  0xfd   :  { %v1345_v26 = vpop.f32.mrf.mxu0  ;;  %v1384_v57 = vpop.f32.mrf.mxu1 }
  0xfe   :  { %v1346_v27 = vadd.f32 %v1345_v26, %v1344_v56 }
  0xff   :  { %v1347_v43 = vpop.f32.mrf.mxu0  ;;  %v1385_v48 = vpop.f32.mrf.mxu1 }
 0x100   :  { %v1386_v63 = vadd.f32 %v1385_v48, %v1384_v57 }
 0x101   :  { %v1348_v60 = vpop.f32.mrf.mxu0  ;;  %v1387_v61 = vpop.f32.mrf.mxu1 }
 0x102   :  { %v1007_v44 = vadd.f32 %v1386_v63, %v1346_v27  ;;  %v1349_v36 = vadd.f32 %v1348_v60, %v1347_v43 }
 0x103   :  { %v2004_v0 = vpop.f32.mrf.mxu0  ;;  %v1388_v1 = vpop.f32.mrf.mxu1 }
 0x104   :  { %v1389_v47 = vadd.f32 %v1388_v1, %v1387_v61 }
 0x105   :  { %v1351_v5 = vpop.f32.mrf.mxu0  ;;  %v1390_v51 = vpop.f32.mrf.mxu1 }
 0x106   :  { %v1010_v48 = vadd.f32 %v1389_v47, %v1349_v36 }
 0x107   :  { %v1353_v6 = vpop.f32.mrf.mxu0  ;;  %v1391_v7 = vpop.f32.mrf.mxu1 }
 0x108   :  { %v1352_v6 = vadd.f32 %v1351_v5, %v2004_v0 }
 0x109   :  { %v1354_v8 = vpop.f32.mrf.mxu0  ;;  %v1393_v9 = vpop.f32.mrf.mxu1 }
 0x10a   :  { %v1392_v8 = vadd.f32 %v1391_v7, %v1390_v51 }
 0x10b   :  { %v1412_v10 = vpop.f32.mrf.mxu0  ;;  %v1394_v11 = vpop.f32.mrf.mxu1 }
 0x10d   :  { %v1413_v12 = vpop.f32.mrf.mxu0 }
 0x10e   :  { %v1414_v16 = vadd.f32 %v1413_v12, %v1412_v10 }
 0x10f   :  { %v1415_v13 = vpop.f32.mrf.mxu0 }
 0x110   :  { %v1055_v22 = vadd.f32 %v1414_v16, %v991_v19 }
 0x111   :  { %v1416_v62 = vpop.f32.mrf.mxu0 }
 0x112   :  { %v1417_v17 = vadd.f32 %v1416_v62, %v1415_v13  ;;  %v1015_v62 = vadd.f32 %v1392_v8, %v1352_v6 }
 0x113   :  { %v1466_v18 = vpop.f32.mrf.mxu1 }
 0x114   :  { %v1058_v23 = vadd.f32 %v1417_v17, %v994_v20 }
 0x115   :  { %v1118_v21 = vpop.f32.mrf.mxu1 }
 0x116   :  { %v1119_v3 = vadd.f32 %v1118_v21, %v1055_v22 }
 0x117   :  { %v1467_v59 = vpop.f32.mrf.mxu1  ;;  %v1418_v24 = vpop.f32.mrf.mxu0 }
 0x118   :  { %v1162_v61 = vmul.f32 %v1119_v3, %v1119_v3 }
 0x119   :  { %v1121_v45 = vpop.f32.mrf.mxu1  ;;  %v1419_v2 = vpop.f32.mrf.mxu0 }
 0x11a   :  { %v1122_v28 = vadd.f32 %v1121_v45, %v1058_v23  ;;  %v1420_v32 = vadd.f32 %v1419_v2, %v1418_v24 }
 0x11b   :  { %v1421_v41 = vpop.f32.mrf.mxu0 }
 0x11c   :  { %v1302_v33 = vpack.c.bf16 %v1122_v28, %v1119_v3  ;;  %v1063_v35 = vadd.f32 %v1420_v32, %v999_v34  ;;  %v1163_v26 = vmul.f32 %v1122_v28, %v1122_v28  ;;  %v1148_v9 = vadd.f32 %v1122_v28, %v1119_v3 }
 0x11d   :  { %v1422_v30 = vpop.f32.mrf.mxu0 }
 0x11e   :  { %1303 = vst [vmem:[%s2026_s4] sm:$0xff] %v1302_v33   ;;  %v1423_v37 = vadd.f32 %v1422_v30, %v1421_v41  ;;  %v1127_v49 = vadd.f32 %v1466_v18, %v1063_v35  ;;  %v1169_v15 = vadd.f32 %v1163_v26, %v1162_v61 }
 0x120   :  { %v1424_v38 = vpop.f32.mrf.mxu0  ;;  %v1066_v39 = vadd.f32 %v1423_v37, %v1002_v42  ;;  %v1164_v1 = vmul.f32 %v1127_v49, %v1127_v49  ;;  %v1149_v14 = vadd.f32 %v1148_v9, %v1127_v49 }
 0x122   :  { %v1425_v46 = vpop.f32.mrf.mxu0  ;;  %v1130_v50 = vadd.f32 %v1467_v59, %v1066_v39  ;;  %v1170_v51 = vadd.f32 %v1169_v15, %v1164_v1 }
 0x123   :  { %v1426_v53 = vadd.f32 %v1425_v46, %v1424_v38 }
 0x124   :  { %v1427_v54 = vpop.f32.mrf.mxu0  ;;  %v1307_v40 = vpack.c.bf16 %v1130_v50, %v1127_v49  ;;  %v1470_v55 = vpop.f32.mrf.mxu1  ;;  %v1165_v52 = vmul.f32 %v1130_v50, %v1130_v50  ;;  %v1150_v7 = vadd.f32 %v1149_v14, %v1130_v50 }
 0x125   :  { %v1071_v56 = vadd.f32 %v1426_v53, %v1007_v44 }
 0x126   :  { %v1428_v57 = vpop.f32.mrf.mxu0  ;;  %1314 = vst [vmem:[%s2026_s4 + $0x8] sm:$0xff] %v1307_v40   ;;  %v1134_v43 = vpop.f32.mrf.mxu1  ;;  %v1171_v21 = vadd.f32 %v1170_v51, %v1165_v52 }
 0x127   :  { %v1429_v60 = vadd.f32 %v1428_v57, %v1427_v54  ;;  %v1135_v10 = vadd.f32 %v1134_v43, %v1071_v56 }
 0x128   :  { %v1430_v11 = vpop.f32.mrf.mxu0  ;;  %v1471_v12 = vpop.f32.mrf.mxu1 }
 0x129   :  { %v1074_v13 = vadd.f32 %v1429_v60, %v1010_v48  ;;  %v1166_v16 = vmul.f32 %v1135_v10, %v1135_v10  ;;  %v1151_v20 = vadd.f32 %v1150_v7, %v1135_v10 }
 0x12a   :  { %v1431_v58 = vpop.f32.mrf.mxu0  ;;  %v1137_v0 = vpop.f32.mrf.mxu1 }
 0x12b   :  { %v1432_v5 = vadd.f32 %v1431_v58, %v1430_v11  ;;  %v1138_v17 = vadd.f32 %v1137_v0, %v1074_v13  ;;  %v1172_v4 = vadd.f32 %v1171_v21, %v1166_v16 }
 0x12c   :  { %v1433_v18 = vpop.f32.mrf.mxu0 }
 0x12d   :  { %v1079_v19 = vadd.f32 %v1432_v5, %v1015_v62  ;;  %v1167_v22 = vmul.f32 %v1138_v17, %v1138_v17  ;;  %v1312_v23 = vpack.c.bf16 %v1138_v17, %v1135_v10  ;;  %v1152_v25 = vadd.f32 %v1151_v20, %v1138_v17 }
 0x12e   :  { %v1434_v59 = vpop.f32.mrf.mxu0 }
 0x12f   :  { %v1143_v24 = vadd.f32 %v1470_v55, %v1079_v19  ;;  %1315 = vst [vmem:[%s2026_s4 + $0x10] sm:$0xff] %v1312_v23   ;;  %v1173_v28 = vadd.f32 %v1172_v4, %v1167_v22 }
 0x131   :  { %v1154_v45 = vsel %vm1153_vm1, %v1143_v24, 0.0  ;;  %v1168_v3 = vmul.f32 %v1143_v24, %v1143_v24  ;;  %v1298_v2 = vpack.c.bf16 %v1143_v24, %v1143_v24 }
 0x132   :  { %v1155_v29 = vadd.f32 %v1154_v45, %v1152_v25 }
 0x133   :  { %v1174_v31 = vsel %vm1153_vm1, %v1168_v3, 0.0  ;;  %1220 = vst [vmem:[%s2026_s4 + $0x18] sm:$0x1] %v1298_v2 }
 0x134   :  { %v1156_v32 = vrot.slane %v1155_v29, 4  ;;  %v1175_v33 = vadd.f32 %v1174_v31, %v1173_v28 }
 0x136   :  { %v1157_v41 = vadd.f32 %v1156_v32, %v1155_v29  ;;  %v1176_v34 = vrot.slane %v1175_v33, 4 }
 0x138   :  { %v1158_v27 = vrot.slane %v1157_v41, 2  ;;  %v1177_v63 = vadd.f32 %v1176_v34, %v1175_v33 }
 0x13a   :  { %v1159_v30 = vadd.f32 %v1158_v27, %v1157_v41  ;;  %v1178_v42 = vrot.slane %v1177_v63, 2 }
 0x13c   :  { %v1160_v35 = vrot.slane %v1159_v30, 1  ;;  %v1179_v37 = vadd.f32 %v1178_v42, %v1177_v63 }
 0x13e   :  { %v1180_v38 = vrot.slane %v1179_v37, 1  ;;  %v1161_v39 = vadd.f32 %v1160_v35, %v1159_v30 }
 0x140   :  { %v1181_v44 = vadd.f32 %v1180_v38, %v1179_v37 }
 0x142   :  { %v1183_v36 = vsel %vm1182_vm2, %v1161_v39, %v1181_v44 }
 0x143   :  { %1184 = vst [vmem:[%s2027_s5] sm:$0x3] %v1183_v36 }

// kernel: tile.73
= control target key start
LH: loop header
LB: loop body
LE: loop exit
PB: predicated region body
PF: predicated region fallthrough
CT: control target
= control target key end

     0   :  { %s40_s0 = inlined_call_operand.vmem [shape: f32[64], index: 0, kind: input, shape index: {}]   ;;  %s41_s1 = inlined_call_operand.vmem [shape: f32[25,64], index: 1, kind: output, shape index: {}]  }
   0x1   :  { %v4_v0 = vld [vmem:[%s40_s0] ss:$0 sm:$0xff] }
   0x2   :  { %5 = vst [vmem:[%s41_s1] sm:$0xff] %v4_v0  ;;  %12 = vst [vmem:[%s41_s1 + $0x8] sm:$0xff] %v4_v0 }
   0x3   :  { %13 = vst [vmem:[%s41_s1 + $0x10] sm:$0xff] %v4_v0  ;;  %14 = vst [vmem:[%s41_s1 + $0x18] sm:$0xff] %v4_v0 }

// kernel: tile.74
= control target key start
LH: loop header
LB: loop body
LE: loop exit
PB: predicated region body
PF: predicated region fallthrough
CT: control target
= control target key end

     0   :  { %vm3_vm0 = vcmask 523264   ;;  %s29_s10 = smov 64   ;;  %vm14_vm1 = vcmask 1048064   ;;  %s64_s0 = inlined_call_operand.vmem [shape: f32[25,64], index: 0, kind: input, shape index: {}]   ;;  %s65_s1 = inlined_call_operand.vmem [shape: f32[1600], index: 1, kind: output, shape index: {}]  }
   0x1   :  { %v25_v0 = vld [vmem:[%s64_s0 + $0x1] ss:$2 sm:$0xff]   ;;  %v2_v1 = vld [vmem:[%s64_s0] ss:$2 sm:$0xff]  }
   0x2   :  { %12 = vrot.lane.b32.xlu0 %v25_v0, %s29_s10  ;;  %v23_v2 = vld [vmem:[%s64_s0 + $0x10] ss:$2 sm:$0x1f]   ;;  %4 = vst.msk [vmem:[%s65_s1] sm:$0xff] %vm3_vm0, %v2_v1  }
   0x3   :  { %v26_v3 = vld [vmem:[%s64_s0 + $0x11] ss:$2 sm:$0xf]   ;;  %24 = vst.msk [vmem:[%s65_s1 + $0x8] sm:$0x1f] %vm3_vm0, %v23_v2  }
   0x6   :  { %18 = vrot.lane.b32.xlu0 %v26_v3, %s29_s10 }
  0x74   :  { %v13_v4 = vpop.permute.xlu0 %12  }
  0x75   :  { %15 = vst.msk [vmem:[%s65_s1] sm:$0xff] %vm14_vm1, %v13_v4  }
  0x78   :  { %v19_v5 = vpop.permute.xlu0 %18  }
  0x79   :  { %27 = vst.msk [vmem:[%s65_s1 + $0x8] sm:$0xf] %vm14_vm1, %v19_v5  }

// kernel: discriminator_forward.9
= control target key start
LH: loop header
LB: loop body
LE: loop exit
PB: predicated region body
PF: predicated region fallthrough
CT: control target
= control target key end

     0   :  { %v31_v20 = vlaneseq  ;;  %v1927_v49 = vmov 1983009808   ;;  %s2379_s0 = inlined_call_operand.vmem [shape: bf16[1,2,1664], index: 0, kind: input, shape index: {}]   ;;  %s2380_s1 = inlined_call_operand.vmem [shape: bf16[1664,128], index: 1, kind: input, shape index: {}]   ;;  %s2381_s2 = inlined_call_operand.vmem [shape: f32[1,1664], index: 2, kind: input, shape index: {}]   ;;  %s2382_s3 = inlined_call_operand.vmem [shape: f32[1,1664], index: 3, kind: input, shape index: {}]   ;;  %s2383_s4 = inlined_call_operand.vmem [shape: f32[1,2,128], index: 4, kind: output, shape index: {0}]   ;;  %s2384_s5 = inlined_call_operand.hbm [shape: f32[1,2,128], index: 5, kind: output, shape index: {1}]  }
   0x1   :  { %v1797_v0 = vld [vmem:[%s2380_s1 + $0x78] sm:$0xff]   ;;  %v1801_v4 = vld [vmem:[%s2380_s1 + $0x70] sm:$0xff]   ;;  %v1805_v8 = vld [vmem:[%s2380_s1 + $0x68] sm:$0xff]   ;;  %v86_v50 = vunpack.c.l.s4 %v1927_v49 }
   0x2   :  { %v1798_v1 = vld [vmem:[%s2380_s1 + $0xf8] sm:$0xff]   ;;  %1632 = vmatprep.subr.bf16.mxu0 %v1797_v0  ;;  %v1802_v5 = vld [vmem:[%s2380_s1 + $0xf0] sm:$0xff]   ;;  %v1806_v9 = vld [vmem:[%s2380_s1 + $0xe8] sm:$0xff]   ;;  %v2033_v25 = vshrl.u32 %v31_v20, 7 }
   0x3   :  { %v1799_v2 = vld [vmem:[%s2380_s1 + $0x38] sm:$0xff]   ;;  %1654 = vmatprep.subr.bf16.mxu1 %v1798_v1  ;;  %v1803_v6 = vld [vmem:[%s2380_s1 + $0x30] sm:$0xff]   ;;  %v1807_v10 = vld [vmem:[%s2380_s1 + $0x28] sm:$0xff]   ;;  %v87_v59 = vunpack.c.0.s8 %v86_v50 }
   0x4   :  { %v1800_v3 = vld [vmem:[%s2380_s1 + $0xb8] sm:$0xff]   ;;  %1633 = vmatpush3.bf16.msra.mxu0 %v1799_v2  ;;  %v1804_v7 = vld [vmem:[%s2380_s1 + $0xb0] sm:$0xff]   ;;  %v1808_v11 = vld [vmem:[%s2380_s1 + $0xa8] sm:$0xff]   ;;  %v2048_v30 = vsub.s32 0, %v2033_v25  ;;  %v2054_v32 = vsub.s32 1, %v2033_v25  ;;  %v2060_v34 = vsub.s32 2, %v2033_v25 }
   0x5   :  { %1655 = vmatpush3.bf16.msra.mxu1 %v1800_v3  ;;  %1634 = vmatprep.subr.bf16.mxu0 %v1801_v4  ;;  %v1809_v12 = vld [vmem:[%s2380_s1 + $0x60] sm:$0xff]   ;;  %v1813_v16 = vld [vmem:[%s2380_s1 + $0x58] sm:$0xff]   ;;  %v1817_v21 = vld [vmem:[%s2380_s1 + $0x50] sm:$0xff]   ;;  %v2066_v36 = vsub.s32 3, %v2033_v25  ;;  %v2072_v38 = vsub.s32 4, %v2033_v25  ;;  %v53_v41 = vsub.s32 5, %v2033_v25  ;;  %v2102_v63 = vsub.s32 %v87_v59, %v2033_v25 }
   0x6   :  { %1656 = vmatprep.subr.bf16.mxu1 %v1802_v5  ;;  %v1810_v13 = vld [vmem:[%s2380_s1 + $0xe0] sm:$0xff]   ;;  %v1814_v17 = vld [vmem:[%s2380_s1 + $0xd8] sm:$0xff]   ;;  %v1818_v22 = vld [vmem:[%s2380_s1 + $0xd0] sm:$0xff]   ;;  %v57_v42 = vsub.s32 6, %v2033_v25  ;;  %v61_v46 = vsub.s32 7, %v2033_v25 }
   0x7   :  { %v1811_v14 = vld [vmem:[%s2380_s1 + $0x20] sm:$0xff]   ;;  %v1815_v18 = vld [vmem:[%s2380_s1 + $0x18] sm:$0xff]   ;;  %v1819_v23 = vld [vmem:[%s2380_s1 + $0x10] sm:$0xff]  }
   0x8   :  { %1635 = vmatpush3.bf16.msra.mxu0 %v1803_v6  ;;  %v1812_v15 = vld [vmem:[%s2380_s1 + $0xa0] sm:$0xff]   ;;  %v1816_v19 = vld [vmem:[%s2380_s1 + $0x98] sm:$0xff]   ;;  %v1820_v24 = vld [vmem:[%s2380_s1 + $0x90] sm:$0xff]  }
   0x9   :  { %1657 = vmatpush3.bf16.msra.mxu1 %v1804_v7  ;;  %1636 = vmatprep.subr.bf16.mxu0 %v1805_v8  ;;  %v1821_v26 = vld [vmem:[%s2380_s1 + $0x48] sm:$0xff]   ;;  %v1825_v31 = vld [vmem:[%s2380_s1 + $0x40] sm:$0xff]   ;;  %v1829_v45 = vld [vmem:[%s2380_s1 + $0x178] sm:$0xff]  }
   0xa   :  { %1658 = vmatprep.subr.bf16.mxu1 %v1806_v9  ;;  %v1822_v27 = vld [vmem:[%s2380_s1 + $0xc8] sm:$0xff]   ;;  %v1826_v33 = vld [vmem:[%s2380_s1 + $0xc0] sm:$0xff]   ;;  %v1831_v55 = vld [vmem:[%s2380_s1 + $0x1f8] sm:$0xff]  }
   0xb   :  { %v1823_v28 = vld [vmem:[%s2380_s1 + $0x8] sm:$0xff]   ;;  %v1827_v35 = vld [vmem:[%s2380_s1] sm:$0xff]  }
   0xc   :  { %1637 = vmatpush3.bf16.msra.mxu0 %v1807_v10  ;;  %v1824_v29 = vld [vmem:[%s2380_s1 + $0x88] sm:$0xff]   ;;  %v1828_v37 = vld [vmem:[%s2380_s1 + $0x80] sm:$0xff]  }
   0xd   :  { %1659 = vmatpush3.bf16.msra.mxu1 %v1808_v11  ;;  %1638 = vmatprep.subr.bf16.mxu0 %v1809_v12  ;;  %v27_v39 = vld [vmem:[%s2381_s2] sm:$0xff]  ;;  %v1837_v50 = vld [vmem:[%s2380_s1 + $0x168] sm:$0xff]  }
   0xe   :  { %1660 = vmatprep.subr.bf16.mxu1 %v1810_v13  ;;  %v149_v40 = vld [vmem:[%s2382_s3] sm:$0xff]  ;;  %v34_v43 = vrot.slane %v27_v39, %v2048_v30  ;;  %v38_v44 = vrot.slane %v27_v39, %v2054_v32  ;;  %v42_v47 = vrot.slane %v27_v39, %v2060_v34  ;;  %v46_v48 = vrot.slane %v27_v39, %v2066_v36 }
   0xf   :  { %v156_v51 = vrot.slane %v149_v40, %v2048_v30  ;;  %v160_v52 = vrot.slane %v149_v40, %v2054_v32  ;;  %v164_v53 = vrot.slane %v149_v40, %v2060_v34  ;;  %v168_v54 = vrot.slane %v149_v40, %v2066_v36  ;;  %v21_v56 = vld [vmem:[%s2379_s0] sm:$0xff] }
  0x10   :  { %1639 = vmatpush3.bf16.msra.mxu0 %v1811_v14  ;;  %v83_v57 = vcombine.low %v34_v43, %v38_v44  ;;  %v84_v58 = vcombine.low %v42_v47, %v46_v48  ;;  %v50_v62 = vrot.slane %v27_v39, %v2072_v38  ;;  %v54_v0 = vrot.slane %v27_v39, %v53_v41  ;;  %v1833_v44 = vld [vmem:[%s2380_s1 + $0x170] sm:$0xff]   ;;  %v1842_v59 = vld [vmem:[%s2380_s1 + $0x120] sm:$0xff]  }
  0x11   :  { %1661 = vmatpush3.bf16.msra.mxu1 %v1812_v15  ;;  %1640 = vmatprep.subr.bf16.mxu0 %v1813_v16  ;;  %v205_v60 = vcombine.low %v156_v51, %v160_v52  ;;  %v206_v61 = vcombine.low %v164_v53, %v168_v54  ;;  %v58_v1 = vrot.slane %v27_v39, %v57_v42  ;;  %v23_v3 = vunpack.c.l.bf16 %v21_v56  ;;  %v1835_v47 = vld [vmem:[%s2380_s1 + $0x1f0] sm:$0xff]   ;;  %v1839_v52 = vld [vmem:[%s2380_s1 + $0x1e8] sm:$0xff]  }
  0x12   :  { %1662 = vmatprep.subr.bf16.mxu1 %v1814_v17  ;;  %v62_v2 = vrot.slane %v27_v39, %v61_v46  ;;  %v91_v4 = vrot.slane %v83_v57, %v2102_v63  ;;  %v98_v5 = vrot.slane %v84_v58, %v2102_v63  ;;  %v100_v10 = vcombine.low %v50_v62, %v54_v0  ;;  %v1834_v48 = vld [vmem:[%s2380_s1 + $0x130] sm:$0xff]   ;;  %v1838_v53 = vld [vmem:[%s2380_s1 + $0x128] sm:$0xff]   ;;  %v1843_v57 = vld [vmem:[%s2380_s1 + $0x1e0] sm:$0xff]  }
  0x13   :  { %v213_v6 = vrot.slane %v205_v60, %v2102_v63  ;;  %v220_v7 = vrot.slane %v206_v61, %v2102_v63  ;;  %v172_v12 = vrot.slane %v149_v40, %v2072_v38  ;;  %v176_v13 = vrot.slane %v149_v40, %v53_v41  ;;  %v1836_v51 = vld [vmem:[%s2380_s1 + $0x1b0] sm:$0xff]   ;;  %v1840_v54 = vld [vmem:[%s2380_s1 + $0x1a8] sm:$0xff]   ;;  %v1845_v62 = vld [vmem:[%s2380_s1 + $0x158] sm:$0xff]  }
  0x14   :  { %1641 = vmatpush3.bf16.msra.mxu0 %v1815_v18  ;;  %v99_v8 = vcombine.low %v91_v4, %v98_v5  ;;  %v101_v11 = vcombine.low %v58_v1, %v62_v2  ;;  %v180_v14 = vrot.slane %v149_v40, %v57_v42  ;;  %v184_v15 = vrot.slane %v149_v40, %v61_v46  ;;  %v1830_v40 = vld [vmem:[%s2380_s1 + $0x138] sm:$0xff]   ;;  %v1844_v0 = vld [vmem:[%s2380_s1 + $0x1a0] sm:$0xff]  }
  0x15   :  { %1663 = vmatpush3.bf16.msra.mxu1 %v1816_v19  ;;  %1642 = vmatprep.subr.bf16.mxu0 %v1817_v21  ;;  %v221_v9 = vcombine.low %v213_v6, %v220_v7  ;;  %v108_v18 = vrot.slane %v100_v10, %v2102_v63  ;;  %v222_v20 = vcombine.low %v172_v12, %v176_v13  ;;  %v1832_v46 = vld [vmem:[%s2380_s1 + $0x1b8] sm:$0xff]   ;;  %v1849_v7 = vld [vmem:[%s2380_s1 + $0x150] sm:$0xff]   ;;  %v1853_v12 = vld [vmem:[%s2380_s1 + $0x148] sm:$0xff]  }
  0x16   :  { %1664 = vmatprep.subr.bf16.mxu1 %v1818_v22  ;;  %v145_v16 = vmul.f32 %v99_v8, %v23_v3  ;;  %v115_v19 = vrot.slane %v101_v11, %v2102_v63  ;;  %v223_v21 = vcombine.low %v180_v14, %v184_v15  ;;  %v1847_v3 = vld [vmem:[%s2380_s1 + $0x1d8] sm:$0xff]   ;;  %v1851_v10 = vld [vmem:[%s2380_s1 + $0x1d0] sm:$0xff]   ;;  %v1855_v14 = vld [vmem:[%s2380_s1 + $0x1c8] sm:$0xff]  }
  0x17   :  { %v1846_v4 = vld [vmem:[%s2380_s1 + $0x118] sm:$0xff]   ;;  %v1850_v11 = vld [vmem:[%s2380_s1 + $0x110] sm:$0xff]   ;;  %v1854_v15 = vld [vmem:[%s2380_s1 + $0x108] sm:$0xff]  }
  0x18   :  { %1643 = vmatpush3.bf16.msra.mxu0 %v1819_v23  ;;  %v267_v17 = vadd.f32 %v221_v9, %v145_v16  ;;  %v24_v23 = vunpack.c.h.bf16 %v21_v56  ;;  %v116_v25 = vcombine.low %v108_v18, %v115_v19  ;;  %v1848_v8 = vld [vmem:[%s2380_s1 + $0x198] sm:$0xff]   ;;  %v1852_v13 = vld [vmem:[%s2380_s1 + $0x190] sm:$0xff]   ;;  %v1857_v16 = vld [vmem:[%s2380_s1 + $0x140] sm:$0xff]  }
  0x19   :  { %1665 = vmatpush3.bf16.msra.mxu1 %v1820_v24  ;;  %1644 = vmatprep.subr.bf16.mxu0 %v1821_v26  ;;  %v1859_v18 = vld [vmem:[%s2380_s1 + $0x1c0] sm:$0xff]  }
  0x1a   :  { %1666 = vmatprep.subr.bf16.mxu1 %v1822_v27  ;;  %vm271_vm0 = vcmp.ge.f32.partialorder %v267_v17, 0.0  ;;  %v275_v22 = vmul.f32 0.2, %v267_v17  ;;  %v146_v41 = vmul.f32 %v116_v25, %v24_v23  ;;  %v1858_v19 = vld [vmem:[%s2380_s1 + $0x100] sm:$0xff]   ;;  %v1863_v23 = vld [vmem:[%s2380_s1 + $0x2f8] sm:$0xff]  }
  0x1c   :  { %1645 = vmatpush3.bf16.msra.mxu0 %v1823_v28  ;;  %v279_v24 = vsel %vm271_vm0, %v267_v17, %v275_v22  ;;  %v230_v28 = vrot.slane %v222_v20, %v2102_v63  ;;  %v1856_v17 = vld [vmem:[%s2380_s1 + $0x188] sm:$0xff]   ;;  %v1861_v20 = vld [vmem:[%s2380_s1 + $0x278] sm:$0xff]  }
  0x1d   :  { %1667 = vmatpush3.bf16.msra.mxu1 %v1824_v29  ;;  %1646 = vmatprep.subr.bf16.mxu0 %v1825_v31  ;;  %v294_v26 = vrot.slane %v279_v24, %v2102_v63  ;;  %v287_v27 = vcombine.high %v279_v24, %v279_v24  ;;  %v237_v29 = vrot.slane %v223_v21, %v2102_v63  ;;  %v1860_v21 = vld [vmem:[%s2380_s1 + $0x180] sm:$0xff]   ;;  %v1862_v24 = vld [vmem:[%s2380_s1 + $0x238] sm:$0xff]  }
  0x1e   :  { %1668 = vmatprep.subr.bf16.mxu1 %v1826_v33 }
  0x1f   :  { %v302_v31 = vcombine.high %v294_v26, %v294_v26  ;;  %v301_v33 = vrot.slane %v287_v27, %v2102_v63  ;;  %v238_v42 = vcombine.low %v230_v28, %v237_v29  ;;  %v1864_v27 = vld [vmem:[%s2380_s1 + $0x2b8] sm:$0xff]   ;;  %v1867_v28 = vld [vmem:[%s2380_s1 + $0x2f0] sm:$0xff]  }
  0x20   :  { %1647 = vmatpush3.bf16.msra.mxu0 %v1827_v35  ;;  %v358_v35 = vpack.c.bf16 %v294_v26, %v294_v26  ;;  %v1865_v26 = vld [vmem:[%s2380_s1 + $0x270] sm:$0xff]  }
  0x21   :  { %1669 = vmatpush3.bf16.msra.mxu1 %v1828_v37  ;;  %1676 = vmatprep.subr.bf16.mxu0 %v1829_v45  ;;  %v359_v37 = vpack.c.bf16 %v302_v31, %v302_v31  ;;  %v303_v39 = vcombine.high %v301_v33, %v301_v33  ;;  %v360_v43 = vpack.c.bf16 %v301_v33, %v301_v33  ;;  %v1866_v29 = vld [vmem:[%s2380_s1 + $0x230] sm:$0xff]   ;;  %v1869_v31 = vld [vmem:[%s2380_s1 + $0x268] sm:$0xff]  }
  0x22   :  { %1698 = vmatprep.subr.bf16.mxu1 %v1831_v55  ;;  %v268_v49 = vadd.f32 %v238_v42, %v146_v41  ;;  %v1841_v55 = vld [vmem:[%s2380_s1 + $0x160] sm:$0xff]   ;;  %v1868_v33 = vld [vmem:[%s2380_s1 + $0x2b0] sm:$0xff]   ;;  %v2249_v41 = vld [vmem:[%s2381_s2 + $0x8] sm:$0x1f] }
  0x23   :  { %1235 = vmatprep.mubr.bf16.mxu0 %v359_v37  ;;  %v361_v45 = vpack.c.bf16 %v303_v39, %v303_v39  ;;  %v1870_v37 = vld [vmem:[%s2380_s1 + $0x228] sm:$0xff]   ;;  %v1874_v42 = vld [vmem:[%s2380_s1 + $0x220] sm:$0xff]  }
  0x24   :  { %1236 = vmatmul.mubr.bf16.vlgmr.msra.gmra.mxu0 %v358_v35  ;;  %vm272_vm1 = vcmp.ge.f32.partialorder %v268_v49, 0.0  ;;  %v276_v56 = vmul.f32 0.2, %v268_v49  ;;  %v1871_v35 = vld [vmem:[%s2380_s1 + $0x2e8] sm:$0xff]  }
  0x25   :  { %1275 = vmatprep.mubr.bf16.mxu1 %v361_v45  ;;  %1677 = vmatpush3.bf16.msra.mxu0 %v1830_v40  ;;  %v1872_v39 = vld [vmem:[%s2380_s1 + $0x2a8] sm:$0xff]   ;;  %v1873_v40 = vld [vmem:[%s2380_s1 + $0x260] sm:$0xff]   ;;  %v74_v45 = vrot.slane %v2249_v41, %v2060_v34 }
  0x26   :  { %1276 = vmatmul.mubr.bf16.vlgmr.msra.gmra.mxu1 %v360_v43  ;;  %1678 = vmatprep.subr.bf16.mxu0 %v1833_v44  ;;  %v280_v58 = vsel %vm272_vm1, %v268_v49, %v276_v56  ;;  %v66_v43 = vrot.slane %v2249_v41, %v2048_v30  ;;  %v70_v44 = vrot.slane %v2249_v41, %v2054_v32 }
  0x27   :  { %1699 = vmatpush3.bf16.msra.mxu1 %v1832_v46  ;;  %v311_v60 = vrot.slane %v280_v58, %v2102_v63  ;;  %v304_v61 = vcombine.high %v280_v58, %v280_v58  ;;  %v2263_v46 = vld [vmem:[%s2382_s3 + $0x8] sm:$0x1f] }
  0x28   :  { %1700 = vmatprep.subr.bf16.mxu1 %v1835_v47  ;;  %v1875_v47 = vld [vmem:[%s2380_s1 + $0x2e0] sm:$0xff]   ;;  %v188_v49 = vrot.slane %v2263_v46, %v2048_v30  ;;  %v1877_v30 = vld [vmem:[%s2380_s1 + $0x258] sm:$0xff]  }
  0x29   :  { %1679 = vmatpush3.bf16.msra.mxu0 %v1834_v48  ;;  %v319_v1 = vcombine.high %v311_v60, %v311_v60  ;;  %v318_v2 = vrot.slane %v304_v61, %v2102_v63  ;;  %v362_v22 = vpack.c.bf16 %v311_v60, %v311_v60  ;;  %v78_v48 = vrot.slane %v2249_v41, %v2066_v36  ;;  %v1878_v61 = vld [vmem:[%s2380_s1 + $0x218] sm:$0xff]  }
  0x2a   :  { %1680 = vmatprep.subr.bf16.mxu0 %v1837_v50  ;;  %v192_v50 = vrot.slane %v2263_v46, %v2054_v32 }
  0x2b   :  { %1701 = vmatpush3.bf16.msra.mxu1 %v1836_v51  ;;  %v363_v5 = vpack.c.bf16 %v319_v1, %v319_v1  ;;  %v320_v6 = vcombine.high %v318_v2, %v318_v2  ;;  %v364_v25 = vpack.c.bf16 %v318_v2, %v318_v2  ;;  %v196_v51 = vrot.slane %v2263_v46, %v2060_v34  ;;  %v1876_v34 = vld [vmem:[%s2380_s1 + $0x2a0] sm:$0xff]   ;;  %v1880_v2 = vld [vmem:[%s2380_s1 + $0x298] sm:$0xff]  }
  0x2c   :  { %1702 = vmatprep.subr.bf16.mxu1 %v1839_v52  ;;  %v2279_v52 = vld [vmem:[%s2379_s0 + $0x8] sm:$0x1f]  ;;  %v239_v32 = vcombine.low %v188_v49, %v192_v50 }
  0x2d   :  { %1681 = vmatpush3.bf16.msra.mxu0 %v1838_v53  ;;  %1315 = vmatprep.mubr.bf16.mxu0 %v363_v5  ;;  %v365_v9 = vpack.c.bf16 %v320_v6, %v320_v6  ;;  %v117_v53 = vcombine.low %v66_v43, %v70_v44  ;;  %v25_v58 = vunpack.c.l.bf16 %v2279_v52 }
  0x2e   :  { %1682 = vmatprep.subr.bf16.mxu0 %v1841_v55  ;;  %v118_v55 = vcombine.low %v74_v45, %v78_v48  ;;  %v247_v60 = vrot.slane %v239_v32, %v2102_v63 }
  0x2f   :  { %1703 = vmatpush3.bf16.msra.mxu1 %v1840_v54  ;;  %1355 = vmatprep.mubr.bf16.mxu1 %v365_v9  ;;  %v200_v54 = vrot.slane %v2263_v46, %v2066_v36  ;;  %v125_v56 = vrot.slane %v117_v53, %v2102_v63  ;;  %v1879_v36 = vld [vmem:[%s2380_s1 + $0x2d8] sm:$0xff]  }
  0x30   :  { %1704 = vmatprep.subr.bf16.mxu1 %v1843_v57 }
  0x31   :  { %1683 = vmatpush3.bf16.msra.mxu0 %v1842_v59  ;;  %v240_v57 = vcombine.low %v196_v51, %v200_v54  ;;  %v132_v59 = vrot.slane %v118_v55, %v2102_v63 }
  0x32   :  { %1684 = vmatprep.subr.bf16.mxu0 %v1845_v62 }
  0x33   :  { %1705 = vmatpush3.bf16.msra.mxu1 %v1844_v0  ;;  %v254_v62 = vrot.slane %v240_v57, %v2102_v63  ;;  %v1881_v0 = vld [vmem:[%s2380_s1 + $0x250] sm:$0xff]   ;;  %v133_v1 = vcombine.low %v125_v56, %v132_v59 }
  0x34   :  { %1706 = vmatprep.subr.bf16.mxu1 %v1847_v3 }
  0x35   :  { %1685 = vmatpush3.bf16.msra.mxu0 %v1846_v4  ;;  %v255_v3 = vcombine.low %v247_v60, %v254_v62  ;;  %v1883_v4 = vld [vmem:[%s2380_s1 + $0x2d0] sm:$0xff]   ;;  %v147_v5 = vmul.f32 %v133_v1, %v25_v58 }
  0x36   :  { %1686 = vmatprep.subr.bf16.mxu0 %v1849_v7 }
  0x37   :  { %1707 = vmatpush3.bf16.msra.mxu1 %v1848_v8 }
  0x38   :  { %1708 = vmatprep.subr.bf16.mxu1 %v1851_v10 }
  0x39   :  { %1687 = vmatpush3.bf16.msra.mxu0 %v1850_v11 }
  0x3a   :  { %1688 = vmatprep.subr.bf16.mxu0 %v1853_v12 }
  0x3b   :  { %1709 = vmatpush3.bf16.msra.mxu1 %v1852_v13 }
  0x3c   :  { %1710 = vmatprep.subr.bf16.mxu1 %v1855_v14 }
  0x3d   :  { %1689 = vmatpush3.bf16.msra.mxu0 %v1854_v15 }
  0x3e   :  { %1690 = vmatprep.subr.bf16.mxu0 %v1857_v16 }
  0x3f   :  { %1711 = vmatpush3.bf16.msra.mxu1 %v1856_v17 }
  0x40   :  { %1712 = vmatprep.subr.bf16.mxu1 %v1859_v18 }
  0x41   :  { %1691 = vmatpush3.bf16.msra.mxu0 %v1858_v19 }
  0x42   :  { %1720 = vmatprep.subr.bf16.mxu0 %v1861_v20 }
  0x43   :  { %1713 = vmatpush3.bf16.msra.mxu1 %v1860_v21 }
  0x44   :  { %1316 = vmatmul.mubr.bf16.vlgmr.msra.gmra.mxu0 %v362_v22  ;;  %1742 = vmatprep.subr.bf16.mxu1 %v1863_v23 }
  0x45   :  { %1721 = vmatpush3.bf16.msra.mxu0 %v1862_v24 }
  0x46   :  { %1356 = vmatmul.mubr.bf16.vlgmr.msra.gmra.mxu1 %v364_v25  ;;  %1722 = vmatprep.subr.bf16.mxu0 %v1865_v26 }
  0x47   :  { %1743 = vmatpush3.bf16.msra.mxu1 %v1864_v27 }
  0x48   :  { %1744 = vmatprep.subr.bf16.mxu1 %v1867_v28 }
  0x49   :  { %1723 = vmatpush3.bf16.msra.mxu0 %v1866_v29 }
  0x4a   :  { %1724 = vmatprep.subr.bf16.mxu0 %v1869_v31 }
  0x4b   :  { %1745 = vmatpush3.bf16.msra.mxu1 %v1868_v33 }
  0x4c   :  { %1746 = vmatprep.subr.bf16.mxu1 %v1871_v35 }
  0x4d   :  { %1725 = vmatpush3.bf16.msra.mxu0 %v1870_v37 }
  0x4e   :  { %1726 = vmatprep.subr.bf16.mxu0 %v1873_v40 }
  0x4f   :  { %1747 = vmatpush3.bf16.msra.mxu1 %v1872_v39 }
  0x50   :  { %1748 = vmatprep.subr.bf16.mxu1 %v1875_v47 }
  0x51   :  { %1727 = vmatpush3.bf16.msra.mxu0 %v1874_v42 }
  0x52   :  { %1728 = vmatprep.subr.bf16.mxu0 %v1877_v30 }
  0x53   :  { %1749 = vmatpush3.bf16.msra.mxu1 %v1876_v34 }
  0x54   :  { %1750 = vmatprep.subr.bf16.mxu1 %v1879_v36 }
  0x55   :  { %11 = vsyncpa [#allocation3], 0  ;;  %1729 = vmatpush3.bf16.msra.mxu0 %v1878_v61  ;;  %v1882_v6 = vld [vmem:[%s2380_s1 + $0x210] sm:$0xff]   ;;  %v1885_v7 = vld [vmem:[%s2380_s1 + $0x248] sm:$0xff]   ;;  %v269_v8 = vadd.f32 %v255_v3, %v147_v5  ;;  %v1928_v28 = vmov 0.0   ;;  %vm1929_vm3 = vmmov 0   ;;  %v82_v33 = vrot.slane %v2249_v41, %v2072_v38 }
  0x56   :  { %1730 = vmatprep.subr.bf16.mxu0 %v1881_v0  ;;  %v1884_v9 = vld [vmem:[%s2380_s1 + $0x290] sm:$0xff]   ;;  %v1887_v10 = vld [vmem:[%s2380_s1 + $0x2c8] sm:$0xff]   ;;  %v1889_v13 = vld [vmem:[%s2380_s1 + $0x240] sm:$0xff]   ;;  %v26_v37 = vunpack.c.h.bf16 %v2279_v52  ;;  %v204_v40 = vrot.slane %v2263_v46, %v2072_v38  ;;  %vm1483_vm5 = vcmask 1041408   ;;  %vm1499_vm6 = vcmask 1040384  }
  0x57   :  { %1751 = vmatpush3.bf16.msra.mxu1 %v1880_v2  ;;  %vm273_vm2 = vcmp.ge.f32.partialorder %v269_v8, 0.0  ;;  %v277_v11 = vmul.f32 0.2, %v269_v8  ;;  %v1886_v12 = vld [vmem:[%s2380_s1 + $0x208] sm:$0xff]   ;;  %v1891_v18 = vld [vmem:[%s2380_s1 + $0x2c0] sm:$0xff]   ;;  %v1893_v27 = vld [vmem:[%s2380_s1 + $0x338] sm:$0xff]   ;;  %v140_v39 = vrot.slane %v82_v33, %v2102_v63 }
  0x58   :  { %1752 = vmatprep.subr.bf16.mxu1 %v1883_v4  ;;  %v1888_v15 = vld [vmem:[%s2380_s1 + $0x288] sm:$0xff]   ;;  %v1890_v19 = vld [vmem:[%s2380_s1 + $0x200] sm:$0xff]   ;;  %v1894_v31 = vld [vmem:[%s2380_s1 + $0x330] sm:$0xff]   ;;  %v262_v43 = vrot.slane %v204_v40, %v2102_v63 }
  0x59   :  { %1731 = vmatpush3.bf16.msra.mxu0 %v1882_v6  ;;  %v281_v14 = vsel %vm273_vm2, %v269_v8, %v277_v11  ;;  %v1892_v23 = vld [vmem:[%s2380_s1 + $0x280] sm:$0xff]   ;;  %v1895_v35 = vld [vmem:[%s2380_s1 + $0x328] sm:$0xff]   ;;  %v148_v42 = vmul.f32 %v140_v39, %v26_v37  ;;  %v1897_v44 = vld [vmem:[%s2380_s1 + $0x318] sm:$0xff]  }
  0x5a   :  { %1732 = vmatprep.subr.bf16.mxu0 %v1885_v7  ;;  %v328_v16 = vrot.slane %v281_v14, %v2102_v63  ;;  %v321_v17 = vcombine.high %v281_v14, %v281_v14  ;;  %v1896_v41 = vld [vmem:[%s2380_s1 + $0x320] sm:$0xff]   ;;  %v1898_v38 = vld [vmem:[%s2380_s1 + $0x310] sm:$0xff]   ;;  %v1899_v47 = vld [vmem:[%s2380_s1 + $0x308] sm:$0xff]  }
  0x5b   :  { %1753 = vmatpush3.bf16.msra.mxu1 %v1884_v9  ;;  %v270_v45 = vadd.f32 %v262_v43, %v148_v42  ;;  %v1900_v50 = vld [vmem:[%s2380_s1 + $0x300] sm:$0xff]   ;;  %s1930_s1 = smov [#allocation2]  }
  0x5c   :  { %1754 = vmatprep.subr.bf16.mxu1 %v1887_v10  ;;  %v336_v20 = vcombine.high %v328_v16, %v328_v16  ;;  %v335_v21 = vrot.slane %v321_v17, %v2102_v63  ;;  %v366_v25 = vpack.c.bf16 %v328_v16, %v328_v16  ;;  %s1517_s7 = sshll.u32 %s1930_s1, 4  ;;  %s1518_s7 = int_to_ptr.vmem [resolvable:$true] %s1517_s7 }
  0x5d   :  { %1733 = vmatpush3.bf16.msra.mxu0 %v1886_v12  ;;  %v278_v46 = vmul.f32 0.2, %v270_v45  ;;  %vm274_vm4 = vcmp.ge.f32.partialorder %v270_v45, 0.0  ;;  %s1905_s8 = scalar_lea.vmem %s1518_s7, 32  ;;  %p1910_p1 = scmp.lt.s32.totalorder %s1518_s7, %s1518_s7 }
  0x5e   :  { %1734 = vmatprep.subr.bf16.mxu0 %v1889_v13  ;;  %v367_v22 = vpack.c.bf16 %v336_v20, %v336_v20  ;;  %v337_v24 = vcombine.high %v335_v21, %v335_v21  ;;  %v368_v29 = vpack.c.bf16 %v335_v21, %v335_v21  ;;  %p1906_p0 = scmp.ne.s32.totalorder %s1518_s7, %s1905_s8  ;;  %p1911_p2 = scmp.lt.s32.totalorder %s1905_s8, %s1905_s8 }
  0x5f   :  { %1755 = vmatpush3.bf16.msra.mxu1 %v1888_v15  ;;  %v282_v48 = vsel %vm274_vm4, %v270_v45, %v278_v46 }
  0x60   :  { %1756 = vmatprep.subr.bf16.mxu1 %v1891_v18  ;;  %1395 = vmatprep.mubr.bf16.mxu0 %v367_v22  ;;  %v369_v26 = vpack.c.bf16 %v337_v24, %v337_v24  ;;  %v344_v49 = vrot.slane %v282_v48, %v2102_v63  ;;  %p1912_p3 = por %p1911_p2, %p1910_p1 }
  0x61   :  { %1735 = vmatpush3.bf16.msra.mxu0 %v1890_v19 }
  0x62   :  { %1773 = vmatprep.subr.bf16.mxu0 %v1928_v28  ;;  %1435 = vmatprep.mubr.bf16.mxu1 %v369_v26  ;;  %v370_v51 = vpack.c.bf16 %v344_v49, %v344_v49  ;;  %p1913_p4 = pnand %p1912_p3, %p1906_p0 }
  0x63   :  { %1757 = vmatpush3.bf16.msra.mxu1 %v1892_v23 }
  0x64   :  { %1396 = vmatmul.mubr.bf16.vlgmr.msra.gmra.mxu0 %v366_v25 }
  0x65   :  { %1774 = vmatpush3.bf16.msra.mxu0 %v1893_v27  ;;  %1789 = vmatprep.mubr.msk.bf16.mxu0 %vm1929_vm3, %v1928_v28 }
  0x66   :  { %1436 = vmatmul.mubr.bf16.vlgmr.msra.gmra.mxu1 %v368_v29  ;;  %1775 = vmatprep.subr.bf16.mxu0 %v1928_v28 }
  0x69   :  { %1776 = vmatpush3.bf16.msra.mxu0 %v1894_v31 }
  0x6a   :  { %1777 = vmatprep.subr.bf16.mxu0 %v1928_v28 }
  0x6d   :  { %1778 = vmatpush3.bf16.msra.mxu0 %v1895_v35 }
  0x6e   :  { %1779 = vmatprep.subr.bf16.mxu0 %v1928_v28 }
  0x71   :  { %1780 = vmatpush3.bf16.msra.mxu0 %v1896_v41 }
  0x72   :  { %1781 = vmatprep.subr.bf16.mxu0 %v1928_v28 }
  0x75   :  { %1782 = vmatpush3.bf16.msra.mxu0 %v1897_v44 }
  0x76   :  { %1783 = vmatprep.subr.bf16.mxu0 %v1928_v28 }
  0x79   :  { %1784 = vmatpush3.bf16.msra.mxu0 %v1898_v38 }
  0x7a   :  { %1785 = vmatprep.subr.bf16.mxu0 %v1928_v28 }
  0x7d   :  { %1786 = vmatpush3.bf16.msra.mxu0 %v1899_v47 }
  0x7e   :  { %1787 = vmatprep.subr.bf16.mxu0 %v1928_v28 }
  0x81   :  { %1788 = vmatpush3.bf16.msra.mxu0 %v1900_v50 }
  0x84   :  { %1790 = vmatmul.mubr.bf16.vlgmr.msra.gmra.mxu0 %v370_v51 }
  0xe4   :  { %v1648_v52 = vpop.f32.mrf.mxu0 }
  0xe6   :  { %v1670_v53 = vpop.f32.mrf.mxu1  ;;  %v1649_v54 = vpop.f32.mrf.mxu0 }
  0xe7   :  { %v1650_v30 = vadd.f32 %v1649_v54, %v1648_v52 }
  0xe8   :  { %v1671_v55 = vpop.f32.mrf.mxu1  ;;  %v1651_v32 = vpop.f32.mrf.mxu0 }
  0xe9   :  { %v1672_v34 = vadd.f32 %v1671_v55, %v1670_v53 }
  0xea   :  { %v1652_v56 = vpop.f32.mrf.mxu0  ;;  %v1673_v57 = vpop.f32.mrf.mxu1 }
  0xeb   :  { %v1278_v36 = vadd.f32 %v1672_v34, %v1650_v30 }
  0xec   :  { %v1674_v63 = vpop.f32.mrf.mxu1 }
 0x104   :  { %v1692_v58 = vpop.f32.mrf.mxu0 }
 0x106   :  { %v1693_v59 = vpop.f32.mrf.mxu0  ;;  %v1714_v60 = vpop.f32.mrf.mxu1 }
 0x107   :  { %v1694_v11 = vadd.f32 %v1693_v59, %v1692_v58 }
 0x108   :  { %v1695_v61 = vpop.f32.mrf.mxu0  ;;  %v1715_v62 = vpop.f32.mrf.mxu1 }
 0x109   :  { %v1318_v12 = vadd.f32 %v1694_v11, %v1278_v36  ;;  %v1716_v13 = vadd.f32 %v1715_v62, %v1714_v60 }
 0x10a   :  { %v1696_v0 = vpop.f32.mrf.mxu0  ;;  %v1717_v1 = vpop.f32.mrf.mxu1 }
 0x10b   :  { %v1358_v15 = vadd.f32 %v1716_v13, %v1318_v12 }
 0x10c   :  { %v1718_v2 = vpop.f32.mrf.mxu1 }
 0x124   :  { %v1736_v3 = vpop.f32.mrf.mxu0 }
 0x126   :  { %v1737_v4 = vpop.f32.mrf.mxu0  ;;  %v1758_v5 = vpop.f32.mrf.mxu1 }
 0x127   :  { %v1738_v14 = vadd.f32 %v1737_v4, %v1736_v3 }
 0x128   :  { %v1739_v6 = vpop.f32.mrf.mxu0  ;;  %v1759_v7 = vpop.f32.mrf.mxu1 }
 0x129   :  { %v1398_v16 = vadd.f32 %v1738_v14, %v1358_v15  ;;  %v1760_v17 = vadd.f32 %v1759_v7, %v1758_v5 }
 0x12a   :  { %v1740_v8 = vpop.f32.mrf.mxu0  ;;  %v1761_v9 = vpop.f32.mrf.mxu1 }
 0x12b   :  { %v1438_v18 = vadd.f32 %v1760_v17, %v1398_v16 }
 0x12c   :  { %v1762_v10 = vpop.f32.mrf.mxu1 }
 0x144   :  { %v1477_v19 = vpop.f32.mrf.mxu0 }
 0x145   :  { %v1478_v20 = vadd.f32 %v1477_v19, %v1438_v18 }
 0x146   :  { %v1791_v21 = vpop.f32.mrf.mxu0 }
 0x147   :  { %v1484_v22 = vsel %vm1483_vm5, %v1478_v20, 0.0  ;;  %v1491_v23 = vmul.f32 %v1478_v20, %v1478_v20  ;;  %v1631_v24 = vmul.f32 -1.442695, %v1478_v20 }
 0x148   :  { %v1485_v25 = vrot.slane %v1484_v22, 4  ;;  %v1480_v26 = vpop.f32.mrf.mxu0 }
 0x149   :  { %v1492_v27 = vsel %vm1483_vm5, %v1491_v23, 0.0  ;;  %1901 = vpow2.f32 %v1631_v24 }
 0x14a   :  { %v1486_v28 = vadd.f32 %v1485_v25, %v1484_v22  ;;  %v1493_v29 = vrot.slane %v1492_v27, 4  ;;  %v1792_v31 = vpop.f32.mrf.mxu0 }
 0x14c   :  { %v1487_v33 = vrot.slane %v1486_v28, 2  ;;  %v1494_v35 = vadd.f32 %v1493_v29, %v1492_v27 }
 0x14e   :  { %v1488_v37 = vadd.f32 %v1487_v33, %v1486_v28  ;;  %v1495_v39 = vrot.slane %v1494_v35, 2 }
 0x150   :  { %v1489_v40 = vrot.slane %v1488_v37, 1  ;;  %v1496_v41 = vadd.f32 %v1495_v39, %v1494_v35 }
 0x152   :  { %v1497_v42 = vrot.slane %v1496_v41, 1  ;;  %v1490_v43 = vadd.f32 %v1489_v40, %v1488_v37 }
 0x154   :  { %v1498_v44 = vadd.f32 %v1497_v42, %v1496_v41 }
 0x156   :  { %v1902_v45 = vpop.eup %1901  ;;  %v1500_v38 = vsel %vm1499_vm6, %v1490_v43, %v1498_v44 }
 0x157   :  { %v1505_v46 = vadd.f32 1.0, %v1902_v45  ;;  %1501 = vst [vmem:[#allocation2] sm:$0x3] %v1500_v38 }
 0x158   :  { %1916 = shalt.err (!%p1913_p4)
}
 0x159   :  { %1520 = dma.vmem_to_hbm [thread:$0]  %s1518_s7, 32, %s2384_s5, [#allocation3]   ;;  %1903 = vrcp.f32 %v1505_v46 }
 0x166   :  { %v1904_v47 = vpop.eup %1903 }
 0x167   :  { %1508 = vst [vmem:[%s2383_s4] sm:$0x3] %v1904_v47 }
 0x168   :  { %1925 = dma.done.wait [#allocation3], 32  }
 0x169   :  { %1926 = vsyncadd [#allocation3], 4294967264 }
 0x16a   :  { %1526 = vsyncpa [#allocation3], 1 }

</bundles_post_ra>
